<compile_context>
chip_gen: v6e
topology: v6e:2x2x1
jax: 0.10.0
libtpu: 0.0.40
codegen_flags: <defaults>
</compile_context>

<pallas_src>
import jax
import jax.numpy as jnp
from jax.experimental import pallas as pl
from jax.experimental.pallas import tpu as pltpu

# ---------------- hyper-parameters (small, consistent with the module) -------
SZ_VOCAB = 16
D_EMBED = SZ_VOCAB          # torch: d_embed=0 -> OneHotEmbedding, d_embed := sz_vocab
K = 1                       # number of "prev" steps
N_PREF_LAYERS = 2           # GPT2 n_layer
D_HIDDEN = 64               # GPT2 n_embd
N_HEAD = 2
HEAD_DIM = D_HIDDEN // N_HEAD
N_INNER = 128               # GPT2 n_inner
N_OBJECTS = 4
N_LOCATIONS = 5
SZ_Z = N_OBJECTS * N_LOCATIONS
SZ_STATE = 100              # tokens per state observation
N_POSITIONS = 64
MAX_TIMESTEPS = 1000
LN_EPS = 1e-5               # nn.LayerNorm / GPT2 layer_norm_epsilon default
# GPT2 activation_function is set to "relu" here (a config knob of the module).

B = 2
S = 8
N_TOK = 3 * K + 2           # stacked feature streams per timestep
L_TOT = N_TOK * S           # transformer sequence length (per batch element)

STATE_N = 208 * 100         # pred_state logical output width (20800)
STATE_N_PAD = 20992         # padded to 164 * 128 -> lane-aligned tiles
STATE_TN = 5248             # 41 * 128, exactly 4 full tiles, no masked tail

VMEM_SPEC = pl.BlockSpec(memory_space=pltpu.MemorySpace.VMEM)


# ---------------- shared in-kernel helpers -----------------------------------
def _layernorm(x, g, b):
    mu = jnp.mean(x, axis=-1, keepdims=True)
    xc = x - mu
    var = jnp.mean(xc * xc, axis=-1, keepdims=True)
    return xc * jax.lax.rsqrt(var + LN_EPS) * g + b


# ---------------- kernel 1: deduplicated input resize projections ------------
def _inproj_kernel(sf_ref, ws_ref, bs_ref, ahf_ref, wah_ref, bah_ref,
                   acf_ref, wac_ref, bac_ref, os_ref, oah_ref, oac_ref):
    # state: bf16 one-hot x bf16 weight, f32 accumulate (one matmul for
    # current + all prev states instead of K+1 separate ones).
    os_ref[...] = jnp.dot(sf_ref[...], ws_ref[...],
                          preferred_element_type=jnp.float32) + bs_ref[...]
    oah_ref[...] = jnp.dot(ahf_ref[...], wah_ref[...],
                           preferred_element_type=jnp.float32) + bah_ref[...]
    oac_ref[...] = jnp.dot(acf_ref[...], wac_ref[...],
                           preferred_element_type=jnp.float32) + bac_ref[...]


def input_projections(params, sf_all, ahf_all, acf_all):
    return pl.pallas_call(
        _inproj_kernel,
        out_shape=(jax.ShapeDtypeStruct((sf_all.shape[0], D_HIDDEN), jnp.float32),
                   jax.ShapeDtypeStruct((ahf_all.shape[0], D_HIDDEN), jnp.float32),
                   jax.ShapeDtypeStruct((acf_all.shape[0], D_HIDDEN), jnp.float32)),
        in_specs=[VMEM_SPEC] * 9,
        out_specs=(VMEM_SPEC, VMEM_SPEC, VMEM_SPEC),
    )(sf_all, params['resize_state_w'], params['resize_state_b'],
      ahf_all, params['resize_ah_w'], params['resize_ah_b'],
      acf_all, params['resize_ac_w'], params['resize_ac_b'])


# ---------------- kernel 2: fused embed_ln + wpe + GPT2 stack + ln_f ----------
def _gpt2_kernel(x_ref, wpe_ref, gln_ref, wqkv_ref, waproj_ref, wfc_ref,
                 wmproj_ref, lvec_ref, o_ref):
    D, HD, NI, L = D_HIDDEN, HEAD_DIM, N_INNER, L_TOT
    x = x_ref[...]                                      # (B*L, D) f32 row slab

    # embed_ln, then GPT2 position embeddings (position_ids = arange(L), per batch)
    h = _layernorm(x, gln_ref[0:1, :], gln_ref[1:2, :]) + wpe_ref[...]

    row = jax.lax.broadcasted_iota(jnp.int32, (L, L), 0)
    col = jax.lax.broadcasted_iota(jnp.int32, (L, L), 1)
    causal = col <= row                                 # hoisted once, reused
    # TODO(synk): non-all-ones (padding) attention_mask not supported; the
    #             module's default mask is all ones -> causal mask only.
    scale = 1.0 / (HD ** 0.5)

    for layer in range(N_PREF_LAYERS):                  # unrolled: 2 layers
        vecs = lvec_ref[layer]                          # (8, 3D) packed f32 vectors
        ln1_g, ln1_b = vecs[0:1, :D], vecs[1:2, :D]
        c_attn_b = vecs[2:3, :]
        aproj_b = vecs[3:4, :D]
        ln2_g, ln2_b = vecs[4:5, :D], vecs[5:6, :D]
        c_fc_b = vecs[6:7, :NI]
        mproj_b = vecs[7:8, :D]

        # ---- attention: qkv on the full row slab (bf16 operands, f32 acc) ----
        a = _layernorm(h, ln1_g, ln1_b)
        qkv = jnp.dot(a.astype(jnp.bfloat16), wqkv_ref[layer],
                      preferred_element_type=jnp.float32) + c_attn_b   # (B*L, 3D)

        ctx_rows = []
        for bidx in range(B):                           # static per-batch row slices
            r0 = bidx * L
            qkv_b = qkv[r0:r0 + L, :]                   # (L, 3D)
            head_ctx = []
            for hd in range(N_HEAD):                    # static lane slices
                q = qkv_b[:, hd * HD:(hd + 1) * HD].astype(jnp.bfloat16)
                k = qkv_b[:, D + hd * HD:D + (hd + 1) * HD].astype(jnp.bfloat16)
                v = qkv_b[:, 2 * D + hd * HD:2 * D + (hd + 1) * HD].astype(jnp.bfloat16)
                s = jax.lax.dot_general(q, k, (((1,), (1,)), ((), ())),
                                        preferred_element_type=jnp.float32) * scale
                s = jnp.where(causal, s, jnp.float32(-1e30))
                s = s - jnp.max(s, axis=-1, keepdims=True)
                p = jnp.exp(s)                          # f32, unnormalized
                denom = jnp.sum(p, axis=-1, keepdims=True)
                ctx = jnp.dot(p.astype(jnp.bfloat16), v,
                              preferred_element_type=jnp.float32)       # (L, HD)
                # deferred softmax normalization on the small ctx (EUP slot)
                ctx = ctx * pl.reciprocal(denom, approx=True)
                head_ctx.append(ctx)
            ctx_rows.append(jnp.concatenate(head_ctx, axis=1))          # (L, D)
        ctx_all = jnp.concatenate(ctx_rows, axis=0)                     # (B*L, D)

        # merged c_proj: one full-depth (B*L,64)x(64,64) matmul
        attn_out = jnp.dot(ctx_all.astype(jnp.bfloat16), waproj_ref[layer],
                           preferred_element_type=jnp.float32) + aproj_b
        h = h + attn_out

        # ---- MLP (activation_function = "relu") ----
        a2 = _layernorm(h, ln2_g, ln2_b)
        m = jnp.maximum(jnp.dot(a2.astype(jnp.bfloat16), wfc_ref[layer],
                                preferred_element_type=jnp.float32) + c_fc_b, 0.0)
        m = jnp.dot(m.astype(jnp.bfloat16), wmproj_ref[layer],
                    preferred_element_type=jnp.float32) + mproj_b
        h = h + m

    o_ref[...] = _layernorm(h, gln_ref[2:3, :], gln_ref[3:4, :])


def gpt2_stack(params, x_rows, wpe_tiled):
    rows, d = x_rows.shape
    return pl.pallas_call(
        _gpt2_kernel,
        out_shape=jax.ShapeDtypeStruct((rows, d), jnp.float32),
        in_specs=[VMEM_SPEC] * 8,
        out_specs=VMEM_SPEC,
    )(x_rows, wpe_tiled, params['ln_global'], params['wqkv'], params['waproj'],
      params['wfc'], params['wmproj'], params['lvecs'])


# ---------------- kernel 3: fused small heads + big pred_state matmul --------
def _heads_state_kernel(x_ref, sfeat_ref, ahfeat_ref, w1_ref, b1_ref,
                        ahw2_ref, ahb2_ref, acw2_ref, acb2_ref,
                        aw1p_ref, aw1s_ref, aw1a_ref, ab1_ref,
                        aw2_ref, ab2_ref, aw3_ref, ab3_ref,
                        sw2_ref, sb2_ref,
                        prefs_ref, acts_ref, ahp_ref, acp_ref, sp_ref,
                        sh_ref):
    D = D_HIDDEN

    @pl.when(pl.program_id(0) == 0)
    def _():
        # ---- all the small heads, executed once (first N tile) ----
        xr = jnp.maximum(x_ref[...], 0.0)               # shared leading ReLU
        # packed first stage: [state_w1 | ah_w1 | ac_w1 | resize_pref_w] -> (M, 212)
        h1 = jnp.dot(xr, w1_ref[...],
                     preferred_element_type=jnp.float32) + b1_ref[...]
        state_h = jnp.maximum(h1[:, 0:D], 0.0)
        ah_h = jnp.maximum(h1[:, D:2 * D], 0.0)
        ac_h = jnp.maximum(h1[:, 2 * D:3 * D], 0.0)
        prefs = h1[:, 3 * D:3 * D + SZ_Z]               # resize_pref: no trailing ReLU

        sh_ref[...] = state_h.astype(sh_ref.dtype)      # stays in VMEM for all tiles
        prefs_ref[...] = prefs
        ahp_ref[...] = jnp.dot(ah_h, ahw2_ref[...],
                               preferred_element_type=jnp.float32) + ahb2_ref[...]
        acp_ref[...] = jnp.dot(ac_h, acw2_ref[...],
                               preferred_element_type=jnp.float32) + acb2_ref[...]

        # pred_action on concat([prefs, state_onehot, ah_onehot]) computed as a
        # sum of three matmuls (avoids materializing the 1636-wide concat).
        a1 = (jnp.dot(prefs, aw1p_ref[...], preferred_element_type=jnp.float32)
              + jnp.dot(sfeat_ref[...], aw1s_ref[...], preferred_element_type=jnp.float32)
              + jnp.dot(ahfeat_ref[...], aw1a_ref[...], preferred_element_type=jnp.float32)
              + ab1_ref[...])
        a2 = jnp.maximum(jnp.dot(a1, aw2_ref[...],
                                 preferred_element_type=jnp.float32) + ab2_ref[...], 0.0)
        acts_ref[...] = jnp.dot(a2, aw3_ref[...],
                                preferred_element_type=jnp.float32) + ab3_ref[...]

    # ---- every tile: pred_state output matmul on a lane-aligned N tile ----
    sp_ref[...] = jnp.dot(sh_ref[...], sw2_ref[...],
                          preferred_element_type=jnp.float32) + sb2_ref[...]


def _full_spec(shape):
    nd = len(shape)
    return pl.BlockSpec(shape, lambda j, _nd=nd: (0,) * _nd)


def fused_heads_state(params, x2, sfeat, ahfeat):
    m = x2.shape[0]
    nt = STATE_N_PAD // STATE_TN                        # exactly 4 full tiles
    small = (x2, sfeat, ahfeat,
             params['head_w1'], params['head_b1'],
             params['ah_w2'], params['ah_b2'], params['ac_w2'], params['ac_b2'],
             params['act_w1_pref'], params['act_w1_state'], params['act_w1_ah'],
             params['act_b1'], params['act_w2'], params['act_b2'],
             params['act_w3'], params['act_b3'])
    return pl.pallas_call(
        _heads_state_kernel,
        out_shape=(jax.ShapeDtypeStruct((m, SZ_Z), jnp.float32),
                   jax.ShapeDtypeStruct((m, SZ_VOCAB), jnp.float32),
                   jax.ShapeDtypeStruct((m, 208), jnp.float32),
                   jax.ShapeDtypeStruct((m, 208), jnp.float32),
                   jax.ShapeDtypeStruct((m, STATE_N_PAD), jnp.float32)),
        grid=(nt,),
        in_specs=[_full_spec(a.shape) for a in small]
                 + [pl.BlockSpec((D_HIDDEN, STATE_TN), lambda j: (0, j)),
                    pl.BlockSpec((1, STATE_TN), lambda j: (0, j))],
        out_specs=(_full_spec((m, SZ_Z)), _full_spec((m, SZ_VOCAB)),
                   _full_spec((m, 208)), _full_spec((m, 208)),
                   pl.BlockSpec((m, STATE_TN), lambda j: (0, j))),
        scratch_shapes=[pltpu.VMEM((m, D_HIDDEN), jnp.bfloat16)],
        # small-head outputs are revisited across the tile axis -> "arbitrary"
        compiler_params=pltpu.CompilerParams(dimension_semantics=("arbitrary",)),
    )(*small, params['state_w2'], params['state_b2'])


# ---------------- parameters --------------------------------------------------
def init_params(key):
    keys = iter(jax.random.split(key, 64))

    def rand(shape, dtype=jnp.float32):
        return (0.02 * jax.random.normal(next(keys), shape, jnp.float32)).astype(dtype)

    def zeros(shape):
        return jnp.zeros(shape, jnp.float32)

    def pad_to(v, n):
        return jnp.pad(v, (0, n - v.shape[0]))

    p = {}
    p['time_embed'] = rand((MAX_TIMESTEPS, D_HIDDEN))
    p['wpe'] = rand((N_POSITIONS, D_HIDDEN))
    # packed [embed_ln_g, embed_ln_b, lnf_g, lnf_b]
    p['ln_global'] = jnp.stack([jnp.ones((D_HIDDEN,), jnp.float32),
                                jnp.zeros((D_HIDDEN,), jnp.float32),
                                jnp.ones((D_HIDDEN,), jnp.float32),
                                jnp.zeros((D_HIDDEN,), jnp.float32)])

    wqkv, waproj, wfc, wmproj, lvecs = [], [], [], [], []
    for _ in range(N_PREF_LAYERS):
        # GPT2 matmul weights stored bf16 (MXU-native); biases/LN stay f32.
        wqkv.append(rand((D_HIDDEN, 3 * D_HIDDEN), jnp.bfloat16))
        waproj.append(rand((D_HIDDEN, D_HIDDEN), jnp.bfloat16))
        wfc.append(rand((D_HIDDEN, N_INNER), jnp.bfloat16))
        wmproj.append(rand((N_INNER, D_HIDDEN), jnp.bfloat16))
        # packed per-layer vectors:
        #   rows = ln1_g, ln1_b, c_attn_b, attn_proj_b, ln2_g, ln2_b, c_fc_b, mlp_proj_b
        lvecs.append(jnp.stack([
            pad_to(jnp.ones((D_HIDDEN,), jnp.float32), 3 * D_HIDDEN),
            pad_to(jnp.zeros((D_HIDDEN,), jnp.float32), 3 * D_HIDDEN),
            jnp.zeros((3 * D_HIDDEN,), jnp.float32),
            pad_to(jnp.zeros((D_HIDDEN,), jnp.float32), 3 * D_HIDDEN),
            pad_to(jnp.ones((D_HIDDEN,), jnp.float32), 3 * D_HIDDEN),
            pad_to(jnp.zeros((D_HIDDEN,), jnp.float32), 3 * D_HIDDEN),
            pad_to(jnp.zeros((N_INNER,), jnp.float32), 3 * D_HIDDEN),
            pad_to(jnp.zeros((D_HIDDEN,), jnp.float32), 3 * D_HIDDEN),
        ]))
    p['wqkv'] = jnp.stack(wqkv)
    p['waproj'] = jnp.stack(waproj)
    p['wfc'] = jnp.stack(wfc)
    p['wmproj'] = jnp.stack(wmproj)
    p['lvecs'] = jnp.stack(lvecs)

    # input resize projections (resize_state weight in bf16; matmul acc in f32)
    p['resize_state_w'] = rand((D_EMBED * SZ_STATE, D_HIDDEN), jnp.bfloat16)
    p['resize_state_b'] = zeros((1, D_HIDDEN))
    p['resize_ah_w'] = rand((D_EMBED, D_HIDDEN))
    p['resize_ah_b'] = zeros((1, D_HIDDEN))
    p['resize_ac_w'] = rand((D_EMBED, D_HIDDEN))
    p['resize_ac_b'] = zeros((1, D_HIDDEN))

    # fused first-stage head weights: [state_w1 | ah_w1 | ac_w1 | resize_pref_w]
    p['head_w1'] = jnp.concatenate(
        [rand((D_HIDDEN, D_HIDDEN)), rand((D_HIDDEN, D_HIDDEN)),
         rand((D_HIDDEN, D_HIDDEN)), rand((D_HIDDEN, SZ_Z))], axis=1)  # (64, 212)
    p['head_b1'] = zeros((1, 3 * D_HIDDEN + SZ_Z))
    p['ah_w2'] = rand((D_HIDDEN, 208)); p['ah_b2'] = zeros((1, 208))
    p['ac_w2'] = rand((D_HIDDEN, 208)); p['ac_b2'] = zeros((1, 208))
    # pred_state output weight, padded N=20800 -> 20992 (=164*128), bf16 (2.7 MB)
    sw2 = rand((D_HIDDEN, STATE_N))
    p['state_w2'] = jnp.pad(sw2, ((0, 0), (0, STATE_N_PAD - STATE_N))).astype(jnp.bfloat16)
    p['state_b2'] = zeros((1, STATE_N_PAD))

    # pred_action: Linear(1636,64) -> Linear(64,64)+ReLU -> Linear(64,16)
    p['act_w1_pref'] = rand((SZ_Z, D_HIDDEN))
    p['act_w1_state'] = rand((D_EMBED * SZ_STATE, D_HIDDEN), jnp.bfloat16)
    p['act_w1_ah'] = rand((D_EMBED, D_HIDDEN))
    p['act_b1'] = zeros((1, D_HIDDEN))
    p['act_w2'] = rand((D_HIDDEN, D_HIDDEN)); p['act_b2'] = zeros((1, D_HIDDEN))
    p['act_w3'] = rand((D_HIDDEN, SZ_VOCAB)); p['act_b3'] = zeros((1, SZ_VOCAB))
    return p


# ---------------- forward ------------------------------------------------------
def forward_fn(params, state, action_h, prev_states, prev_actions_h,
               prev_actions_c, timesteps):
    b, s = state.shape[0], state.shape[1]
    bs = b * s
    d = D_HIDDEN
    k = len(prev_states)

    def onehot(x, dtype):  # OneHotEmbedding(sz_vocab) + .view(B, S, -1)
        return jax.nn.one_hot(x, SZ_VOCAB, dtype=dtype).reshape(b, s, -1)

    # state one-hots in bf16 (exact 0/1) feeding bf16 weights; ah/ac stay f32
    state_f = onehot(state, jnp.bfloat16)                        # (B,S,1600)
    prev_state_f = [onehot(x, jnp.bfloat16) for x in prev_states]
    ah_f = onehot(action_h, jnp.float32)                         # (B,S,16)
    prev_ah_f = [onehot(x, jnp.float32) for x in prev_actions_h]
    prev_ac_f = [onehot(x, jnp.float32) for x in prev_actions_c]

    # deduplicated resize projections: shared weights applied once to all rows
    sf_all = jnp.concatenate([state_f.reshape(bs, -1)]
                             + [f.reshape(bs, -1) for f in prev_state_f], axis=0)
    ahf_all = jnp.concatenate([ah_f.reshape(bs, -1)]
                              + [f.reshape(bs, -1) for f in prev_ah_f], axis=0)
    acf_all = jnp.concatenate([f.reshape(bs, -1) for f in prev_ac_f], axis=0)
    st_o, ah_o, ac_o = input_projections(params, sf_all, ahf_all, acf_all)

    # timesteps - i, clamped at 0, then time embedding lookup (glue gather)
    time_emb = [params['time_embed'][jnp.maximum(timesteps - i, 0)]
                for i in range(k + 1)]

    def chunk(arr, i):
        return arr[i * bs:(i + 1) * bs].reshape(b, s, d)

    state_feat = chunk(st_o, 0) + time_emb[0]
    ah_feat = chunk(ah_o, 0) + time_emb[0]
    prev_state_feats = [chunk(st_o, i + 1) + time_emb[i + 1] for i in range(k)]
    prev_ah_feats = [chunk(ah_o, i + 1) + time_emb[i + 1] for i in range(k)]
    prev_ac_feats = [chunk(ac_o, i) + time_emb[i + 1] for i in range(k)]

    # torch: stack((*prev_state, *prev_ah, *prev_ac, state, ah), 1).permute(0,2,1,3)
    stacked = jnp.stack(prev_state_feats + prev_ah_feats + prev_ac_feats
                        + [state_feat, ah_feat], axis=1)         # (B, 3K+2, S, D)
    n_tok = stacked.shape[1]
    l = n_tok * s
    x_rows = stacked.transpose(0, 2, 1, 3).reshape(b * l, d)     # (B*L, D) row slab
    wpe_tiled = jnp.tile(params['wpe'][:l], (b, 1))              # per-batch wpe (glue)

    # fused embed_ln + wpe + 2-layer GPT2 + ln_f  (one pallas_call, batch folded)
    h = gpt2_stack(params, x_rows, wpe_tiled)                    # (B*L, D)

    # x = last_hidden.reshape(B,S,n_tok,D).permute(0,2,1,3)[:, -1]   (action_h slot)
    x2 = h.reshape(b, s, n_tok, d)[:, :, -1, :].reshape(bs, d)

    prefs, acts, ah_pred, ac_pred, state_pred_pad = fused_heads_state(
        params, x2, state_f.reshape(bs, -1), ah_f.reshape(bs, -1))
    state_pred = state_pred_pad[:, :STATE_N]                     # drop lane padding

    return {'action_r_preds': acts.reshape(b, s, -1),
            'theta_preds': prefs.reshape(b, s, -1),
            'state_preds': state_pred.reshape(b, s, -1),
            'action_h_preds': ah_pred.reshape(b, s, -1),
            'action_c_preds': ac_pred.reshape(b, s, -1)}


forward = jax.jit(forward_fn)


# ---------------- main ---------------------------------------------------------
if __name__ == "__main__":
    root = jax.random.PRNGKey(0)
    pkey, dkey = jax.random.split(root)
    params = init_params(pkey)

    ks = jax.random.split(dkey, 2 + 3 * K)
    state = jax.random.randint(ks[0], (B, S, SZ_STATE), 0, SZ_VOCAB, dtype=jnp.int32)
    action_h = jax.random.randint(ks[1], (B, S), 0, SZ_VOCAB, dtype=jnp.int32)
    prev_states = [jax.random.randint(ks[2 + i], (B, S, SZ_STATE), 0, SZ_VOCAB, dtype=jnp.int32)
                   for i in range(K)]
    prev_actions_h = [jax.random.randint(ks[2 + K + i], (B, S), 0, SZ_VOCAB, dtype=jnp.int32)
                      for i in range(K)]
    prev_actions_c = [jax.random.randint(ks[2 + 2 * K + i], (B, S), 0, SZ_VOCAB, dtype=jnp.int32)
                      for i in range(K)]
    timesteps = jnp.broadcast_to(jnp.arange(S, dtype=jnp.int32)[None, :], (B, S))

    out = forward(params, state, action_h, prev_states, prev_actions_h,
                  prev_actions_c, timesteps)
    out = jax.block_until_ready(out)

    assert out['action_r_preds'].shape == (B, S, SZ_VOCAB)
    assert out['theta_preds'].shape == (B, S, SZ_Z)
    assert out['state_preds'].shape == (B, S, STATE_N)
    assert out['action_h_preds'].shape == (B, S, 208)
    assert out['action_c_preds'].shape == (B, S, 208)
    assert all(jnp.all(jnp.isfinite(v)) for v in out.values())
    print("KERNEL_OK")
</pallas_src>

<mosaic_0001>
module attributes {stable_mosaic.version = 11 : i64} {
  func.func @_inproj_kernel(%arg0: memref<32x1600xbf16, #tpu.memory_space<vmem>>, %arg1: memref<1600x64xbf16, #tpu.memory_space<vmem>>, %arg2: memref<1x64xf32, #tpu.memory_space<vmem>>, %arg3: memref<32x16xf32, #tpu.memory_space<vmem>>, %arg4: memref<16x64xf32, #tpu.memory_space<vmem>>, %arg5: memref<1x64xf32, #tpu.memory_space<vmem>>, %arg6: memref<16x16xf32, #tpu.memory_space<vmem>>, %arg7: memref<16x64xf32, #tpu.memory_space<vmem>>, %arg8: memref<1x64xf32, #tpu.memory_space<vmem>>, %arg9: memref<32x64xf32, #tpu.memory_space<vmem>>, %arg10: memref<32x64xf32, #tpu.memory_space<vmem>>, %arg11: memref<16x64xf32, #tpu.memory_space<vmem>>) attributes {dimension_semantics = [], scalar_prefetch = 0 : i64, scratch_operands = 0 : i64, tpu.core_type = #tpu.core_type<tc>} {
    %c0 = arith.constant 0 : index
    %c0_0 = arith.constant 0 : index
    %0 = vector.load %arg0[%c0, %c0_0] : memref<32x1600xbf16, #tpu.memory_space<vmem>>, vector<32x1600xbf16>
    %c0_1 = arith.constant 0 : index
    %c0_2 = arith.constant 0 : index
    %1 = vector.load %arg1[%c0_1, %c0_2] : memref<1600x64xbf16, #tpu.memory_space<vmem>>, vector<1600x64xbf16>
    %cst = arith.constant dense<0.000000e+00> : vector<32x64xf32>
    %2 = tpu.matmul %0, %1, %cst {dimension_numbers = #tpu.dot_dimension_numbers<[1], [0], [0], [1], [0, 0, 1, 1], [], []>} : vector<32x1600xbf16>, vector<1600x64xbf16>, vector<32x64xf32> -> vector<32x64xf32>
    %c0_3 = arith.constant 0 : index
    %c0_4 = arith.constant 0 : index
    %3 = vector.load %arg2[%c0_3, %c0_4] : memref<1x64xf32, #tpu.memory_space<vmem>>, vector<1x64xf32>
    %4 = vector.broadcast %3 : vector<1x64xf32> to vector<32x64xf32>
    %5 = arith.addf %2, %4 : vector<32x64xf32>
    %c0_5 = arith.constant 0 : index
    %c0_6 = arith.constant 0 : index
    %6 = vector.load %arg9[%c0_5, %c0_6] : memref<32x64xf32, #tpu.memory_space<vmem>>, vector<32x64xf32>
    tpu.vector_store %arg9[%c0_5, %c0_6], %5 {strides = array<i32>} : memref<32x64xf32, #tpu.memory_space<vmem>>, vector<32x64xf32>,
    %c0_7 = arith.constant 0 : index
    %c0_8 = arith.constant 0 : index
    %7 = vector.load %arg3[%c0_7, %c0_8] : memref<32x16xf32, #tpu.memory_space<vmem>>, vector<32x16xf32>
    %c0_9 = arith.constant 0 : index
    %c0_10 = arith.constant 0 : index
    %8 = vector.load %arg4[%c0_9, %c0_10] : memref<16x64xf32, #tpu.memory_space<vmem>>, vector<16x64xf32>
    %cst_11 = arith.constant dense<0.000000e+00> : vector<32x64xf32>
    %9 = tpu.matmul %7, %8, %cst_11 {dimension_numbers = #tpu.dot_dimension_numbers<[1], [0], [0], [1], [0, 0, 1, 1], [], []>} : vector<32x16xf32>, vector<16x64xf32>, vector<32x64xf32> -> vector<32x64xf32>
    %c0_12 = arith.constant 0 : index
    %c0_13 = arith.constant 0 : index
    %10 = vector.load %arg5[%c0_12, %c0_13] : memref<1x64xf32, #tpu.memory_space<vmem>>, vector<1x64xf32>
    %11 = vector.broadcast %10 : vector<1x64xf32> to vector<32x64xf32>
    %12 = arith.addf %9, %11 : vector<32x64xf32>
    %c0_14 = arith.constant 0 : index
    %c0_15 = arith.constant 0 : index
    %13 = vector.load %arg10[%c0_14, %c0_15] : memref<32x64xf32, #tpu.memory_space<vmem>>, vector<32x64xf32>
    tpu.vector_store %arg10[%c0_14, %c0_15], %12 {strides = array<i32>} : memref<32x64xf32, #tpu.memory_space<vmem>>, vector<32x64xf32>,
    %c0_16 = arith.constant 0 : index
    %c0_17 = arith.constant 0 : index
    %14 = vector.load %arg6[%c0_16, %c0_17] : memref<16x16xf32, #tpu.memory_space<vmem>>, vector<16x16xf32>
    %c0_18 = arith.constant 0 : index
    %c0_19 = arith.constant 0 : index
    %15 = vector.load %arg7[%c0_18, %c0_19] : memref<16x64xf32, #tpu.memory_space<vmem>>, vector<16x64xf32>
    %cst_20 = arith.constant dense<0.000000e+00> : vector<16x64xf32>
    %16 = tpu.matmul %14, %15, %cst_20 {dimension_numbers = #tpu.dot_dimension_numbers<[1], [0], [0], [1], [0, 0, 1, 1], [], []>} : vector<16x16xf32>, vector<16x64xf32>, vector<16x64xf32> -> vector<16x64xf32>
    %c0_21 = arith.constant 0 : index
    %c0_22 = arith.constant 0 : index
    %17 = vector.load %arg8[%c0_21, %c0_22] : memref<1x64xf32, #tpu.memory_space<vmem>>, vector<1x64xf32>
    %18 = vector.broadcast %17 : vector<1x64xf32> to vector<16x64xf32>
    %19 = arith.addf %16, %18 : vector<16x64xf32>
    %c0_23 = arith.constant 0 : index
    %c0_24 = arith.constant 0 : index
    %20 = vector.load %arg11[%c0_23, %c0_24] : memref<16x64xf32, #tpu.memory_space<vmem>>, vector<16x64xf32>
    tpu.vector_store %arg11[%c0_23, %c0_24], %19 {strides = array<i32>} : memref<16x64xf32, #tpu.memory_space<vmem>>, vector<16x64xf32>,
    return
  }
}

module attributes {stable_mosaic.version = 11 : i64} {
  func.func @_gpt2_kernel(%arg0: memref<80x64xf32, #tpu.memory_space<vmem>>, %arg1: memref<80x64xf32, #tpu.memory_space<vmem>>, %arg2: memref<4x64xf32, #tpu.memory_space<vmem>>, %arg3: memref<2x64x192xbf16, #tpu.memory_space<vmem>>, %arg4: memref<2x64x64xbf16, #tpu.memory_space<vmem>>, %arg5: memref<2x64x128xbf16, #tpu.memory_space<vmem>>, %arg6: memref<2x128x64xbf16, #tpu.memory_space<vmem>>, %arg7: memref<2x8x192xf32, #tpu.memory_space<vmem>>, %arg8: memref<80x64xf32, #tpu.memory_space<vmem>>) attributes {dimension_semantics = [], scalar_prefetch = 0 : i64, scratch_operands = 0 : i64, tpu.core_type = #tpu.core_type<tc>} {
    %c0 = arith.constant 0 : index
    %c0_0 = arith.constant 0 : index
    %0 = vector.load %arg0[%c0, %c0_0] : memref<80x64xf32, #tpu.memory_space<vmem>>, vector<80x64xf32>
    %c0_1 = arith.constant 0 : index
    %c0_2 = arith.constant 0 : index
    %1 = vector.load %arg2[%c0_1, %c0_2] : memref<4x64xf32, #tpu.memory_space<vmem>>, vector<1x64xf32>
    %c1 = arith.constant 1 : index
    %c0_3 = arith.constant 0 : index
    %2 = vector.load %arg2[%c1, %c0_3] : memref<4x64xf32, #tpu.memory_space<vmem>>, vector<1x64xf32>
    %cst = arith.constant dense<0.000000e+00> : vector<80xf32>
    %3 = vector.multi_reduction <add>, %0, %cst [1] : vector<80x64xf32> to vector<80xf32>
    %4 = vector.shape_cast %3 : vector<80xf32> to vector<80x1xf32>
    %cst_4 = arith.constant 6.400000e+01 : f32
    %5 = vector.broadcast %cst_4 : f32 to vector<80x1xf32>
    %6 = arith.divf %4, %5 : vector<80x1xf32>
    %7 = vector.broadcast %6 : vector<80x1xf32> to vector<80x64xf32>
    %8 = arith.subf %0, %7 : vector<80x64xf32>
    %9 = arith.mulf %8, %8 : vector<80x64xf32>
    %cst_5 = arith.constant dense<0.000000e+00> : vector<80xf32>
    %10 = vector.multi_reduction <add>, %9, %cst_5 [1] : vector<80x64xf32> to vector<80xf32>
    %11 = vector.shape_cast %10 : vector<80xf32> to vector<80x1xf32>
    %cst_6 = arith.constant 6.400000e+01 : f32
    %12 = vector.broadcast %cst_6 : f32 to vector<80x1xf32>
    %13 = arith.divf %11, %12 : vector<80x1xf32>
    %cst_7 = arith.constant 9.99999974E-6 : f32
    %14 = vector.broadcast %cst_7 : f32 to vector<80x1xf32>
    %15 = arith.addf %13, %14 : vector<80x1xf32>
    %16 = math.rsqrt %15 : vector<80x1xf32>
    %17 = vector.broadcast %16 : vector<80x1xf32> to vector<80x64xf32>
    %18 = arith.mulf %8, %17 : vector<80x64xf32>
    %19 = vector.broadcast %1 : vector<1x64xf32> to vector<80x64xf32>
    %20 = arith.mulf %18, %19 : vector<80x64xf32>
    %21 = vector.broadcast %2 : vector<1x64xf32> to vector<80x64xf32>
    %22 = arith.addf %20, %21 : vector<80x64xf32>
    %c0_8 = arith.constant 0 : index
    %c0_9 = arith.constant 0 : index
    %23 = vector.load %arg1[%c0_8, %c0_9] : memref<80x64xf32, #tpu.memory_space<vmem>>, vector<80x64xf32>
    %24 = arith.addf %22, %23 : vector<80x64xf32>
    %25 = tpu.iota {dimensions = array<i32: 0>} : vector<40x40xi32>
    %26 = tpu.iota {dimensions = array<i32: 1>} : vector<40x40xi32>
    %27 = arith.cmpi sle, %26, %25 : vector<40x40xi32>
    %c0_10 = arith.constant 0 : index
    %c0_11 = arith.constant 0 : index
    %c0_12 = arith.constant 0 : index
    %28 = vector.load %arg7[%c0_10, %c0_11, %c0_12] : memref<2x8x192xf32, #tpu.memory_space<vmem>>, vector<1x8x192xf32>
    %29 = vector.shape_cast %28 : vector<1x8x192xf32> to vector<8x192xf32>
    %30 = vector.extract_strided_slice %29 {offsets = [0, 0], sizes = [1, 64], strides = [1, 1]} : vector<8x192xf32> to vector<1x64xf32>
    %31 = vector.extract_strided_slice %29 {offsets = [1, 0], sizes = [1, 64], strides = [1, 1]} : vector<8x192xf32> to vector<1x64xf32>
    %32 = vector.extract_strided_slice %29 {offsets = [2, 0], sizes = [1, 192], strides = [1, 1]} : vector<8x192xf32> to vector<1x192xf32>
    %33 = vector.extract_strided_slice %29 {offsets = [3, 0], sizes = [1, 64], strides = [1, 1]} : vector<8x192xf32> to vector<1x64xf32>
    %34 = vector.extract_strided_slice %29 {offsets = [4, 0], sizes = [1, 64], strides = [1, 1]} : vector<8x192xf32> to vector<1x64xf32>
    %35 = vector.extract_strided_slice %29 {offsets = [5, 0], sizes = [1, 64], strides = [1, 1]} : vector<8x192xf32> to vector<1x64xf32>
    %36 = vector.extract_strided_slice %29 {offsets = [6, 0], sizes = [1, 128], strides = [1, 1]} : vector<8x192xf32> to vector<1x128xf32>
    %37 = vector.extract_strided_slice %29 {offsets = [7, 0], sizes = [1, 64], strides = [1, 1]} : vector<8x192xf32> to vector<1x64xf32>
    %cst_13 = arith.constant dense<0.000000e+00> : vector<80xf32>
    %38 = vector.multi_reduction <add>, %24, %cst_13 [1] : vector<80x64xf32> to vector<80xf32>
    %39 = vector.shape_cast %38 : vector<80xf32> to vector<80x1xf32>
    %cst_14 = arith.constant 6.400000e+01 : f32
    %40 = vector.broadcast %cst_14 : f32 to vector<80x1xf32>
    %41 = arith.divf %39, %40 : vector<80x1xf32>
    %42 = vector.broadcast %41 : vector<80x1xf32> to vector<80x64xf32>
    %43 = arith.subf %24, %42 : vector<80x64xf32>
    %44 = arith.mulf %43, %43 : vector<80x64xf32>
    %cst_15 = arith.constant dense<0.000000e+00> : vector<80xf32>
    %45 = vector.multi_reduction <add>, %44, %cst_15 [1] : vector<80x64xf32> to vector<80xf32>
    %46 = vector.shape_cast %45 : vector<80xf32> to vector<80x1xf32>
    %cst_16 = arith.constant 6.400000e+01 : f32
    %47 = vector.broadcast %cst_16 : f32 to vector<80x1xf32>
    %48 = arith.divf %46, %47 : vector<80x1xf32>
    %cst_17 = arith.constant 9.99999974E-6 : f32
    %49 = vector.broadcast %cst_17 : f32 to vector<80x1xf32>
    %50 = arith.addf %48, %49 : vector<80x1xf32>
    %51 = math.rsqrt %50 : vector<80x1xf32>
    %52 = vector.broadcast %51 : vector<80x1xf32> to vector<80x64xf32>
    %53 = arith.mulf %43, %52 : vector<80x64xf32>
    %54 = vector.broadcast %30 : vector<1x64xf32> to vector<80x64xf32>
    %55 = arith.mulf %53, %54 : vector<80x64xf32>
    %56 = vector.broadcast %31 : vector<1x64xf32> to vector<80x64xf32>
    %57 = arith.addf %55, %56 : vector<80x64xf32>
    %58 = arith.truncf %57 : vector<80x64xf32> to vector<80x64xbf16>
    %c0_18 = arith.constant 0 : index
    %c0_19 = arith.constant 0 : index
    %c0_20 = arith.constant 0 : index
    %59 = vector.load %arg3[%c0_18, %c0_19, %c0_20] : memref<2x64x192xbf16, #tpu.memory_space<vmem>>, vector<1x64x192xbf16>
    %60 = vector.shape_cast %59 : vector<1x64x192xbf16> to vector<64x192xbf16>
    %cst_21 = arith.constant dense<0.000000e+00> : vector<80x192xf32>
    %61 = tpu.matmul %58, %60, %cst_21 {dimension_numbers = #tpu.dot_dimension_numbers<[1], [0], [0], [1], [0, 0, 1, 1], [], []>} : vector<80x64xbf16>, vector<64x192xbf16>, vector<80x192xf32> -> vector<80x192xf32>
    %62 = vector.broadcast %32 : vector<1x192xf32> to vector<80x192xf32>
    %63 = arith.addf %61, %62 : vector<80x192xf32>
    %64 = vector.extract_strided_slice %63 {offsets = [0, 0], sizes = [40, 192], strides = [1, 1]} : vector<80x192xf32> to vector<40x192xf32>
    %65 = vector.extract_strided_slice %64 {offsets = [0, 0], sizes = [40, 32], strides = [1, 1]} : vector<40x192xf32> to vector<40x32xf32>
    %66 = arith.truncf %65 : vector<40x32xf32> to vector<40x32xbf16>
    %67 = vector.extract_strided_slice %64 {offsets = [0, 64], sizes = [40, 32], strides = [1, 1]} : vector<40x192xf32> to vector<40x32xf32>
    %68 = arith.truncf %67 : vector<40x32xf32> to vector<40x32xbf16>
    %69 = vector.extract_strided_slice %64 {offsets = [0, 128], sizes = [40, 32], strides = [1, 1]} : vector<40x192xf32> to vector<40x32xf32>
    %70 = arith.truncf %69 : vector<40x32xf32> to vector<40x32xbf16>
    %cst_22 = arith.constant dense<0.000000e+00> : vector<40x40xf32>
    %71 = tpu.matmul %66, %68, %cst_22 {dimension_numbers = #tpu.dot_dimension_numbers<[1], [1], [0], [0], [0, 0, 1, 0], [], []>} : vector<40x32xbf16>, vector<40x32xbf16>, vector<40x40xf32> -> vector<40x40xf32>
    %cst_23 = arith.constant 0.176776692 : f32
    %72 = vector.broadcast %cst_23 : f32 to vector<40x40xf32>
    %73 = arith.mulf %71, %72 : vector<40x40xf32>
    %cst_24 = arith.constant -1.000000e+30 : f32
    %74 = vector.broadcast %cst_24 : f32 to vector<40x40xf32>
    %75 = arith.select %27, %73, %74 : vector<40x40xi1>, vector<40x40xf32>
    %cst_25 = arith.constant dense<0xFF800000> : vector<40xf32>
    %76 = vector.multi_reduction <maximumf>, %75, %cst_25 [1] : vector<40x40xf32> to vector<40xf32>
    %77 = vector.shape_cast %76 : vector<40xf32> to vector<40x1xf32>
    %78 = vector.broadcast %77 : vector<40x1xf32> to vector<40x40xf32>
    %79 = arith.subf %75, %78 : vector<40x40xf32>
    %80 = math.exp %79 : vector<40x40xf32>
    %cst_26 = arith.constant dense<0.000000e+00> : vector<40xf32>
    %81 = vector.multi_reduction <add>, %80, %cst_26 [1] : vector<40x40xf32> to vector<40xf32>
    %82 = vector.shape_cast %81 : vector<40xf32> to vector<40x1xf32>
    %83 = arith.truncf %80 : vector<40x40xf32> to vector<40x40xbf16>
    %cst_27 = arith.constant dense<0.000000e+00> : vector<40x32xf32>
    %84 = tpu.matmul %83, %70, %cst_27 {dimension_numbers = #tpu.dot_dimension_numbers<[1], [0], [0], [1], [0, 0, 1, 1], [], []>} : vector<40x40xbf16>, vector<40x32xbf16>, vector<40x32xf32> -> vector<40x32xf32>
    %85 = tpu.reciprocal %82 {approx = true} : vector<40x1xf32> -> vector<40x1xf32>
    %86 = vector.broadcast %85 : vector<40x1xf32> to vector<40x32xf32>
    %87 = arith.mulf %84, %86 : vector<40x32xf32>
    %88 = vector.extract_strided_slice %64 {offsets = [0, 32], sizes = [40, 32], strides = [1, 1]} : vector<40x192xf32> to vector<40x32xf32>
    %89 = arith.truncf %88 : vector<40x32xf32> to vector<40x32xbf16>
    %90 = vector.extract_strided_slice %64 {offsets = [0, 96], sizes = [40, 32], strides = [1, 1]} : vector<40x192xf32> to vector<40x32xf32>
    %91 = arith.truncf %90 : vector<40x32xf32> to vector<40x32xbf16>
    %92 = vector.extract_strided_slice %64 {offsets = [0, 160], sizes = [40, 32], strides = [1, 1]} : vector<40x192xf32> to vector<40x32xf32>
    %93 = arith.truncf %92 : vector<40x32xf32> to vector<40x32xbf16>
    %cst_28 = arith.constant dense<0.000000e+00> : vector<40x40xf32>
    %94 = tpu.matmul %89, %91, %cst_28 {dimension_numbers = #tpu.dot_dimension_numbers<[1], [1], [0], [0], [0, 0, 1, 0], [], []>} : vector<40x32xbf16>, vector<40x32xbf16>, vector<40x40xf32> -> vector<40x40xf32>
    %cst_29 = arith.constant 0.176776692 : f32
    %95 = vector.broadcast %cst_29 : f32 to vector<40x40xf32>
    %96 = arith.mulf %94, %95 : vector<40x40xf32>
    %cst_30 = arith.constant -1.000000e+30 : f32
    %97 = vector.broadcast %cst_30 : f32 to vector<40x40xf32>
    %98 = arith.select %27, %96, %97 : vector<40x40xi1>, vector<40x40xf32>
    %cst_31 = arith.constant dense<0xFF800000> : vector<40xf32>
    %99 = vector.multi_reduction <maximumf>, %98, %cst_31 [1] : vector<40x40xf32> to vector<40xf32>
    %100 = vector.shape_cast %99 : vector<40xf32> to vector<40x1xf32>
    %101 = vector.broadcast %100 : vector<40x1xf32> to vector<40x40xf32>
    %102 = arith.subf %98, %101 : vector<40x40xf32>
    %103 = math.exp %102 : vector<40x40xf32>
    %cst_32 = arith.constant dense<0.000000e+00> : vector<40xf32>
    %104 = vector.multi_reduction <add>, %103, %cst_32 [1] : vector<40x40xf32> to vector<40xf32>
    %105 = vector.shape_cast %104 : vector<40xf32> to vector<40x1xf32>
    %106 = arith.truncf %103 : vector<40x40xf32> to vector<40x40xbf16>
    %cst_33 = arith.constant dense<0.000000e+00> : vector<40x32xf32>
    %107 = tpu.matmul %106, %93, %cst_33 {dimension_numbers = #tpu.dot_dimension_numbers<[1], [0], [0], [1], [0, 0, 1, 1], [], []>} : vector<40x40xbf16>, vector<40x32xbf16>, vector<40x32xf32> -> vector<40x32xf32>
    %108 = tpu.reciprocal %105 {approx = true} : vector<40x1xf32> -> vector<40x1xf32>
    %109 = vector.broadcast %108 : vector<40x1xf32> to vector<40x32xf32>
    %110 = arith.mulf %107, %109 : vector<40x32xf32>
    %111 = tpu.concatenate %87, %110 in 1 : vector<40x32xf32>, vector<40x32xf32> -> vector<40x64xf32>
    %112 = vector.extract_strided_slice %63 {offsets = [40, 0], sizes = [40, 192], strides = [1, 1]} : vector<80x192xf32> to vector<40x192xf32>
    %113 = vector.extract_strided_slice %112 {offsets = [0, 0], sizes = [40, 32], strides = [1, 1]} : vector<40x192xf32> to vector<40x32xf32>
    %114 = arith.truncf %113 : vector<40x32xf32> to vector<40x32xbf16>
    %115 = vector.extract_strided_slice %112 {offsets = [0, 64], sizes = [40, 32], strides = [1, 1]} : vector<40x192xf32> to vector<40x32xf32>
    %116 = arith.truncf %115 : vector<40x32xf32> to vector<40x32xbf16>
    %117 = vector.extract_strided_slice %112 {offsets = [0, 128], sizes = [40, 32], strides = [1, 1]} : vector<40x192xf32> to vector<40x32xf32>
    %118 = arith.truncf %117 : vector<40x32xf32> to vector<40x32xbf16>
    %cst_34 = arith.constant dense<0.000000e+00> : vector<40x40xf32>
    %119 = tpu.matmul %114, %116, %cst_34 {dimension_numbers = #tpu.dot_dimension_numbers<[1], [1], [0], [0], [0, 0, 1, 0], [], []>} : vector<40x32xbf16>, vector<40x32xbf16>, vector<40x40xf32> -> vector<40x40xf32>
    %cst_35 = arith.constant 0.176776692 : f32
    %120 = vector.broadcast %cst_35 : f32 to vector<40x40xf32>
    %121 = arith.mulf %119, %120 : vector<40x40xf32>
    %cst_36 = arith.constant -1.000000e+30 : f32
    %122 = vector.broadcast %cst_36 : f32 to vector<40x40xf32>
    %123 = arith.select %27, %121, %122 : vector<40x40xi1>, vector<40x40xf32>
    %cst_37 = arith.constant dense<0xFF800000> : vector<40xf32>
    %124 = vector.multi_reduction <maximumf>, %123, %cst_37 [1] : vector<40x40xf32> to vector<40xf32>
    %125 = vector.shape_cast %124 : vector<40xf32> to vector<40x1xf32>
    %126 = vector.broadcast %125 : vector<40x1xf32> to vector<40x40xf32>
    %127 = arith.subf %123, %126 : vector<40x40xf32>
    %128 = math.exp %127 : vector<40x40xf32>
    %cst_38 = arith.constant dense<0.000000e+00> : vector<40xf32>
    %129 = vector.multi_reduction <add>, %128, %cst_38 [1] : vector<40x40xf32> to vector<40xf32>
    %130 = vector.shape_cast %129 : vector<40xf32> to vector<40x1xf32>
    %131 = arith.truncf %128 : vector<40x40xf32> to vector<40x40xbf16>
    %cst_39 = arith.constant dense<0.000000e+00> : vector<40x32xf32>
    %132 = tpu.matmul %131, %118, %cst_39 {dimension_numbers = #tpu.dot_dimension_numbers<[1], [0], [0], [1], [0, 0, 1, 1], [], []>} : vector<40x40xbf16>, vector<40x32xbf16>, vector<40x32xf32> -> vector<40x32xf32>
    %133 = tpu.reciprocal %130 {approx = true} : vector<40x1xf32> -> vector<40x1xf32>
    %134 = vector.broadcast %133 : vector<40x1xf32> to vector<40x32xf32>
    %135 = arith.mulf %132, %134 : vector<40x32xf32>
    %136 = vector.extract_strided_slice %112 {offsets = [0, 32], sizes = [40, 32], strides = [1, 1]} : vector<40x192xf32> to vector<40x32xf32>
    %137 = arith.truncf %136 : vector<40x32xf32> to vector<40x32xbf16>
    %138 = vector.extract_strided_slice %112 {offsets = [0, 96], sizes = [40, 32], strides = [1, 1]} : vector<40x192xf32> to vector<40x32xf32>
    %139 = arith.truncf %138 : vector<40x32xf32> to vector<40x32xbf16>
    %140 = vector.extract_strided_slice %112 {offsets = [0, 160], sizes = [40, 32], strides = [1, 1]} : vector<40x192xf32> to vector<40x32xf32>
    %141 = arith.truncf %140 : vector<40x32xf32> to vector<40x32xbf16>
    %cst_40 = arith.constant dense<0.000000e+00> : vector<40x40xf32>
    %142 = tpu.matmul %137, %139, %cst_40 {dimension_numbers = #tpu.dot_dimension_numbers<[1], [1], [0], [0], [0, 0, 1, 0], [], []>} : vector<40x32xbf16>, vector<40x32xbf16>, vector<40x40xf32> -> vector<40x40xf32>
    %cst_41 = arith.constant 0.176776692 : f32
    %143 = vector.broadcast %cst_41 : f32 to vector<40x40xf32>
    %144 = arith.mulf %142, %143 : vector<40x40xf32>
    %cst_42 = arith.constant -1.000000e+30 : f32
    %145 = vector.broadcast %cst_42 : f32 to vector<40x40xf32>
    %146 = arith.select %27, %144, %145 : vector<40x40xi1>, vector<40x40xf32>
    %cst_43 = arith.constant dense<0xFF800000> : vector<40xf32>
    %147 = vector.multi_reduction <maximumf>, %146, %cst_43 [1] : vector<40x40xf32> to vector<40xf32>
    %148 = vector.shape_cast %147 : vector<40xf32> to vector<40x1xf32>
    %149 = vector.broadcast %148 : vector<40x1xf32> to vector<40x40xf32>
    %150 = arith.subf %146, %149 : vector<40x40xf32>
    %151 = math.exp %150 : vector<40x40xf32>
    %cst_44 = arith.constant dense<0.000000e+00> : vector<40xf32>
    %152 = vector.multi_reduction <add>, %151, %cst_44 [1] : vector<40x40xf32> to vector<40xf32>
    %153 = vector.shape_cast %152 : vector<40xf32> to vector<40x1xf32>
    %154 = arith.truncf %151 : vector<40x40xf32> to vector<40x40xbf16>
    %cst_45 = arith.constant dense<0.000000e+00> : vector<40x32xf32>
    %155 = tpu.matmul %154, %141, %cst_45 {dimension_numbers = #tpu.dot_dimension_numbers<[1], [0], [0], [1], [0, 0, 1, 1], [], []>} : vector<40x40xbf16>, vector<40x32xbf16>, vector<40x32xf32> -> vector<40x32xf32>
    %156 = tpu.reciprocal %153 {approx = true} : vector<40x1xf32> -> vector<40x1xf32>
    %157 = vector.broadcast %156 : vector<40x1xf32> to vector<40x32xf32>
    %158 = arith.mulf %155, %157 : vector<40x32xf32>
    %159 = tpu.concatenate %135, %158 in 1 : vector<40x32xf32>, vector<40x32xf32> -> vector<40x64xf32>
    %160 = tpu.concatenate %111, %159 in 0 : vector<40x64xf32>, vector<40x64xf32> -> vector<80x64xf32>
    %161 = arith.truncf %160 : vector<80x64xf32> to vector<80x64xbf16>
    %c0_46 = arith.constant 0 : index
    %c0_47 = arith.constant 0 : index
    %c0_48 = arith.constant 0 : index
    %162 = vector.load %arg4[%c0_46, %c0_47, %c0_48] : memref<2x64x64xbf16, #tpu.memory_space<vmem>>, vector<1x64x64xbf16>
    %163 = vector.shape_cast %162 : vector<1x64x64xbf16> to vector<64x64xbf16>
    %cst_49 = arith.constant dense<0.000000e+00> : vector<80x64xf32>
    %164 = tpu.matmul %161, %163, %cst_49 {dimension_numbers = #tpu.dot_dimension_numbers<[1], [0], [0], [1], [0, 0, 1, 1], [], []>} : vector<80x64xbf16>, vector<64x64xbf16>, vector<80x64xf32> -> vector<80x64xf32>
    %165 = vector.broadcast %33 : vector<1x64xf32> to vector<80x64xf32>
    %166 = arith.addf %164, %165 : vector<80x64xf32>
    %167 = arith.addf %24, %166 : vector<80x64xf32>
    %cst_50 = arith.constant dense<0.000000e+00> : vector<80xf32>
    %168 = vector.multi_reduction <add>, %167, %cst_50 [1] : vector<80x64xf32> to vector<80xf32>
    %169 = vector.shape_cast %168 : vector<80xf32> to vector<80x1xf32>
    %cst_51 = arith.constant 6.400000e+01 : f32
    %170 = vector.broadcast %cst_51 : f32 to vector<80x1xf32>
    %171 = arith.divf %169, %170 : vector<80x1xf32>
    %172 = vector.broadcast %171 : vector<80x1xf32> to vector<80x64xf32>
    %173 = arith.subf %167, %172 : vector<80x64xf32>
    %174 = arith.mulf %173, %173 : vector<80x64xf32>
    %cst_52 = arith.constant dense<0.000000e+00> : vector<80xf32>
    %175 = vector.multi_reduction <add>, %174, %cst_52 [1] : vector<80x64xf32> to vector<80xf32>
    %176 = vector.shape_cast %175 : vector<80xf32> to vector<80x1xf32>
    %cst_53 = arith.constant 6.400000e+01 : f32
    %177 = vector.broadcast %cst_53 : f32 to vector<80x1xf32>
    %178 = arith.divf %176, %177 : vector<80x1xf32>
    %cst_54 = arith.constant 9.99999974E-6 : f32
    %179 = vector.broadcast %cst_54 : f32 to vector<80x1xf32>
    %180 = arith.addf %178, %179 : vector<80x1xf32>
    %181 = math.rsqrt %180 : vector<80x1xf32>
    %182 = vector.broadcast %181 : vector<80x1xf32> to vector<80x64xf32>
    %183 = arith.mulf %173, %182 : vector<80x64xf32>
    %184 = vector.broadcast %34 : vector<1x64xf32> to vector<80x64xf32>
    %185 = arith.mulf %183, %184 : vector<80x64xf32>
    %186 = vector.broadcast %35 : vector<1x64xf32> to vector<80x64xf32>
    %187 = arith.addf %185, %186 : vector<80x64xf32>
    %188 = arith.truncf %187 : vector<80x64xf32> to vector<80x64xbf16>
    %c0_55 = arith.constant 0 : index
    %c0_56 = arith.constant 0 : index
    %c0_57 = arith.constant 0 : index
    %189 = vector.load %arg5[%c0_55, %c0_56, %c0_57] : memref<2x64x128xbf16, #tpu.memory_space<vmem>>, vector<1x64x128xbf16>
    %190 = vector.shape_cast %189 : vector<1x64x128xbf16> to vector<64x128xbf16>
    %cst_58 = arith.constant dense<0.000000e+00> : vector<80x128xf32>
    %191 = tpu.matmul %188, %190, %cst_58 {dimension_numbers = #tpu.dot_dimension_numbers<[1], [0], [0], [1], [0, 0, 1, 1], [], []>} : vector<80x64xbf16>, vector<64x128xbf16>, vector<80x128xf32> -> vector<80x128xf32>
    %192 = vector.broadcast %36 : vector<1x128xf32> to vector<80x128xf32>
    %193 = arith.addf %191, %192 : vector<80x128xf32>
    %cst_59 = arith.constant 0.000000e+00 : f32
    %194 = vector.broadcast %cst_59 : f32 to vector<80x128xf32>
    %195 = arith.maximumf %193, %194 : vector<80x128xf32>
    %196 = arith.truncf %195 : vector<80x128xf32> to vector<80x128xbf16>
    %c0_60 = arith.constant 0 : index
    %c0_61 = arith.constant 0 : index
    %c0_62 = arith.constant 0 : index
    %197 = vector.load %arg6[%c0_60, %c0_61, %c0_62] : memref<2x128x64xbf16, #tpu.memory_space<vmem>>, vector<1x128x64xbf16>
    %198 = vector.shape_cast %197 : vector<1x128x64xbf16> to vector<128x64xbf16>
    %cst_63 = arith.constant dense<0.000000e+00> : vector<80x64xf32>
    %199 = tpu.matmul %196, %198, %cst_63 {dimension_numbers = #tpu.dot_dimension_numbers<[1], [0], [0], [1], [0, 0, 1, 1], [], []>} : vector<80x128xbf16>, vector<128x64xbf16>, vector<80x64xf32> -> vector<80x64xf32>
    %200 = vector.broadcast %37 : vector<1x64xf32> to vector<80x64xf32>
    %201 = arith.addf %199, %200 : vector<80x64xf32>
    %202 = arith.addf %167, %201 : vector<80x64xf32>
    %c1_64 = arith.constant 1 : index
    %c0_65 = arith.constant 0 : index
    %c0_66 = arith.constant 0 : index
    %203 = vector.load %arg7[%c1_64, %c0_65, %c0_66] : memref<2x8x192xf32, #tpu.memory_space<vmem>>, vector<1x8x192xf32>
    %204 = vector.shape_cast %203 : vector<1x8x192xf32> to vector<8x192xf32>
    %205 = vector.extract_strided_slice %204 {offsets = [0, 0], sizes = [1, 64], strides = [1, 1]} : vector<8x192xf32> to vector<1x64xf32>
    %206 = vector.extract_strided_slice %204 {offsets = [1, 0], sizes = [1, 64], strides = [1, 1]} : vector<8x192xf32> to vector<1x64xf32>
    %207 = vector.extract_strided_slice %204 {offsets = [2, 0], sizes = [1, 192], strides = [1, 1]} : vector<8x192xf32> to vector<1x192xf32>
    %208 = vector.extract_strided_slice %204 {offsets = [3, 0], sizes = [1, 64], strides = [1, 1]} : vector<8x192xf32> to vector<1x64xf32>
    %209 = vector.extract_strided_slice %204 {offsets = [4, 0], sizes = [1, 64], strides = [1, 1]} : vector<8x192xf32> to vector<1x64xf32>
    %210 = vector.extract_strided_slice %204 {offsets = [5, 0], sizes = [1, 64], strides = [1, 1]} : vector<8x192xf32> to vector<1x64xf32>
    %211 = vector.extract_strided_slice %204 {offsets = [6, 0], sizes = [1, 128], strides = [1, 1]} : vector<8x192xf32> to vector<1x128xf32>
    %212 = vector.extract_strided_slice %204 {offsets = [7, 0], sizes = [1, 64], strides = [1, 1]} : vector<8x192xf32> to vector<1x64xf32>
    %cst_67 = arith.constant dense<0.000000e+00> : vector<80xf32>
    %213 = vector.multi_reduction <add>, %202, %cst_67 [1] : vector<80x64xf32> to vector<80xf32>
    %214 = vector.shape_cast %213 : vector<80xf32> to vector<80x1xf32>
    %cst_68 = arith.constant 6.400000e+01 : f32
    %215 = vector.broadcast %cst_68 : f32 to vector<80x1xf32>
    %216 = arith.divf %214, %215 : vector<80x1xf32>
    %217 = vector.broadcast %216 : vector<80x1xf32> to vector<80x64xf32>
    %218 = arith.subf %202, %217 : vector<80x64xf32>
    %219 = arith.mulf %218, %218 : vector<80x64xf32>
    %cst_69 = arith.constant dense<0.000000e+00> : vector<80xf32>
    %220 = vector.multi_reduction <add>, %219, %cst_69 [1] : vector<80x64xf32> to vector<80xf32>
    %221 = vector.shape_cast %220 : vector<80xf32> to vector<80x1xf32>
    %cst_70 = arith.constant 6.400000e+01 : f32
    %222 = vector.broadcast %cst_70 : f32 to vector<80x1xf32>
    %223 = arith.divf %221, %222 : vector<80x1xf32>
    %cst_71 = arith.constant 9.99999974E-6 : f32
    %224 = vector.broadcast %cst_71 : f32 to vector<80x1xf32>
    %225 = arith.addf %223, %224 : vector<80x1xf32>
    %226 = math.rsqrt %225 : vector<80x1xf32>
    %227 = vector.broadcast %226 : vector<80x1xf32> to vector<80x64xf32>
    %228 = arith.mulf %218, %227 : vector<80x64xf32>
    %229 = vector.broadcast %205 : vector<1x64xf32> to vector<80x64xf32>
    %230 = arith.mulf %228, %229 : vector<80x64xf32>
    %231 = vector.broadcast %206 : vector<1x64xf32> to vector<80x64xf32>
    %232 = arith.addf %230, %231 : vector<80x64xf32>
    %233 = arith.truncf %232 : vector<80x64xf32> to vector<80x64xbf16>
    %c1_72 = arith.constant 1 : index
    %c0_73 = arith.constant 0 : index
    %c0_74 = arith.constant 0 : index
    %234 = vector.load %arg3[%c1_72, %c0_73, %c0_74] : memref<2x64x192xbf16, #tpu.memory_space<vmem>>, vector<1x64x192xbf16>
    %235 = vector.shape_cast %234 : vector<1x64x192xbf16> to vector<64x192xbf16>
    %cst_75 = arith.constant dense<0.000000e+00> : vector<80x192xf32>
    %236 = tpu.matmul %233, %235, %cst_75 {dimension_numbers = #tpu.dot_dimension_numbers<[1], [0], [0], [1], [0, 0, 1, 1], [], []>} : vector<80x64xbf16>, vector<64x192xbf16>, vector<80x192xf32> -> vector<80x192xf32>
    %237 = vector.broadcast %207 : vector<1x192xf32> to vector<80x192xf32>
    %238 = arith.addf %236, %237 : vector<80x192xf32>
    %239 = vector.extract_strided_slice %238 {offsets = [0, 0], sizes = [40, 192], strides = [1, 1]} : vector<80x192xf32> to vector<40x192xf32>
    %240 = vector.extract_strided_slice %239 {offsets = [0, 0], sizes = [40, 32], strides = [1, 1]} : vector<40x192xf32> to vector<40x32xf32>
    %241 = arith.truncf %240 : vector<40x32xf32> to vector<40x32xbf16>
    %242 = vector.extract_strided_slice %239 {offsets = [0, 64], sizes = [40, 32], strides = [1, 1]} : vector<40x192xf32> to vector<40x32xf32>
    %243 = arith.truncf %242 : vector<40x32xf32> to vector<40x32xbf16>
    %244 = vector.extract_strided_slice %239 {offsets = [0, 128], sizes = [40, 32], strides = [1, 1]} : vector<40x192xf32> to vector<40x32xf32>
    %245 = arith.truncf %244 : vector<40x32xf32> to vector<40x32xbf16>
    %cst_76 = arith.constant dense<0.000000e+00> : vector<40x40xf32>
    %246 = tpu.matmul %241, %243, %cst_76 {dimension_numbers = #tpu.dot_dimension_numbers<[1], [1], [0], [0], [0, 0, 1, 0], [], []>} : vector<40x32xbf16>, vector<40x32xbf16>, vector<40x40xf32> -> vector<40x40xf32>
    %cst_77 = arith.constant 0.176776692 : f32
    %247 = vector.broadcast %cst_77 : f32 to vector<40x40xf32>
    %248 = arith.mulf %246, %247 : vector<40x40xf32>
    %cst_78 = arith.constant -1.000000e+30 : f32
    %249 = vector.broadcast %cst_78 : f32 to vector<40x40xf32>
    %250 = arith.select %27, %248, %249 : vector<40x40xi1>, vector<40x40xf32>
    %cst_79 = arith.constant dense<0xFF800000> : vector<40xf32>
    %251 = vector.multi_reduction <maximumf>, %250, %cst_79 [1] : vector<40x40xf32> to vector<40xf32>
    %252 = vector.shape_cast %251 : vector<40xf32> to vector<40x1xf32>
    %253 = vector.broadcast %252 : vector<40x1xf32> to vector<40x40xf32>
    %254 = arith.subf %250, %253 : vector<40x40xf32>
    %255 = math.exp %254 : vector<40x40xf32>
    %cst_80 = arith.constant dense<0.000000e+00> : vector<40xf32>
    %256 = vector.multi_reduction <add>, %255, %cst_80 [1] : vector<40x40xf32> to vector<40xf32>
    %257 = vector.shape_cast %256 : vector<40xf32> to vector<40x1xf32>
    %258 = arith.truncf %255 : vector<40x40xf32> to vector<40x40xbf16>
    %cst_81 = arith.constant dense<0.000000e+00> : vector<40x32xf32>
    %259 = tpu.matmul %258, %245, %cst_81 {dimension_numbers = #tpu.dot_dimension_numbers<[1], [0], [0], [1], [0, 0, 1, 1], [], []>} : vector<40x40xbf16>, vector<40x32xbf16>, vector<40x32xf32> -> vector<40x32xf32>
    %260 = tpu.reciprocal %257 {approx = true} : vector<40x1xf32> -> vector<40x1xf32>
    %261 = vector.broadcast %260 : vector<40x1xf32> to vector<40x32xf32>
    %262 = arith.mulf %259, %261 : vector<40x32xf32>
    %263 = vector.extract_strided_slice %239 {offsets = [0, 32], sizes = [40, 32], strides = [1, 1]} : vector<40x192xf32> to vector<40x32xf32>
    %264 = arith.truncf %263 : vector<40x32xf32> to vector<40x32xbf16>
    %265 = vector.extract_strided_slice %239 {offsets = [0, 96], sizes = [40, 32], strides = [1, 1]} : vector<40x192xf32> to vector<40x32xf32>
    %266 = arith.truncf %265 : vector<40x32xf32> to vector<40x32xbf16>
    %267 = vector.extract_strided_slice %239 {offsets = [0, 160], sizes = [40, 32], strides = [1, 1]} : vector<40x192xf32> to vector<40x32xf32>
    %268 = arith.truncf %267 : vector<40x32xf32> to vector<40x32xbf16>
    %cst_82 = arith.constant dense<0.000000e+00> : vector<40x40xf32>
    %269 = tpu.matmul %264, %266, %cst_82 {dimension_numbers = #tpu.dot_dimension_numbers<[1], [1], [0], [0], [0, 0, 1, 0], [], []>} : vector<40x32xbf16>, vector<40x32xbf16>, vector<40x40xf32> -> vector<40x40xf32>
    %cst_83 = arith.constant 0.176776692 : f32
    %270 = vector.broadcast %cst_83 : f32 to vector<40x40xf32>
    %271 = arith.mulf %269, %270 : vector<40x40xf32>
    %cst_84 = arith.constant -1.000000e+30 : f32
    %272 = vector.broadcast %cst_84 : f32 to vector<40x40xf32>
    %273 = arith.select %27, %271, %272 : vector<40x40xi1>, vector<40x40xf32>
    %cst_85 = arith.constant dense<0xFF800000> : vector<40xf32>
    %274 = vector.multi_reduction <maximumf>, %273, %cst_85 [1] : vector<40x40xf32> to vector<40xf32>
    %275 = vector.shape_cast %274 : vector<40xf32> to vector<40x1xf32>
    %276 = vector.broadcast %275 : vector<40x1xf32> to vector<40x40xf32>
    %277 = arith.subf %273, %276 : vector<40x40xf32>
    %278 = math.exp %277 : vector<40x40xf32>
    %cst_86 = arith.constant dense<0.000000e+00> : vector<40xf32>
    %279 = vector.multi_reduction <add>, %278, %cst_86 [1] : vector<40x40xf32> to vector<40xf32>
    %280 = vector.shape_cast %279 : vector<40xf32> to vector<40x1xf32>
    %281 = arith.truncf %278 : vector<40x40xf32> to vector<40x40xbf16>
    %cst_87 = arith.constant dense<0.000000e+00> : vector<40x32xf32>
    %282 = tpu.matmul %281, %268, %cst_87 {dimension_numbers = #tpu.dot_dimension_numbers<[1], [0], [0], [1], [0, 0, 1, 1], [], []>} : vector<40x40xbf16>, vector<40x32xbf16>, vector<40x32xf32> -> vector<40x32xf32>
    %283 = tpu.reciprocal %280 {approx = true} : vector<40x1xf32> -> vector<40x1xf32>
    %284 = vector.broadcast %283 : vector<40x1xf32> to vector<40x32xf32>
    %285 = arith.mulf %282, %284 : vector<40x32xf32>
    %286 = tpu.concatenate %262, %285 in 1 : vector<40x32xf32>, vector<40x32xf32> -> vector<40x64xf32>
    %287 = vector.extract_strided_slice %238 {offsets = [40, 0], sizes = [40, 192], strides = [1, 1]} : vector<80x192xf32> to vector<40x192xf32>
    %288 = vector.extract_strided_slice %287 {offsets = [0, 0], sizes = [40, 32], strides = [1, 1]} : vector<40x192xf32> to vector<40x32xf32>
    %289 = arith.truncf %288 : vector<40x32xf32> to vector<40x32xbf16>
    %290 = vector.extract_strided_slice %287 {offsets = [0, 64], sizes = [40, 32], strides = [1, 1]} : vector<40x192xf32> to vector<40x32xf32>
    %291 = arith.truncf %290 : vector<40x32xf32> to vector<40x32xbf16>
    %292 = vector.extract_strided_slice %287 {offsets = [0, 128], sizes = [40, 32], strides = [1, 1]} : vector<40x192xf32> to vector<40x32xf32>
    %293 = arith.truncf %292 : vector<40x32xf32> to vector<40x32xbf16>
    %cst_88 = arith.constant dense<0.000000e+00> : vector<40x40xf32>
    %294 = tpu.matmul %289, %291, %cst_88 {dimension_numbers = #tpu.dot_dimension_numbers<[1], [1], [0], [0], [0, 0, 1, 0], [], []>} : vector<40x32xbf16>, vector<40x32xbf16>, vector<40x40xf32> -> vector<40x40xf32>
    %cst_89 = arith.constant 0.176776692 : f32
    %295 = vector.broadcast %cst_89 : f32 to vector<40x40xf32>
    %296 = arith.mulf %294, %295 : vector<40x40xf32>
    %cst_90 = arith.constant -1.000000e+30 : f32
    %297 = vector.broadcast %cst_90 : f32 to vector<40x40xf32>
    %298 = arith.select %27, %296, %297 : vector<40x40xi1>, vector<40x40xf32>
    %cst_91 = arith.constant dense<0xFF800000> : vector<40xf32>
    %299 = vector.multi_reduction <maximumf>, %298, %cst_91 [1] : vector<40x40xf32> to vector<40xf32>
    %300 = vector.shape_cast %299 : vector<40xf32> to vector<40x1xf32>
    %301 = vector.broadcast %300 : vector<40x1xf32> to vector<40x40xf32>
    %302 = arith.subf %298, %301 : vector<40x40xf32>
    %303 = math.exp %302 : vector<40x40xf32>
    %cst_92 = arith.constant dense<0.000000e+00> : vector<40xf32>
    %304 = vector.multi_reduction <add>, %303, %cst_92 [1] : vector<40x40xf32> to vector<40xf32>
    %305 = vector.shape_cast %304 : vector<40xf32> to vector<40x1xf32>
    %306 = arith.truncf %303 : vector<40x40xf32> to vector<40x40xbf16>
    %cst_93 = arith.constant dense<0.000000e+00> : vector<40x32xf32>
    %307 = tpu.matmul %306, %293, %cst_93 {dimension_numbers = #tpu.dot_dimension_numbers<[1], [0], [0], [1], [0, 0, 1, 1], [], []>} : vector<40x40xbf16>, vector<40x32xbf16>, vector<40x32xf32> -> vector<40x32xf32>
    %308 = tpu.reciprocal %305 {approx = true} : vector<40x1xf32> -> vector<40x1xf32>
    %309 = vector.broadcast %308 : vector<40x1xf32> to vector<40x32xf32>
    %310 = arith.mulf %307, %309 : vector<40x32xf32>
    %311 = vector.extract_strided_slice %287 {offsets = [0, 32], sizes = [40, 32], strides = [1, 1]} : vector<40x192xf32> to vector<40x32xf32>
    %312 = arith.truncf %311 : vector<40x32xf32> to vector<40x32xbf16>
    %313 = vector.extract_strided_slice %287 {offsets = [0, 96], sizes = [40, 32], strides = [1, 1]} : vector<40x192xf32> to vector<40x32xf32>
    %314 = arith.truncf %313 : vector<40x32xf32> to vector<40x32xbf16>
    %315 = vector.extract_strided_slice %287 {offsets = [0, 160], sizes = [40, 32], strides = [1, 1]} : vector<40x192xf32> to vector<40x32xf32>
    %316 = arith.truncf %315 : vector<40x32xf32> to vector<40x32xbf16>
    %cst_94 = arith.constant dense<0.000000e+00> : vector<40x40xf32>
    %317 = tpu.matmul %312, %314, %cst_94 {dimension_numbers = #tpu.dot_dimension_numbers<[1], [1], [0], [0], [0, 0, 1, 0], [], []>} : vector<40x32xbf16>, vector<40x32xbf16>, vector<40x40xf32> -> vector<40x40xf32>
    %cst_95 = arith.constant 0.176776692 : f32
    %318 = vector.broadcast %cst_95 : f32 to vector<40x40xf32>
    %319 = arith.mulf %317, %318 : vector<40x40xf32>
    %cst_96 = arith.constant -1.000000e+30 : f32
    %320 = vector.broadcast %cst_96 : f32 to vector<40x40xf32>
    %321 = arith.select %27, %319, %320 : vector<40x40xi1>, vector<40x40xf32>
    %cst_97 = arith.constant dense<0xFF800000> : vector<40xf32>
    %322 = vector.multi_reduction <maximumf>, %321, %cst_97 [1] : vector<40x40xf32> to vector<40xf32>
    %323 = vector.shape_cast %322 : vector<40xf32> to vector<40x1xf32>
    %324 = vector.broadcast %323 : vector<40x1xf32> to vector<40x40xf32>
    %325 = arith.subf %321, %324 : vector<40x40xf32>
    %326 = math.exp %325 : vector<40x40xf32>
    %cst_98 = arith.constant dense<0.000000e+00> : vector<40xf32>
    %327 = vector.multi_reduction <add>, %326, %cst_98 [1] : vector<40x40xf32> to vector<40xf32>
    %328 = vector.shape_cast %327 : vector<40xf32> to vector<40x1xf32>
    %329 = arith.truncf %326 : vector<40x40xf32> to vector<40x40xbf16>
    %cst_99 = arith.constant dense<0.000000e+00> : vector<40x32xf32>
    %330 = tpu.matmul %329, %316, %cst_99 {dimension_numbers = #tpu.dot_dimension_numbers<[1], [0], [0], [1], [0, 0, 1, 1], [], []>} : vector<40x40xbf16>, vector<40x32xbf16>, vector<40x32xf32> -> vector<40x32xf32>
    %331 = tpu.reciprocal %328 {approx = true} : vector<40x1xf32> -> vector<40x1xf32>
    %332 = vector.broadcast %331 : vector<40x1xf32> to vector<40x32xf32>
    %333 = arith.mulf %330, %332 : vector<40x32xf32>
    %334 = tpu.concatenate %310, %333 in 1 : vector<40x32xf32>, vector<40x32xf32> -> vector<40x64xf32>
    %335 = tpu.concatenate %286, %334 in 0 : vector<40x64xf32>, vector<40x64xf32> -> vector<80x64xf32>
    %336 = arith.truncf %335 : vector<80x64xf32> to vector<80x64xbf16>
    %c1_100 = arith.constant 1 : index
    %c0_101 = arith.constant 0 : index
    %c0_102 = arith.constant 0 : index
    %337 = vector.load %arg4[%c1_100, %c0_101, %c0_102] : memref<2x64x64xbf16, #tpu.memory_space<vmem>>, vector<1x64x64xbf16>
    %338 = vector.shape_cast %337 : vector<1x64x64xbf16> to vector<64x64xbf16>
    %cst_103 = arith.constant dense<0.000000e+00> : vector<80x64xf32>
    %339 = tpu.matmul %336, %338, %cst_103 {dimension_numbers = #tpu.dot_dimension_numbers<[1], [0], [0], [1], [0, 0, 1, 1], [], []>} : vector<80x64xbf16>, vector<64x64xbf16>, vector<80x64xf32> -> vector<80x64xf32>
    %340 = vector.broadcast %208 : vector<1x64xf32> to vector<80x64xf32>
    %341 = arith.addf %339, %340 : vector<80x64xf32>
    %342 = arith.addf %202, %341 : vector<80x64xf32>
    %cst_104 = arith.constant dense<0.000000e+00> : vector<80xf32>
    %343 = vector.multi_reduction <add>, %342, %cst_104 [1] : vector<80x64xf32> to vector<80xf32>
    %344 = vector.shape_cast %343 : vector<80xf32> to vector<80x1xf32>
    %cst_105 = arith.constant 6.400000e+01 : f32
    %345 = vector.broadcast %cst_105 : f32 to vector<80x1xf32>
    %346 = arith.divf %344, %345 : vector<80x1xf32>
    %347 = vector.broadcast %346 : vector<80x1xf32> to vector<80x64xf32>
    %348 = arith.subf %342, %347 : vector<80x64xf32>
    %349 = arith.mulf %348, %348 : vector<80x64xf32>
    %cst_106 = arith.constant dense<0.000000e+00> : vector<80xf32>
    %350 = vector.multi_reduction <add>, %349, %cst_106 [1] : vector<80x64xf32> to vector<80xf32>
    %351 = vector.shape_cast %350 : vector<80xf32> to vector<80x1xf32>
    %cst_107 = arith.constant 6.400000e+01 : f32
    %352 = vector.broadcast %cst_107 : f32 to vector<80x1xf32>
    %353 = arith.divf %351, %352 : vector<80x1xf32>
    %cst_108 = arith.constant 9.99999974E-6 : f32
    %354 = vector.broadcast %cst_108 : f32 to vector<80x1xf32>
    %355 = arith.addf %353, %354 : vector<80x1xf32>
    %356 = math.rsqrt %355 : vector<80x1xf32>
    %357 = vector.broadcast %356 : vector<80x1xf32> to vector<80x64xf32>
    %358 = arith.mulf %348, %357 : vector<80x64xf32>
    %359 = vector.broadcast %209 : vector<1x64xf32> to vector<80x64xf32>
    %360 = arith.mulf %358, %359 : vector<80x64xf32>
    %361 = vector.broadcast %210 : vector<1x64xf32> to vector<80x64xf32>
    %362 = arith.addf %360, %361 : vector<80x64xf32>
    %363 = arith.truncf %362 : vector<80x64xf32> to vector<80x64xbf16>
    %c1_109 = arith.constant 1 : index
    %c0_110 = arith.constant 0 : index
    %c0_111 = arith.constant 0 : index
    %364 = vector.load %arg5[%c1_109, %c0_110, %c0_111] : memref<2x64x128xbf16, #tpu.memory_space<vmem>>, vector<1x64x128xbf16>
    %365 = vector.shape_cast %364 : vector<1x64x128xbf16> to vector<64x128xbf16>
    %cst_112 = arith.constant dense<0.000000e+00> : vector<80x128xf32>
    %366 = tpu.matmul %363, %365, %cst_112 {dimension_numbers = #tpu.dot_dimension_numbers<[1], [0], [0], [1], [0, 0, 1, 1], [], []>} : vector<80x64xbf16>, vector<64x128xbf16>, vector<80x128xf32> -> vector<80x128xf32>
    %367 = vector.broadcast %211 : vector<1x128xf32> to vector<80x128xf32>
    %368 = arith.addf %366, %367 : vector<80x128xf32>
    %cst_113 = arith.constant 0.000000e+00 : f32
    %369 = vector.broadcast %cst_113 : f32 to vector<80x128xf32>
    %370 = arith.maximumf %368, %369 : vector<80x128xf32>
    %371 = arith.truncf %370 : vector<80x128xf32> to vector<80x128xbf16>
    %c1_114 = arith.constant 1 : index
    %c0_115 = arith.constant 0 : index
    %c0_116 = arith.constant 0 : index
    %372 = vector.load %arg6[%c1_114, %c0_115, %c0_116] : memref<2x128x64xbf16, #tpu.memory_space<vmem>>, vector<1x128x64xbf16>
    %373 = vector.shape_cast %372 : vector<1x128x64xbf16> to vector<128x64xbf16>
    %cst_117 = arith.constant dense<0.000000e+00> : vector<80x64xf32>
    %374 = tpu.matmul %371, %373, %cst_117 {dimension_numbers = #tpu.dot_dimension_numbers<[1], [0], [0], [1], [0, 0, 1, 1], [], []>} : vector<80x128xbf16>, vector<128x64xbf16>, vector<80x64xf32> -> vector<80x64xf32>
    %375 = vector.broadcast %212 : vector<1x64xf32> to vector<80x64xf32>
    %376 = arith.addf %374, %375 : vector<80x64xf32>
    %377 = arith.addf %342, %376 : vector<80x64xf32>
    %c2 = arith.constant 2 : index
    %c0_118 = arith.constant 0 : index
    %378 = vector.load %arg2[%c2, %c0_118] : memref<4x64xf32, #tpu.memory_space<vmem>>, vector<1x64xf32>
    %c3 = arith.constant 3 : index
    %c0_119 = arith.constant 0 : index
    %379 = vector.load %arg2[%c3, %c0_119] : memref<4x64xf32, #tpu.memory_space<vmem>>, vector<1x64xf32>
    %cst_120 = arith.constant dense<0.000000e+00> : vector<80xf32>
    %380 = vector.multi_reduction <add>, %377, %cst_120 [1] : vector<80x64xf32> to vector<80xf32>
    %381 = vector.shape_cast %380 : vector<80xf32> to vector<80x1xf32>
    %cst_121 = arith.constant 6.400000e+01 : f32
    %382 = vector.broadcast %cst_121 : f32 to vector<80x1xf32>
    %383 = arith.divf %381, %382 : vector<80x1xf32>
    %384 = vector.broadcast %383 : vector<80x1xf32> to vector<80x64xf32>
    %385 = arith.subf %377, %384 : vector<80x64xf32>
    %386 = arith.mulf %385, %385 : vector<80x64xf32>
    %cst_122 = arith.constant dense<0.000000e+00> : vector<80xf32>
    %387 = vector.multi_reduction <add>, %386, %cst_122 [1] : vector<80x64xf32> to vector<80xf32>
    %388 = vector.shape_cast %387 : vector<80xf32> to vector<80x1xf32>
    %cst_123 = arith.constant 6.400000e+01 : f32
    %389 = vector.broadcast %cst_123 : f32 to vector<80x1xf32>
    %390 = arith.divf %388, %389 : vector<80x1xf32>
    %cst_124 = arith.constant 9.99999974E-6 : f32
    %391 = vector.broadcast %cst_124 : f32 to vector<80x1xf32>
    %392 = arith.addf %390, %391 : vector<80x1xf32>
    %393 = math.rsqrt %392 : vector<80x1xf32>
    %394 = vector.broadcast %393 : vector<80x1xf32> to vector<80x64xf32>
    %395 = arith.mulf %385, %394 : vector<80x64xf32>
    %396 = vector.broadcast %378 : vector<1x64xf32> to vector<80x64xf32>
    %397 = arith.mulf %395, %396 : vector<80x64xf32>
    %398 = vector.broadcast %379 : vector<1x64xf32> to vector<80x64xf32>
    %399 = arith.addf %397, %398 : vector<80x64xf32>
    %c0_125 = arith.constant 0 : index
    %c0_126 = arith.constant 0 : index
    %400 = vector.load %arg8[%c0_125, %c0_126] : memref<80x64xf32, #tpu.memory_space<vmem>>, vector<80x64xf32>
    tpu.vector_store %arg8[%c0_125, %c0_126], %399 {strides = array<i32>} : memref<80x64xf32, #tpu.memory_space<vmem>>, vector<80x64xf32>,
    return
  }
}

module attributes {stable_mosaic.version = 11 : i64} {
  func.func @_heads_state_kernel(%arg0: i32, %arg1: memref<16x64xf32, #tpu.memory_space<vmem>>, %arg2: memref<16x1600xbf16, #tpu.memory_space<vmem>>, %arg3: memref<16x16xf32, #tpu.memory_space<vmem>>, %arg4: memref<64x212xf32, #tpu.memory_space<vmem>>, %arg5: memref<1x212xf32, #tpu.memory_space<vmem>>, %arg6: memref<64x208xf32, #tpu.memory_space<vmem>>, %arg7: memref<1x208xf32, #tpu.memory_space<vmem>>, %arg8: memref<64x208xf32, #tpu.memory_space<vmem>>, %arg9: memref<1x208xf32, #tpu.memory_space<vmem>>, %arg10: memref<20x64xf32, #tpu.memory_space<vmem>>, %arg11: memref<1600x64xbf16, #tpu.memory_space<vmem>>, %arg12: memref<16x64xf32, #tpu.memory_space<vmem>>, %arg13: memref<1x64xf32, #tpu.memory_space<vmem>>, %arg14: memref<64x64xf32, #tpu.memory_space<vmem>>, %arg15: memref<1x64xf32, #tpu.memory_space<vmem>>, %arg16: memref<64x16xf32, #tpu.memory_space<vmem>>, %arg17: memref<1x16xf32, #tpu.memory_space<vmem>>, %arg18: memref<64x5248xbf16, #tpu.memory_space<vmem>>, %arg19: memref<1x5248xf32, #tpu.memory_space<vmem>>, %arg20: memref<16x20xf32, #tpu.memory_space<vmem>>, %arg21: memref<16x16xf32, #tpu.memory_space<vmem>>, %arg22: memref<16x208xf32, #tpu.memory_space<vmem>>, %arg23: memref<16x208xf32, #tpu.memory_space<vmem>>, %arg24: memref<16x5248xf32, #tpu.memory_space<vmem>>, %arg25: memref<16x64xbf16, #tpu.memory_space<vmem>>) attributes {dimension_semantics = [#tpu.dimension_semantics<arbitrary>], iteration_bounds = array<i64: 4>, scalar_prefetch = 0 : i64, scratch_operands = 1 : i64, tpu.core_type = #tpu.core_type<tc>, window_params = [{pipeline_mode = #tpu.pipeline_mode<synchronous>, transform_indices = @transform_0, window_bounds = array<i64: 16, 64>}, {pipeline_mode = #tpu.pipeline_mode<synchronous>, transform_indices = @transform_1, window_bounds = array<i64: 16, 1600>}, {pipeline_mode = #tpu.pipeline_mode<synchronous>, transform_indices = @transform_2, window_bounds = array<i64: 16, 16>}, {pipeline_mode = #tpu.pipeline_mode<synchronous>, transform_indices = @transform_3, window_bounds = array<i64: 64, 212>}, {pipeline_mode = #tpu.pipeline_mode<synchronous>, transform_indices = @transform_4, window_bounds = array<i64: 1, 212>}, {pipeline_mode = #tpu.pipeline_mode<synchronous>, transform_indices = @transform_5, window_bounds = array<i64: 64, 208>}, {pipeline_mode = #tpu.pipeline_mode<synchronous>, transform_indices = @transform_6, window_bounds = array<i64: 1, 208>}, {pipeline_mode = #tpu.pipeline_mode<synchronous>, transform_indices = @transform_7, window_bounds = array<i64: 64, 208>}, {pipeline_mode = #tpu.pipeline_mode<synchronous>, transform_indices = @transform_8, window_bounds = array<i64: 1, 208>}, {pipeline_mode = #tpu.pipeline_mode<synchronous>, transform_indices = @transform_9, window_bounds = array<i64: 20, 64>}, {pipeline_mode = #tpu.pipeline_mode<synchronous>, transform_indices = @transform_10, window_bounds = array<i64: 1600, 64>}, {pipeline_mode = #tpu.pipeline_mode<synchronous>, transform_indices = @transform_11, window_bounds = array<i64: 16, 64>}, {pipeline_mode = #tpu.pipeline_mode<synchronous>, transform_indices = @transform_12, window_bounds = array<i64: 1, 64>}, {pipeline_mode = #tpu.pipeline_mode<synchronous>, transform_indices = @transform_13, window_bounds = array<i64: 64, 64>}, {pipeline_mode = #tpu.pipeline_mode<synchronous>, transform_indices = @transform_14, window_bounds = array<i64: 1, 64>}, {pipeline_mode = #tpu.pipeline_mode<synchronous>, transform_indices = @transform_15, window_bounds = array<i64: 64, 16>}, {pipeline_mode = #tpu.pipeline_mode<synchronous>, transform_indices = @transform_16, window_bounds = array<i64: 1, 16>}, {transform_indices = @transform_17, window_bounds = array<i64: 64, 5248>}, {transform_indices = @transform_18, window_bounds = array<i64: 1, 5248>}, {pipeline_mode = #tpu.pipeline_mode<synchronous>, transform_indices = @transform_19, window_bounds = array<i64: 16, 20>}, {pipeline_mode = #tpu.pipeline_mode<synchronous>, transform_indices = @transform_20, window_bounds = array<i64: 16, 16>}, {pipeline_mode = #tpu.pipeline_mode<synchronous>, transform_indices = @transform_21, window_bounds = array<i64: 16, 208>}, {pipeline_mode = #tpu.pipeline_mode<synchronous>, transform_indices = @transform_22, window_bounds = array<i64: 16, 208>}, {transform_indices = @transform_23, window_bounds = array<i64: 16, 5248>}]} {
    %c0_i32 = arith.constant 0 : i32
    %0 = arith.cmpi eq, %arg0, %c0_i32 : i32
    %1 = arith.extui %0 : i1 to i32
    %c0_i32_0 = arith.constant 0 : i32
    %2 = arith.cmpi ne, %1, %c0_i32_0 : i32
    scf.if %2 {
      %c0_8 = arith.constant 0 : index
      %c0_9 = arith.constant 0 : index
      %10 = vector.load %arg1[%c0_8, %c0_9] : memref<16x64xf32, #tpu.memory_space<vmem>>, vector<16x64xf32>
      %cst_10 = arith.constant 0.000000e+00 : f32
      %11 = vector.broadcast %cst_10 : f32 to vector<16x64xf32>
      %12 = arith.maximumf %10, %11 : vector<16x64xf32>
      %c0_11 = arith.constant 0 : index
      %c0_12 = arith.constant 0 : index
      %13 = vector.load %arg4[%c0_11, %c0_12] : memref<64x212xf32, #tpu.memory_space<vmem>>, vector<64x212xf32>
      %cst_13 = arith.constant dense<0.000000e+00> : vector<16x212xf32>
      %14 = tpu.matmul %12, %13, %cst_13 {dimension_numbers = #tpu.dot_dimension_numbers<[1], [0], [0], [1], [0, 0, 1, 1], [], []>} : vector<16x64xf32>, vector<64x212xf32>, vector<16x212xf32> -> vector<16x212xf32>
      %c0_14 = arith.constant 0 : index
      %c0_15 = arith.constant 0 : index
      %15 = vector.load %arg5[%c0_14, %c0_15] : memref<1x212xf32, #tpu.memory_space<vmem>>, vector<1x212xf32>
      %16 = vector.broadcast %15 : vector<1x212xf32> to vector<16x212xf32>
      %17 = arith.addf %14, %16 : vector<16x212xf32>
      %18 = vector.extract_strided_slice %17 {offsets = [0, 0], sizes = [16, 64], strides = [1, 1]} : vector<16x212xf32> to vector<16x64xf32>
      %cst_16 = arith.constant 0.000000e+00 : f32
      %19 = vector.broadcast %cst_16 : f32 to vector<16x64xf32>
      %20 = arith.maximumf %18, %19 : vector<16x64xf32>
      %21 = vector.extract_strided_slice %17 {offsets = [0, 64], sizes = [16, 64], strides = [1, 1]} : vector<16x212xf32> to vector<16x64xf32>
      %cst_17 = arith.constant 0.000000e+00 : f32
      %22 = vector.broadcast %cst_17 : f32 to vector<16x64xf32>
      %23 = arith.maximumf %21, %22 : vector<16x64xf32>
      %24 = vector.extract_strided_slice %17 {offsets = [0, 128], sizes = [16, 64], strides = [1, 1]} : vector<16x212xf32> to vector<16x64xf32>
      %cst_18 = arith.constant 0.000000e+00 : f32
      %25 = vector.broadcast %cst_18 : f32 to vector<16x64xf32>
      %26 = arith.maximumf %24, %25 : vector<16x64xf32>
      %27 = vector.extract_strided_slice %17 {offsets = [0, 192], sizes = [16, 20], strides = [1, 1]} : vector<16x212xf32> to vector<16x20xf32>
      %28 = arith.truncf %20 : vector<16x64xf32> to vector<16x64xbf16>
      %c0_19 = arith.constant 0 : index
      %c0_20 = arith.constant 0 : index
      %29 = vector.load %arg25[%c0_19, %c0_20] : memref<16x64xbf16, #tpu.memory_space<vmem>>, vector<16x64xbf16>
      tpu.vector_store %arg25[%c0_19, %c0_20], %28 {strides = array<i32>} : memref<16x64xbf16, #tpu.memory_space<vmem>>, vector<16x64xbf16>,
      %c0_21 = arith.constant 0 : index
      %c0_22 = arith.constant 0 : index
      %30 = vector.load %arg20[%c0_21, %c0_22] : memref<16x20xf32, #tpu.memory_space<vmem>>, vector<16x20xf32>
      tpu.vector_store %arg20[%c0_21, %c0_22], %27 {strides = array<i32>} : memref<16x20xf32, #tpu.memory_space<vmem>>, vector<16x20xf32>,
      %c0_23 = arith.constant 0 : index
      %c0_24 = arith.constant 0 : index
      %31 = vector.load %arg6[%c0_23, %c0_24] : memref<64x208xf32, #tpu.memory_space<vmem>>, vector<64x208xf32>
      %cst_25 = arith.constant dense<0.000000e+00> : vector<16x208xf32>
      %32 = tpu.matmul %23, %31, %cst_25 {dimension_numbers = #tpu.dot_dimension_numbers<[1], [0], [0], [1], [0, 0, 1, 1], [], []>} : vector<16x64xf32>, vector<64x208xf32>, vector<16x208xf32> -> vector<16x208xf32>
      %c0_26 = arith.constant 0 : index
      %c0_27 = arith.constant 0 : index
      %33 = vector.load %arg7[%c0_26, %c0_27] : memref<1x208xf32, #tpu.memory_space<vmem>>, vector<1x208xf32>
      %34 = vector.broadcast %33 : vector<1x208xf32> to vector<16x208xf32>
      %35 = arith.addf %32, %34 : vector<16x208xf32>
      %c0_28 = arith.constant 0 : index
      %c0_29 = arith.constant 0 : index
      %36 = vector.load %arg22[%c0_28, %c0_29] : memref<16x208xf32, #tpu.memory_space<vmem>>, vector<16x208xf32>
      tpu.vector_store %arg22[%c0_28, %c0_29], %35 {strides = array<i32>} : memref<16x208xf32, #tpu.memory_space<vmem>>, vector<16x208xf32>,
      %c0_30 = arith.constant 0 : index
      %c0_31 = arith.constant 0 : index
      %37 = vector.load %arg8[%c0_30, %c0_31] : memref<64x208xf32, #tpu.memory_space<vmem>>, vector<64x208xf32>
      %cst_32 = arith.constant dense<0.000000e+00> : vector<16x208xf32>
      %38 = tpu.matmul %26, %37, %cst_32 {dimension_numbers = #tpu.dot_dimension_numbers<[1], [0], [0], [1], [0, 0, 1, 1], [], []>} : vector<16x64xf32>, vector<64x208xf32>, vector<16x208xf32> -> vector<16x208xf32>
      %c0_33 = arith.constant 0 : index
      %c0_34 = arith.constant 0 : index
      %39 = vector.load %arg9[%c0_33, %c0_34] : memref<1x208xf32, #tpu.memory_space<vmem>>, vector<1x208xf32>
      %40 = vector.broadcast %39 : vector<1x208xf32> to vector<16x208xf32>
      %41 = arith.addf %38, %40 : vector<16x208xf32>
      %c0_35 = arith.constant 0 : index
      %c0_36 = arith.constant 0 : index
      %42 = vector.load %arg23[%c0_35, %c0_36] : memref<16x208xf32, #tpu.memory_space<vmem>>, vector<16x208xf32>
      tpu.vector_store %arg23[%c0_35, %c0_36], %41 {strides = array<i32>} : memref<16x208xf32, #tpu.memory_space<vmem>>, vector<16x208xf32>,
      %c0_37 = arith.constant 0 : index
      %c0_38 = arith.constant 0 : index
      %43 = vector.load %arg10[%c0_37, %c0_38] : memref<20x64xf32, #tpu.memory_space<vmem>>, vector<20x64xf32>
      %cst_39 = arith.constant dense<0.000000e+00> : vector<16x64xf32>
      %44 = tpu.matmul %27, %43, %cst_39 {dimension_numbers = #tpu.dot_dimension_numbers<[1], [0], [0], [1], [0, 0, 1, 1], [], []>} : vector<16x20xf32>, vector<20x64xf32>, vector<16x64xf32> -> vector<16x64xf32>
      %c0_40 = arith.constant 0 : index
      %c0_41 = arith.constant 0 : index
      %45 = vector.load %arg2[%c0_40, %c0_41] : memref<16x1600xbf16, #tpu.memory_space<vmem>>, vector<16x1600xbf16>
      %c0_42 = arith.constant 0 : index
      %c0_43 = arith.constant 0 : index
      %46 = vector.load %arg11[%c0_42, %c0_43] : memref<1600x64xbf16, #tpu.memory_space<vmem>>, vector<1600x64xbf16>
      %cst_44 = arith.constant dense<0.000000e+00> : vector<16x64xf32>
      %47 = tpu.matmul %45, %46, %cst_44 {dimension_numbers = #tpu.dot_dimension_numbers<[1], [0], [0], [1], [0, 0, 1, 1], [], []>} : vector<16x1600xbf16>, vector<1600x64xbf16>, vector<16x64xf32> -> vector<16x64xf32>
      %48 = arith.addf %44, %47 : vector<16x64xf32>
      %c0_45 = arith.constant 0 : index
      %c0_46 = arith.constant 0 : index
      %49 = vector.load %arg3[%c0_45, %c0_46] : memref<16x16xf32, #tpu.memory_space<vmem>>, vector<16x16xf32>
      %c0_47 = arith.constant 0 : index
      %c0_48 = arith.constant 0 : index
      %50 = vector.load %arg12[%c0_47, %c0_48] : memref<16x64xf32, #tpu.memory_space<vmem>>, vector<16x64xf32>
      %cst_49 = arith.constant dense<0.000000e+00> : vector<16x64xf32>
      %51 = tpu.matmul %49, %50, %cst_49 {dimension_numbers = #tpu.dot_dimension_numbers<[1], [0], [0], [1], [0, 0, 1, 1], [], []>} : vector<16x16xf32>, vector<16x64xf32>, vector<16x64xf32> -> vector<16x64xf32>
      %52 = arith.addf %48, %51 : vector<16x64xf32>
      %c0_50 = arith.constant 0 : index
      %c0_51 = arith.constant 0 : index
      %53 = vector.load %arg13[%c0_50, %c0_51] : memref<1x64xf32, #tpu.memory_space<vmem>>, vector<1x64xf32>
      %54 = vector.broadcast %53 : vector<1x64xf32> to vector<16x64xf32>
      %55 = arith.addf %52, %54 : vector<16x64xf32>
      %c0_52 = arith.constant 0 : index
      %c0_53 = arith.constant 0 : index
      %56 = vector.load %arg14[%c0_52, %c0_53] : memref<64x64xf32, #tpu.memory_space<vmem>>, vector<64x64xf32>
      %cst_54 = arith.constant dense<0.000000e+00> : vector<16x64xf32>
      %57 = tpu.matmul %55, %56, %cst_54 {dimension_numbers = #tpu.dot_dimension_numbers<[1], [0], [0], [1], [0, 0, 1, 1], [], []>} : vector<16x64xf32>, vector<64x64xf32>, vector<16x64xf32> -> vector<16x64xf32>
      %c0_55 = arith.constant 0 : index
      %c0_56 = arith.constant 0 : index
      %58 = vector.load %arg15[%c0_55, %c0_56] : memref<1x64xf32, #tpu.memory_space<vmem>>, vector<1x64xf32>
      %59 = vector.broadcast %58 : vector<1x64xf32> to vector<16x64xf32>
      %60 = arith.addf %57, %59 : vector<16x64xf32>
      %cst_57 = arith.constant 0.000000e+00 : f32
      %61 = vector.broadcast %cst_57 : f32 to vector<16x64xf32>
      %62 = arith.maximumf %60, %61 : vector<16x64xf32>
      %c0_58 = arith.constant 0 : index
      %c0_59 = arith.constant 0 : index
      %63 = vector.load %arg16[%c0_58, %c0_59] : memref<64x16xf32, #tpu.memory_space<vmem>>, vector<64x16xf32>
      %cst_60 = arith.constant dense<0.000000e+00> : vector<16x16xf32>
      %64 = tpu.matmul %62, %63, %cst_60 {dimension_numbers = #tpu.dot_dimension_numbers<[1], [0], [0], [1], [0, 0, 1, 1], [], []>} : vector<16x64xf32>, vector<64x16xf32>, vector<16x16xf32> -> vector<16x16xf32>
      %c0_61 = arith.constant 0 : index
      %c0_62 = arith.constant 0 : index
      %65 = vector.load %arg17[%c0_61, %c0_62] : memref<1x16xf32, #tpu.memory_space<vmem>>, vector<1x16xf32>
      %66 = vector.broadcast %65 : vector<1x16xf32> to vector<16x16xf32>
      %67 = arith.addf %64, %66 : vector<16x16xf32>
      %c0_63 = arith.constant 0 : index
      %c0_64 = arith.constant 0 : index
      %68 = vector.load %arg21[%c0_63, %c0_64] : memref<16x16xf32, #tpu.memory_space<vmem>>, vector<16x16xf32>
      tpu.vector_store %arg21[%c0_63, %c0_64], %67 {strides = array<i32>} : memref<16x16xf32, #tpu.memory_space<vmem>>, vector<16x16xf32>,
    } else {
    }
    %c0 = arith.constant 0 : index
    %c0_1 = arith.constant 0 : index
    %3 = vector.load %arg25[%c0, %c0_1] : memref<16x64xbf16, #tpu.memory_space<vmem>>, vector<16x64xbf16>
    %c0_2 = arith.constant 0 : index
    %c0_3 = arith.constant 0 : index
    %4 = vector.load %arg18[%c0_2, %c0_3] : memref<64x5248xbf16, #tpu.memory_space<vmem>>, vector<64x5248xbf16>
    %cst = arith.constant dense<0.000000e+00> : vector<16x5248xf32>
    %5 = tpu.matmul %3, %4, %cst {dimension_numbers = #tpu.dot_dimension_numbers<[1], [0], [0], [1], [0, 0, 1, 1], [], []>} : vector<16x64xbf16>, vector<64x5248xbf16>, vector<16x5248xf32> -> vector<16x5248xf32>
    %c0_4 = arith.constant 0 : index
    %c0_5 = arith.constant 0 : index
    %6 = vector.load %arg19[%c0_4, %c0_5] : memref<1x5248xf32, #tpu.memory_space<vmem>>, vector<1x5248xf32>
    %7 = vector.broadcast %6 : vector<1x5248xf32> to vector<16x5248xf32>
    %8 = arith.addf %5, %7 : vector<16x5248xf32>
    %c0_6 = arith.constant 0 : index
    %c0_7 = arith.constant 0 : index
    %9 = vector.load %arg24[%c0_6, %c0_7] : memref<16x5248xf32, #tpu.memory_space<vmem>>, vector<16x5248xf32>
    tpu.vector_store %arg24[%c0_6, %c0_7], %8 {strides = array<i32>} : memref<16x5248xf32, #tpu.memory_space<vmem>>, vector<16x5248xf32>,
    return
  }
  func.func @transform_0(%arg0: i32) -> (i32, i32) {
    %c0_i32 = arith.constant 0 : i32
    %c0_i32_0 = arith.constant 0 : i32
    %c0_i32_1 = arith.constant 0 : i32
    return %c0_i32, %c0_i32_0 : i32, i32
  }
  func.func @transform_1(%arg0: i32) -> (i32, i32) {
    %c0_i32 = arith.constant 0 : i32
    %c0_i32_0 = arith.constant 0 : i32
    %c0_i32_1 = arith.constant 0 : i32
    return %c0_i32, %c0_i32_0 : i32, i32
  }
  func.func @transform_2(%arg0: i32) -> (i32, i32) {
    %c0_i32 = arith.constant 0 : i32
    %c0_i32_0 = arith.constant 0 : i32
    %c0_i32_1 = arith.constant 0 : i32
    return %c0_i32, %c0_i32_0 : i32, i32
  }
  func.func @transform_3(%arg0: i32) -> (i32, i32) {
    %c0_i32 = arith.constant 0 : i32
    %c0_i32_0 = arith.constant 0 : i32
    %c0_i32_1 = arith.constant 0 : i32
    return %c0_i32, %c0_i32_0 : i32, i32
  }
  func.func @transform_4(%arg0: i32) -> (i32, i32) {
    %c0_i32 = arith.constant 0 : i32
    %c0_i32_0 = arith.constant 0 : i32
    %c0_i32_1 = arith.constant 0 : i32
    return %c0_i32, %c0_i32_0 : i32, i32
  }
  func.func @transform_5(%arg0: i32) -> (i32, i32) {
    %c0_i32 = arith.constant 0 : i32
    %c0_i32_0 = arith.constant 0 : i32
    %c0_i32_1 = arith.constant 0 : i32
    return %c0_i32, %c0_i32_0 : i32, i32
  }
  func.func @transform_6(%arg0: i32) -> (i32, i32) {
    %c0_i32 = arith.constant 0 : i32
    %c0_i32_0 = arith.constant 0 : i32
    %c0_i32_1 = arith.constant 0 : i32
    return %c0_i32, %c0_i32_0 : i32, i32
  }
  func.func @transform_7(%arg0: i32) -> (i32, i32) {
    %c0_i32 = arith.constant 0 : i32
    %c0_i32_0 = arith.constant 0 : i32
    %c0_i32_1 = arith.constant 0 : i32
    return %c0_i32, %c0_i32_0 : i32, i32
  }
  func.func @transform_8(%arg0: i32) -> (i32, i32) {
    %c0_i32 = arith.constant 0 : i32
    %c0_i32_0 = arith.constant 0 : i32
    %c0_i32_1 = arith.constant 0 : i32
    return %c0_i32, %c0_i32_0 : i32, i32
  }
  func.func @transform_9(%arg0: i32) -> (i32, i32) {
    %c0_i32 = arith.constant 0 : i32
    %c0_i32_0 = arith.constant 0 : i32
    %c0_i32_1 = arith.constant 0 : i32
    return %c0_i32, %c0_i32_0 : i32, i32
  }
  func.func @transform_10(%arg0: i32) -> (i32, i32) {
    %c0_i32 = arith.constant 0 : i32
    %c0_i32_0 = arith.constant 0 : i32
    %c0_i32_1 = arith.constant 0 : i32
    return %c0_i32, %c0_i32_0 : i32, i32
  }
  func.func @transform_11(%arg0: i32) -> (i32, i32) {
    %c0_i32 = arith.constant 0 : i32
    %c0_i32_0 = arith.constant 0 : i32
    %c0_i32_1 = arith.constant 0 : i32
    return %c0_i32, %c0_i32_0 : i32, i32
  }
  func.func @transform_12(%arg0: i32) -> (i32, i32) {
    %c0_i32 = arith.constant 0 : i32
    %c0_i32_0 = arith.constant 0 : i32
    %c0_i32_1 = arith.constant 0 : i32
    return %c0_i32, %c0_i32_0 : i32, i32
  }
  func.func @transform_13(%arg0: i32) -> (i32, i32) {
    %c0_i32 = arith.constant 0 : i32
    %c0_i32_0 = arith.constant 0 : i32
    %c0_i32_1 = arith.constant 0 : i32
    return %c0_i32, %c0_i32_0 : i32, i32
  }
  func.func @transform_14(%arg0: i32) -> (i32, i32) {
    %c0_i32 = arith.constant 0 : i32
    %c0_i32_0 = arith.constant 0 : i32
    %c0_i32_1 = arith.constant 0 : i32
    return %c0_i32, %c0_i32_0 : i32, i32
  }
  func.func @transform_15(%arg0: i32) -> (i32, i32) {
    %c0_i32 = arith.constant 0 : i32
    %c0_i32_0 = arith.constant 0 : i32
    %c0_i32_1 = arith.constant 0 : i32
    return %c0_i32, %c0_i32_0 : i32, i32
  }
  func.func @transform_16(%arg0: i32) -> (i32, i32) {
    %c0_i32 = arith.constant 0 : i32
    %c0_i32_0 = arith.constant 0 : i32
    %c0_i32_1 = arith.constant 0 : i32
    return %c0_i32, %c0_i32_0 : i32, i32
  }
  func.func @transform_17(%arg0: i32) -> (i32, i32) {
    %c0_i32 = arith.constant 0 : i32
    %c0_i32_0 = arith.constant 0 : i32
    return %c0_i32, %arg0 : i32, i32
  }
  func.func @transform_18(%arg0: i32) -> (i32, i32) {
    %c0_i32 = arith.constant 0 : i32
    %c0_i32_0 = arith.constant 0 : i32
    return %c0_i32, %arg0 : i32, i32
  }
  func.func @transform_19(%arg0: i32) -> (i32, i32) {
    %c0_i32 = arith.constant 0 : i32
    %c0_i32_0 = arith.constant 0 : i32
    %c0_i32_1 = arith.constant 0 : i32
    return %c0_i32, %c0_i32_0 : i32, i32
  }
  func.func @transform_20(%arg0: i32) -> (i32, i32) {
    %c0_i32 = arith.constant 0 : i32
    %c0_i32_0 = arith.constant 0 : i32
    %c0_i32_1 = arith.constant 0 : i32
    return %c0_i32, %c0_i32_0 : i32, i32
  }
  func.func @transform_21(%arg0: i32) -> (i32, i32) {
    %c0_i32 = arith.constant 0 : i32
    %c0_i32_0 = arith.constant 0 : i32
    %c0_i32_1 = arith.constant 0 : i32
    return %c0_i32, %c0_i32_0 : i32, i32
  }
  func.func @transform_22(%arg0: i32) -> (i32, i32) {
    %c0_i32 = arith.constant 0 : i32
    %c0_i32_0 = arith.constant 0 : i32
    %c0_i32_1 = arith.constant 0 : i32
    return %c0_i32, %c0_i32_0 : i32, i32
  }
  func.func @transform_23(%arg0: i32) -> (i32, i32) {
    %c0_i32 = arith.constant 0 : i32
    %c0_i32_0 = arith.constant 0 : i32
    return %c0_i32, %arg0 : i32, i32
  }
}

</mosaic_0001>

<bundles_post_ra>
// kernel: forward_fn.3
= control target key start
LH: loop header
LB: loop body
LE: loop exit
PB: predicated region body
PF: predicated region fallthrough
CT: control target
= control target key end

     0   :  { %vm1001_vm0 = vcmask 523264   ;;  %vm1368_vm1 = vcmask 130048   ;;  %s2589_s1 = inlined_call_operand.vmem [shape: bf16[1600,64], index: 1, kind: input, shape index: {}]   ;;  %s2590_s0 = inlined_call_operand.vmem [shape: bf16[32,1600], index: 0, kind: input, shape index: {}]   ;;  %s2591_s4 = inlined_call_operand.vmem [shape: f32[16,64], index: 4, kind: input, shape index: {}]   ;;  %s2592_s3 = inlined_call_operand.vmem [shape: f32[32,16], index: 3, kind: input, shape index: {}]   ;;  %s2593_s7 = inlined_call_operand.vmem [shape: f32[16,64], index: 7, kind: input, shape index: {}]   ;;  %s2594_s6 = inlined_call_operand.vmem [shape: f32[16,16], index: 6, kind: input, shape index: {}]   ;;  %s2595_s2 = inlined_call_operand.vmem [shape: f32[1,64], index: 2, kind: input, shape index: {}]   ;;  %s2596_s5 = inlined_call_operand.vmem [shape: f32[1,64], index: 5, kind: input, shape index: {}]   ;;  %s2597_s9 = inlined_call_operand.vmem [shape: f32[32,64], index: 9, kind: output, shape index: {0}]   ;;  %s2598_s10 = inlined_call_operand.vmem [shape: f32[32,64], index: 10, kind: output, shape index: {1}]   ;;  %s2599_s8 = inlined_call_operand.vmem [shape: f32[1,64], index: 8, kind: input, shape index: {}]   ;;  %s2600_s11 = inlined_call_operand.vmem [shape: f32[16,64], index: 11, kind: output, shape index: {2}]  }
   0x1   :  { %v1926_v0 = vld [vmem:[%s2589_s1 + $0x78] sm:$0xff]   ;;  %v1930_v4 = vld [vmem:[%s2589_s1 + $0x70] sm:$0xff]   ;;  %v1934_v8 = vld [vmem:[%s2589_s1 + $0x68] sm:$0xff]  }
   0x2   :  { %v1927_v1 = vld [vmem:[%s2589_s1 + $0xf8] sm:$0xff]   ;;  %1713 = vmatprep.subr.bf16.mxu0 %v1926_v0  ;;  %v1931_v5 = vld [vmem:[%s2589_s1 + $0xf0] sm:$0xff]   ;;  %v1935_v9 = vld [vmem:[%s2589_s1 + $0xe8] sm:$0xff]  }
   0x3   :  { %v1928_v2 = vld [vmem:[%s2589_s1 + $0x38] sm:$0xff]   ;;  %1741 = vmatprep.subr.bf16.mxu1 %v1927_v1  ;;  %v1932_v6 = vld [vmem:[%s2589_s1 + $0x30] sm:$0xff]   ;;  %v1936_v10 = vld [vmem:[%s2589_s1 + $0x28] sm:$0xff]  }
   0x4   :  { %v1929_v3 = vld [vmem:[%s2589_s1 + $0xb8] sm:$0xff]   ;;  %1714 = vmatpush3.bf16.msra.mxu0 %v1928_v2  ;;  %v1933_v7 = vld [vmem:[%s2589_s1 + $0xb0] sm:$0xff]   ;;  %v1937_v11 = vld [vmem:[%s2589_s1 + $0xa8] sm:$0xff]  }
   0x5   :  { %1742 = vmatpush3.bf16.msra.mxu1 %v1929_v3  ;;  %1715 = vmatprep.subr.bf16.mxu0 %v1930_v4  ;;  %v1938_v12 = vld [vmem:[%s2589_s1 + $0x60] sm:$0xff]   ;;  %v1942_v16 = vld [vmem:[%s2589_s1 + $0x58] sm:$0xff]   ;;  %v1946_v20 = vld [vmem:[%s2589_s1 + $0x50] sm:$0xff]  }
   0x6   :  { %1743 = vmatprep.subr.bf16.mxu1 %v1931_v5  ;;  %v1939_v13 = vld [vmem:[%s2589_s1 + $0xe0] sm:$0xff]   ;;  %v1943_v17 = vld [vmem:[%s2589_s1 + $0xd8] sm:$0xff]   ;;  %v1947_v21 = vld [vmem:[%s2589_s1 + $0xd0] sm:$0xff]  }
   0x7   :  { %v1940_v14 = vld [vmem:[%s2589_s1 + $0x20] sm:$0xff]   ;;  %v1944_v18 = vld [vmem:[%s2589_s1 + $0x18] sm:$0xff]   ;;  %v1948_v22 = vld [vmem:[%s2589_s1 + $0x10] sm:$0xff]  }
   0x8   :  { %1716 = vmatpush3.bf16.msra.mxu0 %v1932_v6  ;;  %v1941_v15 = vld [vmem:[%s2589_s1 + $0xa0] sm:$0xff]   ;;  %v1945_v19 = vld [vmem:[%s2589_s1 + $0x98] sm:$0xff]   ;;  %v1949_v23 = vld [vmem:[%s2589_s1 + $0x90] sm:$0xff]  }
   0x9   :  { %1744 = vmatpush3.bf16.msra.mxu1 %v1933_v7  ;;  %1717 = vmatprep.subr.bf16.mxu0 %v1934_v8  ;;  %v1950_v24 = vld [vmem:[%s2589_s1 + $0x48] sm:$0xff]   ;;  %v1954_v28 = vld [vmem:[%s2589_s1 + $0x40] sm:$0xff]   ;;  %v1964_v36 = vld [vmem:[%s2589_s1 + $0x178] sm:$0xff]  }
   0xa   :  { %1745 = vmatprep.subr.bf16.mxu1 %v1935_v9  ;;  %v1951_v25 = vld [vmem:[%s2589_s1 + $0xc8] sm:$0xff]   ;;  %v1955_v29 = vld [vmem:[%s2589_s1 + $0xc0] sm:$0xff]   ;;  %v1965_v37 = vld [vmem:[%s2589_s1 + $0x1f8] sm:$0xff]  }
   0xb   :  { %v1952_v26 = vld [vmem:[%s2589_s1 + $0x8] sm:$0xff]   ;;  %v1956_v30 = vld [vmem:[%s2589_s1] sm:$0xff]   ;;  %v1966_v38 = vld [vmem:[%s2589_s1 + $0x138] sm:$0xff]  }
   0xc   :  { %1718 = vmatpush3.bf16.msra.mxu0 %v1936_v10  ;;  %v1953_v27 = vld [vmem:[%s2589_s1 + $0x88] sm:$0xff]   ;;  %v1957_v31 = vld [vmem:[%s2589_s1 + $0x80] sm:$0xff]   ;;  %v1967_v39 = vld [vmem:[%s2589_s1 + $0x1b8] sm:$0xff]  }
   0xd   :  { %1746 = vmatpush3.bf16.msra.mxu1 %v1937_v11  ;;  %1719 = vmatprep.subr.bf16.mxu0 %v1938_v12  ;;  %v1958_v32 = vld [vmem:[%s2590_s0] ss:$52 sps:$4 sm:$0xff]   ;;  %v1960_v33 = vld [vmem:[%s2590_s0 + $0x4] ss:$52 sps:$4 sm:$0xff]   ;;  %v1961_v34 = vld [vmem:[%s2590_s0 + $0x8] ss:$52 sps:$4 sm:$0xff]  }
   0xe   :  { %1747 = vmatprep.subr.bf16.mxu1 %v1939_v13  ;;  %v1963_v35 = vld [vmem:[%s2590_s0 + $0xc] ss:$52 sps:$4 sm:$0xff]   ;;  %1040 = vmatprep.mubr.bf16.mxu0 %v1960_v33  ;;  %v1968_v40 = vld [vmem:[%s2589_s1 + $0x170] sm:$0xff]   ;;  %v1980_v52 = vld [vmem:[%s2589_s1 + $0x158] sm:$0xff]  }
   0xf   :  { %1089 = vmatprep.mubr.bf16.mxu1 %v1963_v35  ;;  %v1969_v41 = vld [vmem:[%s2589_s1 + $0x1f0] sm:$0xff]   ;;  %v1972_v44 = vld [vmem:[%s2589_s1 + $0x168] sm:$0xff]   ;;  %v1976_v48 = vld [vmem:[%s2589_s1 + $0x160] sm:$0xff]  }
  0x10   :  { %1720 = vmatpush3.bf16.msra.mxu0 %v1940_v14  ;;  %v1970_v42 = vld [vmem:[%s2589_s1 + $0x130] sm:$0xff]   ;;  %v1973_v45 = vld [vmem:[%s2589_s1 + $0x1e8] sm:$0xff]   ;;  %v1977_v49 = vld [vmem:[%s2589_s1 + $0x1e0] sm:$0xff]  }
  0x11   :  { %1748 = vmatpush3.bf16.msra.mxu1 %v1941_v15  ;;  %1721 = vmatprep.subr.bf16.mxu0 %v1942_v16  ;;  %v1971_v43 = vld [vmem:[%s2589_s1 + $0x1b0] sm:$0xff]   ;;  %v1974_v46 = vld [vmem:[%s2589_s1 + $0x128] sm:$0xff]   ;;  %v1978_v50 = vld [vmem:[%s2589_s1 + $0x120] sm:$0xff]  }
  0x12   :  { %1749 = vmatprep.subr.bf16.mxu1 %v1943_v17  ;;  %v1975_v47 = vld [vmem:[%s2589_s1 + $0x1a8] sm:$0xff]   ;;  %v1979_v51 = vld [vmem:[%s2589_s1 + $0x1a0] sm:$0xff]   ;;  %v1981_v53 = vld [vmem:[%s2589_s1 + $0x1d8] sm:$0xff]  }
  0x13   :  { %v1982_v54 = vld [vmem:[%s2589_s1 + $0x118] sm:$0xff]   ;;  %v1984_v56 = vld [vmem:[%s2590_s0 + $0x6c] ss:$52 sps:$4 sm:$0xff]   ;;  %v1987_v58 = vld [vmem:[%s2590_s0 + $0x74] ss:$52 sps:$4 sm:$0xff]  }
  0x14   :  { %1722 = vmatpush3.bf16.msra.mxu0 %v1944_v18  ;;  %v1983_v55 = vld [vmem:[%s2589_s1 + $0x198] sm:$0xff]   ;;  %v1989_v59 = vld [vmem:[%s2589_s1 + $0x150] sm:$0xff]   ;;  %v1994_v0 = vld [vmem:[%s2589_s1 + $0x148] sm:$0xff]  }
  0x15   :  { %1750 = vmatpush3.bf16.msra.mxu1 %v1945_v19  ;;  %1723 = vmatprep.subr.bf16.mxu0 %v1946_v20  ;;  %v1986_v57 = vld [vmem:[%s2590_s0 + $0x68] ss:$52 sps:$4 sm:$0xff]   ;;  %v1990_v60 = vld [vmem:[%s2589_s1 + $0x1d0] sm:$0xff]   ;;  %v1998_v4 = vld [vmem:[%s2589_s1 + $0x140] sm:$0xff]  }
  0x16   :  { %1751 = vmatprep.subr.bf16.mxu1 %v1947_v21  ;;  %v1991_v61 = vld [vmem:[%s2590_s0 + $0x70] ss:$52 sps:$4 sm:$0xff]   ;;  %v1995_v1 = vld [vmem:[%s2589_s1 + $0x1c8] sm:$0xff]   ;;  %v2008_v12 = vld [vmem:[%s2589_s1 + $0x278] sm:$0xff]  }
  0x17   :  { %v1992_v62 = vld [vmem:[%s2589_s1 + $0x110] sm:$0xff]   ;;  %v1996_v2 = vld [vmem:[%s2589_s1 + $0x108] sm:$0xff]   ;;  %v1999_v5 = vld [vmem:[%s2589_s1 + $0x1c0] sm:$0xff]  }
  0x18   :  { %1724 = vmatpush3.bf16.msra.mxu0 %v1948_v22  ;;  %v1993_v63 = vld [vmem:[%s2589_s1 + $0x190] sm:$0xff]   ;;  %v1997_v3 = vld [vmem:[%s2589_s1 + $0x188] sm:$0xff]   ;;  %v2000_v6 = vld [vmem:[%s2589_s1 + $0x100] sm:$0xff]  }
  0x19   :  { %1752 = vmatpush3.bf16.msra.mxu1 %v1949_v23  ;;  %1725 = vmatprep.subr.bf16.mxu0 %v1950_v24  ;;  %v2001_v7 = vld [vmem:[%s2589_s1 + $0x180] sm:$0xff]   ;;  %v2004_v9 = vld [vmem:[%s2590_s0 + $0x14] ss:$52 sps:$4 sm:$0xff]   ;;  %v2005_v10 = vld [vmem:[%s2590_s0 + $0x18] ss:$52 sps:$4 sm:$0xff]  }
  0x1a   :  { %1753 = vmatprep.subr.bf16.mxu1 %v1951_v25  ;;  %v2002_v8 = vld [vmem:[%s2590_s0 + $0x10] ss:$52 sps:$4 sm:$0xff]   ;;  %v2009_v13 = vld [vmem:[%s2589_s1 + $0x2f8] sm:$0xff]   ;;  %v2019_v22 = vld [vmem:[%s2589_s1 + $0x268] sm:$0xff]  }
  0x1b   :  { %v2007_v11 = vld [vmem:[%s2590_s0 + $0x1c] ss:$52 sps:$4 sm:$0xff]   ;;  %v2018_v21 = vld [vmem:[%s2590_s0 + $0x78] ss:$52 sps:$4 sm:$0xff]  }
  0x1c   :  { %1726 = vmatpush3.bf16.msra.mxu0 %v1952_v26  ;;  %v2010_v14 = vld [vmem:[%s2589_s1 + $0x238] sm:$0xff]   ;;  %v2012_v16 = vld [vmem:[%s2589_s1 + $0x270] sm:$0xff]   ;;  %v2020_v23 = vld [vmem:[%s2589_s1 + $0x2e8] sm:$0xff]  }
  0x1d   :  { %1754 = vmatpush3.bf16.msra.mxu1 %v1953_v27  ;;  %1727 = vmatprep.subr.bf16.mxu0 %v1954_v28  ;;  %v2011_v15 = vld [vmem:[%s2589_s1 + $0x2b8] sm:$0xff]   ;;  %v2013_v17 = vld [vmem:[%s2589_s1 + $0x2f0] sm:$0xff]   ;;  %v2023_v25 = vld [vmem:[%s2589_s1 + $0x228] sm:$0xff]  }
  0x1e   :  { %1755 = vmatprep.subr.bf16.mxu1 %v1955_v29  ;;  %v2014_v18 = vld [vmem:[%s2589_s1 + $0x230] sm:$0xff]   ;;  %v2021_v24 = vld [vmem:[%s2590_s0 + $0x84] ss:$52 sps:$4 sm:$0xff]   ;;  %v2024_v26 = vld [vmem:[%s2589_s1 + $0x2a8] sm:$0xff]  }
  0x1f   :  { %v2015_v19 = vld [vmem:[%s2589_s1 + $0x2b0] sm:$0xff]   ;;  %v2026_v28 = vld [vmem:[%s2589_s1 + $0x260] sm:$0xff]   ;;  %v2031_v33 = vld [vmem:[%s2589_s1 + $0x2d8] sm:$0xff]  }
  0x20   :  { %1728 = vmatpush3.bf16.msra.mxu0 %v1956_v30  ;;  %v2016_v20 = vld [vmem:[%s2590_s0 + $0x7c] ss:$52 sps:$4 sm:$0xff]   ;;  %v2025_v27 = vld [vmem:[%s2590_s0 + $0x80] ss:$52 sps:$4 sm:$0xff]  }
  0x21   :  { %1756 = vmatpush3.bf16.msra.mxu1 %v1957_v31  ;;  %1769 = vmatprep.subr.bf16.mxu0 %v1964_v36  ;;  %v2027_v29 = vld [vmem:[%s2589_s1 + $0x2e0] sm:$0xff]   ;;  %v2033_v35 = vld [vmem:[%s2589_s1 + $0x298] sm:$0xff]   ;;  %v2034_v36 = vld [vmem:[%s2589_s1 + $0x250] sm:$0xff]  }
  0x22   :  { %1797 = vmatprep.subr.bf16.mxu1 %v1965_v37  ;;  %v2028_v30 = vld [vmem:[%s2589_s1 + $0x220] sm:$0xff]   ;;  %v2035_v37 = vld [vmem:[%s2589_s1 + $0x2d0] sm:$0xff]  }
  0x23   :  { %1041 = vmatmul.mubr.bf16.vlgmr.msra.gmra.mxu0 %v1958_v32  ;;  %v2029_v31 = vld [vmem:[%s2589_s1 + $0x2a0] sm:$0xff]   ;;  %v2030_v32 = vld [vmem:[%s2589_s1 + $0x258] sm:$0xff]  }
  0x24   :  { %1090 = vmatmul.mubr.bf16.vlgmr.msra.gmra.mxu1 %v1961_v34  ;;  %1770 = vmatpush3.bf16.msra.mxu0 %v1966_v38  ;;  %v2032_v34 = vld [vmem:[%s2589_s1 + $0x218] sm:$0xff]   ;;  %v2036_v38 = vld [vmem:[%s2589_s1 + $0x210] sm:$0xff]  }
  0x25   :  { %1798 = vmatpush3.bf16.msra.mxu1 %v1967_v39  ;;  %1771 = vmatprep.subr.bf16.mxu0 %v1968_v40  ;;  %v2037_v39 = vld [vmem:[%s2589_s1 + $0x290] sm:$0xff]   ;;  %v2038_v40 = vld [vmem:[%s2589_s1 + $0x248] sm:$0xff]  }
  0x26   :  { %1799 = vmatprep.subr.bf16.mxu1 %v1969_v41  ;;  %1048 = vmatprep.mubr.bf16.mxu0 %v1984_v56  ;;  %v2039_v41 = vld [vmem:[%s2589_s1 + $0x2c8] sm:$0xff]  }
  0x27   :  { %1097 = vmatprep.mubr.bf16.mxu1 %v1987_v58  ;;  %v2056_v56 = vld [vmem:[%s2590_s0 + $0x94] ss:$52 sps:$4 sm:$0xff]  }
  0x28   :  { %1772 = vmatpush3.bf16.msra.mxu0 %v1970_v42  ;;  %v2040_v42 = vld [vmem:[%s2589_s1 + $0x208] sm:$0xff]  }
  0x29   :  { %1800 = vmatpush3.bf16.msra.mxu1 %v1971_v43  ;;  %1773 = vmatprep.subr.bf16.mxu0 %v1972_v44  ;;  %v2041_v43 = vld [vmem:[%s2589_s1 + $0x288] sm:$0xff]   ;;  %v2042_v44 = vld [vmem:[%s2589_s1 + $0x240] sm:$0xff]  }
  0x2a   :  { %1801 = vmatprep.subr.bf16.mxu1 %v1973_v45  ;;  %v2043_v45 = vld [vmem:[%s2589_s1 + $0x2c0] sm:$0xff]   ;;  %v2060_v58 = vld [vmem:[%s2589_s1 + $0x308] sm:$0xff]  }
  0x2b   :  { %1049 = vmatmul.mubr.bf16.gmra.mxu0 %v1986_v57  ;;  %v2058_v57 = vld [vmem:[%s2590_s0 + $0x88] ss:$52 sps:$4 sm:$0xff]  }
  0x2c   :  { %1774 = vmatpush3.bf16.msra.mxu0 %v1974_v46  ;;  %1098 = vmatmul.mubr.bf16.gmra.mxu1 %v1991_v61  ;;  %v2044_v46 = vld [vmem:[%s2589_s1 + $0x200] sm:$0xff]  }
  0x2d   :  { %1802 = vmatpush3.bf16.msra.mxu1 %v1975_v47  ;;  %1775 = vmatprep.subr.bf16.mxu0 %v1976_v48  ;;  %v2045_v47 = vld [vmem:[%s2589_s1 + $0x280] sm:$0xff]  }
  0x2e   :  { %1803 = vmatprep.subr.bf16.mxu1 %v1977_v49  ;;  %1138 = vmatprep.mubr.bf16.mxu0 %v2004_v9  ;;  %v2046_v48 = vld [vmem:[%s2590_s0 + $0x20] ss:$52 sps:$4 sm:$0xff]   ;;  %v2048_v49 = vld [vmem:[%s2590_s0 + $0x24] ss:$52 sps:$4 sm:$0xff]  }
  0x2f   :  { %1187 = vmatprep.mubr.bf16.mxu1 %v2007_v11  ;;  %v2062_v61 = vld [vmem:[%s2590_s0 + $0x30] ss:$52 sps:$4 sm:$0xff]  }
  0x30   :  { %1776 = vmatpush3.bf16.msra.mxu0 %v1978_v50  ;;  %v2049_v50 = vld [vmem:[%s2590_s0 + $0x28] ss:$52 sps:$4 sm:$0xff]  }
  0x31   :  { %1804 = vmatpush3.bf16.msra.mxu1 %v1979_v51  ;;  %1777 = vmatprep.subr.bf16.mxu0 %v1980_v52  ;;  %v2051_v51 = vld [vmem:[%s2590_s0 + $0x2c] ss:$52 sps:$4 sm:$0xff]   ;;  %v2052_v52 = vld [vmem:[%s2589_s1 + $0x318] sm:$0xff]  }
  0x32   :  { %1805 = vmatprep.subr.bf16.mxu1 %v1981_v53  ;;  %v2053_v53 = vld [vmem:[%s2589_s1 + $0x310] sm:$0xff]  }
  0x34   :  { %1778 = vmatpush3.bf16.msra.mxu0 %v1982_v54  ;;  %v1360_v54 = vld [vmem:[%s2591_s4 + $0x8] sm:$0xff] }
  0x35   :  { %1806 = vmatpush3.bf16.msra.mxu1 %v1983_v55  ;;  %1779 = vmatprep.subr.bf16.mxu0 %v1989_v59  ;;  %v2054_v55 = vld [vmem:[%s2590_s0 + $0x8c] ss:$52 sps:$4 sm:$0xff]   ;;  %v2059_v59 = vld [vmem:[%s2590_s0 + $0x90] ss:$52 sps:$4 sm:$0xff]  }
  0x36   :  { %1807 = vmatprep.subr.bf16.mxu1 %v1990_v60  ;;  %v1359_v60 = vld [vmem:[%s2591_s4] sm:$0xff] }
  0x38   :  { %1780 = vmatpush3.bf16.msra.mxu0 %v1992_v62  ;;  %v2061_v62 = vld [vmem:[%s2589_s1 + $0x300] sm:$0xff]  }
  0x39   :  { %1808 = vmatpush3.bf16.msra.mxu1 %v1993_v63  ;;  %1781 = vmatprep.subr.bf16.mxu0 %v1994_v0  ;;  %v1355_v63 = vld [vmem:[%s2592_s3] sm:$0xff]  ;;  %v1473_v0 = vld [vmem:[%s2593_s7 + $0x8] sm:$0xff] }
  0x3a   :  { %1809 = vmatprep.subr.bf16.mxu1 %v1995_v1  ;;  %v2063_v1 = vld [vmem:[%s2590_s0 + $0x98] ss:$52 sps:$4 sm:$0xff]  }
  0x3c   :  { %1782 = vmatpush3.bf16.msra.mxu0 %v1996_v2  ;;  %v1356_v2 = vld [vmem:[%s2592_s3 + $0x8] sm:$0xff] }
  0x3d   :  { %1810 = vmatpush3.bf16.msra.mxu1 %v1997_v3  ;;  %1783 = vmatprep.subr.bf16.mxu0 %v1998_v4  ;;  %v1357_v3 = vld [vmem:[%s2592_s3 + $0x10] sm:$0xff]  ;;  %v1472_v4 = vld [vmem:[%s2593_s7] sm:$0xff] }
  0x3e   :  { %1811 = vmatprep.subr.bf16.mxu1 %v1999_v5  ;;  %v1470_v5 = vld [vmem:[%s2594_s6] sm:$0xff] }
  0x40   :  { %1784 = vmatpush3.bf16.msra.mxu0 %v2000_v6  ;;  %v1358_v6 = vld [vmem:[%s2592_s3 + $0x18] sm:$0xff] }
  0x41   :  { %1812 = vmatpush3.bf16.msra.mxu1 %v2001_v7  ;;  %1825 = vmatprep.subr.bf16.mxu0 %v2008_v12  ;;  %v1471_v7 = vld [vmem:[%s2594_s6 + $0x8] sm:$0xff] }
  0x42   :  { %1853 = vmatprep.subr.bf16.mxu1 %v2009_v13 }
  0x43   :  { %1139 = vmatmul.mubr.bf16.vlgmr.msra.gmra.mxu0 %v2002_v8 }
  0x44   :  { %1188 = vmatmul.mubr.bf16.vlgmr.msra.gmra.mxu1 %v2005_v10  ;;  %1826 = vmatpush3.bf16.msra.mxu0 %v2010_v14 }
  0x45   :  { %1854 = vmatpush3.bf16.msra.mxu1 %v2011_v15  ;;  %1827 = vmatprep.subr.bf16.mxu0 %v2012_v16 }
  0x46   :  { %1855 = vmatprep.subr.bf16.mxu1 %v2013_v17  ;;  %1146 = vmatprep.mubr.bf16.mxu0 %v2016_v20 }
  0x47   :  { %1195 = vmatprep.mubr.bf16.mxu1 %v2021_v24 }
  0x48   :  { %1828 = vmatpush3.bf16.msra.mxu0 %v2014_v18 }
  0x49   :  { %1856 = vmatpush3.bf16.msra.mxu1 %v2015_v19  ;;  %1829 = vmatprep.subr.bf16.mxu0 %v2019_v22 }
  0x4a   :  { %1857 = vmatprep.subr.bf16.mxu1 %v2020_v23 }
  0x4b   :  { %1147 = vmatmul.mubr.bf16.gmra.mxu0 %v2018_v21 }
  0x4c   :  { %1830 = vmatpush3.bf16.msra.mxu0 %v2023_v25  ;;  %1196 = vmatmul.mubr.bf16.gmra.mxu1 %v2025_v27 }
  0x4d   :  { %1858 = vmatpush3.bf16.msra.mxu1 %v2024_v26  ;;  %1831 = vmatprep.subr.bf16.mxu0 %v2026_v28 }
  0x4e   :  { %1859 = vmatprep.subr.bf16.mxu1 %v2027_v29  ;;  %1236 = vmatprep.mubr.bf16.mxu0 %v2048_v49 }
  0x4f   :  { %1285 = vmatprep.mubr.bf16.mxu1 %v2051_v51 }
  0x50   :  { %1832 = vmatpush3.bf16.msra.mxu0 %v2028_v30 }
  0x51   :  { %1860 = vmatpush3.bf16.msra.mxu1 %v2029_v31  ;;  %1833 = vmatprep.subr.bf16.mxu0 %v2030_v32 }
  0x52   :  { %1861 = vmatprep.subr.bf16.mxu1 %v2031_v33 }
  0x54   :  { %1834 = vmatpush3.bf16.msra.mxu0 %v2032_v34 }
  0x55   :  { %1862 = vmatpush3.bf16.msra.mxu1 %v2033_v35  ;;  %1835 = vmatprep.subr.bf16.mxu0 %v2034_v36 }
  0x56   :  { %1863 = vmatprep.subr.bf16.mxu1 %v2035_v37 }
  0x58   :  { %1836 = vmatpush3.bf16.msra.mxu0 %v2036_v38 }
  0x59   :  { %1864 = vmatpush3.bf16.msra.mxu1 %v2037_v39  ;;  %1837 = vmatprep.subr.bf16.mxu0 %v2038_v40 }
  0x5a   :  { %1865 = vmatprep.subr.bf16.mxu1 %v2039_v41  ;;  %v1576_v41 = vld [vmem:[%s2595_s2] ss:$0 sm:$0xff] }
  0x5c   :  { %1838 = vmatpush3.bf16.msra.mxu0 %v2040_v42 }
  0x5d   :  { %1866 = vmatpush3.bf16.msra.mxu1 %v2041_v43  ;;  %1839 = vmatprep.subr.bf16.mxu0 %v2042_v44 }
  0x5e   :  { %1867 = vmatprep.subr.bf16.mxu1 %v2043_v45 }
  0x60   :  { %1840 = vmatpush3.bf16.msra.mxu0 %v2044_v46 }
  0x61   :  { %1868 = vmatpush3.bf16.msra.mxu1 %v2045_v47  ;;  %1897 = vmatprep.subr.bf16.mxu0 %v2052_v52 }
  0x62   :  { %1909 = vmatprep.subr.mxu1 %v1360_v54 }
  0x63   :  { %1237 = vmatmul.mubr.bf16.vlgmr.msra.gmra.mxu0 %v2046_v48 }
  0x64   :  { %1286 = vmatmul.mubr.bf16.vlgmr.msra.gmra.mxu1 %v2049_v50  ;;  %1898 = vmatpush3.bf16.msra.mxu0 %v2052_v52 }
  0x65   :  { %1899 = vmatprep.subr.bf16.mxu0 %v2053_v53  ;;  %1910 = vmatpush3.msra.mxu1 %v1360_v54 }
  0x66   :  { %1244 = vmatprep.mubr.bf16.mxu0 %v2054_v55  ;;  %1293 = vmatprep.mubr.bf16.mxu1 %v2056_v56 }
  0x67   :  { %1911 = vmatprep.subr.mxu1 %v1359_v60 }
  0x68   :  { %1900 = vmatpush3.bf16.msra.mxu0 %v2053_v53  ;;  %1912 = vmatpush3.msra.mxu1 %v1359_v60 }
  0x69   :  { %1901 = vmatprep.subr.bf16.mxu0 %v2060_v58 }
  0x6b   :  { %1245 = vmatmul.mubr.bf16.gmra.mxu0 %v2058_v57 }
  0x6c   :  { %1905 = vmatprep.mubr.msk.bf16.mxu0 %vm1001_vm0, %v2062_v61  ;;  %1294 = vmatmul.mubr.bf16.gmra.mxu1 %v2059_v59 }
  0x6d   :  { %1902 = vmatpush3.bf16.msra.mxu0 %v2060_v58  ;;  %1913 = vmatprep.mubr.msk.f32.mxu1 %vm1368_vm1, %v1355_v63 }
  0x6e   :  { %1903 = vmatprep.subr.bf16.mxu0 %v2061_v62 }
  0x71   :  { %1904 = vmatpush3.bf16.msra.mxu0 %v2061_v62 }
  0x72   :  { %1919 = vmatprep.subr.mxu0 %v1473_v0 }
  0x74   :  { %1906 = vmatmul.mubr.msk.bf16.vlgmr.msra.gmra.mxu0 %vm1001_vm0, %v2063_v1  ;;  %1914 = vmatmul.mubr.msk.f32.vlgmr.msra.gmra.mxu1 %vm1368_vm1, %v1356_v2 }
  0x75   :  { %1920 = vmatpush3.msra.mxu0 %v1473_v0  ;;  %1916 = vmatprep.mubr.msk.f32.mxu1 %vm1368_vm1, %v1357_v3 }
  0x76   :  { %1921 = vmatprep.subr.mxu0 %v1472_v4  ;;  %1923 = vmatprep.mubr.msk.f32.mxu0 %vm1368_vm1, %v1470_v5 }
  0x77   :  { %1922 = vmatpush3.msra.mxu0 %v1472_v4 }
  0x78   :  { %1917 = vmatmul.mubr.msk.f32.gmra.mxu1 %vm1368_vm1, %v1358_v6 }
  0x7c   :  { %1924 = vmatmul.mubr.msk.f32.vlgmr.msra.gmra.mxu0 %vm1368_vm1, %v1471_v7 }
  0xe3   :  { %v1729_v8 = vpop.f32.mrf.mxu0 }
  0xe4   :  { %v1757_v9 = vpop.f32.mrf.mxu1 }
  0xe5   :  { %v1730_v10 = vpop.f32.mrf.mxu0 }
  0xe6   :  { %v1758_v11 = vpop.f32.mrf.mxu1  ;;  %v1731_v39 = vadd.f32 %v1730_v10, %v1729_v8 }
  0xe7   :  { %v1732_v12 = vpop.f32.mrf.mxu0  ;;  %v1759_v48 = vadd.f32 %v1758_v11, %v1757_v9 }
  0xe8   :  { %v1760_v13 = vpop.f32.mrf.mxu1  ;;  %v1043_v47 = vadd.f32 %v1731_v39, %v1576_v41 }
  0xe9   :  { %v1733_v14 = vpop.f32.mrf.mxu0 }
  0xea   :  { %v1761_v16 = vpop.f32.mrf.mxu1  ;;  %v1734_v49 = vadd.f32 %v1733_v14, %v1732_v12  ;;  %v1092_v59 = vadd.f32 %v1759_v48, %v1043_v47 }
  0xeb   :  { %v1735_v15 = vpop.f32.mrf.mxu0  ;;  %v1762_v2 = vadd.f32 %v1761_v16, %v1760_v13 }
  0xec   :  { %v1763_v18 = vpop.f32.mrf.mxu1  ;;  %v1046_v60 = vadd.f32 %v1734_v49, %v1576_v41 }
  0xed   :  { %v1736_v17 = vpop.f32.mrf.mxu0 }
  0xee   :  { %v1764_v20 = vpop.f32.mrf.mxu1  ;;  %v1737_v38 = vadd.f32 %v1736_v17, %v1735_v15  ;;  %v1095_v9 = vadd.f32 %v1762_v2, %v1046_v60 }
  0xef   :  { %v1738_v19 = vpop.f32.mrf.mxu0  ;;  %v1765_v45 = vadd.f32 %v1764_v20, %v1763_v18 }
  0xf0   :  { %v1766_v22 = vpop.f32.mrf.mxu1  ;;  %v1051_v44 = vadd.f32 %v1737_v38, %v1576_v41 }
  0xf1   :  { %v1739_v21 = vpop.f32.mrf.mxu0 }
  0xf2   :  { %v1767_v24 = vpop.f32.mrf.mxu1  ;;  %v1740_v46 = vadd.f32 %v1739_v21, %v1738_v19  ;;  %v1100_v56 = vadd.f32 %v1765_v45, %v1051_v44 }
  0xf3   :  { %v1768_v58 = vadd.f32 %v1767_v24, %v1766_v22 }
  0xf4   :  { %v1054_v57 = vadd.f32 %v1740_v46, %v1576_v41 }
  0xf6   :  { %v1103_v7 = vadd.f32 %v1768_v58, %v1054_v57 }
 0x103   :  { %v1785_v23 = vpop.f32.mrf.mxu0 }
 0x104   :  { %v1813_v25 = vpop.f32.mrf.mxu1 }
 0x105   :  { %v1786_v26 = vpop.f32.mrf.mxu0 }
 0x106   :  { %v1814_v27 = vpop.f32.mrf.mxu1  ;;  %v1787_v53 = vadd.f32 %v1786_v26, %v1785_v23 }
 0x107   :  { %v1788_v28 = vpop.f32.mrf.mxu0  ;;  %v1815_v4 = vadd.f32 %v1814_v27, %v1813_v25 }
 0x108   :  { %v1816_v29 = vpop.f32.mrf.mxu1  ;;  %v1141_v3 = vadd.f32 %v1787_v53, %v1092_v59 }
 0x109   :  { %v1789_v30 = vpop.f32.mrf.mxu0 }
 0x10a   :  { %v1817_v31 = vpop.f32.mrf.mxu1  ;;  %v1790_v8 = vadd.f32 %v1789_v30, %v1788_v28  ;;  %v1190_v19 = vadd.f32 %v1815_v4, %v1141_v3 }
 0x10b   :  { %v1791_v32 = vpop.f32.mrf.mxu0  ;;  %v1818_v16 = vadd.f32 %v1817_v31, %v1816_v29 }
 0x10c   :  { %v1819_v33 = vpop.f32.mrf.mxu1  ;;  %v1144_v22 = vadd.f32 %v1790_v8, %v1095_v9 }
 0x10d   :  { %v1792_v34 = vpop.f32.mrf.mxu0 }
 0x10e   :  { %v1820_v35 = vpop.f32.mrf.mxu1  ;;  %v1793_v52 = vadd.f32 %v1792_v34, %v1791_v32 }
 0x10f   :  { %v1794_v36 = vpop.f32.mrf.mxu0  ;;  %v1821_v0 = vadd.f32 %v1820_v35, %v1819_v33  ;;  %v1705_v35 = vld [vmem:[%s2596_s5] ss:$0 sm:$0xff] }
 0x110   :  { %v1822_v37 = vpop.f32.mrf.mxu1  ;;  %v1149_v63 = vadd.f32 %v1793_v52, %v1100_v56 }
 0x111   :  { %v1795_v40 = vpop.f32.mrf.mxu0 }
 0x112   :  { %v1823_v42 = vpop.f32.mrf.mxu1  ;;  %v1796_v1 = vadd.f32 %v1795_v40, %v1794_v36  ;;  %v1198_v14 = vadd.f32 %v1821_v0, %v1149_v63  ;;  %v1193_v36 = vadd.f32 %v1818_v16, %v1144_v22 }
 0x113   :  { %v1824_v17 = vadd.f32 %v1823_v42, %v1822_v37 }
 0x114   :  { %v1152_v15 = vadd.f32 %v1796_v1, %v1103_v7 }
 0x116   :  { %v1201_v28 = vadd.f32 %v1824_v17, %v1152_v15 }
 0x123   :  { %v1841_v43 = vpop.f32.mrf.mxu0 }
 0x124   :  { %v1869_v50 = vpop.f32.mrf.mxu1 }
 0x125   :  { %v1842_v51 = vpop.f32.mrf.mxu0 }
 0x126   :  { %v1870_v54 = vpop.f32.mrf.mxu1  ;;  %v1843_v10 = vadd.f32 %v1842_v51, %v1841_v43 }
 0x127   :  { %v1844_v55 = vpop.f32.mrf.mxu0  ;;  %v1871_v25 = vadd.f32 %v1870_v54, %v1869_v50 }
 0x128   :  { %v1872_v61 = vpop.f32.mrf.mxu1  ;;  %v1239_v24 = vadd.f32 %v1843_v10, %v1190_v19 }
 0x129   :  { %v1845_v62 = vpop.f32.mrf.mxu0 }
 0x12a   :  { %v1873_v5 = vpop.f32.mrf.mxu1  ;;  %v1846_v30 = vadd.f32 %v1845_v62, %v1844_v55  ;;  %v1288_v40 = vadd.f32 %v1871_v25, %v1239_v24  ;;  %v1710_v55 = vld [vmem:[%s2599_s8] ss:$0 sm:$0xff] }
 0x12b   :  { %v1847_v6 = vpop.f32.mrf.mxu0  ;;  %v1874_v46 = vadd.f32 %v1873_v5, %v1872_v61 }
 0x12c   :  { %v1875_v11 = vpop.f32.mrf.mxu1  ;;  %v1242_v29 = vadd.f32 %v1846_v30, %v1193_v36 }
 0x12d   :  { %v1848_v12 = vpop.f32.mrf.mxu0 }
 0x12e   :  { %v1849_v18 = vadd.f32 %v1848_v12, %v1847_v6  ;;  %v1876_v20 = vpop.f32.mrf.mxu1  ;;  %v1291_v52 = vadd.f32 %v1874_v46, %v1242_v29 }
 0x12f   :  { %v1850_v21 = vpop.f32.mrf.mxu0  ;;  %v1877_v13 = vadd.f32 %v1876_v20, %v1875_v11 }
 0x130   :  { %v1247_v23 = vadd.f32 %v1849_v18, %v1198_v14  ;;  %v1878_v26 = vpop.f32.mrf.mxu1 }
 0x131   :  { %v1851_v27 = vpop.f32.mrf.mxu0 }
 0x132   :  { %v1852_v32 = vadd.f32 %v1851_v27, %v1850_v21  ;;  %v1296_v33 = vadd.f32 %v1877_v13, %v1247_v23  ;;  %v1879_v34 = vpop.f32.mrf.mxu1 }
 0x133   :  { %v1880_v38 = vadd.f32 %v1879_v34, %v1878_v26 }
 0x134   :  { %v1250_v37 = vadd.f32 %v1852_v32, %v1201_v28  ;;  %v1907_v39 = vpop.f32.mrf.mxu0  ;;  %v1915_v41 = vpop.f32.mrf.mxu1 }
 0x135   :  { %v1345_v31 = vadd.f32 %v1907_v39, %v1296_v33  ;;  %v1453_v42 = vadd.f32 %v1915_v41, %v1705_v35 }
 0x136   :  { %v1299_v43 = vadd.f32 %v1880_v38, %v1250_v37  ;;  %v1336_v44 = vpop.f32.mrf.mxu0  ;;  %v1447_v45 = vpop.f32.mrf.mxu1 }
 0x137   :  { %1353 = vst.msk [vmem:[%s2597_s9 + $0x10] sm:$0xff] %vm1001_vm0, %v1345_v31  ;;  %v1337_v47 = vadd.f32 %v1336_v44, %v1288_v40  ;;  %1467 = vst.msk [vmem:[%s2598_s10 + $0x8] sm:$0xff] %vm1001_vm0, %v1453_v42  ;;  %v1448_v48 = vadd.f32 %v1705_v35, %v1447_v45 }
 0x138   :  { %v1908_v49 = vpop.f32.mrf.mxu0  ;;  %v1918_v50 = vpop.f32.mrf.mxu1 }
 0x139   :  { %1351 = vst.msk [vmem:[%s2597_s9] sm:$0xff] %vm1001_vm0, %v1337_v47  ;;  %v1348_v51 = vadd.f32 %v1908_v49, %v1299_v43  ;;  %1466 = vst.msk [vmem:[%s2598_s10] sm:$0xff] %vm1001_vm0, %v1448_v48  ;;  %v1463_v53 = vadd.f32 %v1918_v50, %v1705_v35 }
 0x13a   :  { %v1339_v54 = vpop.f32.mrf.mxu0  ;;  %v1457_v56 = vpop.f32.mrf.mxu1 }
 0x13b   :  { %1354 = vst.msk [vmem:[%s2597_s9 + $0x18] sm:$0xff] %vm1001_vm0, %v1348_v51  ;;  %v1340_v57 = vadd.f32 %v1339_v54, %v1291_v52  ;;  %1469 = vst.msk [vmem:[%s2598_s10 + $0x18] sm:$0xff] %vm1001_vm0, %v1463_v53  ;;  %v1458_v58 = vadd.f32 %v1705_v35, %v1457_v56 }
 0x13c   :  { %v1925_v59 = vpop.f32.mrf.mxu0 }
 0x13d   :  { %1352 = vst.msk [vmem:[%s2597_s9 + $0x8] sm:$0xff] %vm1001_vm0, %v1340_v57  ;;  %v1559_v60 = vadd.f32 %v1925_v59, %v1710_v55  ;;  %1468 = vst.msk [vmem:[%s2598_s10 + $0x10] sm:$0xff] %vm1001_vm0, %v1458_v58 }
 0x13e   :  { %v1553_v61 = vpop.f32.mrf.mxu0 }
 0x13f   :  { %1563 = vst.msk [vmem:[%s2600_s11 + $0x8] sm:$0xff] %vm1001_vm0, %v1559_v60  ;;  %v1554_v62 = vadd.f32 %v1710_v55, %v1553_v61 }
 0x141   :  { %1562 = vst.msk [vmem:[%s2600_s11] sm:$0xff] %vm1001_vm0, %v1554_v62 }

// kernel: forward_fn.4
= control target key start
LH: loop header
LB: loop body
LE: loop exit
PB: predicated region body
PF: predicated region fallthrough
CT: control target
= control target key end

     0   :  { %vm42_vm0 = vcmask 523264   ;;  %s5377_s22 = smov 64   ;;  %s5378_s23 = smov 32   ;;  %vm5380_vm1 = vmmov 0   ;;  %vm569_vm2 = vcmask 261120   ;;  %vm712_vm3 = vcmask 1043456   ;;  %s7559_s0 = inlined_call_operand.vmem [shape: f32[80,64], index: 0, kind: input, shape index: {}]   ;;  %s7560_s2 = inlined_call_operand.vmem [shape: f32[4,64], index: 2, kind: input, shape index: {}]   ;;  %s7561_s1 = inlined_call_operand.vmem [shape: f32[80,64], index: 1, kind: input, shape index: {}]   ;;  %s7562_s3 = inlined_call_operand.vmem [shape: bf16[2,64,192], index: 3, kind: input, shape index: {}]   ;;  %s7563_s7 = inlined_call_operand.vmem [shape: f32[2,8,192], index: 7, kind: input, shape index: {}]   ;;  %s7564_s4 = inlined_call_operand.vmem [shape: bf16[2,64,64], index: 4, kind: input, shape index: {}]   ;;  %s7565_s5 = inlined_call_operand.vmem [shape: bf16[2,64,128], index: 5, kind: input, shape index: {}]   ;;  %s7566_s6 = inlined_call_operand.vmem [shape: bf16[2,128,64], index: 6, kind: input, shape index: {}]   ;;  %s7567_s8 = inlined_call_operand.vmem [shape: f32[80,64], index: 8, kind: output, shape index: {}]  }
   0x1   :  { %v30_v0 = vld [vmem:[%s7559_s0] sm:$0xff]  ;;  %v32_v1 = vld [vmem:[%s7559_s0 + $0x10] sm:$0xff]  ;;  %v31_v2 = vld [vmem:[%s7559_s0 + $0x8] sm:$0xff]  ;;  %s5379_s24 = smov 96   ;;  %vm654_vm5 = vcmask 326656  }
   0x2   :  { %v43_v3 = vsel %vm42_vm0, %v30_v0, 0.0  ;;  %v49_v4 = vsel %vm42_vm0, %v32_v1, 0.0  ;;  %v33_v5 = vld [vmem:[%s7559_s0 + $0x18] sm:$0xff]  ;;  %v46_v6 = vsel %vm42_vm0, %v31_v2, 0.0  ;;  %v34_v8 = vld [vmem:[%s7559_s0 + $0x20] sm:$0xff]  ;;  %v35_v9 = vld [vmem:[%s7559_s0 + $0x28] sm:$0xff] }
   0x3   :  { %44 = vadd.xlane.f32.xlu0 %v43_v3  ;;  %50 = vadd.xlane.f32.xlu1 %v49_v4  ;;  %v52_v7 = vsel %vm42_vm0, %v33_v5, 0.0  ;;  %v55_v10 = vsel %vm42_vm0, %v34_v8, 0.0  ;;  %v58_v11 = vsel %vm42_vm0, %v35_v9, 0.0  ;;  %v36_v12 = vld [vmem:[%s7559_s0 + $0x30] sm:$0xff]  ;;  %v37_v13 = vld [vmem:[%s7559_s0 + $0x38] sm:$0xff]  ;;  %v38_v16 = vld [vmem:[%s7559_s0 + $0x40] sm:$0xff] }
   0x4   :  { %v61_v14 = vsel %vm42_vm0, %v36_v12, 0.0  ;;  %v64_v15 = vsel %vm42_vm0, %v37_v13, 0.0  ;;  %v39_v17 = vld [vmem:[%s7559_s0 + $0x48] sm:$0xff]  ;;  %v67_v18 = vsel %vm42_vm0, %v38_v16, 0.0 }
   0x5   :  { %v70_v19 = vsel %vm42_vm0, %v39_v17, 0.0 }
   0x7   :  { %47 = vadd.xlane.f32.xlu0 %v46_v6  ;;  %53 = vadd.xlane.f32.xlu1 %v52_v7 }
   0xb   :  { %56 = vadd.xlane.f32.xlu0 %v55_v10  ;;  %59 = vadd.xlane.f32.xlu1 %v58_v11 }
   0xf   :  { %62 = vadd.xlane.f32.xlu0 %v61_v14  ;;  %65 = vadd.xlane.f32.xlu1 %v64_v15 }
  0x13   :  { %68 = vadd.xlane.f32.xlu0 %v67_v18  ;;  %71 = vadd.xlane.f32.xlu1 %v70_v19 }
  0x8c   :  { %v45_v20 = vpop.xlane.xlu0 %44  ;;  %v51_v21 = vpop.xlane.xlu1 %50 }
  0x8d   :  { %v74_v22 = vmul.f32 0.015625, %v45_v20  ;;  %v76_v23 = vmul.f32 0.015625, %v51_v21 }
  0x8f   :  { %v5466_v24 = vsub.f32 %v30_v0, %v74_v22  ;;  %v5468_v25 = vsub.f32 %v32_v1, %v76_v23 }
  0x90   :  { %v48_v26 = vpop.xlane.xlu0 %47  ;;  %v54_v27 = vpop.xlane.xlu1 %53 }
  0x91   :  { %v75_v28 = vmul.f32 0.015625, %v48_v26  ;;  %v77_v29 = vmul.f32 0.015625, %v54_v27  ;;  %v94_v30 = vmul.f32 %v5466_v24, %v5466_v24  ;;  %v96_v31 = vmul.f32 %v5468_v25, %v5468_v25 }
  0x93   :  { %v5474_v32 = vsub.f32 %v31_v2, %v75_v28  ;;  %v5476_v33 = vsub.f32 %v33_v5, %v77_v29  ;;  %v104_v34 = vsel %vm42_vm0, %v94_v30, 0.0  ;;  %v110_v37 = vsel %vm42_vm0, %v96_v31, 0.0 }
  0x94   :  { %105 = vadd.xlane.f32.xlu0 %v104_v34  ;;  %v57_v35 = vpop.xlane.xlu0 %56  ;;  %v60_v36 = vpop.xlane.xlu1 %59 }
  0x95   :  { %v78_v38 = vmul.f32 0.015625, %v57_v35  ;;  %v79_v39 = vmul.f32 0.015625, %v60_v36  ;;  %v95_v40 = vmul.f32 %v5474_v32, %v5474_v32  ;;  %v97_v41 = vmul.f32 %v5476_v33, %v5476_v33  ;;  %v5519_v36 = vld [vmem:[%s7560_s2] ss:$0 sm:$0xff] }
  0x97   :  { %v5484_v42 = vsub.f32 %v34_v8, %v78_v38  ;;  %v5486_v43 = vsub.f32 %v35_v9, %v79_v39  ;;  %v107_v44 = vsel %vm42_vm0, %v95_v40, 0.0  ;;  %v113_v47 = vsel %vm42_vm0, %v97_v41, 0.0  ;;  %v5525_v41 = vld [vmem:[%s7560_s2 + $0x1] ss:$0 sm:$0xff] }
  0x98   :  { %111 = vadd.xlane.f32.xlu0 %v110_v37  ;;  %108 = vadd.xlane.f32.xlu1 %v107_v44  ;;  %v63_v45 = vpop.xlane.xlu0 %62  ;;  %v66_v46 = vpop.xlane.xlu1 %65 }
  0x99   :  { %v80_v48 = vmul.f32 0.015625, %v63_v45  ;;  %v81_v49 = vmul.f32 0.015625, %v66_v46  ;;  %v98_v50 = vmul.f32 %v5484_v42, %v5484_v42  ;;  %v99_v51 = vmul.f32 %v5486_v43, %v5486_v43 }
  0x9b   :  { %v5494_v52 = vsub.f32 %v36_v12, %v80_v48  ;;  %v5496_v53 = vsub.f32 %v37_v13, %v81_v49  ;;  %v116_v54 = vsel %vm42_vm0, %v98_v50, 0.0  ;;  %v119_v57 = vsel %vm42_vm0, %v99_v51, 0.0 }
  0x9c   :  { %114 = vadd.xlane.f32.xlu1 %v113_v47  ;;  %117 = vadd.xlane.f32.xlu0 %v116_v54  ;;  %v69_v55 = vpop.xlane.xlu0 %68  ;;  %v72_v56 = vpop.xlane.xlu1 %71  ;;  %v202_v47 = vld [vmem:[%s7561_s1] sm:$0xff] }
  0x9d   :  { %v82_v58 = vmul.f32 0.015625, %v69_v55  ;;  %v83_v59 = vmul.f32 0.015625, %v72_v56  ;;  %v100_v60 = vmul.f32 %v5494_v52, %v5494_v52  ;;  %v101_v61 = vmul.f32 %v5496_v53, %v5496_v53 }
  0x9f   :  { %v5504_v62 = vsub.f32 %v38_v16, %v82_v58  ;;  %v5506_v63 = vsub.f32 %v39_v17, %v83_v59  ;;  %v122_v0 = vsel %vm42_vm0, %v100_v60, 0.0  ;;  %v125_v1 = vsel %vm42_vm0, %v101_v61, 0.0 }
  0xa0   :  { %120 = vadd.xlane.f32.xlu1 %v119_v57  ;;  %123 = vadd.xlane.f32.xlu0 %v122_v0  ;;  %v203_v57 = vld [vmem:[%s7561_s1 + $0x8] sm:$0xff] }
  0xa1   :  { %v102_v2 = vmul.f32 %v5504_v62, %v5504_v62  ;;  %v103_v3 = vmul.f32 %v5506_v63, %v5506_v63 }
  0xa3   :  { %v128_v4 = vsel %vm42_vm0, %v102_v2, 0.0  ;;  %v131_v5 = vsel %vm42_vm0, %v103_v3, 0.0 }
  0xa4   :  { %126 = vadd.xlane.f32.xlu1 %v125_v1  ;;  %129 = vadd.xlane.f32.xlu0 %v128_v4 }
  0xa8   :  { %132 = vadd.xlane.f32.xlu1 %v131_v5 }
 0x11d   :  { %v106_v6 = vpop.xlane.xlu0 %105 }
 0x11e   :  { %v134_v7 = vmul.f32 0.015625, %v106_v6  ;;  %v205_v6 = vld [vmem:[%s7561_s1 + $0x18] sm:$0xff] }
 0x120   :  { %v144_v8 = vadd.f32 1e-05, %v134_v7 }
 0x121   :  { %v109_v9 = vpop.xlane.xlu1 %108  ;;  %v112_v10 = vpop.xlane.xlu0 %111 }
 0x122   :  { %5093 = vrsqrt.f32 %v144_v8  ;;  %v135_v11 = vmul.f32 0.015625, %v109_v9  ;;  %v136_v12 = vmul.f32 0.015625, %v112_v10 }
 0x124   :  { %v145_v13 = vadd.f32 1e-05, %v135_v11  ;;  %v146_v14 = vadd.f32 1e-05, %v136_v12 }
 0x125   :  { %v115_v15 = vpop.xlane.xlu1 %114  ;;  %v118_v16 = vpop.xlane.xlu0 %117 }
 0x126   :  { %5095 = vrsqrt.f32 %v145_v13  ;;  %v137_v17 = vmul.f32 0.015625, %v115_v15  ;;  %v138_v18 = vmul.f32 0.015625, %v118_v16 }
 0x127   :  { %5097 = vrsqrt.f32 %v146_v14 }
 0x128   :  { %v147_v19 = vadd.f32 1e-05, %v137_v17  ;;  %v148_v20 = vadd.f32 1e-05, %v138_v18 }
 0x129   :  { %v121_v21 = vpop.xlane.xlu1 %120  ;;  %v124_v22 = vpop.xlane.xlu0 %123 }
 0x12a   :  { %5099 = vrsqrt.f32 %v147_v19  ;;  %v139_v23 = vmul.f32 0.015625, %v121_v21  ;;  %v140_v26 = vmul.f32 0.015625, %v124_v22  ;;  %v208_v21 = vld [vmem:[%s7561_s1 + $0x30] sm:$0xff] }
 0x12b   :  { %5101 = vrsqrt.f32 %v148_v20 }
 0x12c   :  { %v149_v27 = vadd.f32 1e-05, %v139_v23  ;;  %v150_v28 = vadd.f32 1e-05, %v140_v26 }
 0x12d   :  { %v127_v29 = vpop.xlane.xlu1 %126  ;;  %v130_v30 = vpop.xlane.xlu0 %129 }
 0x12e   :  { %5103 = vrsqrt.f32 %v149_v27  ;;  %v141_v31 = vmul.f32 0.015625, %v127_v29  ;;  %v142_v34 = vmul.f32 0.015625, %v130_v30 }
 0x12f   :  { %v5094_v35 = vpop.eup %5093  ;;  %5105 = vrsqrt.f32 %v150_v28 }
 0x130   :  { %v151_v37 = vadd.f32 1e-05, %v141_v31  ;;  %v152_v38 = vadd.f32 1e-05, %v142_v34  ;;  %v164_v39 = vmul.f32 %v5094_v35, %v5466_v24 }
 0x131   :  { %v133_v40 = vpop.xlane.xlu1 %132 }
 0x132   :  { %5107 = vrsqrt.f32 %v151_v37  ;;  %v143_v44 = vmul.f32 0.015625, %v133_v40  ;;  %v178_v45 = vmul.f32 %v5519_v36, %v164_v39 }
 0x133   :  { %v5096_v46 = vpop.eup %5095  ;;  %5109 = vrsqrt.f32 %v152_v38 }
 0x134   :  { %v5098_v48 = vpop.eup %5097  ;;  %v153_v49 = vadd.f32 1e-05, %v143_v44  ;;  %v192_v24 = vadd.f32 %v5525_v41, %v178_v45  ;;  %v165_v50 = vmul.f32 %v5096_v46, %v5474_v32 }
 0x135   :  { %v166_v51 = vmul.f32 %v5098_v48, %v5468_v25  ;;  %v204_v25 = vld [vmem:[%s7561_s1 + $0x10] sm:$0xff] }
 0x136   :  { %5111 = vrsqrt.f32 %v153_v49  ;;  %v5534_v54 = vadd.f32 %v202_v47, %v192_v24  ;;  %v179_v55 = vmul.f32 %v5519_v36, %v165_v50  ;;  %v211_v47 = vld [vmem:[%s7561_s1 + $0x48] sm:$0xff] }
 0x137   :  { %v5100_v56 = vpop.eup %5099  ;;  %v180_v58 = vmul.f32 %v5519_v36, %v166_v51 }
 0x138   :  { %v5102_v59 = vpop.eup %5101  ;;  %v237_v60 = vsel %vm42_vm0, %v5534_v54, 0.0  ;;  %v193_v32 = vadd.f32 %v5525_v41, %v179_v55  ;;  %v167_v61 = vmul.f32 %v5100_v56, %v5476_v33 }
 0x139   :  { %238 = vadd.xlane.f32.xlu0 %v237_v60  ;;  %v194_v0 = vadd.f32 %v5525_v41, %v180_v58  ;;  %v168_v1 = vmul.f32 %v5102_v59, %v5484_v42  ;;  %v206_v42 = vld [vmem:[%s7561_s1 + $0x20] sm:$0xff] }
 0x13a   :  { %v5550_v2 = vadd.f32 %v203_v57, %v193_v32  ;;  %v181_v3 = vmul.f32 %v5519_v36, %v167_v61 }
 0x13b   :  { %v5104_v4 = vpop.eup %5103  ;;  %v5553_v5 = vadd.f32 %v204_v25, %v194_v0  ;;  %v182_v7 = vmul.f32 %v5519_v36, %v168_v1 }
 0x13c   :  { %v5106_v8 = vpop.eup %5105  ;;  %v240_v33 = vsel %vm42_vm0, %v5550_v2, 0.0  ;;  %v195_v9 = vadd.f32 %v5525_v41, %v181_v3  ;;  %v169_v10 = vmul.f32 %v5104_v4, %v5486_v43  ;;  %v207_v43 = vld [vmem:[%s7561_s1 + $0x28] sm:$0xff] }
 0x13d   :  { %241 = vadd.xlane.f32.xlu1 %v240_v33  ;;  %v243_v11 = vsel %vm42_vm0, %v5553_v5, 0.0  ;;  %v196_v12 = vadd.f32 %v5525_v41, %v182_v7  ;;  %v170_v13 = vmul.f32 %v5106_v8, %v5494_v52 }
 0x13e   :  { %244 = vadd.xlane.f32.xlu0 %v243_v11  ;;  %v5570_v14 = vadd.f32 %v205_v6, %v195_v9  ;;  %v183_v15 = vmul.f32 %v5519_v36, %v169_v10 }
 0x13f   :  { %v5108_v16 = vpop.eup %5107  ;;  %v5573_v17 = vadd.f32 %v206_v42, %v196_v12  ;;  %v184_v18 = vmul.f32 %v5519_v36, %v170_v13 }
 0x140   :  { %v5110_v19 = vpop.eup %5109  ;;  %v246_v20 = vsel %vm42_vm0, %v5570_v14, 0.0  ;;  %v197_v52 = vadd.f32 %v5525_v41, %v183_v15  ;;  %v171_v22 = vmul.f32 %v5108_v16, %v5496_v53  ;;  %v209_v53 = vld [vmem:[%s7561_s1 + $0x38] sm:$0xff] }
 0x141   :  { %247 = vadd.xlane.f32.xlu1 %v246_v20  ;;  %v249_v23 = vsel %vm42_vm0, %v5573_v17, 0.0  ;;  %v198_v26 = vadd.f32 %v5525_v41, %v184_v18  ;;  %v172_v27 = vmul.f32 %v5110_v19, %v5504_v62  ;;  %v210_v62 = vld [vmem:[%s7561_s1 + $0x40] sm:$0xff] }
 0x142   :  { %250 = vadd.xlane.f32.xlu0 %v249_v23  ;;  %v5590_v28 = vadd.f32 %v207_v43, %v197_v52  ;;  %v185_v29 = vmul.f32 %v5519_v36, %v171_v22 }
 0x143   :  { %v5112_v30 = vpop.eup %5111  ;;  %v5593_v31 = vadd.f32 %v208_v21, %v198_v26  ;;  %v186_v34 = vmul.f32 %v5519_v36, %v172_v27 }
 0x144   :  { %v252_v35 = vsel %vm42_vm0, %v5590_v28, 0.0  ;;  %v199_v37 = vadd.f32 %v5525_v41, %v185_v29  ;;  %v173_v38 = vmul.f32 %v5112_v30, %v5506_v63 }
 0x145   :  { %253 = vadd.xlane.f32.xlu1 %v252_v35  ;;  %v255_v39 = vsel %vm42_vm0, %v5593_v31, 0.0  ;;  %v200_v40 = vadd.f32 %v5525_v41, %v186_v34 }
 0x146   :  { %256 = vadd.xlane.f32.xlu0 %v255_v39  ;;  %v5609_v44 = vadd.f32 %v209_v53, %v199_v37  ;;  %v187_v45 = vmul.f32 %v5519_v36, %v173_v38 }
 0x147   :  { %v5612_v46 = vadd.f32 %v210_v62, %v200_v40 }
 0x148   :  { %v258_v63 = vsel %vm42_vm0, %v5609_v44, 0.0  ;;  %v201_v48 = vadd.f32 %v5525_v41, %v187_v45 }
 0x149   :  { %259 = vadd.xlane.f32.xlu1 %v258_v63  ;;  %v261_v49 = vsel %vm42_vm0, %v5612_v46, 0.0  ;;  %v5037_v63 = vld [vmem:[%s7562_s3 + $0x34] ss:$8 sps:$4 sm:$0xff]  }
 0x14a   :  { %262 = vadd.xlane.f32.xlu0 %v261_v49  ;;  %v5622_v24 = vadd.f32 %v211_v47, %v201_v48  ;;  %v5039_v48 = vld [vmem:[%s7562_s3 + $0x30] ss:$8 sps:$4 sm:$0xff]   ;;  %479 = vmatprep.subr.bf16.mxu0 %v5037_v63  ;;  %v5040_v49 = vld [vmem:[%s7562_s3 + $0x24] ss:$8 sps:$4 sm:$0xff]  }
 0x14b   :  { %4973 = vmatprep.subr.bf16.mxu1 %v5037_v63  ;;  %480 = vmatpush1.bf16.msra.mxu0 %v5039_v48 }
 0x14c   :  { %v264_v36 = vsel %vm42_vm0, %v5622_v24, 0.0  ;;  %4977 = vmatpush1.bf16.msra.mxu1 %v5039_v48  ;;  %481 = vmatprep.subr.bf16.mxu0 %v5040_v49 }
 0x14d   :  { %265 = vadd.xlane.f32.xlu1 %v264_v36  ;;  %v5042_v36 = vld [vmem:[%s7562_s3 + $0x20] ss:$8 sps:$4 sm:$0xff]   ;;  %4974 = vmatprep.subr.bf16.mxu1 %v5040_v49 }
 0x14f   :  { %482 = vmatpush1.bf16.msra.mxu0 %v5042_v36 }
 0x150   :  { %4978 = vmatpush1.bf16.msra.mxu1 %v5042_v36 }
 0x1c2   :  { %v239_v50 = vpop.xlane.xlu0 %238 }
 0x1c3   :  { %v267_v51 = vmul.f32 0.015625, %v239_v50  ;;  %v5043_v50 = vld [vmem:[%s7562_s3 + $0x14] ss:$8 sps:$4 sm:$0xff]  }
 0x1c4   :  { %483 = vmatprep.subr.bf16.mxu0 %v5043_v50  ;;  %4975 = vmatprep.subr.bf16.mxu1 %v5043_v50 }
 0x1c5   :  { %v5627_v55 = vsub.f32 %v5534_v54, %v267_v51  ;;  %v5045_v51 = vld [vmem:[%s7562_s3 + $0x10] ss:$8 sps:$4 sm:$0xff]  }
 0x1c6   :  { %v242_v56 = vpop.xlane.xlu1 %241  ;;  %484 = vmatpush1.bf16.msra.mxu0 %v5045_v51  ;;  %4979 = vmatpush1.bf16.msra.mxu1 %v5045_v51 }
 0x1c7   :  { %v268_v57 = vmul.f32 0.015625, %v242_v56  ;;  %v245_v58 = vpop.xlane.xlu0 %244  ;;  %v287_v41 = vmul.f32 %v5627_v55, %v5627_v55  ;;  %v5046_v56 = vld [vmem:[%s7562_s3 + $0x4] ss:$8 sps:$4 sm:$0xff]  }
 0x1c8   :  { %v269_v59 = vmul.f32 0.015625, %v245_v58  ;;  %v5375_v58 = vmov 0   ;;  %485 = vmatprep.subr.bf16.mxu0 %v5046_v56  ;;  %4976 = vmatprep.subr.bf16.mxu1 %v5046_v56 }
 0x1c9   :  { %v5632_v60 = vsub.f32 %v5550_v2, %v268_v57  ;;  %v297_v32 = vsel %vm42_vm0, %v287_v41, 0.0  ;;  %v5048_v57 = vld [vmem:[%s7562_s3] ss:$8 sps:$4 sm:$0xff]   ;;  %503 = vmatprep.mubr.bf16.mxu0 %v5375_v58  ;;  %533 = vmatprep.mubr.bf16.mxu1 %v5375_v58 }
 0x1ca   :  { %v5636_v25 = vsub.f32 %v5553_v5, %v269_v59  ;;  %v248_v61 = vpop.xlane.xlu1 %247  ;;  %298 = vadd.xlane.f32.xlu0 %v297_v32  ;;  %486 = vmatpush1.bf16.msra.mxu0 %v5048_v57 }
 0x1cb   :  { %v270_v0 = vmul.f32 0.015625, %v248_v61  ;;  %v251_v1 = vpop.xlane.xlu0 %250  ;;  %v288_v3 = vmul.f32 %v5632_v60, %v5632_v60  ;;  %4980 = vmatpush1.bf16.msra.mxu1 %v5048_v57 }
 0x1cc   :  { %v271_v4 = vmul.f32 0.015625, %v251_v1  ;;  %v289_v6 = vmul.f32 %v5636_v25, %v5636_v25 }
 0x1cd   :  { %v5643_v7 = vsub.f32 %v5570_v14, %v270_v0  ;;  %v300_v8 = vsel %vm42_vm0, %v288_v3, 0.0 }
 0x1ce   :  { %v5647_v33 = vsub.f32 %v5573_v17, %v271_v4  ;;  %301 = vadd.xlane.f32.xlu1 %v300_v8  ;;  %v254_v9 = vpop.xlane.xlu1 %253  ;;  %v303_v42 = vsel %vm42_vm0, %v289_v6, 0.0  ;;  %v222_v6 = vlaneseq }
 0x1cf   :  { %v272_v10 = vmul.f32 0.015625, %v254_v9  ;;  %304 = vadd.xlane.f32.xlu0 %v303_v42  ;;  %v257_v11 = vpop.xlane.xlu0 %256  ;;  %v290_v12 = vmul.f32 %v5643_v7, %v5643_v7 }
 0x1d0   :  { %v273_v13 = vmul.f32 0.015625, %v257_v11  ;;  %v291_v15 = vmul.f32 %v5647_v33, %v5647_v33 }
 0x1d1   :  { %v5655_v16 = vsub.f32 %v5590_v28, %v272_v10  ;;  %v306_v43 = vsel %vm42_vm0, %v290_v12, 0.0 }
 0x1d2   :  { %v5659_v18 = vsub.f32 %v5593_v31, %v273_v13  ;;  %307 = vadd.xlane.f32.xlu1 %v306_v43  ;;  %v260_v19 = vpop.xlane.xlu1 %259  ;;  %v309_v20 = vsel %vm42_vm0, %v291_v15, 0.0  ;;  %v5713_v13 = vshrl.u32 %v222_v6, 7 }
 0x1d3   :  { %v274_v52 = vmul.f32 0.015625, %v260_v19  ;;  %310 = vadd.xlane.f32.xlu0 %v309_v20  ;;  %v263_v21 = vpop.xlane.xlu0 %262  ;;  %v292_v22 = vmul.f32 %v5655_v16, %v5655_v16 }
 0x1d4   :  { %v275_v23 = vmul.f32 0.015625, %v263_v21  ;;  %v293_v26 = vmul.f32 %v5659_v18, %v5659_v18 }
 0x1d5   :  { %v5667_v27 = vsub.f32 %v5609_v44, %v274_v52  ;;  %v312_v29 = vsel %vm42_vm0, %v292_v22, 0.0  ;;  %v369_v22 = vsub.s32 0, %v5713_v13 }
 0x1d6   :  { %v5671_v30 = vsub.f32 %v5612_v46, %v275_v23  ;;  %313 = vadd.xlane.f32.xlu1 %v312_v29  ;;  %v266_v53 = vpop.xlane.xlu1 %265  ;;  %v315_v34 = vsel %vm42_vm0, %v293_v26, 0.0  ;;  %v5719_v29 = vld [vmem:[%s7563_s7] sm:$0xff] }
 0x1d7   :  { %v276_v35 = vmul.f32 0.015625, %v266_v53  ;;  %316 = vadd.xlane.f32.xlu0 %v315_v34  ;;  %v294_v37 = vmul.f32 %v5667_v27, %v5667_v27 }
 0x1d8   :  { %v295_v62 = vmul.f32 %v5671_v30, %v5671_v30 }
 0x1d9   :  { %v5679_v38 = vsub.f32 %v5622_v24, %v276_v35  ;;  %v318_v39 = vsel %vm42_vm0, %v294_v37, 0.0 }
 0x1da   :  { %319 = vadd.xlane.f32.xlu1 %v318_v39  ;;  %v321_v40 = vsel %vm42_vm0, %v295_v62, 0.0  ;;  %v383_v62 = vsub.s32 1, %v5713_v13 }
 0x1db   :  { %322 = vadd.xlane.f32.xlu0 %v321_v40  ;;  %v296_v45 = vmul.f32 %v5679_v38, %v5679_v38 }
 0x1dc   :  { %v384_v36 = vrot.slane %v5719_v29, %v383_v62 }
 0x1dd   :  { %v324_v47 = vsel %vm42_vm0, %v296_v45, 0.0  ;;  %v370_v45 = vrot.slane %v5719_v29, %v369_v22 }
 0x1de   :  { %325 = vadd.xlane.f32.xlu1 %v324_v47 }
 0x253   :  { %v299_v41 = vpop.xlane.xlu0 %298 }
 0x254   :  { %v327_v59 = vmul.f32 0.015625, %v299_v41 }
 0x256   :  { %v337_v32 = vadd.f32 1e-05, %v327_v59 }
 0x257   :  { %v302_v61 = vpop.xlane.xlu1 %301 }
 0x258   :  { %5113 = vrsqrt.f32 %v337_v32  ;;  %v328_v0 = vmul.f32 0.015625, %v302_v61  ;;  %v305_v1 = vpop.xlane.xlu0 %304 }
 0x259   :  { %v329_v3 = vmul.f32 0.015625, %v305_v1 }
 0x25a   :  { %v338_v4 = vadd.f32 1e-05, %v328_v0 }
 0x25b   :  { %v339_v8 = vadd.f32 1e-05, %v329_v3  ;;  %v308_v9 = vpop.xlane.xlu1 %307 }
 0x25c   :  { %5115 = vrsqrt.f32 %v338_v4  ;;  %v330_v42 = vmul.f32 0.015625, %v308_v9  ;;  %v311_v10 = vpop.xlane.xlu0 %310 }
 0x25d   :  { %v331_v11 = vmul.f32 0.015625, %v311_v10  ;;  %5117 = vrsqrt.f32 %v339_v8 }
 0x25e   :  { %v340_v12 = vadd.f32 1e-05, %v330_v42 }
 0x25f   :  { %v341_v15 = vadd.f32 1e-05, %v331_v11  ;;  %v314_v43 = vpop.xlane.xlu1 %313 }
 0x260   :  { %5119 = vrsqrt.f32 %v340_v12  ;;  %v332_v19 = vmul.f32 0.015625, %v314_v43  ;;  %v317_v20 = vpop.xlane.xlu0 %316 }
 0x261   :  { %v333_v52 = vmul.f32 0.015625, %v317_v20  ;;  %5121 = vrsqrt.f32 %v341_v15 }
 0x262   :  { %v342_v21 = vadd.f32 1e-05, %v332_v19 }
 0x263   :  { %v343_v23 = vadd.f32 1e-05, %v333_v52  ;;  %v320_v26 = vpop.xlane.xlu1 %319 }
 0x264   :  { %5123 = vrsqrt.f32 %v342_v21  ;;  %v334_v53 = vmul.f32 0.015625, %v320_v26  ;;  %v323_v34 = vpop.xlane.xlu0 %322 }
 0x265   :  { %v5114_v35 = vpop.eup %5113  ;;  %5125 = vrsqrt.f32 %v343_v23  ;;  %v335_v37 = vmul.f32 0.015625, %v323_v34 }
 0x266   :  { %v344_v39 = vadd.f32 1e-05, %v334_v53  ;;  %v357_v40 = vmul.f32 %v5114_v35, %v5627_v55 }
 0x267   :  { %v345_v47 = vadd.f32 1e-05, %v335_v37  ;;  %v326_v63 = vpop.xlane.xlu1 %325 }
 0x268   :  { %5127 = vrsqrt.f32 %v344_v39  ;;  %v336_v48 = vmul.f32 0.015625, %v326_v63  ;;  %v371_v56 = vmul.f32 %v370_v45, %v357_v40 }
 0x269   :  { %v5116_v49 = vpop.eup %5115  ;;  %5129 = vrsqrt.f32 %v345_v47 }
 0x26a   :  { %v346_v50 = vadd.f32 1e-05, %v336_v48  ;;  %v358_v51 = vmul.f32 %v5116_v49, %v5632_v60  ;;  %v5118_v57 = vpop.eup %5117  ;;  %v385_v59 = vadd.f32 %v384_v36, %v371_v56 }
 0x26b   :  { %v359_v61 = vmul.f32 %v5118_v57, %v5636_v25 }
 0x26c   :  { %5131 = vrsqrt.f32 %v346_v50  ;;  %v372_v55 = vmul.f32 %v370_v45, %v358_v51 }
 0x26d   :  { %v5120_v41 = vpop.eup %5119  ;;  %v373_v42 = vmul.f32 %v370_v45, %v359_v61 }
 0x26e   :  { %v386_v32 = vadd.f32 %v384_v36, %v372_v55  ;;  %v360_v0 = vmul.f32 %v5120_v41, %v5643_v7  ;;  %v5122_v1 = vpop.eup %5121 }
 0x26f   :  { %v361_v25 = vmul.f32 %v5122_v1, %v5647_v33  ;;  %v387_v15 = vadd.f32 %v384_v36, %v373_v42 }
 0x270   :  { %v395_v3 = vpack.c.bf16 %v386_v32, %v385_v59  ;;  %v374_v4 = vmul.f32 %v370_v45, %v360_v0  ;;  %v5376_v59 = vmov 0.0  }
 0x271   :  { %v5124_v8 = vpop.eup %5123  ;;  %v375_v26 = vmul.f32 %v370_v45, %v361_v25  ;;  %4501 = vmatprep.subr.bf16.mxu1 %v5376_v59  ;;  %4537 = vmatprep.subr.bf16.mxu0 %v5376_v59 }
 0x272   :  { %v5126_v9 = vpop.eup %5125  ;;  %4181 = vmatmul.mubr.msk.bf16.vlgmr.msra.gmra.mxu0 %vm42_vm0, %v395_v3  ;;  %v388_v10 = vadd.f32 %v384_v36, %v374_v4  ;;  %v362_v11 = vmul.f32 %v5124_v8, %v5655_v16 }
 0x273   :  { %513 = vmatprep.mubr.bf16.mxu0 %v5375_v58  ;;  %v363_v60 = vmul.f32 %v5126_v9, %v5659_v18  ;;  %v389_v37 = vadd.f32 %v384_v36, %v375_v26 }
 0x274   :  { %v396_v20 = vpack.c.bf16 %v388_v10, %v387_v15  ;;  %v376_v21 = vmul.f32 %v370_v45, %v362_v11 }
 0x275   :  { %v5128_v12 = vpop.eup %5127  ;;  %v377_v43 = vmul.f32 %v370_v45, %v363_v60 }
 0x276   :  { %v364_v7 = vmul.f32 %v5128_v12, %v5667_v27  ;;  %v5130_v19 = vpop.eup %5129  ;;  %v390_v35 = vadd.f32 %v384_v36, %v376_v21 }
 0x277   :  { %v391_v53 = vadd.f32 %v384_v36, %v377_v43  ;;  %v365_v34 = vmul.f32 %v5130_v19, %v5671_v30  ;;  %v236_v30 = vld [vmem:[%s7563_s7 + $0x8] sm:$0xff] }
 0x278   :  { %v378_v52 = vmul.f32 %v370_v45, %v364_v7  ;;  %v397_v40 = vpack.c.bf16 %v390_v35, %v389_v37 }
 0x279   :  { %v5132_v23 = vpop.eup %5131  ;;  %v379_v39 = vmul.f32 %v370_v45, %v365_v34 }
 0x27a   :  { %4182 = vmatmul.mubr.msk.bf16.gmra.mxu0 %vm42_vm0, %v396_v20  ;;  %v392_v18 = vadd.f32 %v384_v36, %v378_v52  ;;  %v366_v16 = vmul.f32 %v5132_v23, %v5679_v38  ;;  %v5750_v38 = vsub.s32 2, %v5713_v13 }
 0x27b   :  { %523 = vmatprep.mubr.bf16.mxu0 %v5375_v58  ;;  %v393_v63 = vadd.f32 %v384_v36, %v379_v39 }
 0x27c   :  { %v398_v33 = vpack.c.bf16 %v392_v18, %v391_v53  ;;  %v380_v27 = vmul.f32 %v370_v45, %v366_v16  ;;  %v5753_v49 = vrot.slane %v236_v30, %v5750_v38  ;;  %v411_v61 = vrot.slane %v5719_v29, %v5750_v38 }
 0x27e   :  { %4184 = vmatmul.mubr.msk.bf16.vlgmr.msra.gmra.mxu1 %vm42_vm0, %v398_v33  ;;  %v394_v47 = vadd.f32 %v384_v36, %v380_v27 }
 0x27f   :  { %543 = vmatprep.mubr.bf16.mxu1 %v5375_v58 }
 0x280   :  { %v399_v48 = vpack.c.bf16 %v394_v47, %v393_v63 }
 0x282   :  { %4183 = vmatmul.mubr.msk.bf16.gmra.mxu0 %vm42_vm0, %v397_v40 }
 0x283   :  { %4543 = vmatprep.mubr.msk.bf16.mxu0 %vm5380_vm1, %v5376_v59 }
 0x286   :  { %4185 = vmatmul.mubr.msk.bf16.gmra.mxu1 %vm42_vm0, %v399_v48 }
 0x287   :  { %4507 = vmatprep.mubr.msk.bf16.mxu1 %vm5380_vm1, %v5376_v59 }
 0x332   :  { %v505_v45 = vpop.f32.mrf.mxu0 }
 0x333   :  { %v506_v25 = vadd.f32 %v505_v45, %v411_v61 }
 0x334   :  { %v507_v50 = vpop.f32.mrf.mxu0 }
 0x335   :  { %v508_v51 = vadd.f32 %v507_v50, %v5753_v49 }
 0x336   :  { %v509_v56 = vpop.f32.mrf.mxu0 }
 0x337   :  { %v510_v42 = vadd.f32 %v509_v56, %v411_v61 }
 0x338   :  { %v511_v57 = vpop.f32.mrf.mxu0 }
 0x339   :  { %v512_v36 = vadd.f32 %v511_v57, %v5753_v49  ;;  %v5770_v43 = vpack.c.bf16 %v510_v42, %v506_v25 }
 0x33a   :  { %v515_v55 = vpop.f32.mrf.mxu0 }
 0x33b   :  { %v5757_v41 = vpack.c.bf16 %v512_v36, %v508_v51  ;;  %v516_v3 = vadd.f32 %v515_v55, %v411_v61 }
 0x33c   :  { %v5761_v32 = vpop.f32.mrf.mxu0 }
 0x33d   :  { %v518_v51 = vadd.f32 %v5761_v32, %v5753_v49 }
 0x33e   :  { %v519_v0 = vpop.f32.mrf.mxu0  ;;  %v535_v1 = vpop.f32.mrf.mxu1 }
 0x33f   :  { %v520_v4 = vadd.f32 %v519_v0, %v411_v61  ;;  %v536_v63 = vadd.f32 %v535_v1, %v411_v61 }
 0x340   :  { %v521_v8 = vpop.f32.mrf.mxu0  ;;  %v537_v9 = vpop.f32.mrf.mxu1 }
 0x341   :  { %v5765_v60 = vpack.c.bf16 %v520_v4, %v516_v3  ;;  %v538_v10 = vadd.f32 %v537_v9, %v5753_v49  ;;  %v522_v45 = vadd.f32 %v521_v8, %v5753_v49 }
 0x342   :  { %v525_v11 = vpop.f32.mrf.mxu0  ;;  %v539_v12 = vpop.f32.mrf.mxu1 }
 0x343   :  { %v526_v15 = vadd.f32 %v525_v11, %v411_v61  ;;  %565 = vrot.lane.b32.xlu1 %v5765_v60, %s5377_s22  ;;  %v540_v39 = vadd.f32 %v539_v12, %v411_v61  ;;  %v558_v56 = vpack.c.bf16 %v522_v45, %v518_v51 }
 0x344   :  { %v527_v29 = vpop.f32.mrf.mxu0  ;;  %v541_v7 = vpop.f32.mrf.mxu1 }
 0x345   :  { %v5772_v19 = vpack.c.bf16 %v526_v15, %v526_v15  ;;  %v542_v53 = vadd.f32 %v541_v7, %v5753_v49  ;;  %v528_v30 = vadd.f32 %v527_v29, %v5753_v49 }
 0x346   :  { %v529_v20 = vpop.f32.mrf.mxu0  ;;  %v545_v52 = vpop.f32.mrf.mxu1 }
 0x347   :  { %563 = vrot.lane.b32.xlu1 %v5770_v43, %s5377_s22  ;;  %567 = vrot.lane.b32.xlu0 %v5772_v19, %s5377_s22  ;;  %v546_v27 = vadd.f32 %v545_v52, %v411_v61  ;;  %v530_v40 = vadd.f32 %v529_v20, %v411_v61  ;;  %v559_v50 = vpack.c.bf16 %v528_v30, %v528_v30 }
 0x348   :  { %v531_v21 = vpop.f32.mrf.mxu0  ;;  %v547_v23 = vpop.f32.mrf.mxu1 }
 0x349   :  { %v532_v26 = vadd.f32 %v531_v21, %v5753_v49  ;;  %v548_v18 = vadd.f32 %v547_v23, %v5753_v49  ;;  %v5803_v47 = vpack.c.bf16 %v546_v27, %v540_v39  ;;  %v5809_v48 = vpack.c.bf16 %v536_v63, %v530_v40 }
 0x34a   :  { %v549_v34 = vpop.f32.mrf.mxu1  ;;  %v5903_v27 = vand.u32 127, %v222_v6 }
 0x34b   :  { %v5781_v16 = vpack.c.bf16 %v538_v10, %v532_v26  ;;  %792 = vrot.lane.b32.xlu1 %v5772_v19, %s5378_s23  ;;  %790 = vrot.lane.b32.xlu0 %v5765_v60, %s5378_s23  ;;  %v5787_v33 = vpack.c.bf16 %v548_v18, %v542_v53  ;;  %v550_v35 = vadd.f32 %v549_v34, %v411_v61  ;;  %v714_v10 = vsel %vm712_vm3, %v559_v50, 0 }
 0x34c   :  { %vm5909_vm4 = vcmp.le.s32.totalorder %v5903_v27, %v5713_v13 }
 0x34d   :  { %v5797_v37 = vpack.c.bf16 %v550_v35, %v550_v35 }
 0x34f   :  { %788 = vrot.lane.b32.xlu1 %v5770_v43, %s5378_s23  ;;  %782 = vrot.lane.b32.xlu0 %v5770_v43, %s5379_s24 }
 0x353   :  { %784 = vrot.lane.b32.xlu0 %v5765_v60, %s5379_s24  ;;  %1053 = vrot.lane.b32.xlu1 %v5797_v37, %s5377_s22 }
 0x357   :  { %786 = vrot.lane.b32.xlu0 %v5772_v19, %s5379_s24  ;;  %1051 = vrot.lane.b32.xlu1 %v5803_v47, %s5377_s22 }
 0x35b   :  { %1275 = vrot.lane.b32.xlu0 %v5797_v37, %s5378_s23  ;;  %1049 = vrot.lane.b32.xlu1 %v5809_v48, %s5377_s22 }
 0x35f   :  { %1271 = vrot.lane.b32.xlu0 %v5809_v48, %s5378_s23  ;;  %1273 = vrot.lane.b32.xlu1 %v5803_v47, %s5378_s23 }
 0x363   :  { %1267 = vrot.lane.b32.xlu0 %v5803_v47, %s5379_s24  ;;  %1265 = vrot.lane.b32.xlu1 %v5809_v48, %s5379_s24 }
 0x367   :  { %933 = vrot.lane.b32.xlu0 %v559_v50, %s5379_s24  ;;  %1269 = vrot.lane.b32.xlu1 %v5797_v37, %s5379_s24 }
 0x36b   :  { %931 = vrot.lane.b32.xlu1 %v558_v56, %s5379_s24 }
 0x3b5   :  { %v566_v57 = vpop.permute.xlu1 %565 }
 0x3b6   :  { %v583_v1 = vsel %vm569_vm2, %v566_v57, 0 }
 0x3b9   :  { %v564_v36 = vpop.permute.xlu1 %563  ;;  %v568_v55 = vpop.permute.xlu0 %567 }
 0x3ba   :  { %v586_v61 = vsel %vm569_vm2, %v568_v55, 0  ;;  %v580_v8 = vsel %vm569_vm2, %v564_v36, 0 }
 0x3bb   :  { %4502 = vmatpush3.bf16.xpose.msra.mxu1 %v586_v61  ;;  %v225_v61 = vadd.s32 16, %v5713_v13 }
 0x3bc   :  { %4503 = vmatprep.subr.bf16.mxu1 %v5376_v59 }
 0x3bd   :  { %v793_v0 = vpop.permute.xlu1 %792  ;;  %v791_v3 = vpop.permute.xlu0 %790  ;;  %vm5937_vm7 = vcmp.le.s32.totalorder %v5903_v27, %v225_v61 }
 0x3be   :  { %v810_v32 = vsel %vm569_vm2, %v793_v0, 0  ;;  %v807_v4 = vsel %vm569_vm2, %v791_v3, 0 }
 0x3bf   :  { %4538 = vmatpush3.bf16.xpose.msra.mxu0 %v810_v32 }
 0x3c0   :  { %4539 = vmatprep.subr.bf16.mxu0 %v5376_v59 }
 0x3c1   :  { %v789_v9 = vpop.permute.xlu1 %788  ;;  %v783_v12 = vpop.permute.xlu0 %782 }
 0x3c2   :  { %v804_v42 = vsel %vm569_vm2, %v789_v9, 0 }
 0x3c3   :  { %4504 = vmatpush3.bf16.xpose.msra.mxu1 %v583_v1 }
 0x3c4   :  { %4505 = vmatprep.subr.bf16.mxu1 %v5376_v59 }
 0x3c5   :  { %v1054_v11 = vpop.permute.xlu1 %1053  ;;  %v785_v29 = vpop.permute.xlu0 %784 }
 0x3c6   :  { %v1071_v25 = vsel %vm569_vm2, %v1054_v11, 0 }
 0x3c7   :  { %4540 = vmatpush3.bf16.xpose.msra.mxu0 %v807_v4 }
 0x3c8   :  { %4541 = vmatprep.subr.bf16.mxu0 %v5376_v59 }
 0x3c9   :  { %v1052_v15 = vpop.permute.xlu1 %1051 }
 0x3ca   :  { %v1068_v7 = vsel %vm569_vm2, %v1052_v15, 0 }
 0x3cb   :  { %4506 = vmatpush3.bf16.xpose.msra.mxu1 %v580_v8 }
 0x3cc   :  { %4519 = vmatprep.subr.bf16.mxu1 %v5376_v59 }
 0x3cf   :  { %4542 = vmatpush3.bf16.xpose.msra.mxu0 %v804_v42 }
 0x3d0   :  { %4573 = vmatprep.subr.bf16.mxu0 %v5376_v59 }
 0x3d2   :  { %4508 = vmatmul.mubr.msk.bf16.vlgmr.msra.gmra.mxu1 %vm569_vm2, %v5770_v43  ;;  %v787_v43 = vpop.permute.xlu0 %786 }
 0x3d3   :  { %4520 = vmatpush3.bf16.msra.mxu1 %v714_v10  ;;  %4511 = vmatprep.mubr.msk.bf16.mxu1 %vm5380_vm1, %v5376_v59 }
 0x3d4   :  { %4521 = vmatprep.subr.bf16.mxu1 %v5376_v59 }
 0x3d6   :  { %4544 = vmatmul.mubr.msk.bf16.vlgmr.msra.gmra.mxu0 %vm569_vm2, %v783_v12  ;;  %v1276_v52 = vpop.permute.xlu0 %1275  ;;  %v226_v12 = vadd.s32 24, %v5713_v13 }
 0x3d7   :  { %4522 = vmatpush3.bf16.msra.mxu1 %v558_v56  ;;  %4574 = vmatpush3.bf16.xpose.msra.mxu0 %v1071_v25  ;;  %v1293_v21 = vsel %vm569_vm2, %v1276_v52, 0 }
 0x3d8   :  { %4523 = vmatprep.subr.bf16.mxu1 %v5376_v59  ;;  %4547 = vmatprep.mubr.msk.bf16.mxu0 %vm5380_vm1, %v5376_v59  ;;  %vm5955_vm8 = vcmp.le.s32.totalorder %v5903_v27, %v226_v12 }
 0x3d9   :  { %4575 = vmatprep.subr.bf16.mxu0 %v5376_v59 }
 0x3da   :  { %4512 = vmatmul.mubr.msk.bf16.gmra.mxu1 %vm569_vm2, %v5765_v60  ;;  %v1050_v60 = vpop.permute.xlu1 %1049  ;;  %v1272_v26 = vpop.permute.xlu0 %1271 }
 0x3db   :  { %4524 = vmatpush3.bf16.msra.mxu1 %v5757_v41  ;;  %4515 = vmatprep.mubr.msk.bf16.mxu1 %vm5380_vm1, %v5376_v59  ;;  %v1065_v20 = vsel %vm569_vm2, %v1050_v60, 0  ;;  %v1287_v53 = vsel %vm569_vm2, %v1272_v26, 0 }
 0x3dc   :  { %4555 = vmatprep.subr.bf16.mxu1 %v5376_v59 }
 0x3de   :  { %4548 = vmatmul.mubr.msk.bf16.gmra.mxu0 %vm569_vm2, %v785_v29  ;;  %v1268_v34 = vpop.permute.xlu0 %1267 }
 0x3df   :  { %4576 = vmatpush3.bf16.xpose.msra.mxu0 %v1068_v7  ;;  %4551 = vmatprep.mubr.msk.bf16.mxu0 %vm5380_vm1, %v5376_v59 }
 0x3e0   :  { %4577 = vmatprep.subr.bf16.mxu0 %v5376_v59 }
 0x3e2   :  { %4516 = vmatmul.mubr.msk.bf16.gmra.mxu1 %vm569_vm2, %v5772_v19  ;;  %v1274_v19 = vpop.permute.xlu1 %1273 }
 0x3e3   :  { %4525 = vmatprep.mubr.msk.bf16.mxu1 %vm5380_vm1, %v5376_v59  ;;  %v1290_v23 = vsel %vm569_vm2, %v1274_v19, 0 }
 0x3e6   :  { %4552 = vmatmul.mubr.msk.bf16.gmra.mxu0 %vm569_vm2, %v787_v43  ;;  %v1266_v18 = vpop.permute.xlu1 %1265 }
 0x3e7   :  { %4578 = vmatpush3.bf16.xpose.msra.mxu0 %v1065_v20  ;;  %4579 = vmatprep.mubr.msk.bf16.mxu0 %vm5380_vm1, %v5376_v59 }
 0x3e8   :  { %4609 = vmatprep.subr.bf16.mxu0 %v5376_v59 }
 0x3ea   :  { %v1270_v35 = vpop.permute.xlu1 %1269 }
 0x3ee   :  { %4580 = vmatmul.mubr.msk.bf16.vlgmr.msra.gmra.mxu0 %vm569_vm2, %v5809_v48  ;;  %v224_v48 = vadd.s32 8, %v5713_v13 }
 0x3ef   :  { %4610 = vmatpush3.bf16.xpose.msra.mxu0 %v1293_v21  ;;  %4583 = vmatprep.mubr.msk.bf16.mxu0 %vm5380_vm1, %v5376_v59 }
 0x3f0   :  { %4611 = vmatprep.subr.bf16.mxu0 %v5376_v59  ;;  %vm5921_vm6 = vcmp.le.s32.totalorder %v5903_v27, %v224_v48 }
 0x3f6   :  { %4584 = vmatmul.mubr.msk.bf16.gmra.mxu0 %vm569_vm2, %v5803_v47 }
 0x3f7   :  { %4612 = vmatpush3.bf16.xpose.msra.mxu0 %v1290_v23  ;;  %4587 = vmatprep.mubr.msk.bf16.mxu0 %vm5380_vm1, %v5376_v59 }
 0x3f8   :  { %4613 = vmatprep.subr.bf16.mxu0 %v5376_v59 }
 0x3fe   :  { %4588 = vmatmul.mubr.msk.bf16.gmra.mxu0 %vm569_vm2, %v5797_v37  ;;  %v5905_v37 = vpop.f32.mrf.mxu1 }
 0x3ff   :  { %4614 = vmatpush3.bf16.xpose.msra.mxu0 %v1287_v53  ;;  %4615 = vmatprep.mubr.msk.bf16.mxu0 %vm5380_vm1, %v5376_v59 }
 0x400   :  { %4645 = vmatprep.subr.bf16.mxu0 %v5376_v59 }
 0x406   :  { %4616 = vmatmul.mubr.msk.bf16.vlgmr.msra.gmra.mxu0 %vm569_vm2, %v1266_v18 }
 0x407   :  { %4619 = vmatprep.mubr.msk.bf16.mxu0 %vm5380_vm1, %v5376_v59 }
 0x40e   :  { %4620 = vmatmul.mubr.msk.bf16.gmra.mxu0 %vm569_vm2, %v1268_v34 }
 0x40f   :  { %4623 = vmatprep.mubr.msk.bf16.mxu0 %vm5380_vm1, %v5376_v59 }
 0x416   :  { %4624 = vmatmul.mubr.msk.bf16.gmra.mxu0 %vm569_vm2, %v1270_v35 }
 0x417   :  { %4653 = vmatprep.mubr.msk.bf16.mxu0 %vm5380_vm1, %v5376_v59 }
 0x492   :  { %v622_v39 = vpop.f32.mrf.mxu1 }
 0x493   :  { %v644_v47 = vmul.f32 0.17677669, %v622_v39 }
 0x494   :  { %v4509_v63 = vpop.f32.mrf.mxu1 }
 0x495   :  { %v5916_v30 = vsel %vm5909_vm4, %v644_v47, -1e+30 }
 0x496   :  { %v625_v6 = vpop.f32.mrf.mxu1  ;;  %v846_v45 = vpop.f32.mrf.mxu0  ;;  %v655_v50 = vsel %vm654_vm5, %v5916_v30, -inf }
 0x497   :  { %v645_v51 = vmul.f32 0.17677669, %v625_v6  ;;  %v868_v56 = vmul.f32 0.17677669, %v846_v45  ;;  %656 = vmax.xlane.f32.xlu0 %v655_v50  ;;  %v227_v6 = vadd.s32 32, %v5713_v13 }
 0x498   :  { %v4510_v57 = vpop.f32.mrf.mxu1  ;;  %v4545_v36 = vpop.f32.mrf.mxu0 }
 0x499   :  { %v5928_v0 = vsel %vm5909_vm4, %v868_v56, -1e+30  ;;  %v5934_v9 = vsel %vm5921_vm6, %v645_v51, -1e+30  ;;  %vm5979_vm9 = vcmp.le.s32.totalorder %v5903_v27, %v227_v6 }
 0x49a   :  { %v630_v32 = vpop.f32.mrf.mxu1  ;;  %v849_v1 = vpop.f32.mrf.mxu0  ;;  %v878_v3 = vsel %vm654_vm5, %v5928_v0, -inf  ;;  %v658_v7 = vsel %vm654_vm5, %v5934_v9, -inf }
 0x49b   :  { %v646_v4 = vmul.f32 0.17677669, %v630_v32  ;;  %v869_v8 = vmul.f32 0.17677669, %v849_v1  ;;  %879 = vmax.xlane.f32.xlu1 %v878_v3 }
 0x49c   :  { %v4513_v42 = vpop.f32.mrf.mxu1  ;;  %v4546_v10 = vpop.f32.mrf.mxu0 }
 0x49d   :  { %v5944_v25 = vsel %vm5921_vm6, %v869_v8, -1e+30  ;;  %v5952_v52 = vsel %vm5937_vm7, %v646_v4, -1e+30 }
 0x49e   :  { %v633_v15 = vpop.f32.mrf.mxu1  ;;  %v854_v29 = vpop.f32.mrf.mxu0  ;;  %v881_v60 = vsel %vm654_vm5, %v5944_v25, -inf  ;;  %v661_v34 = vsel %vm654_vm5, %v5952_v52, -inf }
 0x49f   :  { %v647_v43 = vmul.f32 0.17677669, %v633_v15  ;;  %v870_v20 = vmul.f32 0.17677669, %v854_v29  ;;  %659 = vmax.xlane.f32.xlu1 %v658_v7  ;;  %882 = vmax.xlane.f32.xlu0 %v881_v60 }
 0x4a0   :  { %v4514_v21 = vpop.f32.mrf.mxu1  ;;  %v4549_v19 = vpop.f32.mrf.mxu0 }
 0x4a1   :  { %v5961_v26 = vsel %vm5937_vm7, %v870_v20, -1e+30  ;;  %v5969_v47 = vsel %vm5955_vm8, %v647_v43, -1e+30 }
 0x4a2   :  { %v638_v53 = vpop.f32.mrf.mxu1  ;;  %v857_v18 = vpop.f32.mrf.mxu0  ;;  %v884_v35 = vsel %vm654_vm5, %v5961_v26, -inf  ;;  %v664_v51 = vsel %vm654_vm5, %v5969_v47, -inf }
 0x4a3   :  { %v871_v39 = vmul.f32 0.17677669, %v857_v18  ;;  %662 = vmax.xlane.f32.xlu0 %v661_v34  ;;  %885 = vmax.xlane.f32.xlu1 %v884_v35  ;;  %v648_v56 = vmul.f32 0.17677669, %v638_v53 }
 0x4a4   :  { %v4517_v63 = vpop.f32.mrf.mxu1  ;;  %v4550_v48 = vpop.f32.mrf.mxu0 }
 0x4a5   :  { %v5976_v36 = vsel %vm5955_vm8, %v871_v39, -1e+30  ;;  %v5993_v10 = vsel %vm5979_vm9, %v648_v56, -1e+30 }
 0x4a6   :  { %v641_v45 = vpop.f32.mrf.mxu1  ;;  %v862_v50 = vpop.f32.mrf.mxu0  ;;  %v887_v8 = vsel %vm654_vm5, %v5976_v36, -inf  ;;  %v667_v15 = vsel %vm654_vm5, %v5993_v10, -inf }
 0x4a7   :  { %v872_v57 = vmul.f32 0.17677669, %v862_v50  ;;  %665 = vmax.xlane.f32.xlu0 %v664_v51 }
 0x4a8   :  { %v4518_v61 = vpop.f32.mrf.mxu1  ;;  %v4553_v32 = vpop.f32.mrf.mxu0 }
 0x4a9   :  { %v5985_v3 = vsel %vm5979_vm9, %v872_v57, -1e+30 }
 0x4aa   :  { %v865_v4 = vpop.f32.mrf.mxu0  ;;  %v890_v42 = vsel %vm654_vm5, %v5985_v3, -inf }
 0x4ab   :  { %888 = vmax.xlane.f32.xlu0 %v887_v8  ;;  %891 = vmax.xlane.f32.xlu1 %v890_v42 }
 0x4ac   :  { %v4554_v27 = vpop.f32.mrf.mxu0 }
 0x4ae   :  { %v1107_v12 = vpop.f32.mrf.mxu0 }
 0x4af   :  { %v1129_v29 = vmul.f32 0.17677669, %v1107_v12  ;;  %668 = vmax.xlane.f32.xlu0 %v667_v15 }
 0x4b0   :  { %v4581_v7 = vpop.f32.mrf.mxu0 }
 0x4b1   :  { %v5999_v60 = vsel %vm5909_vm4, %v1129_v29, -1e+30 }
 0x4b2   :  { %v1110_v43 = vpop.f32.mrf.mxu0  ;;  %v1139_v20 = vsel %vm654_vm5, %v5999_v60, -inf }
 0x4b3   :  { %v1130_v21 = vmul.f32 0.17677669, %v1110_v43  ;;  %1140 = vmax.xlane.f32.xlu1 %v1139_v20 }
 0x4b4   :  { %v4582_v19 = vpop.f32.mrf.mxu0 }
 0x4b5   :  { %v6005_v53 = vsel %vm5921_vm6, %v1130_v21, -1e+30 }
 0x4b6   :  { %v1115_v18 = vpop.f32.mrf.mxu0  ;;  %v1142_v34 = vsel %vm654_vm5, %v6005_v53, -inf }
 0x4b7   :  { %v1131_v35 = vmul.f32 0.17677669, %v1115_v18  ;;  %1143 = vmax.xlane.f32.xlu1 %v1142_v34 }
 0x4b8   :  { %v4585_v39 = vpop.f32.mrf.mxu0 }
 0x4b9   :  { %v6011_v63 = vsel %vm5937_vm7, %v1131_v35, -1e+30 }
 0x4ba   :  { %v1118_v48 = vpop.f32.mrf.mxu0  ;;  %v1145_v6 = vsel %vm654_vm5, %v6011_v63, -inf }
 0x4bb   :  { %1146 = vmax.xlane.f32.xlu1 %v1145_v6  ;;  %v1132_v20 = vmul.f32 0.17677669, %v1118_v48 }
 0x4bc   :  { %v4586_v45 = vpop.f32.mrf.mxu0 }
 0x4be   :  { %v1123_v50 = vpop.f32.mrf.mxu0 }
 0x4bf   :  { %v1133_v19 = vmul.f32 0.17677669, %v1123_v50 }
 0x4c0   :  { %v4589_v51 = vpop.f32.mrf.mxu0 }
 0x4c1   :  { %v6027_v35 = vsel %vm5979_vm9, %v1133_v19, -1e+30 }
 0x4c2   :  { %v1126_v56 = vpop.f32.mrf.mxu0  ;;  %v1151_v39 = vsel %vm654_vm5, %v6027_v35, -inf }
 0x4c3   :  { %v552_v56 = vadd.f32 %v5905_v37, %v5753_v49 }
 0x4c4   :  { %v4590_v57 = vpop.f32.mrf.mxu0 }
 0x4c5   :  { %929 = vrot.lane.b32.xlu0 %v5757_v41, %s5379_s24  ;;  %v6021_v41 = vsel %vm5955_vm8, %v1132_v20, -1e+30  ;;  %v6045_v57 = vpack.c.bf16 %v552_v56, %v552_v56 }
 0x4c6   :  { %v1329_v61 = vpop.f32.mrf.mxu0  ;;  %v1148_v18 = vsel %vm654_vm5, %v6021_v41, -inf }
 0x4c7   :  { %v1351_v34 = vmul.f32 0.17677669, %v1329_v61 }
 0x4c8   :  { %v4617_v32 = vpop.f32.mrf.mxu0 }
 0x4c9   :  { %v6033_v48 = vsel %vm5909_vm4, %v1351_v34, -1e+30  ;;  %v934_v32 = vpop.permute.xlu0 %933 }
 0x4ca   :  { %v1332_v4 = vpop.f32.mrf.mxu0  ;;  %v1361_v45 = vsel %vm654_vm5, %v6033_v48, -inf }
 0x4cb   :  { %v1352_v6 = vmul.f32 0.17677669, %v1332_v4 }
 0x4cc   :  { %1414 = vrot.lane.b32.xlu1 %v5787_v33, %s5379_s24  ;;  %v4618_v8 = vpop.f32.mrf.mxu0 }
 0x4cd   :  { %v6039_v50 = vsel %vm5921_vm6, %v1352_v6, -1e+30 }
 0x4ce   :  { %v1337_v42 = vpop.f32.mrf.mxu0  ;;  %v1364_v51 = vsel %vm654_vm5, %v6039_v50, -inf }
 0x4cf   :  { %v1353_v4 = vmul.f32 0.17677669, %v1337_v42 }
 0x4d0   :  { %v4621_v27 = vpop.f32.mrf.mxu0 }
 0x4d2   :  { %v1340_v12 = vpop.f32.mrf.mxu0 }
 0x4d3   :  { %v1354_v61 = vmul.f32 0.17677669, %v1340_v12 }
 0x4d4   :  { %v4622_v15 = vpop.f32.mrf.mxu0 }
 0x4d5   :  { %v6053_v27 = vsel %vm5955_vm8, %v1354_v61, -1e+30  ;;  %v6055_v15 = vpop.permute.xlu1 %931 }
 0x4d6   :  { %v1345_v29 = vpop.f32.mrf.mxu0  ;;  %v1370_v49 = vsel %vm654_vm5, %v6053_v27, -inf }
 0x4d7   :  { %v1355_v8 = vmul.f32 0.17677669, %v1345_v29 }
 0x4d8   :  { %v4625_v7 = vpop.f32.mrf.mxu0 }
 0x4d9   :  { %v6061_v7 = vsel %vm5937_vm7, %v1353_v4, -1e+30  ;;  %v6065_v12 = vsel %vm5979_vm9, %v1355_v8, -1e+30 }
 0x4da   :  { %v1348_v43 = vpop.f32.mrf.mxu0  ;;  %v1373_v20 = vsel %vm654_vm5, %v6065_v12, -inf }
 0x4db   :  { %v1367_v43 = vsel %vm654_vm5, %v6061_v7, -inf }
 0x4dc   :  { %v4626_v21 = vpop.f32.mrf.mxu0 }
 0x4e4   :  { %1149 = vmax.xlane.f32.xlu0 %v1148_v18 }
 0x4e8   :  { %1152 = vmax.xlane.f32.xlu0 %v1151_v39 }
 0x4ec   :  { %1362 = vmax.xlane.f32.xlu0 %v1361_v45 }
 0x4f0   :  { %1365 = vmax.xlane.f32.xlu1 %v1364_v51 }
 0x501   :  { %1412 = vrot.lane.b32.xlu1 %v5781_v16, %s5379_s24 }
 0x502   :  { %1416 = vrot.lane.b32.xlu0 %v6045_v57, %s5379_s24 }
 0x520   :  { %v657_v37 = vpop.xlane.xlu0 %656 }
 0x521   :  { %1371 = vmax.xlane.f32.xlu0 %v1370_v49  ;;  %v670_v42 = vsub.f32 %v5916_v30, %v657_v37 }
 0x523   :  { %v675_v18 = vmul.f32 1.442695, %v670_v42 }
 0x524   :  { %v880_v29 = vpop.xlane.xlu1 %879 }
 0x525   :  { %v893_v21 = vsub.f32 %v5928_v0, %v880_v29  ;;  %1368 = vmax.xlane.f32.xlu1 %v1367_v43  ;;  %1374 = vmax.xlane.f32.xlu0 %v1373_v20 }
 0x527   :  { %v898_v19 = vmul.f32 1.442695, %v893_v21 }
 0x528   :  { %v660_v34 = vpop.xlane.xlu1 %659  ;;  %v883_v39 = vpop.xlane.xlu0 %882 }
 0x529   :  { %5133 = vpow2.f32 %v898_v19  ;;  %v671_v6 = vsub.f32 %v5934_v9, %v660_v34  ;;  %v894_v30 = vsub.f32 %v5944_v25, %v883_v39 }
 0x52a   :  { %5135 = vpow2.f32 %v675_v18 }
 0x52b   :  { %v677_v45 = vmul.f32 1.442695, %v671_v6  ;;  %v900_v51 = vmul.f32 1.442695, %v894_v30 }
 0x52c   :  { %v886_v56 = vpop.xlane.xlu1 %885  ;;  %v663_v61 = vpop.xlane.xlu0 %662 }
 0x52d   :  { %5137 = vpow2.f32 %v677_v45  ;;  %v895_v4 = vsub.f32 %v5961_v26, %v886_v56  ;;  %v672_v0 = vsub.f32 %v5952_v52, %v663_v61  ;;  %v947_v45 = vsel %vm712_vm3, %v934_v32, 0 }
 0x52e   :  { %5139 = vpow2.f32 %v900_v51 }
 0x52f   :  { %v902_v8 = vmul.f32 1.442695, %v895_v4  ;;  %v679_v49 = vmul.f32 1.442695, %v672_v0 }
 0x530   :  { %v666_v37 = vpop.xlane.xlu0 %665 }
 0x531   :  { %5141 = vpow2.f32 %v902_v8  ;;  %v673_v42 = vsub.f32 %v5969_v47, %v666_v37 }
 0x532   :  { %5143 = vpow2.f32 %v679_v49 }
 0x533   :  { %v681_v9 = vmul.f32 1.442695, %v673_v42 }
 0x534   :  { %v892_v25 = vpop.xlane.xlu1 %891  ;;  %v889_v29 = vpop.xlane.xlu0 %888 }
 0x535   :  { %5145 = vpow2.f32 %v681_v9  ;;  %v897_v43 = vsub.f32 %v5985_v3, %v892_v25  ;;  %v896_v20 = vsub.f32 %v5976_v36, %v889_v29 }
 0x536   :  { %v5134_v21 = vpop.eup %5133 }
 0x537   :  { %v906_v26 = vmul.f32 1.442695, %v897_v43  ;;  %v904_v19 = vmul.f32 1.442695, %v896_v20  ;;  %v908_v52 = vsel %vm654_vm5, %v5134_v21, 0.0  ;;  %v5136_v34 = vpop.eup %5135 }
 0x538   :  { %909 = vadd.xlane.f32.xlu0 %v908_v52  ;;  %v669_v18 = vpop.xlane.xlu0 %668  ;;  %v685_v9 = vsel %vm654_vm5, %v5136_v34, 0.0 }
 0x539   :  { %5147 = vpow2.f32 %v906_v26  ;;  %v674_v47 = vsub.f32 %v5993_v10, %v669_v18  ;;  %v1197_v18 = vsel %vm712_vm3, %v6045_v57, 0 }
 0x53a   :  { %v6082_v39 = vpop.eup %5137  ;;  %5149 = vpow2.f32 %v904_v19 }
 0x53b   :  { %v5140_v6 = vpop.eup %5139  ;;  %v700_v30 = vpack.c.bf16 %v6082_v39, %v5136_v34  ;;  %v683_v3 = vmul.f32 1.442695, %v674_v47 }
 0x53c   :  { %v911_v36 = vsel %vm654_vm5, %v5140_v6, 0.0  ;;  %v930_v4 = vpop.permute.xlu0 %929  ;;  %v1141_v42 = vpop.xlane.xlu1 %1140  ;;  %v923_v20 = vpack.c.bf16 %v5140_v6, %v5134_v21 }
 0x53d   :  { %5151 = vpow2.f32 %v683_v3  ;;  %912 = vadd.xlane.f32.xlu1 %v911_v36  ;;  %4526 = vmatmul.mubr.msk.bf16.vlgmr.msra.gmra.mxu1 %vm654_vm5, %v700_v30  ;;  %v1154_v52 = vsub.f32 %v5999_v60, %v1141_v42 }
 0x53e   :  { %v5142_v51 = vpop.eup %5141  ;;  %4556 = vmatpush3.bf16.msra.mxu1 %v947_v45  ;;  %4529 = vmatprep.mubr.msk.bf16.mxu1 %vm5380_vm1, %v5376_v59 }
 0x53f   :  { %v914_v10 = vsel %vm654_vm5, %v5142_v51, 0.0  ;;  %4557 = vmatprep.subr.bf16.mxu1 %v5376_v59  ;;  %v5144_v56 = vpop.eup %5143  ;;  %v1159_v21 = vmul.f32 1.442695, %v1154_v52 }
 0x540   :  { %915 = vadd.xlane.f32.xlu0 %v914_v10  ;;  %v691_v29 = vsel %vm654_vm5, %v5144_v56, 0.0  ;;  %v1144_v43 = vpop.xlane.xlu1 %1143 }
 0x541   :  { %v1155_v26 = vsub.f32 %v6005_v53, %v1144_v43 }
 0x542   :  { %v6092_v61 = vpop.eup %5145  ;;  %4558 = vmatpush3.bf16.msra.mxu1 %v6055_v15 }
 0x543   :  { %4559 = vmatprep.subr.bf16.mxu1 %v5376_v59  ;;  %v701_v32 = vpack.c.bf16 %v6092_v61, %v5144_v56  ;;  %v1161_v34 = vmul.f32 1.442695, %v1155_v26 }
 0x544   :  { %v1147_v57 = vpop.xlane.xlu1 %1146 }
 0x545   :  { %4530 = vmatmul.mubr.msk.bf16.gmra.mxu1 %vm654_vm5, %v701_v32  ;;  %5153 = vpow2.f32 %v1161_v34  ;;  %v1156_v47 = vsub.f32 %v6011_v63, %v1147_v57 }
 0x546   :  { %v5148_v0 = vpop.eup %5147  ;;  %4560 = vmatpush3.bf16.msra.mxu1 %v930_v4  ;;  %4533 = vmatprep.mubr.msk.bf16.mxu1 %vm5380_vm1, %v5376_v59  ;;  %5155 = vpow2.f32 %v1159_v21 }
 0x547   :  { %v5150_v8 = vpop.eup %5149  ;;  %v920_v49 = vsel %vm654_vm5, %v5148_v0, 0.0  ;;  %4591 = vmatprep.subr.bf16.mxu1 %v5376_v59  ;;  %v925_v60 = vpack.c.bf16 %v5148_v0, %v5148_v0 }
 0x548   :  { %921 = vadd.xlane.f32.xlu0 %v920_v49  ;;  %v917_v15 = vsel %vm654_vm5, %v5150_v8, 0.0  ;;  %v924_v53 = vpack.c.bf16 %v5150_v8, %v5142_v51  ;;  %v1415_v63 = vpop.permute.xlu1 %1414 }
 0x549   :  { %918 = vadd.xlane.f32.xlu1 %v917_v15 }
 0x54a   :  { %v5152_v37 = vpop.eup %5151 }
 0x54b   :  { %v702_v25 = vpack.c.bf16 %v5152_v37, %v5152_v37  ;;  %v697_v19 = vsel %vm654_vm5, %v5152_v37, 0.0 }
 0x54c   :  { %686 = vadd.xlane.f32.xlu0 %v685_v9 }
 0x54d   :  { %4534 = vmatmul.mubr.msk.bf16.gmra.mxu1 %vm654_vm5, %v702_v25 }
 0x54e   :  { %4561 = vmatprep.mubr.msk.bf16.mxu1 %vm5380_vm1, %v5376_v59 }
 0x550   :  { %692 = vadd.xlane.f32.xlu0 %v691_v29 }
 0x554   :  { %698 = vadd.xlane.f32.xlu0 %v697_v19  ;;  %v688_v19 = vsel %vm654_vm5, %v6082_v39, 0.0 }
 0x555   :  { %4562 = vmatmul.mubr.msk.bf16.vlgmr.msra.gmra.mxu1 %vm654_vm5, %v923_v20 }
 0x556   :  { %4592 = vmatpush3.bf16.msra.mxu1 %v1197_v18  ;;  %4565 = vmatprep.mubr.msk.bf16.mxu1 %vm5380_vm1, %v5376_v59  ;;  %v694_v18 = vsel %vm654_vm5, %v6092_v61, 0.0 }
 0x557   :  { %4593 = vmatprep.subr.bf16.mxu1 %v5376_v59 }
 0x55a   :  { %4594 = vmatpush3.bf16.msra.mxu1 %v5787_v33  ;;  %v6127_v33 = vpop.eup %5153 }
 0x55b   :  { %4595 = vmatprep.subr.bf16.mxu1 %v5376_v59  ;;  %v5156_v6 = vpop.eup %5155 }
 0x55c   :  { %v1184_v30 = vpack.c.bf16 %v6127_v33, %v5156_v6  ;;  %v1169_v34 = vsel %vm654_vm5, %v5156_v6, 0.0 }
 0x55d   :  { %4566 = vmatmul.mubr.msk.bf16.gmra.mxu1 %vm654_vm5, %v924_v53 }
 0x55e   :  { %4596 = vmatpush3.bf16.msra.mxu1 %v5781_v16  ;;  %4569 = vmatprep.mubr.msk.bf16.mxu1 %vm5380_vm1, %v5376_v59  ;;  %v1163_v16 = vmul.f32 1.442695, %v1156_v47 }
 0x55f   :  { %4627 = vmatprep.subr.bf16.mxu1 %v5376_v59 }
 0x560   :  { %5157 = vpow2.f32 %v1163_v16 }
 0x565   :  { %4570 = vmatmul.mubr.msk.bf16.gmra.mxu1 %vm654_vm5, %v925_v60 }
 0x566   :  { %4597 = vmatprep.mubr.msk.bf16.mxu1 %vm5380_vm1, %v5376_v59 }
 0x56d   :  { %4598 = vmatmul.mubr.msk.bf16.vlgmr.msra.gmra.mxu1 %vm654_vm5, %v1184_v30  ;;  %v1150_v3 = vpop.xlane.xlu0 %1149  ;;  %v6140_v42 = vpop.eup %5157 }
 0x56e   :  { %v1157_v36 = vsub.f32 %v6021_v41, %v1150_v3  ;;  %4601 = vmatprep.mubr.msk.bf16.mxu1 %vm5380_vm1, %v5376_v59 }
 0x570   :  { %v1165_v45 = vmul.f32 1.442695, %v1157_v36 }
 0x571   :  { %v1153_v51 = vpop.xlane.xlu0 %1152 }
 0x572   :  { %5159 = vpow2.f32 %v1165_v45  ;;  %v1158_v10 = vsub.f32 %v6027_v35, %v1153_v51 }
 0x574   :  { %v1167_v56 = vmul.f32 1.442695, %v1158_v10 }
 0x575   :  { %v1363_v32 = vpop.xlane.xlu0 %1362 }
 0x576   :  { %v1376_v4 = vsub.f32 %v6033_v48, %v1363_v32  ;;  %5161 = vpow2.f32 %v1167_v56 }
 0x578   :  { %v1381_v0 = vmul.f32 1.442695, %v1376_v4 }
 0x579   :  { %v1366_v8 = vpop.xlane.xlu1 %1365  ;;  %v1417_v49 = vpop.permute.xlu0 %1416 }
 0x57a   :  { %5163 = vpow2.f32 %v1381_v0  ;;  %v1377_v41 = vsub.f32 %v6039_v50, %v1366_v8  ;;  %v1430_v15 = vsel %vm712_vm3, %v1417_v49, 0  ;;  %v5049_v0 = vld [vmem:[%s7564_s4 + $0x18] sm:$0xff]  }
 0x57b   :  { %4628 = vmatpush3.bf16.msra.mxu1 %v1430_v15  ;;  %4646 = vmatpush3.bf16.msra.mxu0 %v5049_v0 }
 0x57c   :  { %v1383_v37 = vmul.f32 1.442695, %v1377_v41  ;;  %4629 = vmatprep.subr.bf16.mxu1 %v5376_v59  ;;  %4647 = vmatprep.subr.bf16.mxu0 %v5376_v59 }
 0x57d   :  { %v1413_v9 = vpop.permute.xlu1 %1412 }
 0x57e   :  { %5165 = vpow2.f32 %v1383_v37  ;;  %v5050_v37 = vld [vmem:[%s7564_s4 + $0x10] sm:$0xff]  }
 0x57f   :  { %v6142_v35 = vpop.eup %5159  ;;  %4630 = vmatpush3.bf16.msra.mxu1 %v1415_v63  ;;  %4648 = vmatpush3.bf16.msra.mxu0 %v5050_v37 }
 0x580   :  { %v1185_v48 = vpack.c.bf16 %v6142_v35, %v6140_v42  ;;  %4631 = vmatprep.subr.bf16.mxu1 %v5376_v59  ;;  %4649 = vmatprep.subr.bf16.mxu0 %v5376_v59 }
 0x582   :  { %4602 = vmatmul.mubr.msk.bf16.gmra.mxu1 %vm654_vm5, %v1185_v48 }
 0x583   :  { %4632 = vmatpush3.bf16.msra.mxu1 %v1413_v9  ;;  %4605 = vmatprep.mubr.msk.bf16.mxu1 %vm5380_vm1, %v5376_v59  ;;  %v6151_v50 = vpop.eup %5161 }
 0x584   :  { %4673 = vmatprep.subr.bf16.mxu1 %v5376_v59  ;;  %v1186_v43 = vpack.c.bf16 %v6151_v50, %v6151_v50 }
 0x587   :  { %v5164_v25 = vpop.eup %5163 }
 0x588   :  { %v1391_v29 = vsel %vm654_vm5, %v5164_v25, 0.0 }
 0x589   :  { %1392 = vadd.xlane.f32.xlu1 %v1391_v29 }
 0x58a   :  { %4606 = vmatmul.mubr.msk.bf16.gmra.mxu1 %vm654_vm5, %v1186_v43 }
 0x58b   :  { %v5166_v20 = vpop.eup %5165  ;;  %4633 = vmatprep.mubr.msk.bf16.mxu1 %vm5380_vm1, %v5376_v59 }
 0x58c   :  { %v1394_v26 = vsel %vm654_vm5, %v5166_v20, 0.0  ;;  %v1406_v52 = vpack.c.bf16 %v5166_v20, %v5164_v25  ;;  %v5051_v25 = vld [vmem:[%s7564_s4 + $0x8] sm:$0xff]  }
 0x58d   :  { %1395 = vadd.xlane.f32.xlu0 %v1394_v26  ;;  %689 = vadd.xlane.f32.xlu1 %v688_v19  ;;  %v5052_v19 = vld [vmem:[%s7564_s4] sm:$0xff]  }
 0x58e   :  { %4650 = vmatpush3.bf16.msra.mxu0 %v5051_v25  ;;  %v1178_v25 = vsel %vm654_vm5, %v6142_v35, 0.0 }
 0x58f   :  { %4651 = vmatprep.subr.bf16.mxu0 %v5376_v59 }
 0x591   :  { %695 = vadd.xlane.f32.xlu1 %v694_v18 }
 0x592   :  { %4634 = vmatmul.mubr.msk.bf16.vlgmr.msra.gmra.mxu1 %vm654_vm5, %v1406_v52  ;;  %4652 = vmatpush3.bf16.msra.mxu0 %v5052_v19  ;;  %v1181_v19 = vsel %vm654_vm5, %v6151_v50, 0.0 }
 0x593   :  { %4637 = vmatprep.mubr.msk.bf16.mxu1 %vm5380_vm1, %v5376_v59  ;;  %4701 = vmatprep.subr.bf16.mxu0 %v5376_v59 }
 0x595   :  { %1170 = vadd.xlane.f32.xlu1 %v1169_v34 }
 0x5aa   :  { %v1372_v21 = vpop.xlane.xlu0 %1371 }
 0x5ab   :  { %v1379_v53 = vsub.f32 %v6053_v27, %v1372_v21 }
 0x5ad   :  { %v1387_v60 = vmul.f32 1.442695, %v1379_v53 }
 0x5ae   :  { %v1369_v39 = vpop.xlane.xlu1 %1368  ;;  %v1375_v57 = vpop.xlane.xlu0 %1374 }
 0x5af   :  { %5167 = vpow2.f32 %v1387_v60  ;;  %v1378_v47 = vsub.f32 %v6061_v7, %v1369_v39  ;;  %v1380_v61 = vsub.f32 %v6065_v12, %v1375_v57 }
 0x5b1   :  { %v1385_v30 = vmul.f32 1.442695, %v1378_v47  ;;  %v1389_v16 = vmul.f32 1.442695, %v1380_v61 }
 0x5b3   :  { %5169 = vpow2.f32 %v1385_v30 }
 0x5b4   :  { %5171 = vpow2.f32 %v1389_v16 }
 0x5bc   :  { %v5168_v3 = vpop.eup %5167 }
 0x5bd   :  { %v1400_v36 = vsel %vm654_vm5, %v5168_v3, 0.0 }
 0x5be   :  { %1401 = vadd.xlane.f32.xlu0 %v1400_v36 }
 0x5c0   :  { %v5170_v6 = vpop.eup %5169 }
 0x5c1   :  { %v1397_v45 = vsel %vm654_vm5, %v5170_v6, 0.0  ;;  %v1407_v27 = vpack.c.bf16 %v5168_v3, %v5170_v6  ;;  %v5172_v51 = vpop.eup %5171  ;;  %v910_v49 = vpop.xlane.xlu0 %909 }
 0x5c2   :  { %1398 = vadd.xlane.f32.xlu1 %v1397_v45  ;;  %v1403_v7 = vsel %vm654_vm5, %v5172_v51, 0.0  ;;  %v1408_v12 = vpack.c.bf16 %v5172_v51, %v5172_v51  ;;  %5173 = vrcp.f32 %v910_v49 }
 0x5c3   :  { %4638 = vmatmul.mubr.msk.bf16.gmra.mxu1 %vm654_vm5, %v1407_v27 }
 0x5c4   :  { %4641 = vmatprep.mubr.msk.bf16.mxu1 %vm5380_vm1, %v5376_v59 }
 0x5c6   :  { %1404 = vadd.xlane.f32.xlu1 %v1403_v7  ;;  %v913_v41 = vpop.xlane.xlu1 %912 }
 0x5c7   :  { %5175 = vrcp.f32 %v913_v41 }
 0x5c9   :  { %v916_v43 = vpop.xlane.xlu0 %915 }
 0x5ca   :  { %5177 = vrcp.f32 %v916_v43 }
 0x5cb   :  { %4642 = vmatmul.mubr.msk.bf16.gmra.mxu1 %vm654_vm5, %v1408_v12 }
 0x5cc   :  { %4681 = vmatprep.mubr.msk.bf16.mxu1 %vm5380_vm1, %v5376_v59 }
 0x5cf   :  { %v5174_v21 = vpop.eup %5173 }
 0x5d2   :  { %v919_v20 = vpop.xlane.xlu1 %918 }
 0x5d3   :  { %5179 = vrcp.f32 %v919_v20 }
 0x5d4   :  { %v5176_v53 = vpop.eup %5175 }
 0x5d7   :  { %v5178_v3 = vpop.eup %5177 }
 0x5e0   :  { %v5180_v36 = vpop.eup %5179 }
 0x5fd   :  { %v6180_v10 = vpop.f32.mrf.mxu1 }
 0x5ff   :  { %v4527_v56 = vpop.f32.mrf.mxu1 }
 0x601   :  { %v6182_v63 = vpop.f32.mrf.mxu1 }
 0x603   :  { %v4528_v32 = vpop.f32.mrf.mxu1 }
 0x605   :  { %v6184_v4 = vpop.f32.mrf.mxu1 }
 0x607   :  { %v4531_v8 = vpop.f32.mrf.mxu1 }
 0x609   :  { %v6189_v15 = vpop.f32.mrf.mxu1 }
 0x60b   :  { %v4532_v48 = vpop.f32.mrf.mxu1 }
 0x60c   :  { %v1175_v48 = vsel %vm654_vm5, %v6140_v42, 0.0 }
 0x60d   :  { %v6195_v9 = vpop.f32.mrf.mxu1 }
 0x60f   :  { %v4535_v29 = vpop.f32.mrf.mxu1 }
 0x610   :  { %v922_v29 = vpop.xlane.xlu0 %921 }
 0x611   :  { %v769_v26 = vpop.f32.mrf.mxu1  ;;  %5181 = vrcp.f32 %v922_v29 }
 0x612   :  { %v1393_v43 = vpop.xlane.xlu1 %1392 }
 0x613   :  { %v4536_v52 = vpop.f32.mrf.mxu1  ;;  %5183 = vrcp.f32 %v1393_v43 }
 0x615   :  { %v983_v18 = vpop.f32.mrf.mxu1 }
 0x616   :  { %v1010_v39 = vmul.f32 %v5174_v21, %v983_v18 }
 0x617   :  { %v4563_v34 = vpop.f32.mrf.mxu1 }
 0x619   :  { %v986_v60 = vpop.f32.mrf.mxu1 }
 0x61a   :  { %v1011_v57 = vmul.f32 %v5176_v53, %v986_v60 }
 0x61b   :  { %v4564_v47 = vpop.f32.mrf.mxu1 }
 0x61c   :  { %v4987_v61 = vpack.i.bf16 %v1011_v57, %v1010_v39 }
 0x61d   :  { %v991_v30 = vpop.f32.mrf.mxu1 }
 0x61e   :  { %4988 = vrot.lane.b32.xlu0 %v4987_v61, %s5378_s23  ;;  %v1012_v45 = vmul.f32 %v5178_v3, %v991_v30  ;;  %v5182_v53 = vpop.eup %5181  ;;  %v690_v3 = vpop.xlane.xlu1 %689 }
 0x61f   :  { %v4567_v16 = vpop.f32.mrf.mxu1 }
 0x620   :  { %v5184_v60 = vpop.eup %5183 }
 0x621   :  { %v994_v6 = vpop.f32.mrf.mxu1 }
 0x622   :  { %v1013_v27 = vmul.f32 %v5180_v36, %v994_v6  ;;  %v687_v36 = vpop.xlane.xlu0 %686  ;;  %v696_v6 = vpop.xlane.xlu1 %695 }
 0x623   :  { %v4568_v51 = vpop.f32.mrf.mxu1 }
 0x624   :  { %v4992_v7 = vpack.i.bf16 %v1013_v27, %v1012_v45 }
 0x625   :  { %v999_v12 = vpop.f32.mrf.mxu1 }
 0x626   :  { %4993 = vrot.lane.b32.xlu1 %v4992_v7, %s5378_s23  ;;  %v1014_v57 = vmul.f32 %v5182_v53, %v999_v12  ;;  %v693_v45 = vpop.xlane.xlu0 %692  ;;  %v1171_v27 = vpop.xlane.xlu1 %1170  ;;  %v1172_v12 = vsel %vm654_vm5, %v6127_v33, 0.0 }
 0x627   :  { %v4571_v56 = vpop.f32.mrf.mxu1 }
 0x629   :  { %v1002_v32 = vpop.f32.mrf.mxu1 }
 0x62a   :  { %v699_v51 = vpop.xlane.xlu0 %698 }
 0x62b   :  { %v4572_v0 = vpop.f32.mrf.mxu1 }
 0x62d   :  { %v6208_v8 = vpop.f32.mrf.mxu1 }
 0x62e   :  { %v1396_v56 = vpop.xlane.xlu0 %1395 }
 0x62f   :  { %v4599_v49 = vpop.f32.mrf.mxu1 }
 0x631   :  { %v6210_v41 = vpop.f32.mrf.mxu1 }
 0x633   :  { %v4600_v37 = vpop.f32.mrf.mxu1 }
 0x63d   :  { %1176 = vadd.xlane.f32.xlu0 %v1175_v48 }
 0x641   :  { %1179 = vadd.xlane.f32.xlu0 %v1178_v25 }
 0x642   :  { %v6216_v20 = vpop.f32.mrf.mxu1 }
 0x644   :  { %v4603_v26 = vpop.f32.mrf.mxu1 }
 0x645   :  { %1182 = vadd.xlane.f32.xlu0 %v1181_v19 }
 0x646   :  { %v6220_v52 = vpop.f32.mrf.mxu1 }
 0x647   :  { %v1402_v32 = vpop.xlane.xlu0 %1401 }
 0x648   :  { %v4604_v18 = vpop.f32.mrf.mxu1 }
 0x64a   :  { %v6222_v42 = vpop.f32.mrf.mxu1 }
 0x64b   :  { %v1399_v7 = vpop.xlane.xlu1 %1398 }
 0x64c   :  { %v4607_v34 = vpop.f32.mrf.mxu1  ;;  %5185 = vrcp.f32 %v1399_v7 }
 0x64d   :  { %5187 = vrcp.f32 %v1396_v56 }
 0x64e   :  { %v1252_v21 = vpop.f32.mrf.mxu1  ;;  %5189 = vrcp.f32 %v1402_v32 }
 0x64f   :  { %v1405_v0 = vpop.xlane.xlu1 %1404 }
 0x650   :  { %v4608_v35 = vpop.f32.mrf.mxu1  ;;  %5191 = vrcp.f32 %v1405_v0 }
 0x651   :  { %5193 = vrcp.f32 %v690_v3 }
 0x652   :  { %v1466_v39 = vpop.f32.mrf.mxu1  ;;  %5195 = vrcp.f32 %v687_v36 }
 0x653   :  { %v1493_v47 = vmul.f32 %v5184_v60, %v1466_v39  ;;  %5197 = vrcp.f32 %v696_v6 }
 0x654   :  { %v4635_v61 = vpop.f32.mrf.mxu1  ;;  %5199 = vrcp.f32 %v693_v45 }
 0x655   :  { %v4997_v30 = vpack.i.bf16 %v1493_v47, %v1014_v57  ;;  %5201 = vrcp.f32 %v1171_v27 }
 0x656   :  { %v1469_v16 = vpop.f32.mrf.mxu1  ;;  %5203 = vrcp.f32 %v699_v51 }
 0x657   :  { %4998 = vrot.lane.b32.xlu1 %v4997_v30, %s5378_s23 }
 0x658   :  { %v4636_v50 = vpop.f32.mrf.mxu1 }
 0x659   :  { %v5186_v37 = vpop.eup %5185 }
 0x65a   :  { %v5188_v29 = vpop.eup %5187 }
 0x65b   :  { %v1494_v26 = vmul.f32 %v5188_v29, %v1469_v16  ;;  %v5190_v18 = vpop.eup %5189 }
 0x65d   :  { %v5192_v21 = vpop.eup %5191 }
 0x65e   :  { %v5194_v39 = vpop.eup %5193 }
 0x65f   :  { %v5196_v61 = vpop.eup %5195  ;;  %v778_v50 = vmul.f32 %v5194_v39, %v6182_v63 }
 0x660   :  { %v777_v16 = vmul.f32 %v5196_v61, %v6180_v10  ;;  %v5198_v32 = vpop.eup %5197 }
 0x661   :  { %v780_v63 = vmul.f32 %v5198_v32, %v6189_v15 }
 0x67b   :  { %1173 = vadd.xlane.f32.xlu1 %v1172_v12  ;;  %v5200_v12 = vpop.eup %5199 }
 0x67c   :  { %v779_v10 = vmul.f32 %v5200_v12, %v6184_v4 }
 0x683   :  { %v1474_v49 = vpop.f32.mrf.mxu1 }
 0x684   :  { %v1495_v25 = vmul.f32 %v5186_v37, %v1474_v49 }
 0x685   :  { %v4639_v48 = vpop.f32.mrf.mxu1 }
 0x686   :  { %v5002_v34 = vpack.i.bf16 %v1495_v25, %v1494_v26 }
 0x687   :  { %v1477_v43 = vpop.f32.mrf.mxu1 }
 0x688   :  { %v1496_v35 = vmul.f32 %v5190_v18, %v1477_v43  ;;  %v5202_v43 = vpop.eup %5201 }
 0x689   :  { %v4640_v19 = vpop.f32.mrf.mxu1  ;;  %v5204_v26 = vpop.eup %5203  ;;  %v1260_v15 = vmul.f32 %v5202_v43, %v6208_v8 }
 0x68a   :  { %v781_v4 = vmul.f32 %v5204_v26, %v6195_v9 }
 0x68b   :  { %v1482_v33 = vpop.f32.mrf.mxu1 }
 0x68c   :  { %v1497_v53 = vmul.f32 %v5192_v21, %v1482_v33  ;;  %5003 = vrot.lane.b32.xlu1 %v5002_v34, %s5378_s23 }
 0x68d   :  { %v4643_v60 = vpop.f32.mrf.mxu1 }
 0x68e   :  { %v5007_v57 = vpack.i.bf16 %v1497_v53, %v1496_v35 }
 0x68f   :  { %v1485_v47 = vpop.f32.mrf.mxu1 }
 0x690   :  { %5008 = vrot.lane.b32.xlu0 %v5007_v57, %s5378_s23  ;;  %v4989_v30 = vpop.permute.xlu0 %4988 }
 0x691   :  { %v4991_v3 = vunpack.i.h.bf16 %v4989_v30  ;;  %v4990_v36 = vunpack.i.l.bf16 %v4989_v30  ;;  %v4644_v6 = vpop.f32.mrf.mxu1 }
 0x693   :  { %v1036_v45 = vsel %vm569_vm2, %v778_v50, %v4991_v3  ;;  %v1035_v7 = vsel %vm569_vm2, %v777_v16, %v4990_v36 }
 0x694   :  { %v1523_v56 = vpack.c.bf16 %v1036_v45, %v1035_v7 }
 0x696   :  { %4654 = vmatmul.mubr.msk.bf16.vlgmr.msra.gmra.mxu0 %vm42_vm0, %v1523_v56 }
 0x697   :  { %4657 = vmatprep.mubr.msk.bf16.mxu0 %vm5380_vm1, %v5376_v59 }
 0x698   :  { %v4994_v0 = vpop.permute.xlu1 %4993 }
 0x699   :  { %v4996_v49 = vunpack.i.h.bf16 %v4994_v0  ;;  %v4995_v37 = vunpack.i.l.bf16 %v4994_v0 }
 0x69b   :  { %v1038_v48 = vsel %vm569_vm2, %v780_v63, %v4996_v49  ;;  %v1037_v25 = vsel %vm569_vm2, %v779_v10, %v4995_v37  ;;  %v1538_v10 = vsub.s32 3, %v5713_v13 }
 0x69c   :  { %v1524_v29 = vpack.c.bf16 %v1038_v48, %v1037_v25 }
 0x69e   :  { %4658 = vmatmul.mubr.msk.bf16.gmra.mxu0 %vm42_vm0, %v1524_v29 }
 0x69f   :  { %4661 = vmatprep.mubr.msk.bf16.mxu0 %vm5380_vm1, %v5376_v59 }
 0x6c6   :  { %v1177_v27 = vpop.xlane.xlu0 %1176 }
 0x6c7   :  { %5205 = vrcp.f32 %v1177_v27 }
 0x6c9   :  { %v4999_v19 = vpop.permute.xlu1 %4998 }
 0x6ca   :  { %v5001_v18 = vunpack.i.h.bf16 %v4999_v19  ;;  %v5000_v34 = vunpack.i.l.bf16 %v4999_v19  ;;  %v1180_v51 = vpop.xlane.xlu0 %1179 }
 0x6cc   :  { %v1518_v21 = vsel %vm569_vm2, %v1260_v15, %v5001_v18  ;;  %v1039_v33 = vsel %vm569_vm2, %v781_v4, %v5000_v34 }
 0x6cd   :  { %v1525_v35 = vpack.c.bf16 %v1518_v21, %v1039_v33 }
 0x6ce   :  { %v1183_v9 = vpop.xlane.xlu0 %1182 }
 0x6cf   :  { %4662 = vmatmul.mubr.msk.bf16.gmra.mxu0 %vm42_vm0, %v1525_v35 }
 0x6d0   :  { %4665 = vmatprep.mubr.msk.bf16.mxu0 %vm5380_vm1, %v5376_v59 }
 0x6d4   :  { %v5206_v60 = vpop.eup %5205 }
 0x6d5   :  { %v1262_v30 = vmul.f32 %v5206_v60, %v6216_v20 }
 0x702   :  { %v5009_v16 = vpop.permute.xlu0 %5008 }
 0x703   :  { %v5011_v7 = vunpack.i.h.bf16 %v5009_v16  ;;  %v5010_v56 = vunpack.i.l.bf16 %v5009_v16 }
 0x704   :  { %v1174_v53 = vpop.xlane.xlu1 %1173 }
 0x705   :  { %5207 = vrcp.f32 %v1174_v53 }
 0x706   :  { %5209 = vrcp.f32 %v1180_v51 }
 0x707   :  { %5211 = vrcp.f32 %v1183_v9 }
 0x708   :  { %v5004_v8 = vpop.permute.xlu1 %5003 }
 0x709   :  { %v5006_v39 = vunpack.i.h.bf16 %v5004_v8  ;;  %v5005_v61 = vunpack.i.l.bf16 %v5004_v8 }
 0x70b   :  { %v1520_v36 = vsel %vm569_vm2, %v1262_v30, %v5006_v39 }
 0x712   :  { %v5208_v57 = vpop.eup %5207 }
 0x713   :  { %v1261_v47 = vmul.f32 %v5208_v57, %v6210_v41  ;;  %v5210_v50 = vpop.eup %5209 }
 0x714   :  { %v5212_v6 = vpop.eup %5211  ;;  %v1263_v32 = vmul.f32 %v5210_v50, %v6220_v52  ;;  %v6268_v52 = vld [vmem:[%s7563_s7] sm:$0xff] }
 0x715   :  { %v1519_v3 = vsel %vm569_vm2, %v1261_v47, %v5005_v61  ;;  %v1264_v12 = vmul.f32 %v5212_v6, %v6222_v42  ;;  %v1539_v42 = vrot.slane %v6268_v52, %v1538_v10 }
 0x716   :  { %v1526_v45 = vpack.c.bf16 %v1520_v36, %v1519_v3  ;;  %v1521_v20 = vsel %vm569_vm2, %v1263_v32, %v5010_v56 }
 0x717   :  { %v1522_v41 = vsel %vm569_vm2, %v1264_v12, %v5011_v7 }
 0x718   :  { %4666 = vmatmul.mubr.msk.bf16.gmra.mxu0 %vm42_vm0, %v1526_v45  ;;  %v1527_v0 = vpack.c.bf16 %v1522_v41, %v1521_v20 }
 0x719   :  { %4669 = vmatprep.mubr.msk.bf16.mxu0 %vm5380_vm1, %v5376_v59 }
 0x720   :  { %4670 = vmatmul.mubr.msk.bf16.gmra.mxu0 %vm42_vm0, %v1527_v0 }
 0x721   :  { %4717 = vmatprep.mubr.msk.bf16.mxu0 %vm5380_vm1, %v5376_v59 }
 0x756   :  { %v1613_v63 = vpop.f32.mrf.mxu0 }
 0x757   :  { %v1614_v49 = vadd.f32 %v1613_v63, %v1539_v42 }
 0x758   :  { %v4655_v37 = vpop.f32.mrf.mxu0 }
 0x759   :  { %v6274_v48 = vadd.f32 %v1614_v49, %v5534_v54 }
 0x75a   :  { %v1616_v25 = vpop.f32.mrf.mxu0 }
 0x75b   :  { %v1617_v29 = vadd.f32 %v1616_v25, %v1539_v42  ;;  %v1662_v43 = vsel %vm42_vm0, %v6274_v48, 0.0 }
 0x75c   :  { %1663 = vadd.xlane.f32.xlu1 %v1662_v43  ;;  %v4656_v26 = vpop.f32.mrf.mxu0 }
 0x75d   :  { %v6279_v19 = vadd.f32 %v1617_v29, %v5550_v2 }
 0x75e   :  { %v1621_v4 = vpop.f32.mrf.mxu0 }
 0x75f   :  { %v1622_v15 = vadd.f32 %v1621_v4, %v1539_v42  ;;  %v1665_v18 = vsel %vm42_vm0, %v6279_v19, 0.0 }
 0x760   :  { %1666 = vadd.xlane.f32.xlu0 %v1665_v18  ;;  %v4659_v34 = vpop.f32.mrf.mxu0 }
 0x761   :  { %v6284_v54 = vadd.f32 %v1622_v15, %v5553_v5 }
 0x762   :  { %v1624_v21 = vpop.f32.mrf.mxu0 }
 0x763   :  { %v1625_v33 = vadd.f32 %v1624_v21, %v1539_v42  ;;  %v1668_v35 = vsel %vm42_vm0, %v6284_v54, 0.0 }
 0x764   :  { %1669 = vadd.xlane.f32.xlu1 %v1668_v35  ;;  %v4660_v27 = vpop.f32.mrf.mxu0 }
 0x765   :  { %v6289_v2 = vadd.f32 %v1625_v33, %v5570_v14 }
 0x767   :  { %v1671_v51 = vsel %vm42_vm0, %v6289_v2, 0.0 }
 0x768   :  { %1672 = vadd.xlane.f32.xlu0 %v1671_v51 }
 0x78f   :  { %v1629_v53 = vpop.f32.mrf.mxu0 }
 0x790   :  { %v1630_v9 = vadd.f32 %v1629_v53, %v1539_v42 }
 0x791   :  { %v4663_v8 = vpop.f32.mrf.mxu0 }
 0x792   :  { %v6294_v5 = vadd.f32 %v1630_v9, %v5573_v17 }
 0x793   :  { %v1632_v60 = vpop.f32.mrf.mxu0 }
 0x794   :  { %v1633_v39 = vadd.f32 %v1632_v60, %v1539_v42  ;;  %v1674_v57 = vsel %vm42_vm0, %v6294_v5, 0.0  ;;  %v5053_v60 = vld [vmem:[%s7565_s5 + $0x18] sm:$0xff]  }
 0x795   :  { %1675 = vadd.xlane.f32.xlu1 %v1674_v57  ;;  %v4664_v47 = vpop.f32.mrf.mxu0  ;;  %4674 = vmatpush3.bf16.msra.mxu1 %v5053_v60  ;;  %v5055_v57 = vld [vmem:[%s7565_s5 + $0x8] sm:$0xff]  }
 0x796   :  { %v6299_v14 = vadd.f32 %v1633_v39, %v5590_v28  ;;  %4675 = vmatprep.subr.bf16.mxu1 %v5376_v59  ;;  %v5054_v39 = vld [vmem:[%s7565_s5 + $0x10] sm:$0xff]   ;;  %v5056_v47 = vld [vmem:[%s7565_s5] sm:$0xff]  }
 0x798   :  { %v1677_v61 = vsel %vm42_vm0, %v6299_v14, 0.0 }
 0x799   :  { %1678 = vadd.xlane.f32.xlu0 %v1677_v61  ;;  %4676 = vmatpush3.bf16.msra.mxu1 %v5054_v39 }
 0x79a   :  { %4677 = vmatprep.subr.bf16.mxu1 %v5376_v59 }
 0x79d   :  { %4678 = vmatpush3.bf16.msra.mxu1 %v5055_v57 }
 0x79e   :  { %4679 = vmatprep.subr.bf16.mxu1 %v5376_v59 }
 0x7a1   :  { %4680 = vmatpush3.bf16.msra.mxu1 %v5056_v47 }
 0x7d8   :  { %v1637_v30 = vpop.f32.mrf.mxu0 }
 0x7d9   :  { %v1638_v16 = vadd.f32 %v1637_v30, %v1539_v42 }
 0x7da   :  { %v4667_v50 = vpop.f32.mrf.mxu0 }
 0x7db   :  { %v6304_v17 = vadd.f32 %v1638_v16, %v5593_v31 }
 0x7dc   :  { %v1640_v3 = vpop.f32.mrf.mxu0 }
 0x7dd   :  { %v1641_v36 = vadd.f32 %v1640_v3, %v1539_v42  ;;  %v1680_v6 = vsel %vm42_vm0, %v6304_v17, 0.0 }
 0x7de   :  { %1681 = vadd.xlane.f32.xlu1 %v1680_v6  ;;  %v4668_v45 = vpop.f32.mrf.mxu0 }
 0x7df   :  { %v6309_v28 = vadd.f32 %v1641_v36, %v5609_v44 }
 0x7e0   :  { %v1645_v7 = vpop.f32.mrf.mxu0 }
 0x7e1   :  { %v1646_v56 = vadd.f32 %v1645_v7, %v1539_v42  ;;  %v1683_v32 = vsel %vm42_vm0, %v6309_v28, 0.0 }
 0x7e2   :  { %1684 = vadd.xlane.f32.xlu0 %v1683_v32  ;;  %v4671_v12 = vpop.f32.mrf.mxu0 }
 0x7e3   :  { %v6314_v31 = vadd.f32 %v1646_v56, %v5612_v46 }
 0x7e4   :  { %v1648_v41 = vpop.f32.mrf.mxu0 }
 0x7e5   :  { %v1649_v20 = vadd.f32 %v1648_v41, %v1539_v42  ;;  %v1664_v0 = vpop.xlane.xlu1 %1663  ;;  %v1686_v63 = vsel %vm42_vm0, %v6314_v31, 0.0 }
 0x7e6   :  { %v1692_v49 = vmul.f32 0.015625, %v1664_v0  ;;  %1687 = vadd.xlane.f32.xlu1 %v1686_v63  ;;  %v4672_v44 = vpop.f32.mrf.mxu0 }
 0x7e7   :  { %v6319_v37 = vadd.f32 %v1649_v20, %v5622_v24 }
 0x7e8   :  { %v6322_v25 = vsub.f32 %v6274_v48, %v1692_v49 }
 0x7e9   :  { %v1667_v29 = vpop.xlane.xlu0 %1666  ;;  %v1689_v46 = vsel %vm42_vm0, %v6319_v37, 0.0 }
 0x7ea   :  { %v1693_v43 = vmul.f32 0.015625, %v1667_v29  ;;  %1690 = vadd.xlane.f32.xlu0 %v1689_v46  ;;  %v1712_v42 = vmul.f32 %v6322_v25, %v6322_v25 }
 0x7ec   :  { %v6329_v26 = vsub.f32 %v6279_v19, %v1693_v43  ;;  %v1722_v4 = vsel %vm42_vm0, %v1712_v42, 0.0 }
 0x7ed   :  { %v1670_v15 = vpop.xlane.xlu1 %1669  ;;  %1723 = vadd.xlane.f32.xlu1 %v1722_v4 }
 0x7ee   :  { %v1694_v24 = vmul.f32 0.015625, %v1670_v15  ;;  %v1713_v18 = vmul.f32 %v6329_v26, %v6329_v26 }
 0x7f0   :  { %v6335_v34 = vsub.f32 %v6284_v54, %v1694_v24  ;;  %v1725_v21 = vsel %vm42_vm0, %v1713_v18, 0.0 }
 0x7f1   :  { %v1673_v33 = vpop.xlane.xlu0 %1672  ;;  %1726 = vadd.xlane.f32.xlu0 %v1725_v21 }
 0x7f2   :  { %v1695_v35 = vmul.f32 0.015625, %v1673_v33  ;;  %v1714_v27 = vmul.f32 %v6335_v34, %v6335_v34 }
 0x7f4   :  { %v6341_v51 = vsub.f32 %v6289_v2, %v1695_v35  ;;  %v1728_v53 = vsel %vm42_vm0, %v1714_v27, 0.0 }
 0x7f5   :  { %1729 = vadd.xlane.f32.xlu1 %v1728_v53 }
 0x7f6   :  { %v1715_v9 = vmul.f32 %v6341_v51, %v6341_v51 }
 0x7f8   :  { %v1731_v8 = vsel %vm42_vm0, %v1715_v9, 0.0 }
 0x7f9   :  { %1732 = vadd.xlane.f32.xlu0 %v1731_v8 }
 0x81e   :  { %v1676_v61 = vpop.xlane.xlu1 %1675 }
 0x81f   :  { %v1696_v30 = vmul.f32 0.015625, %v1676_v61 }
 0x821   :  { %v6363_v16 = vsub.f32 %v6294_v5, %v1696_v30 }
 0x822   :  { %v1679_v50 = vpop.xlane.xlu0 %1678 }
 0x823   :  { %v1697_v3 = vmul.f32 0.015625, %v1679_v50  ;;  %v1716_v36 = vmul.f32 %v6363_v16, %v6363_v16 }
 0x825   :  { %v6368_v6 = vsub.f32 %v6299_v14, %v1697_v3  ;;  %v1734_v45 = vsel %vm42_vm0, %v1716_v36, 0.0  ;;  %v1794_v36 = vsub.s32 4, %v5713_v13 }
 0x826   :  { %1735 = vadd.xlane.f32.xlu1 %v1734_v45 }
 0x827   :  { %v1717_v7 = vmul.f32 %v6368_v6, %v6368_v6 }
 0x829   :  { %v1737_v56 = vsel %vm42_vm0, %v1717_v7, 0.0 }
 0x82a   :  { %1738 = vadd.xlane.f32.xlu0 %v1737_v56  ;;  %v6402_v56 = vrot.slane %v6268_v52, %v1794_v36 }
 0x867   :  { %v1682_v32 = vpop.xlane.xlu1 %1681 }
 0x868   :  { %v1698_v12 = vmul.f32 0.015625, %v1682_v32 }
 0x86a   :  { %v6375_v41 = vsub.f32 %v6304_v17, %v1698_v12  ;;  %v1808_v12 = vsub.s32 5, %v5713_v13 }
 0x86b   :  { %v1685_v20 = vpop.xlane.xlu0 %1684 }
 0x86c   :  { %v1699_v0 = vmul.f32 0.015625, %v1685_v20  ;;  %v1718_v63 = vmul.f32 %v6375_v41, %v6375_v41 }
 0x86e   :  { %v6380_v49 = vsub.f32 %v6309_v28, %v1699_v0  ;;  %v1740_v44 = vsel %vm42_vm0, %v1718_v63, 0.0 }
 0x86f   :  { %1741 = vadd.xlane.f32.xlu1 %v1740_v44  ;;  %v1688_v29 = vpop.xlane.xlu1 %1687  ;;  %v6411_v44 = vrot.slane %v6268_v52, %v1808_v12 }
 0x870   :  { %v1700_v46 = vmul.f32 0.015625, %v1688_v29  ;;  %v1719_v43 = vmul.f32 %v6380_v49, %v6380_v49 }
 0x872   :  { %v6386_v42 = vsub.f32 %v6314_v31, %v1700_v46  ;;  %v1743_v4 = vsel %vm42_vm0, %v1719_v43, 0.0 }
 0x873   :  { %1744 = vadd.xlane.f32.xlu0 %v1743_v4  ;;  %v1691_v15 = vpop.xlane.xlu0 %1690 }
 0x874   :  { %v1701_v24 = vmul.f32 0.015625, %v1691_v15  ;;  %v1720_v18 = vmul.f32 %v6386_v42, %v6386_v42 }
 0x876   :  { %v6392_v21 = vsub.f32 %v6319_v37, %v1701_v24  ;;  %v1724_v33 = vpop.xlane.xlu1 %1723  ;;  %v1746_v35 = vsel %vm42_vm0, %v1720_v18, 0.0 }
 0x877   :  { %v1752_v27 = vmul.f32 0.015625, %v1724_v33  ;;  %1747 = vadd.xlane.f32.xlu1 %v1746_v35 }
 0x878   :  { %v1721_v53 = vmul.f32 %v6392_v21, %v6392_v21 }
 0x879   :  { %v1762_v9 = vadd.f32 1e-05, %v1752_v27 }
 0x87a   :  { %v1727_v8 = vpop.xlane.xlu0 %1726  ;;  %v1749_v60 = vsel %vm42_vm0, %v1721_v53, 0.0 }
 0x87b   :  { %5213 = vrsqrt.f32 %v1762_v9  ;;  %v1753_v39 = vmul.f32 0.015625, %v1727_v8  ;;  %1750 = vadd.xlane.f32.xlu0 %v1749_v60  ;;  %v5059_v9 = vld [vmem:[%s7566_s6 + $0x28] sm:$0xff]   ;;  %v5060_v8 = vld [vmem:[%s7566_s6 + $0x20] sm:$0xff]   ;;  %v5061_v60 = vld [vmem:[%s7566_s6 + $0x18] sm:$0xff]  }
 0x87d   :  { %v1763_v57 = vadd.f32 1e-05, %v1753_v39 }
 0x87e   :  { %v1730_v47 = vpop.xlane.xlu1 %1729 }
 0x87f   :  { %5215 = vrsqrt.f32 %v1763_v57  ;;  %v1754_v61 = vmul.f32 0.015625, %v1730_v47 }
 0x881   :  { %v1764_v30 = vadd.f32 1e-05, %v1754_v61 }
 0x882   :  { %v1733_v50 = vpop.xlane.xlu0 %1732 }
 0x883   :  { %5217 = vrsqrt.f32 %v1764_v30  ;;  %v1755_v3 = vmul.f32 0.015625, %v1733_v50 }
 0x885   :  { %v1765_v45 = vadd.f32 1e-05, %v1755_v3 }
 0x887   :  { %5219 = vrsqrt.f32 %v1765_v45 }
 0x888   :  { %v5214_v7 = vpop.eup %5213 }
 0x889   :  { %v1782_v32 = vmul.f32 %v5214_v7, %v6322_v25 }
 0x88b   :  { %v1796_v0 = vmul.f32 %v6402_v56, %v1782_v32 }
 0x88c   :  { %v5216_v20 = vpop.eup %5215 }
 0x88d   :  { %v1783_v63 = vmul.f32 %v5216_v20, %v6329_v26  ;;  %v1810_v43 = vadd.f32 %v6411_v44, %v1796_v0 }
 0x88f   :  { %v1797_v29 = vmul.f32 %v6402_v56, %v1783_v63 }
 0x890   :  { %v5218_v46 = vpop.eup %5217 }
 0x891   :  { %v1811_v4 = vadd.f32 %v6411_v44, %v1797_v29  ;;  %v1784_v25 = vmul.f32 %v5218_v46, %v6335_v34  ;;  %v5057_v34 = vld [vmem:[%s7566_s6 + $0x38] sm:$0xff]  }
 0x892   :  { %4702 = vmatpush3.bf16.msra.mxu0 %v5057_v34 }
 0x893   :  { %v1820_v15 = vpack.c.bf16 %v1811_v4, %v1810_v43  ;;  %v1798_v18 = vmul.f32 %v6402_v56, %v1784_v25  ;;  %4703 = vmatprep.subr.bf16.mxu0 %v5376_v59  ;;  %v5064_v43 = vld [vmem:[%s7566_s6] sm:$0xff]  }
 0x894   :  { %v5220_v24 = vpop.eup %5219 }
 0x895   :  { %4682 = vmatmul.mubr.msk.bf16.vlgmr.msra.gmra.mxu1 %vm42_vm0, %v1820_v15  ;;  %v1785_v26 = vmul.f32 %v5220_v24, %v6341_v51  ;;  %v1812_v35 = vadd.f32 %v6411_v44, %v1798_v18  ;;  %v5058_v51 = vld [vmem:[%s7566_s6 + $0x30] sm:$0xff]  }
 0x896   :  { %4685 = vmatprep.mubr.msk.bf16.mxu1 %vm5380_vm1, %v5376_v59  ;;  %4704 = vmatpush3.bf16.msra.mxu0 %v5058_v51 }
 0x897   :  { %v1799_v33 = vmul.f32 %v6402_v56, %v1785_v26  ;;  %4705 = vmatprep.subr.bf16.mxu0 %v5376_v59 }
 0x899   :  { %v1813_v27 = vadd.f32 %v6411_v44, %v1799_v33 }
 0x89a   :  { %4706 = vmatpush3.bf16.msra.mxu0 %v5059_v9 }
 0x89b   :  { %v1821_v53 = vpack.c.bf16 %v1813_v27, %v1812_v35  ;;  %4707 = vmatprep.subr.bf16.mxu0 %v5376_v59 }
 0x89d   :  { %4686 = vmatmul.mubr.msk.bf16.gmra.mxu1 %vm42_vm0, %v1821_v53 }
 0x89e   :  { %4689 = vmatprep.mubr.msk.bf16.mxu1 %vm5380_vm1, %v5376_v59  ;;  %4708 = vmatpush3.bf16.msra.mxu0 %v5060_v8 }
 0x89f   :  { %4709 = vmatprep.subr.bf16.mxu0 %v5376_v59 }
 0x8a2   :  { %4710 = vmatpush3.bf16.msra.mxu0 %v5061_v60 }
 0x8a3   :  { %4711 = vmatprep.subr.bf16.mxu0 %v5376_v59 }
 0x8af   :  { %v1736_v39 = vpop.xlane.xlu1 %1735 }
 0x8b0   :  { %v1756_v57 = vmul.f32 0.015625, %v1736_v39 }
 0x8b2   :  { %v1766_v47 = vadd.f32 1e-05, %v1756_v57 }
 0x8b3   :  { %v1739_v61 = vpop.xlane.xlu0 %1738 }
 0x8b4   :  { %5221 = vrsqrt.f32 %v1766_v47  ;;  %v1757_v30 = vmul.f32 0.015625, %v1739_v61 }
 0x8b6   :  { %v1767_v50 = vadd.f32 1e-05, %v1757_v30 }
 0x8b8   :  { %5223 = vrsqrt.f32 %v1767_v50 }
 0x8c1   :  { %v5222_v3 = vpop.eup %5221 }
 0x8c2   :  { %v1786_v45 = vmul.f32 %v5222_v3, %v6363_v16  ;;  %v5062_v16 = vld [vmem:[%s7566_s6 + $0x10] sm:$0xff]  }
 0x8c3   :  { %4712 = vmatpush3.bf16.msra.mxu0 %v5062_v16 }
 0x8c4   :  { %v1800_v20 = vmul.f32 %v6402_v56, %v1786_v45  ;;  %4713 = vmatprep.subr.bf16.mxu0 %v5376_v59 }
 0x8c5   :  { %v5224_v7 = vpop.eup %5223 }
 0x8c6   :  { %v1787_v32 = vmul.f32 %v5224_v7, %v6368_v6  ;;  %v1814_v63 = vadd.f32 %v6411_v44, %v1800_v20  ;;  %v5063_v6 = vld [vmem:[%s7566_s6 + $0x8] sm:$0xff]  }
 0x8c7   :  { %4714 = vmatpush3.bf16.msra.mxu0 %v5063_v6 }
 0x8c8   :  { %v1801_v0 = vmul.f32 %v6402_v56, %v1787_v32  ;;  %4715 = vmatprep.subr.bf16.mxu0 %v5376_v59 }
 0x8ca   :  { %v1815_v29 = vadd.f32 %v6411_v44, %v1801_v0 }
 0x8cb   :  { %4716 = vmatpush3.bf16.msra.mxu0 %v5064_v43 }
 0x8cc   :  { %v1822_v46 = vpack.c.bf16 %v1815_v29, %v1814_v63  ;;  %4737 = vmatprep.subr.bf16.mxu0 %v5376_v59 }
 0x8ce   :  { %4690 = vmatmul.mubr.msk.bf16.gmra.mxu1 %vm42_vm0, %v1822_v46 }
 0x8cf   :  { %4693 = vmatprep.mubr.msk.bf16.mxu1 %vm5380_vm1, %v5376_v59 }
 0x8f8   :  { %v1742_v4 = vpop.xlane.xlu1 %1741 }
 0x8f9   :  { %v1758_v25 = vmul.f32 0.015625, %v1742_v4 }
 0x8fb   :  { %v1768_v15 = vadd.f32 1e-05, %v1758_v25 }
 0x8fc   :  { %v1745_v24 = vpop.xlane.xlu0 %1744 }
 0x8fd   :  { %5225 = vrsqrt.f32 %v1768_v15  ;;  %v1759_v26 = vmul.f32 0.015625, %v1745_v24 }
 0x8ff   :  { %v1769_v18 = vadd.f32 1e-05, %v1759_v26 }
 0x900   :  { %v1748_v33 = vpop.xlane.xlu1 %1747 }
 0x901   :  { %5227 = vrsqrt.f32 %v1769_v18  ;;  %v1760_v35 = vmul.f32 0.015625, %v1748_v33 }
 0x903   :  { %v1770_v27 = vadd.f32 1e-05, %v1760_v35 }
 0x904   :  { %v1751_v53 = vpop.xlane.xlu0 %1750 }
 0x905   :  { %5229 = vrsqrt.f32 %v1770_v27  ;;  %v1761_v34 = vmul.f32 0.015625, %v1751_v53 }
 0x907   :  { %v1771_v51 = vadd.f32 1e-05, %v1761_v34 }
 0x909   :  { %5231 = vrsqrt.f32 %v1771_v51 }
 0x90a   :  { %v5226_v9 = vpop.eup %5225 }
 0x90b   :  { %v1788_v8 = vmul.f32 %v5226_v9, %v6375_v41 }
 0x90d   :  { %v1802_v57 = vmul.f32 %v6402_v56, %v1788_v8 }
 0x90e   :  { %v5228_v60 = vpop.eup %5227 }
 0x90f   :  { %v1789_v39 = vmul.f32 %v5228_v60, %v6380_v49  ;;  %v1816_v30 = vadd.f32 %v6411_v44, %v1802_v57 }
 0x911   :  { %v1803_v47 = vmul.f32 %v6402_v56, %v1789_v39 }
 0x912   :  { %v5230_v61 = vpop.eup %5229 }
 0x913   :  { %v1817_v50 = vadd.f32 %v6411_v44, %v1803_v47  ;;  %v1790_v3 = vmul.f32 %v5230_v61, %v6386_v42  ;;  %v1835_v42 = vsub.s32 6, %v5713_v13 }
 0x915   :  { %v1823_v45 = vpack.c.bf16 %v1817_v50, %v1816_v30  ;;  %v1804_v32 = vmul.f32 %v6402_v56, %v1790_v3 }
 0x916   :  { %v5232_v7 = vpop.eup %5231 }
 0x917   :  { %4694 = vmatmul.mubr.msk.bf16.gmra.mxu1 %vm42_vm0, %v1823_v45  ;;  %v1791_v41 = vmul.f32 %v5232_v7, %v6392_v21  ;;  %v1818_v20 = vadd.f32 %v6411_v44, %v1804_v32  ;;  %v1836_v21 = vrot.slane %v6268_v52, %v1835_v42 }
 0x918   :  { %4697 = vmatprep.mubr.msk.bf16.mxu1 %vm5380_vm1, %v5376_v59 }
 0x919   :  { %v1805_v49 = vmul.f32 %v6402_v56, %v1791_v41 }
 0x91b   :  { %v1819_v0 = vadd.f32 %v6411_v44, %v1805_v49 }
 0x91d   :  { %v1824_v63 = vpack.c.bf16 %v1819_v0, %v1818_v20 }
 0x91f   :  { %4698 = vmatmul.mubr.msk.bf16.gmra.mxu1 %vm42_vm0, %v1824_v63 }
 0x920   :  { %2385 = vmatprep.mubr.bf16.mxu1 %v5375_v58 }
 0x955   :  { %v1910_v29 = vpop.f32.mrf.mxu1 }
 0x956   :  { %v1911_v16 = vadd.f32 %v1910_v29, %v1836_v21 }
 0x957   :  { %v4683_v46 = vpop.f32.mrf.mxu1 }
 0x958   :  { %v1949_v4 = vmax.f32 %v1911_v16, 0.0 }
 0x959   :  { %v1913_v6 = vpop.f32.mrf.mxu1 }
 0x95a   :  { %v1914_v56 = vadd.f32 %v1913_v6, %v1836_v21 }
 0x95b   :  { %v4684_v43 = vpop.f32.mrf.mxu1 }
 0x95c   :  { %v1950_v25 = vmax.f32 %v1914_v56, 0.0 }
 0x95d   :  { %v1918_v44 = vpop.f32.mrf.mxu1 }
 0x95e   :  { %v1959_v15 = vpack.c.bf16 %v1950_v25, %v1949_v4  ;;  %v1919_v26 = vadd.f32 %v1918_v44, %v1836_v21  ;;  %v1982_v44 = vsub.s32 7, %v5713_v13 }
 0x95f   :  { %v4687_v24 = vpop.f32.mrf.mxu1 }
 0x960   :  { %4718 = vmatmul.mubr.bf16.vlgmr.msra.gmra.mxu0 %v1959_v15  ;;  %v1951_v27 = vmax.f32 %v1919_v26, 0.0  ;;  %v1983_v15 = vrot.slane %v6268_v52, %v1982_v44 }
 0x961   :  { %v1921_v18 = vpop.f32.mrf.mxu1  ;;  %4721 = vmatprep.mubr.msk.bf16.mxu0 %vm5380_vm1, %v5376_v59 }
 0x962   :  { %v1922_v33 = vadd.f32 %v1921_v18, %v1836_v21 }
 0x963   :  { %v4688_v35 = vpop.f32.mrf.mxu1 }
 0x964   :  { %v1952_v53 = vmax.f32 %v1922_v33, 0.0 }
 0x966   :  { %v1960_v34 = vpack.c.bf16 %v1952_v53, %v1951_v27 }
 0x968   :  { %4722 = vmatmul.mubr.bf16.gmra.mxu0 %v1960_v34 }
 0x969   :  { %4725 = vmatprep.mubr.msk.bf16.mxu0 %vm5380_vm1, %v5376_v59 }
 0x98e   :  { %v1926_v51 = vpop.f32.mrf.mxu1 }
 0x98f   :  { %v1927_v8 = vadd.f32 %v1926_v51, %v1836_v21 }
 0x990   :  { %v4691_v9 = vpop.f32.mrf.mxu1 }
 0x991   :  { %v1953_v47 = vmax.f32 %v1927_v8, 0.0 }
 0x992   :  { %v1929_v60 = vpop.f32.mrf.mxu1 }
 0x993   :  { %v1930_v39 = vadd.f32 %v1929_v60, %v1836_v21 }
 0x994   :  { %v4692_v57 = vpop.f32.mrf.mxu1 }
 0x995   :  { %v1954_v61 = vmax.f32 %v1930_v39, 0.0 }
 0x997   :  { %v1961_v30 = vpack.c.bf16 %v1954_v61, %v1953_v47 }
 0x999   :  { %4726 = vmatmul.mubr.bf16.gmra.mxu0 %v1961_v30 }
 0x99a   :  { %4729 = vmatprep.mubr.msk.bf16.mxu0 %vm5380_vm1, %v5376_v59 }
 0x9d7   :  { %v1934_v50 = vpop.f32.mrf.mxu1 }
 0x9d8   :  { %v1935_v45 = vadd.f32 %v1934_v50, %v1836_v21 }
 0x9d9   :  { %v4695_v3 = vpop.f32.mrf.mxu1 }
 0x9da   :  { %v1955_v49 = vmax.f32 %v1935_v45, 0.0 }
 0x9db   :  { %v1937_v7 = vpop.f32.mrf.mxu1 }
 0x9dc   :  { %v1938_v41 = vadd.f32 %v1937_v7, %v1836_v21 }
 0x9dd   :  { %v4696_v32 = vpop.f32.mrf.mxu1 }
 0x9de   :  { %v1956_v20 = vmax.f32 %v1938_v41, 0.0 }
 0x9df   :  { %v1942_v0 = vpop.f32.mrf.mxu1 }
 0x9e0   :  { %v1962_v63 = vpack.c.bf16 %v1956_v20, %v1955_v49  ;;  %v1943_v46 = vadd.f32 %v1942_v0, %v1836_v21 }
 0x9e1   :  { %v4699_v29 = vpop.f32.mrf.mxu1 }
 0x9e2   :  { %4730 = vmatmul.mubr.bf16.gmra.mxu0 %v1962_v63  ;;  %v1957_v43 = vmax.f32 %v1943_v46, 0.0 }
 0x9e3   :  { %v1945_v16 = vpop.f32.mrf.mxu1  ;;  %4733 = vmatprep.mubr.msk.bf16.mxu0 %vm5380_vm1, %v5376_v59 }
 0x9e4   :  { %v1946_v6 = vadd.f32 %v1945_v16, %v1836_v21 }
 0x9e5   :  { %v4700_v56 = vpop.f32.mrf.mxu1 }
 0x9e6   :  { %v1958_v4 = vmax.f32 %v1946_v6, 0.0 }
 0x9e8   :  { %v1963_v25 = vpack.c.bf16 %v1958_v4, %v1957_v43 }
 0x9ea   :  { %4734 = vmatmul.mubr.bf16.gmra.mxu0 %v1963_v25 }
 0x9eb   :  { %4743 = vmatprep.mubr.msk.bf16.mxu0 %vm5380_vm1, %v5376_v59 }
 0xa20   :  { %v2066_v24 = vpop.f32.mrf.mxu0 }
 0xa21   :  { %v2067_v26 = vadd.f32 %v2066_v24, %v1983_v15 }
 0xa22   :  { %v4719_v18 = vpop.f32.mrf.mxu0 }
 0xa23   :  { %v6505_v33 = vadd.f32 %v2067_v26, %v6274_v48 }
 0xa24   :  { %v2069_v21 = vpop.f32.mrf.mxu0 }
 0xa25   :  { %v2070_v35 = vadd.f32 %v2069_v21, %v1983_v15  ;;  %v2118_v27 = vsel %vm42_vm0, %v6505_v33, 0.0 }
 0xa26   :  { %2119 = vadd.xlane.f32.xlu1 %v2118_v27  ;;  %v4720_v53 = vpop.f32.mrf.mxu0 }
 0xa27   :  { %v6510_v34 = vadd.f32 %v2070_v35, %v6279_v19 }
 0xa28   :  { %v2074_v51 = vpop.f32.mrf.mxu0 }
 0xa29   :  { %v2075_v9 = vadd.f32 %v2074_v51, %v1983_v15  ;;  %v2121_v52 = vsel %vm42_vm0, %v6510_v34, 0.0 }
 0xa2a   :  { %2122 = vadd.xlane.f32.xlu0 %v2121_v52  ;;  %v4723_v8 = vpop.f32.mrf.mxu0 }
 0xa2b   :  { %v6515_v48 = vadd.f32 %v2075_v9, %v6284_v54 }
 0xa2c   :  { %v2077_v60 = vpop.f32.mrf.mxu0 }
 0xa2d   :  { %v2078_v39 = vadd.f32 %v2077_v60, %v1983_v15  ;;  %v2124_v57 = vsel %vm42_vm0, %v6515_v48, 0.0 }
 0xa2e   :  { %2125 = vadd.xlane.f32.xlu1 %v2124_v57  ;;  %v4724_v47 = vpop.f32.mrf.mxu0 }
 0xa2f   :  { %v6520_v19 = vadd.f32 %v2078_v39, %v6289_v2 }
 0xa31   :  { %v2127_v61 = vsel %vm42_vm0, %v6520_v19, 0.0 }
 0xa32   :  { %2128 = vadd.xlane.f32.xlu0 %v2127_v61 }
 0xa59   :  { %v2082_v30 = vpop.f32.mrf.mxu0 }
 0xa5a   :  { %v2083_v50 = vadd.f32 %v2082_v30, %v1983_v15 }
 0xa5b   :  { %v4727_v3 = vpop.f32.mrf.mxu0 }
 0xa5c   :  { %v6525_v54 = vadd.f32 %v2083_v50, %v6294_v5 }
 0xa5d   :  { %v2085_v45 = vpop.f32.mrf.mxu0 }
 0xa5e   :  { %v2086_v7 = vadd.f32 %v2085_v45, %v1983_v15  ;;  %v2130_v41 = vsel %vm42_vm0, %v6525_v54, 0.0 }
 0xa5f   :  { %2131 = vadd.xlane.f32.xlu1 %v2130_v41  ;;  %v4728_v32 = vpop.f32.mrf.mxu0 }
 0xa60   :  { %v6530_v2 = vadd.f32 %v2086_v7, %v6299_v14  ;;  %v5067_v32 = vld [vmem:[%s7562_s3 + $0x74] ss:$8 sps:$4 sm:$0xff]  }
 0xa61   :  { %2361 = vmatprep.subr.bf16.mxu1 %v5067_v32 }
 0xa62   :  { %v2133_v49 = vsel %vm42_vm0, %v6530_v2, 0.0 }
 0xa63   :  { %2134 = vadd.xlane.f32.xlu0 %v2133_v49  ;;  %v5065_v49 = vld [vmem:[%s7562_s3 + $0x70] ss:$8 sps:$4 sm:$0xff]  }
 0xa64   :  { %2362 = vmatpush1.bf16.msra.mxu1 %v5065_v49 }
 0xaa2   :  { %v2090_v20 = vpop.f32.mrf.mxu0 }
 0xaa3   :  { %v2091_v0 = vadd.f32 %v2090_v20, %v1983_v15  ;;  %v5070_v20 = vld [vmem:[%s7562_s3 + $0x64] ss:$8 sps:$4 sm:$0xff]  }
 0xaa4   :  { %v4731_v63 = vpop.f32.mrf.mxu0  ;;  %2363 = vmatprep.subr.bf16.mxu1 %v5070_v20 }
 0xaa5   :  { %v6535_v5 = vadd.f32 %v2091_v0, %v6304_v17  ;;  %v5068_v0 = vld [vmem:[%s7562_s3 + $0x60] ss:$8 sps:$4 sm:$0xff]   ;;  %v5073_v63 = vld [vmem:[%s7562_s3 + $0x54] ss:$8 sps:$4 sm:$0xff]  }
 0xaa6   :  { %v2093_v29 = vpop.f32.mrf.mxu0  ;;  %2364 = vmatpush1.bf16.msra.mxu1 %v5068_v0 }
 0xaa7   :  { %v2094_v46 = vadd.f32 %v2093_v29, %v1983_v15  ;;  %v2136_v16 = vsel %vm42_vm0, %v6535_v5, 0.0  ;;  %v5071_v29 = vld [vmem:[%s7562_s3 + $0x50] ss:$8 sps:$4 sm:$0xff]   ;;  %2365 = vmatprep.subr.bf16.mxu1 %v5073_v63 }
 0xaa8   :  { %2137 = vadd.xlane.f32.xlu1 %v2136_v16  ;;  %v4732_v6 = vpop.f32.mrf.mxu0  ;;  %v5076_v16 = vld [vmem:[%s7562_s3 + $0x44] ss:$8 sps:$4 sm:$0xff]  }
 0xaa9   :  { %v6540_v14 = vadd.f32 %v2094_v46, %v6309_v28  ;;  %v5074_v46 = vld [vmem:[%s7562_s3 + $0x40] ss:$8 sps:$4 sm:$0xff]  }
 0xaaa   :  { %v2098_v56 = vpop.f32.mrf.mxu0  ;;  %2366 = vmatpush1.bf16.msra.mxu1 %v5071_v29 }
 0xaab   :  { %v2099_v43 = vadd.f32 %v2098_v56, %v1983_v15  ;;  %v2139_v4 = vsel %vm42_vm0, %v6540_v14, 0.0  ;;  %2367 = vmatprep.subr.bf16.mxu1 %v5076_v16 }
 0xaac   :  { %2140 = vadd.xlane.f32.xlu0 %v2139_v4  ;;  %v4735_v25 = vpop.f32.mrf.mxu0 }
 0xaad   :  { %v6545_v17 = vadd.f32 %v2099_v43, %v6314_v31 }
 0xaae   :  { %v2101_v24 = vpop.f32.mrf.mxu0  ;;  %2368 = vmatpush1.bf16.msra.mxu1 %v5074_v46 }
 0xaaf   :  { %v2102_v26 = vadd.f32 %v2101_v24, %v1983_v15  ;;  %v2120_v18 = vpop.xlane.xlu1 %2119  ;;  %v2142_v21 = vsel %vm42_vm0, %v6545_v17, 0.0  ;;  %4755 = vmatprep.subr.bf16.mxu1 %v5376_v59 }
 0xab0   :  { %v2148_v35 = vmul.f32 0.015625, %v2120_v18  ;;  %2143 = vadd.xlane.f32.xlu1 %v2142_v21  ;;  %v4736_v28 = vpop.f32.mrf.mxu0 }
 0xab1   :  { %v6550_v27 = vadd.f32 %v2102_v26, %v6319_v37 }
 0xab2   :  { %v6553_v53 = vsub.f32 %v6505_v33, %v2148_v35 }
 0xab3   :  { %v2123_v51 = vpop.xlane.xlu0 %2122  ;;  %v2145_v31 = vsel %vm42_vm0, %v6550_v27, 0.0 }
 0xab4   :  { %v2149_v9 = vmul.f32 0.015625, %v2123_v51  ;;  %2146 = vadd.xlane.f32.xlu0 %v2145_v31  ;;  %v2168_v15 = vmul.f32 %v6553_v53, %v6553_v53 }
 0xab6   :  { %v6560_v52 = vsub.f32 %v6510_v34, %v2149_v9  ;;  %v2178_v8 = vsel %vm42_vm0, %v2168_v15, 0.0 }
 0xab7   :  { %v2126_v60 = vpop.xlane.xlu1 %2125  ;;  %2179 = vadd.xlane.f32.xlu1 %v2178_v8 }
 0xab8   :  { %v2150_v37 = vmul.f32 0.015625, %v2126_v60  ;;  %v2169_v39 = vmul.f32 %v6560_v52, %v6560_v52 }
 0xaba   :  { %v6566_v57 = vsub.f32 %v6515_v48, %v2150_v37  ;;  %v2181_v47 = vsel %vm42_vm0, %v2169_v39, 0.0 }
 0xabb   :  { %v2129_v61 = vpop.xlane.xlu0 %2128  ;;  %2182 = vadd.xlane.f32.xlu0 %v2181_v47 }
 0xabc   :  { %v2151_v30 = vmul.f32 0.015625, %v2129_v61  ;;  %v2170_v50 = vmul.f32 %v6566_v57, %v6566_v57 }
 0xabe   :  { %v6572_v3 = vsub.f32 %v6520_v19, %v2151_v30  ;;  %v2184_v45 = vsel %vm42_vm0, %v2170_v50, 0.0 }
 0xabf   :  { %2185 = vadd.xlane.f32.xlu1 %v2184_v45 }
 0xac0   :  { %v2171_v7 = vmul.f32 %v6572_v3, %v6572_v3 }
 0xac2   :  { %v2187_v41 = vsel %vm42_vm0, %v2171_v7, 0.0 }
 0xac3   :  { %2188 = vadd.xlane.f32.xlu0 %v2187_v41 }
 0xae8   :  { %v2132_v6 = vpop.xlane.xlu1 %2131 }
 0xae9   :  { %v2152_v56 = vmul.f32 0.015625, %v2132_v6 }
 0xaeb   :  { %v6604_v43 = vsub.f32 %v6525_v54, %v2152_v56 }
 0xaec   :  { %v2135_v4 = vpop.xlane.xlu0 %2134 }
 0xaed   :  { %v2153_v25 = vmul.f32 0.015625, %v2135_v4  ;;  %v2172_v24 = vmul.f32 %v6604_v43, %v6604_v43 }
 0xaef   :  { %v6609_v26 = vsub.f32 %v6530_v2, %v2153_v25  ;;  %v2190_v18 = vsel %vm42_vm0, %v2172_v24, 0.0 }
 0xaf0   :  { %2191 = vadd.xlane.f32.xlu1 %v2190_v18 }
 0xaf1   :  { %v2173_v21 = vmul.f32 %v6609_v26, %v6609_v26 }
 0xaf3   :  { %v2193_v35 = vsel %vm42_vm0, %v2173_v21, 0.0 }
 0xaf4   :  { %2194 = vadd.xlane.f32.xlu0 %v2193_v35 }
 0xb31   :  { %v2138_v28 = vpop.xlane.xlu1 %2137 }
 0xb32   :  { %v2154_v51 = vmul.f32 0.015625, %v2138_v28  ;;  %v6642_v28 = vld [vmem:[%s7563_s7 + $0x10] sm:$0xff] }
 0xb34   :  { %v6616_v31 = vsub.f32 %v6535_v5, %v2154_v51 }
 0xb35   :  { %v2141_v9 = vpop.xlane.xlu0 %2140 }
 0xb36   :  { %v2155_v15 = vmul.f32 0.015625, %v2141_v9  ;;  %v2174_v8 = vmul.f32 %v6616_v31, %v6616_v31  ;;  %v6647_v9 = vrot.slane %v6642_v28, %v369_v22 }
 0xb38   :  { %v6621_v60 = vsub.f32 %v6540_v14, %v2155_v15  ;;  %v2196_v37 = vsel %vm42_vm0, %v2174_v8, 0.0 }
 0xb39   :  { %2197 = vadd.xlane.f32.xlu1 %v2196_v37  ;;  %v2144_v39 = vpop.xlane.xlu1 %2143  ;;  %v6653_v37 = vrot.slane %v6642_v28, %v383_v62 }
 0xb3a   :  { %v2156_v47 = vmul.f32 0.015625, %v2144_v39  ;;  %v2175_v61 = vmul.f32 %v6621_v60, %v6621_v60 }
 0xb3c   :  { %v6627_v30 = vsub.f32 %v6545_v17, %v2156_v47  ;;  %v2199_v50 = vsel %vm42_vm0, %v2175_v61, 0.0 }
 0xb3d   :  { %2200 = vadd.xlane.f32.xlu0 %v2199_v50  ;;  %v2147_v45 = vpop.xlane.xlu0 %2146 }
 0xb3e   :  { %v2157_v7 = vmul.f32 0.015625, %v2147_v45  ;;  %v2176_v41 = vmul.f32 %v6627_v30, %v6627_v30 }
 0xb40   :  { %v6633_v32 = vsub.f32 %v6550_v27, %v2157_v7  ;;  %v2180_v49 = vpop.xlane.xlu1 %2179  ;;  %v2202_v20 = vsel %vm42_vm0, %v2176_v41, 0.0 }
 0xb41   :  { %v2208_v0 = vmul.f32 0.015625, %v2180_v49  ;;  %2203 = vadd.xlane.f32.xlu1 %v2202_v20 }
 0xb42   :  { %v2177_v63 = vmul.f32 %v6633_v32, %v6633_v32 }
 0xb43   :  { %v2218_v29 = vadd.f32 1e-05, %v2208_v0 }
 0xb44   :  { %v2183_v46 = vpop.xlane.xlu0 %2182  ;;  %v2205_v16 = vsel %vm42_vm0, %v2177_v63, 0.0 }
 0xb45   :  { %5233 = vrsqrt.f32 %v2218_v29  ;;  %v2209_v6 = vmul.f32 0.015625, %v2183_v46  ;;  %2206 = vadd.xlane.f32.xlu0 %v2205_v16 }
 0xb47   :  { %v2219_v56 = vadd.f32 1e-05, %v2209_v6 }
 0xb48   :  { %v2186_v4 = vpop.xlane.xlu1 %2185 }
 0xb49   :  { %5235 = vrsqrt.f32 %v2219_v56  ;;  %v2210_v25 = vmul.f32 0.015625, %v2186_v4 }
 0xb4b   :  { %v2220_v24 = vadd.f32 1e-05, %v2210_v25 }
 0xb4c   :  { %v2189_v18 = vpop.xlane.xlu0 %2188 }
 0xb4d   :  { %5237 = vrsqrt.f32 %v2220_v24  ;;  %v2211_v21 = vmul.f32 0.015625, %v2189_v18 }
 0xb4f   :  { %v2221_v35 = vadd.f32 1e-05, %v2211_v21 }
 0xb51   :  { %5239 = vrsqrt.f32 %v2221_v35 }
 0xb52   :  { %v5234_v51 = vpop.eup %5233 }
 0xb53   :  { %v2238_v15 = vmul.f32 %v5234_v51, %v6553_v53 }
 0xb55   :  { %v2252_v39 = vmul.f32 %v6647_v9, %v2238_v15 }
 0xb56   :  { %v5236_v8 = vpop.eup %5235 }
 0xb57   :  { %v2239_v47 = vmul.f32 %v5236_v8, %v6560_v52  ;;  %v2266_v45 = vadd.f32 %v6653_v37, %v2252_v39 }
 0xb59   :  { %v2253_v61 = vmul.f32 %v6647_v9, %v2239_v47 }
 0xb5a   :  { %v5238_v50 = vpop.eup %5237 }
 0xb5b   :  { %v2267_v22 = vadd.f32 %v6653_v37, %v2253_v61  ;;  %v2240_v7 = vmul.f32 %v5238_v50, %v6566_v57 }
 0xb5d   :  { %v2276_v53 = vpack.c.bf16 %v2267_v22, %v2266_v45  ;;  %v2254_v49 = vmul.f32 %v6647_v9, %v2240_v7 }
 0xb5e   :  { %v5240_v41 = vpop.eup %5239 }
 0xb5f   :  { %4254 = vmatmul.mubr.msk.bf16.vlgmr.msra.gmra.mxu1 %vm42_vm0, %v2276_v53  ;;  %v2241_v62 = vmul.f32 %v5240_v41, %v6572_v3  ;;  %v2268_v20 = vadd.f32 %v6653_v37, %v2254_v49 }
 0xb60   :  { %2395 = vmatprep.mubr.bf16.mxu1 %v5375_v58 }
 0xb61   :  { %v2255_v52 = vmul.f32 %v6647_v9, %v2241_v62 }
 0xb63   :  { %v2269_v0 = vadd.f32 %v6653_v37, %v2255_v52 }
 0xb65   :  { %v2277_v63 = vpack.c.bf16 %v2269_v0, %v2268_v20 }
 0xb67   :  { %4255 = vmatmul.mubr.msk.bf16.gmra.mxu1 %vm42_vm0, %v2277_v63 }
 0xb68   :  { %2405 = vmatprep.mubr.bf16.mxu1 %v5375_v58 }
 0xb79   :  { %v2192_v57 = vpop.xlane.xlu1 %2191 }
 0xb7a   :  { %v2212_v29 = vmul.f32 0.015625, %v2192_v57 }
 0xb7c   :  { %v2222_v46 = vadd.f32 1e-05, %v2212_v29 }
 0xb7d   :  { %v2195_v16 = vpop.xlane.xlu0 %2194 }
 0xb7e   :  { %5241 = vrsqrt.f32 %v2222_v46  ;;  %v2213_v3 = vmul.f32 0.015625, %v2195_v16 }
 0xb80   :  { %v2223_v6 = vadd.f32 1e-05, %v2213_v3 }
 0xb82   :  { %5243 = vrsqrt.f32 %v2223_v6 }
 0xb8b   :  { %v5242_v56 = vpop.eup %5241 }
 0xb8c   :  { %v2242_v4 = vmul.f32 %v5242_v56, %v6604_v43 }
 0xb8e   :  { %v2256_v18 = vmul.f32 %v6647_v9, %v2242_v4 }
 0xb8f   :  { %v5244_v25 = vpop.eup %5243 }
 0xb90   :  { %v2243_v24 = vmul.f32 %v5244_v25, %v6609_v26  ;;  %v2270_v35 = vadd.f32 %v6653_v37, %v2256_v18 }
 0xb92   :  { %v2257_v21 = vmul.f32 %v6647_v9, %v2243_v24 }
 0xb94   :  { %v2271_v51 = vadd.f32 %v6653_v37, %v2257_v21 }
 0xb96   :  { %v2278_v15 = vpack.c.bf16 %v2271_v51, %v2270_v35 }
 0xb98   :  { %4256 = vmatmul.mubr.msk.bf16.gmra.mxu1 %vm42_vm0, %v2278_v15 }
 0xb99   :  { %2415 = vmatprep.mubr.bf16.mxu1 %v5375_v58 }
 0xbc2   :  { %v2198_v8 = vpop.xlane.xlu1 %2197 }
 0xbc3   :  { %v2214_v39 = vmul.f32 0.015625, %v2198_v8 }
 0xbc5   :  { %v2224_v47 = vadd.f32 1e-05, %v2214_v39 }
 0xbc6   :  { %v2201_v43 = vpop.xlane.xlu0 %2200 }
 0xbc7   :  { %5245 = vrsqrt.f32 %v2224_v47  ;;  %v2215_v61 = vmul.f32 0.015625, %v2201_v43 }
 0xbc9   :  { %v2225_v26 = vadd.f32 1e-05, %v2215_v61  ;;  %v4237_v61 = vld [vmem:[%s7563_s7 + $0x18] sm:$0xff] }
 0xbca   :  { %v2204_v50 = vpop.xlane.xlu1 %2203 }
 0xbcb   :  { %5247 = vrsqrt.f32 %v2225_v26  ;;  %v2216_v45 = vmul.f32 0.015625, %v2204_v50  ;;  %v6709_v50 = vrot.slane %v4237_v61, %v5750_v38 }
 0xbcd   :  { %v2226_v22 = vadd.f32 1e-05, %v2216_v45 }
 0xbce   :  { %v2207_v7 = vpop.xlane.xlu0 %2206 }
 0xbcf   :  { %5249 = vrsqrt.f32 %v2226_v22  ;;  %v2217_v53 = vmul.f32 0.015625, %v2207_v7 }
 0xbd1   :  { %v2227_v41 = vadd.f32 1e-05, %v2217_v53 }
 0xbd3   :  { %5251 = vrsqrt.f32 %v2227_v41 }
 0xbd4   :  { %v5246_v62 = vpop.eup %5245 }
 0xbd5   :  { %v2244_v49 = vmul.f32 %v5246_v62, %v6616_v31 }
 0xbd7   :  { %v2258_v0 = vmul.f32 %v6647_v9, %v2244_v49 }
 0xbd8   :  { %v5248_v52 = vpop.eup %5247 }
 0xbd9   :  { %v2245_v20 = vmul.f32 %v5248_v52, %v6621_v60  ;;  %v2272_v29 = vadd.f32 %v6653_v37, %v2258_v0 }
 0xbdb   :  { %v2259_v63 = vmul.f32 %v6647_v9, %v2245_v20 }
 0xbdc   :  { %v5250_v57 = vpop.eup %5249 }
 0xbdd   :  { %v2273_v46 = vadd.f32 %v6653_v37, %v2259_v63  ;;  %v2246_v16 = vmul.f32 %v5250_v57, %v6627_v30 }
 0xbdf   :  { %v2279_v3 = vpack.c.bf16 %v2273_v46, %v2272_v29  ;;  %v2260_v56 = vmul.f32 %v6647_v9, %v2246_v16 }
 0xbe0   :  { %v5252_v6 = vpop.eup %5251 }
 0xbe1   :  { %4257 = vmatmul.mubr.msk.bf16.gmra.mxu1 %vm42_vm0, %v2279_v3  ;;  %v2247_v31 = vmul.f32 %v5252_v6, %v6633_v32  ;;  %v2274_v4 = vadd.f32 %v6653_v37, %v2260_v56 }
 0xbe2   :  { %2425 = vmatprep.mubr.bf16.mxu1 %v5375_v58  ;;  %v2293_v58 = vrot.slane %v6642_v28, %v5750_v38 }
 0xbe3   :  { %v2261_v60 = vmul.f32 %v6647_v9, %v2247_v31 }
 0xbe5   :  { %v2275_v25 = vadd.f32 %v6653_v37, %v2261_v60 }
 0xbe7   :  { %v2280_v24 = vpack.c.bf16 %v2275_v25, %v2274_v4 }
 0xbe9   :  { %4258 = vmatmul.mubr.msk.bf16.gmra.mxu1 %vm42_vm0, %v2280_v24 }
 0xbea   :  { %4761 = vmatprep.mubr.msk.bf16.mxu1 %vm5380_vm1, %v5376_v59 }
 0xc1f   :  { %v2387_v30 = vpop.f32.mrf.mxu1 }
 0xc20   :  { %v2388_v47 = vadd.f32 %v2387_v30, %v2293_v58 }
 0xc21   :  { %v2389_v18 = vpop.f32.mrf.mxu1 }
 0xc22   :  { %v2390_v0 = vadd.f32 %v2389_v18, %v6709_v50 }
 0xc23   :  { %v2391_v21 = vpop.f32.mrf.mxu1 }
 0xc24   :  { %v2392_v39 = vadd.f32 %v2391_v21, %v2293_v58 }
 0xc25   :  { %v2393_v32 = vpop.f32.mrf.mxu1 }
 0xc26   :  { %v6701_v43 = vpack.c.bf16 %v2392_v39, %v2388_v47  ;;  %v2394_v38 = vadd.f32 %v2393_v32, %v6709_v50 }
 0xc27   :  { %v2397_v35 = vpop.f32.mrf.mxu1 }
 0xc28   :  { %v2398_v15 = vadd.f32 %v2397_v35, %v2293_v58  ;;  %v6730_v63 = vpack.c.bf16 %v2394_v38, %v2390_v0 }
 0xc29   :  { %v2399_v51 = vpop.f32.mrf.mxu1 }
 0xc2a   :  { %v2400_v52 = vadd.f32 %v2399_v51, %v6709_v50 }
 0xc2b   :  { %v2401_v9 = vpop.f32.mrf.mxu1 }
 0xc2c   :  { %v2402_v8 = vadd.f32 %v2401_v9, %v2293_v58 }
 0xc2d   :  { %v2403_v28 = vpop.f32.mrf.mxu1 }
 0xc2e   :  { %v6697_v37 = vpack.c.bf16 %v2402_v8, %v2398_v15  ;;  %v2404_v62 = vadd.f32 %v2403_v28, %v6709_v50 }
 0xc30   :  { %2447 = vrot.lane.b32.xlu0 %v6697_v37, %s5377_s22  ;;  %v6723_v20 = vpack.c.bf16 %v2404_v62, %v2400_v52 }
 0xc34   :  { %2667 = vrot.lane.b32.xlu0 %v6701_v43, %s5378_s23 }
 0xc58   :  { %v2407_v26 = vpop.f32.mrf.mxu1 }
 0xc59   :  { %v2408_v45 = vadd.f32 %v2407_v26, %v2293_v58 }
 0xc5a   :  { %v2409_v22 = vpop.f32.mrf.mxu1 }
 0xc5b   :  { %v6711_v7 = vpack.c.bf16 %v2408_v45, %v2408_v45  ;;  %v2410_v53 = vadd.f32 %v2409_v22, %v6709_v50 }
 0xc5c   :  { %v2411_v57 = vpop.f32.mrf.mxu1 }
 0xc5d   :  { %v2441_v41 = vpack.c.bf16 %v2410_v53, %v2410_v53  ;;  %2449 = vrot.lane.b32.xlu1 %v6711_v7, %s5377_s22  ;;  %v2412_v35 = vadd.f32 %v2411_v57, %v2293_v58 }
 0xc5e   :  { %v6742_v29 = vpop.f32.mrf.mxu1 }
 0xc5f   :  { %v2593_v49 = vsel %vm712_vm3, %v2441_v41, 0 }
 0xc60   :  { %4756 = vmatpush3.bf16.msra.mxu1 %v2593_v49 }
 0xc61   :  { %2445 = vrot.lane.b32.xlu1 %v6701_v43, %s5377_s22  ;;  %4757 = vmatprep.subr.bf16.mxu1 %v5376_v59 }
 0xc64   :  { %4758 = vmatpush3.bf16.msra.mxu1 %v6723_v20 }
 0xc65   :  { %2671 = vrot.lane.b32.xlu1 %v6711_v7, %s5378_s23  ;;  %4759 = vmatprep.subr.bf16.mxu1 %v5376_v59 }
 0xc68   :  { %4760 = vmatpush3.bf16.msra.mxu1 %v6730_v63 }
 0xc69   :  { %2669 = vrot.lane.b32.xlu1 %v6697_v37, %s5378_s23  ;;  %4791 = vmatprep.subr.bf16.mxu1 %v5376_v59 }
 0xc6d   :  { %2661 = vrot.lane.b32.xlu1 %v6701_v43, %s5379_s24 }
 0xc71   :  { %2663 = vrot.lane.b32.xlu1 %v6697_v37, %s5379_s24 }
 0xc75   :  { %2665 = vrot.lane.b32.xlu1 %v6711_v7, %s5379_s24 }
 0xca1   :  { %v2417_v46 = vpop.f32.mrf.mxu1 }
 0xca2   :  { %v2418_v18 = vadd.f32 %v2417_v46, %v2293_v58  ;;  %v2448_v39 = vpop.permute.xlu0 %2447 }
 0xca3   :  { %v6744_v16 = vpop.f32.mrf.mxu1  ;;  %v2464_v47 = vsel %vm569_vm2, %v2448_v39, 0 }
 0xca4   :  { %v6756_v9 = vpack.c.bf16 %v2418_v18, %v2412_v35 }
 0xca5   :  { %v2421_v3 = vpop.f32.mrf.mxu1 }
 0xca6   :  { %v2422_v51 = vadd.f32 %v2421_v3, %v2293_v58 }
 0xca7   :  { %v2423_v6 = vpop.f32.mrf.mxu1 }
 0xca8   :  { %v2424_v60 = vadd.f32 %v2423_v6, %v6709_v50 }
 0xca9   :  { %v2427_v31 = vpop.f32.mrf.mxu1 }
 0xcaa   :  { %v2428_v21 = vadd.f32 %v2427_v31, %v2293_v58 }
 0xcab   :  { %v2429_v56 = vpop.f32.mrf.mxu1 }
 0xcac   :  { %v2430_v4 = vadd.f32 %v2429_v56, %v6709_v50  ;;  %v6758_v15 = vpack.c.bf16 %v2428_v21, %v2422_v51 }
 0xcad   :  { %v2431_v25 = vpop.f32.mrf.mxu1 }
 0xcae   :  { %v6748_v24 = vpack.c.bf16 %v2430_v4, %v2424_v60  ;;  %v2432_v30 = vadd.f32 %v2431_v25, %v2293_v58 }
 0xcb0   :  { %v6750_v32 = vpack.c.bf16 %v2432_v30, %v2432_v30 }
 0xcb2   :  { %3154 = vrot.lane.b32.xlu1 %v6750_v32, %s5378_s23  ;;  %2932 = vrot.lane.b32.xlu0 %v6750_v32, %s5377_s22 }
 0xcb6   :  { %3150 = vrot.lane.b32.xlu1 %v6756_v9, %s5378_s23  ;;  %2930 = vrot.lane.b32.xlu0 %v6758_v15, %s5377_s22 }
 0xcba   :  { %3146 = vrot.lane.b32.xlu1 %v6758_v15, %s5379_s24  ;;  %2928 = vrot.lane.b32.xlu0 %v6756_v9, %s5377_s22 }
 0xcbe   :  { %2812 = vrot.lane.b32.xlu1 %v2441_v41, %s5379_s24  ;;  %3152 = vrot.lane.b32.xlu0 %v6758_v15, %s5378_s23  ;;  %v2668_v41 = vpop.permute.xlu0 %2667 }
 0xcc2   :  { %3144 = vrot.lane.b32.xlu0 %v6756_v9, %s5379_s24 }
 0xcc6   :  { %3148 = vrot.lane.b32.xlu0 %v6750_v32, %s5379_s24 }
 0xccf   :  { %v2450_v58 = vpop.permute.xlu1 %2449 }
 0xcd0   :  { %v2467_v8 = vsel %vm569_vm2, %v2450_v58, 0 }
 0xcd1   :  { %4738 = vmatpush3.bf16.xpose.msra.mxu0 %v2467_v8 }
 0xcd2   :  { %4739 = vmatprep.subr.bf16.mxu0 %v5376_v59 }
 0xcd3   :  { %v2446_v61 = vpop.permute.xlu1 %2445 }
 0xcd4   :  { %v2461_v28 = vsel %vm569_vm2, %v2446_v61, 0 }
 0xcd7   :  { %v2672_v26 = vpop.permute.xlu1 %2671 }
 0xcd8   :  { %v2689_v45 = vsel %vm569_vm2, %v2672_v26, 0 }
 0xcd9   :  { %4740 = vmatpush3.bf16.xpose.msra.mxu0 %v2464_v47 }
 0xcda   :  { %4741 = vmatprep.subr.bf16.mxu0 %v5376_v59 }
 0xcdb   :  { %v2670_v22 = vpop.permute.xlu1 %2669 }
 0xcdc   :  { %v2686_v53 = vsel %vm569_vm2, %v2670_v22, 0 }
 0xcdf   :  { %v2662_v62 = vpop.permute.xlu1 %2661 }
 0xce1   :  { %4742 = vmatpush3.bf16.xpose.msra.mxu0 %v2461_v28 }
 0xce2   :  { %4773 = vmatprep.subr.bf16.mxu0 %v5376_v59 }
 0xce8   :  { %4744 = vmatmul.mubr.msk.bf16.vlgmr.msra.gmra.mxu0 %vm569_vm2, %v6701_v43  ;;  %v2683_v43 = vsel %vm569_vm2, %v2668_v41, 0 }
 0xce9   :  { %4774 = vmatpush3.bf16.xpose.msra.mxu0 %v2689_v45  ;;  %4747 = vmatprep.mubr.msk.bf16.mxu0 %vm5380_vm1, %v5376_v59 }
 0xcea   :  { %4775 = vmatprep.subr.bf16.mxu0 %v5376_v59 }
 0xcf0   :  { %4748 = vmatmul.mubr.msk.bf16.gmra.mxu0 %vm569_vm2, %v6697_v37  ;;  %v2664_v37 = vpop.permute.xlu1 %2663 }
 0xcf1   :  { %4776 = vmatpush3.bf16.xpose.msra.mxu0 %v2686_v53  ;;  %4751 = vmatprep.mubr.msk.bf16.mxu0 %vm5380_vm1, %v5376_v59 }
 0xcf2   :  { %4777 = vmatprep.subr.bf16.mxu0 %v5376_v59 }
 0xcf4   :  { %v2666_v49 = vpop.permute.xlu1 %2665 }
 0xcf8   :  { %4752 = vmatmul.mubr.msk.bf16.gmra.mxu0 %vm569_vm2, %v6711_v7 }
 0xcf9   :  { %4778 = vmatpush3.bf16.xpose.msra.mxu0 %v2683_v43  ;;  %4779 = vmatprep.mubr.msk.bf16.mxu0 %vm5380_vm1, %v5376_v59 }
 0xcfa   :  { %4809 = vmatprep.subr.bf16.mxu0 %v5376_v59 }
 0xd00   :  { %4780 = vmatmul.mubr.msk.bf16.vlgmr.msra.gmra.mxu0 %vm569_vm2, %v2662_v62 }
 0xd01   :  { %4783 = vmatprep.mubr.msk.bf16.mxu0 %vm5380_vm1, %v5376_v59 }
 0xd08   :  { %4784 = vmatmul.mubr.msk.bf16.gmra.mxu0 %vm569_vm2, %v2664_v37 }
 0xd09   :  { %4787 = vmatprep.mubr.msk.bf16.mxu0 %vm5380_vm1, %v5376_v59 }
 0xd10   :  { %4788 = vmatmul.mubr.msk.bf16.gmra.mxu0 %vm569_vm2, %v2666_v49 }
 0xd11   :  { %4815 = vmatprep.mubr.msk.bf16.mxu0 %vm5380_vm1, %v5376_v59 }
 0xd24   :  { %v2933_v7 = vpop.permute.xlu0 %2932  ;;  %v3155_v3 = vpop.permute.xlu1 %3154 }
 0xd25   :  { %v2950_v52 = vsel %vm569_vm2, %v2933_v7, 0  ;;  %v3172_v6 = vsel %vm569_vm2, %v3155_v3, 0 }
 0xd26   :  { %4810 = vmatpush3.bf16.xpose.msra.mxu0 %v2950_v52 }
 0xd27   :  { %4811 = vmatprep.subr.bf16.mxu0 %v5376_v59 }
 0xd28   :  { %v2931_v38 = vpop.permute.xlu0 %2930  ;;  %v3151_v60 = vpop.permute.xlu1 %3150 }
 0xd29   :  { %v2947_v0 = vsel %vm569_vm2, %v2931_v38, 0  ;;  %v3166_v4 = vsel %vm569_vm2, %v3151_v60, 0 }
 0xd2c   :  { %v2929_v57 = vpop.permute.xlu0 %2928  ;;  %v3147_v30 = vpop.permute.xlu1 %3146 }
 0xd2d   :  { %v2944_v46 = vsel %vm569_vm2, %v2929_v57, 0 }
 0xd2e   :  { %4812 = vmatpush3.bf16.xpose.msra.mxu0 %v2947_v0 }
 0xd2f   :  { %4813 = vmatprep.subr.bf16.mxu0 %v5376_v59 }
 0xd30   :  { %v3153_v31 = vpop.permute.xlu0 %3152 }
 0xd31   :  { %v3169_v56 = vsel %vm569_vm2, %v3153_v31, 0 }
 0xd34   :  { %v3145_v25 = vpop.permute.xlu0 %3144 }
 0xd36   :  { %4814 = vmatpush3.bf16.xpose.msra.mxu0 %v2944_v46 }
 0xd37   :  { %4845 = vmatprep.subr.bf16.mxu0 %v5376_v59 }
 0xd38   :  { %v3149_v18 = vpop.permute.xlu0 %3148 }
 0xd3d   :  { %4816 = vmatmul.mubr.msk.bf16.vlgmr.msra.gmra.mxu0 %vm569_vm2, %v6756_v9 }
 0xd3e   :  { %4846 = vmatpush3.bf16.xpose.msra.mxu0 %v3172_v6  ;;  %4819 = vmatprep.mubr.msk.bf16.mxu0 %vm5380_vm1, %v5376_v59 }
 0xd3f   :  { %4847 = vmatprep.subr.bf16.mxu0 %v5376_v59 }
 0xd45   :  { %4820 = vmatmul.mubr.msk.bf16.gmra.mxu0 %vm569_vm2, %v6758_v15 }
 0xd46   :  { %4848 = vmatpush3.bf16.xpose.msra.mxu0 %v3169_v56  ;;  %4823 = vmatprep.mubr.msk.bf16.mxu0 %vm5380_vm1, %v5376_v59 }
 0xd47   :  { %4849 = vmatprep.subr.bf16.mxu0 %v5376_v59 }
 0xd4d   :  { %4824 = vmatmul.mubr.msk.bf16.gmra.mxu0 %vm569_vm2, %v6750_v32 }
 0xd4e   :  { %4850 = vmatpush3.bf16.xpose.msra.mxu0 %v3166_v4  ;;  %4851 = vmatprep.mubr.msk.bf16.mxu0 %vm5380_vm1, %v5376_v59 }
 0xd4f   :  { %4881 = vmatprep.subr.bf16.mxu0 %v5376_v59 }
 0xd55   :  { %4852 = vmatmul.mubr.msk.bf16.vlgmr.msra.gmra.mxu0 %vm569_vm2, %v3145_v25 }
 0xd56   :  { %4855 = vmatprep.mubr.msk.bf16.mxu0 %vm5380_vm1, %v5376_v59 }
 0xd5d   :  { %4856 = vmatmul.mubr.msk.bf16.gmra.mxu0 %vm569_vm2, %v3147_v30 }
 0xd5e   :  { %4859 = vmatprep.mubr.msk.bf16.mxu0 %vm5380_vm1, %v5376_v59 }
 0xd65   :  { %4860 = vmatmul.mubr.msk.bf16.gmra.mxu0 %vm569_vm2, %v3149_v18 }
 0xd66   :  { %4889 = vmatprep.mubr.msk.bf16.mxu0 %vm5380_vm1, %v5376_v59 }
 0xda8   :  { %v2503_v21 = vpop.f32.mrf.mxu0 }
 0xda9   :  { %v2525_v32 = vmul.f32 0.17677669, %v2503_v21 }
 0xdaa   :  { %v4745_v35 = vpop.f32.mrf.mxu0 }
 0xdab   :  { %v6843_v51 = vsel %vm5909_vm4, %v2525_v32, -1e+30 }
 0xdac   :  { %v2506_v9 = vpop.f32.mrf.mxu0  ;;  %v2535_v15 = vsel %vm654_vm5, %v6843_v51, -inf }
 0xdad   :  { %v2526_v58 = vmul.f32 0.17677669, %v2506_v9  ;;  %2536 = vmax.xlane.f32.xlu1 %v2535_v15 }
 0xdae   :  { %v4746_v8 = vpop.f32.mrf.mxu0 }
 0xdaf   :  { %v6849_v39 = vsel %vm5921_vm6, %v2526_v58, -1e+30 }
 0xdb0   :  { %v2511_v47 = vpop.f32.mrf.mxu0  ;;  %v2538_v61 = vsel %vm654_vm5, %v6849_v39, -inf }
 0xdb1   :  { %v2527_v28 = vmul.f32 0.17677669, %v2511_v47  ;;  %2539 = vmax.xlane.f32.xlu0 %v2538_v61 }
 0xdb2   :  { %v4749_v26 = vpop.f32.mrf.mxu0 }
 0xdb3   :  { %v6855_v45 = vsel %vm5937_vm7, %v2527_v28, -1e+30 }
 0xdb4   :  { %v2514_v22 = vpop.f32.mrf.mxu0  ;;  %v2541_v53 = vsel %vm654_vm5, %v6855_v45, -inf }
 0xdb5   :  { %v2528_v41 = vmul.f32 0.17677669, %v2514_v22  ;;  %2542 = vmax.xlane.f32.xlu0 %v2541_v53 }
 0xdb6   :  { %v4750_v43 = vpop.f32.mrf.mxu0 }
 0xdb7   :  { %v6861_v62 = vsel %vm5955_vm8, %v2528_v41, -1e+30 }
 0xdb8   :  { %v2519_v37 = vpop.f32.mrf.mxu0  ;;  %v2544_v49 = vsel %vm654_vm5, %v6861_v62, -inf }
 0xdb9   :  { %v2529_v7 = vmul.f32 0.17677669, %v2519_v37  ;;  %2545 = vmax.xlane.f32.xlu0 %v2544_v49 }
 0xdba   :  { %v4753_v52 = vpop.f32.mrf.mxu0 }
 0xdbb   :  { %v6867_v38 = vsel %vm5979_vm9, %v2529_v7, -1e+30 }
 0xdbc   :  { %v2522_v0 = vpop.f32.mrf.mxu0  ;;  %v2547_v57 = vsel %vm654_vm5, %v6867_v38, -inf }
 0xdbd   :  { %2548 = vmax.xlane.f32.xlu1 %v2547_v57 }
 0xdbe   :  { %v4754_v46 = vpop.f32.mrf.mxu0 }
 0xdc0   :  { %v2725_v3 = vpop.f32.mrf.mxu0 }
 0xdc1   :  { %v2747_v6 = vmul.f32 0.17677669, %v2725_v3 }
 0xdc2   :  { %v4781_v31 = vpop.f32.mrf.mxu0 }
 0xdc3   :  { %v6873_v56 = vsel %vm5909_vm4, %v2747_v6, -1e+30 }
 0xdc4   :  { %v2728_v60 = vpop.f32.mrf.mxu0  ;;  %v2757_v4 = vsel %vm654_vm5, %v6873_v56, -inf }
 0xdc5   :  { %v2748_v25 = vmul.f32 0.17677669, %v2728_v60  ;;  %2758 = vmax.xlane.f32.xlu0 %v2757_v4 }
 0xdc6   :  { %v4782_v30 = vpop.f32.mrf.mxu0 }
 0xdc7   :  { %v6879_v18 = vsel %vm5921_vm6, %v2748_v25, -1e+30 }
 0xdc8   :  { %v2733_v21 = vpop.f32.mrf.mxu0  ;;  %v2760_v32 = vsel %vm654_vm5, %v6879_v18, -inf }
 0xdc9   :  { %v2749_v35 = vmul.f32 0.17677669, %v2733_v21  ;;  %2761 = vmax.xlane.f32.xlu1 %v2760_v32 }
 0xdca   :  { %v4785_v9 = vpop.f32.mrf.mxu0 }
 0xdcb   :  { %v6885_v15 = vsel %vm5937_vm7, %v2749_v35, -1e+30 }
 0xdcc   :  { %v2736_v58 = vpop.f32.mrf.mxu0  ;;  %v2763_v8 = vsel %vm654_vm5, %v6885_v15, -inf }
 0xdcd   :  { %v2750_v47 = vmul.f32 0.17677669, %v2736_v58  ;;  %2764 = vmax.xlane.f32.xlu0 %v2763_v8 }
 0xdce   :  { %v4786_v61 = vpop.f32.mrf.mxu0 }
 0xdcf   :  { %v6891_v28 = vsel %vm5955_vm8, %v2750_v47, -1e+30 }
 0xdd0   :  { %v2741_v26 = vpop.f32.mrf.mxu0  ;;  %v2766_v22 = vsel %vm654_vm5, %v6891_v28, -inf }
 0xdd1   :  { %v2751_v53 = vmul.f32 0.17677669, %v2741_v26  ;;  %2767 = vmax.xlane.f32.xlu1 %v2766_v22 }
 0xdd2   :  { %v4789_v41 = vpop.f32.mrf.mxu0 }
 0xdd3   :  { %v6897_v43 = vsel %vm5979_vm9, %v2751_v53, -1e+30 }
 0xdd4   :  { %v2744_v37 = vpop.f32.mrf.mxu0  ;;  %v2769_v49 = vsel %vm654_vm5, %v6897_v43, -inf }
 0xdd5   :  { %2770 = vmax.xlane.f32.xlu0 %v2769_v49 }
 0xdd6   :  { %v4790_v7 = vpop.f32.mrf.mxu0 }
 0xde2   :  { %2808 = vrot.lane.b32.xlu1 %v6730_v63, %s5379_s24 }
 0xdfd   :  { %v2986_v52 = vpop.f32.mrf.mxu0 }
 0xdfe   :  { %v3008_v0 = vmul.f32 0.17677669, %v2986_v52 }
 0xdff   :  { %v4817_v57 = vpop.f32.mrf.mxu0 }
 0xe00   :  { %v6905_v46 = vsel %vm5909_vm4, %v3008_v0, -1e+30 }
 0xe01   :  { %v2989_v3 = vpop.f32.mrf.mxu0  ;;  %v3018_v6 = vsel %vm654_vm5, %v6905_v46, -inf }
 0xe02   :  { %v3009_v31 = vmul.f32 0.17677669, %v2989_v3  ;;  %3019 = vmax.xlane.f32.xlu0 %v3018_v6 }
 0xe03   :  { %v4818_v60 = vpop.f32.mrf.mxu0 }
 0xe04   :  { %v6911_v4 = vsel %vm5921_vm6, %v3009_v31, -1e+30 }
 0xe05   :  { %v2994_v25 = vpop.f32.mrf.mxu0  ;;  %v3021_v63 = vsel %vm654_vm5, %v6911_v4, -inf }
 0xe06   :  { %v3010_v30 = vmul.f32 0.17677669, %v2994_v25  ;;  %3022 = vmax.xlane.f32.xlu0 %v3021_v63 }
 0xe07   :  { %v4821_v21 = vpop.f32.mrf.mxu0 }
 0xe08   :  { %v6917_v32 = vsel %vm5937_vm7, %v3010_v30, -1e+30 }
 0xe09   :  { %v2997_v35 = vpop.f32.mrf.mxu0  ;;  %v3024_v9 = vsel %vm654_vm5, %v6917_v32, -inf }
 0xe0a   :  { %3025 = vmax.xlane.f32.xlu1 %v3024_v9 }
 0xe0b   :  { %v4822_v58 = vpop.f32.mrf.mxu0 }
 0xe0d   :  { %v3002_v8 = vpop.f32.mrf.mxu0 }
 0xe0e   :  { %v3012_v47 = vmul.f32 0.17677669, %v3002_v8 }
 0xe0f   :  { %v4825_v61 = vpop.f32.mrf.mxu0 }
 0xe10   :  { %v6923_v26 = vsel %vm5979_vm9, %v3012_v47, -1e+30  ;;  %v2813_v47 = vpop.permute.xlu1 %2812  ;;  %v3011_v61 = vmul.f32 0.17677669, %v2997_v35 }
 0xe11   :  { %v3005_v22 = vpop.f32.mrf.mxu0  ;;  %v3030_v53 = vsel %vm654_vm5, %v6923_v26, -inf }
 0xe12   :  { %3031 = vmax.xlane.f32.xlu1 %v3030_v53  ;;  %v6945_v11 = vsel %vm5955_vm8, %v3011_v61, -1e+30  ;;  %v2826_v61 = vsel %vm712_vm3, %v2813_v47, 0 }
 0xe13   :  { %v4826_v41 = vpop.f32.mrf.mxu0 }
 0xe15   :  { %v3208_v37 = vpop.f32.mrf.mxu0 }
 0xe16   :  { %v3230_v49 = vmul.f32 0.17677669, %v3208_v37 }
 0xe17   :  { %v4853_v7 = vpop.f32.mrf.mxu0 }
 0xe18   :  { %v6929_v52 = vsel %vm5909_vm4, %v3230_v49, -1e+30  ;;  %v3027_v49 = vsel %vm654_vm5, %v6945_v11, -inf }
 0xe19   :  { %v3211_v0 = vpop.f32.mrf.mxu0  ;;  %v3240_v57 = vsel %vm654_vm5, %v6929_v52, -inf }
 0xe1a   :  { %3241 = vmax.xlane.f32.xlu1 %v3240_v57  ;;  %v3231_v22 = vmul.f32 0.17677669, %v3211_v0 }
 0xe1b   :  { %v4854_v3 = vpop.f32.mrf.mxu0 }
 0xe1c   :  { %2810 = vrot.lane.b32.xlu0 %v6723_v20, %s5379_s24  ;;  %v6952_v7 = vsel %vm5921_vm6, %v3231_v22, -1e+30 }
 0xe1d   :  { %v3216_v6 = vpop.f32.mrf.mxu0  ;;  %v3243_v0 = vsel %vm654_vm5, %v6952_v7, -inf }
 0xe1e   :  { %v3232_v31 = vmul.f32 0.17677669, %v3216_v6 }
 0xe1f   :  { %v4857_v60 = vpop.f32.mrf.mxu0 }
 0xe20   :  { %v6937_v25 = vsel %vm5937_vm7, %v3232_v31, -1e+30 }
 0xe21   :  { %v3219_v63 = vpop.f32.mrf.mxu0  ;;  %v3246_v40 = vsel %vm654_vm5, %v6937_v25, -inf }
 0xe22   :  { %3247 = vmax.xlane.f32.xlu1 %v3246_v40  ;;  %v3233_v35 = vmul.f32 0.17677669, %v3219_v63 }
 0xe23   :  { %v4858_v30 = vpop.f32.mrf.mxu0 }
 0xe25   :  { %v3224_v21 = vpop.f32.mrf.mxu0 }
 0xe27   :  { %v4861_v9 = vpop.f32.mrf.mxu0 }
 0xe29   :  { %v3227_v58 = vpop.f32.mrf.mxu0 }
 0xe2b   :  { %v4862_v8 = vpop.f32.mrf.mxu0 }
 0xe33   :  { %3293 = vrot.lane.b32.xlu1 %v6748_v24, %s5379_s24 }
 0xe36   :  { %v2537_v20 = vpop.xlane.xlu1 %2536 }
 0xe37   :  { %v2550_v53 = vsub.f32 %v6843_v51, %v2537_v20  ;;  %v6959_v51 = vsel %vm5955_vm8, %v3233_v35, -1e+30  ;;  %v3234_v20 = vmul.f32 0.17677669, %v3224_v21 }
 0xe39   :  { %v2555_v41 = vmul.f32 1.442695, %v2550_v53  ;;  %v6982_v53 = vsel %vm5979_vm9, %v3234_v20, -1e+30 }
 0xe3a   :  { %v2540_v37 = vpop.xlane.xlu0 %2539  ;;  %v3252_v47 = vsel %vm654_vm5, %v6982_v53, -inf }
 0xe3b   :  { %v2551_v57 = vsub.f32 %v6849_v39, %v2540_v37  ;;  %3028 = vmax.xlane.f32.xlu0 %v3027_v49  ;;  %5253 = vpow2.f32 %v2555_v41  ;;  %v3249_v39 = vsel %vm654_vm5, %v6959_v51, -inf }
 0xe3d   :  { %v2557_v3 = vmul.f32 1.442695, %v2551_v57 }
 0xe3e   :  { %v2543_v6 = vpop.xlane.xlu0 %2542 }
 0xe3f   :  { %5255 = vpow2.f32 %v2557_v3  ;;  %v2552_v31 = vsub.f32 %v6855_v45, %v2543_v6  ;;  %3244 = vmax.xlane.f32.xlu0 %v3243_v0  ;;  %v2420_v0 = vadd.f32 %v6744_v16, %v6709_v50 }
 0xe41   :  { %v2559_v55 = vmul.f32 1.442695, %v2552_v31 }
 0xe42   :  { %v2546_v60 = vpop.xlane.xlu0 %2545 }
 0xe43   :  { %v2553_v63 = vsub.f32 %v6861_v62, %v2546_v60  ;;  %3250 = vmax.xlane.f32.xlu0 %v3249_v39  ;;  %5257 = vpow2.f32 %v2559_v55  ;;  %v2433_v62 = vpop.f32.mrf.mxu1  ;;  %v2414_v60 = vadd.f32 %v6742_v29, %v6709_v50 }
 0xe44   :  { %v2434_v22 = vadd.f32 %v2433_v62, %v6709_v50 }
 0xe45   :  { %v2561_v40 = vmul.f32 1.442695, %v2553_v63  ;;  %v2922_v63 = vpack.c.bf16 %v2420_v0, %v2414_v60 }
 0xe46   :  { %v2549_v30 = vpop.xlane.xlu1 %2548  ;;  %v2924_v37 = vpack.c.bf16 %v2434_v22, %v2434_v22 }
 0xe47   :  { %5259 = vpow2.f32 %v2561_v40  ;;  %v2554_v23 = vsub.f32 %v6867_v38, %v2549_v30 }
 0xe48   :  { %v6966_v58 = vpop.eup %5253  ;;  %v3076_v0 = vsel %vm712_vm3, %v2924_v37, 0 }
 0xe49   :  { %v2563_v9 = vmul.f32 1.442695, %v2554_v23 }
 0xe4b   :  { %5261 = vpow2.f32 %v2563_v9 }
 0xe4c   :  { %v6968_v8 = vpop.eup %5255 }
 0xe4d   :  { %v2580_v45 = vpack.c.bf16 %v6968_v8, %v6966_v58 }
 0xe4e   :  { %v2759_v49 = vpop.xlane.xlu0 %2758 }
 0xe4f   :  { %4762 = vmatmul.mubr.msk.bf16.vlgmr.msra.gmra.mxu1 %vm654_vm5, %v2580_v45  ;;  %v2772_v23 = vsub.f32 %v6873_v56, %v2759_v49 }
 0xe50   :  { %4792 = vmatpush3.bf16.msra.mxu1 %v2826_v61  ;;  %4765 = vmatprep.mubr.msk.bf16.mxu1 %vm5380_vm1, %v5376_v59  ;;  %v6977_v38 = vpop.eup %5257 }
 0xe51   :  { %4793 = vmatprep.subr.bf16.mxu1 %v5376_v59  ;;  %v2777_v45 = vmul.f32 1.442695, %v2772_v23 }
 0xe52   :  { %v2762_v35 = vpop.xlane.xlu1 %2761 }
 0xe53   :  { %v2773_v3 = vsub.f32 %v6879_v18, %v2762_v35 }
 0xe54   :  { %v6984_v41 = vpop.eup %5259 }
 0xe55   :  { %v2581_v21 = vpack.c.bf16 %v6984_v41, %v6977_v38  ;;  %v2779_v31 = vmul.f32 1.442695, %v2773_v3 }
 0xe56   :  { %v2765_v6 = vpop.xlane.xlu0 %2764 }
 0xe57   :  { %4766 = vmatmul.mubr.msk.bf16.gmra.mxu1 %vm654_vm5, %v2581_v21  ;;  %3253 = vmax.xlane.f32.xlu1 %v3252_v47  ;;  %v2774_v55 = vsub.f32 %v6885_v15, %v2765_v6  ;;  %5263 = vpow2.f32 %v2779_v31 }
 0xe58   :  { %4769 = vmatprep.mubr.msk.bf16.mxu1 %vm5380_vm1, %v5376_v59  ;;  %v6994_v1 = vpop.eup %5261 }
 0xe59   :  { %3295 = vrot.lane.b32.xlu0 %v2924_v37, %s5379_s24  ;;  %v2582_v57 = vpack.c.bf16 %v6994_v1, %v6994_v1  ;;  %v2781_v40 = vmul.f32 1.442695, %v2774_v55 }
 0xe5a   :  { %v2768_v39 = vpop.xlane.xlu1 %2767 }
 0xe5b   :  { %v2775_v18 = vsub.f32 %v6891_v28, %v2768_v39  ;;  %5265 = vpow2.f32 %v2781_v40 }
 0xe5d   :  { %v2783_v30 = vmul.f32 1.442695, %v2775_v18 }
 0xe5e   :  { %v2771_v9 = vpop.xlane.xlu0 %2770 }
 0xe5f   :  { %4770 = vmatmul.mubr.msk.bf16.gmra.mxu1 %vm654_vm5, %v2582_v57  ;;  %5267 = vpow2.f32 %v2783_v30  ;;  %v2776_v15 = vsub.f32 %v6897_v43, %v2771_v9  ;;  %v2809_v57 = vpop.permute.xlu1 %2808 }
 0xe60   :  { %4797 = vmatprep.mubr.msk.bf16.mxu1 %vm5380_vm1, %v5376_v59  ;;  %5269 = vpow2.f32 %v2777_v45 }
 0xe61   :  { %v2785_v61 = vmul.f32 1.442695, %v2776_v15 }
 0xe63   :  { %5271 = vpow2.f32 %v2785_v61 }
 0xe64   :  { %v5264_v16 = vpop.eup %5263 }
 0xe65   :  { %v2790_v50 = vsel %vm654_vm5, %v5264_v16, 0.0 }
 0xe68   :  { %3291 = vrot.lane.b32.xlu1 %v2922_v63, %s5379_s24  ;;  %v5266_v29 = vpop.eup %5265 }
 0xe69   :  { %v2793_v28 = vsel %vm654_vm5, %v5266_v29, 0.0 }
 0xe6c   :  { %v5268_v20 = vpop.eup %5267 }
 0xe6d   :  { %v2796_v62 = vsel %vm654_vm5, %v5268_v20, 0.0  ;;  %v5270_v56 = vpop.eup %5269 }
 0xe6e   :  { %v2787_v21 = vsel %vm654_vm5, %v5270_v56, 0.0  ;;  %v2802_v3 = vpack.c.bf16 %v5264_v16, %v5270_v56 }
 0xe70   :  { %v5272_v47 = vpop.eup %5271 }
 0xe71   :  { %v2799_v49 = vsel %vm654_vm5, %v5272_v47, 0.0  ;;  %v2804_v30 = vpack.c.bf16 %v5272_v47, %v5272_v47 }
 0xe78   :  { %2791 = vadd.xlane.f32.xlu0 %v2790_v50 }
 0xe7c   :  { %2794 = vadd.xlane.f32.xlu0 %v2793_v28 }
 0xe80   :  { %2797 = vadd.xlane.f32.xlu0 %v2796_v62 }
 0xe8b   :  { %v3020_v22 = vpop.xlane.xlu0 %3019 }
 0xe8c   :  { %2788 = vadd.xlane.f32.xlu1 %v2787_v21  ;;  %v3033_v31 = vsub.f32 %v6905_v46, %v3020_v22 }
 0xe8e   :  { %v3038_v39 = vmul.f32 1.442695, %v3033_v31 }
 0xe8f   :  { %v3023_v43 = vpop.xlane.xlu0 %3022 }
 0xe90   :  { %2800 = vadd.xlane.f32.xlu1 %v2799_v49  ;;  %v3034_v6 = vsub.f32 %v6911_v4, %v3023_v43  ;;  %v2803_v4 = vpack.c.bf16 %v5268_v20, %v5266_v29 }
 0xe92   :  { %v3040_v60 = vmul.f32 1.442695, %v3034_v6 }
 0xe93   :  { %v2811_v35 = vpop.permute.xlu0 %2810  ;;  %v3026_v55 = vpop.xlane.xlu1 %3025 }
 0xe94   :  { %4794 = vmatpush3.bf16.msra.mxu1 %v2811_v35  ;;  %5273 = vpow2.f32 %v3040_v60  ;;  %v3035_v29 = vsub.f32 %v6917_v32, %v3026_v55 }
 0xe95   :  { %4795 = vmatprep.subr.bf16.mxu1 %v5376_v59  ;;  %5275 = vpow2.f32 %v3038_v39 }
 0xe96   :  { %v3042_v61 = vmul.f32 1.442695, %v3035_v29 }
 0xe98   :  { %4796 = vmatpush3.bf16.msra.mxu1 %v2809_v57 }
 0xe99   :  { %4827 = vmatprep.subr.bf16.mxu1 %v5376_v59 }
 0xe9b   :  { %4798 = vmatmul.mubr.msk.bf16.vlgmr.msra.gmra.mxu1 %vm654_vm5, %v2802_v3  ;;  %v3032_v40 = vpop.xlane.xlu1 %3031 }
 0xe9c   :  { %4828 = vmatpush3.bf16.msra.mxu1 %v3076_v0  ;;  %4801 = vmatprep.mubr.msk.bf16.mxu1 %vm5380_vm1, %v5376_v59  ;;  %v3037_v62 = vsub.f32 %v6923_v26, %v3032_v40 }
 0xe9d   :  { %4829 = vmatprep.subr.bf16.mxu1 %v5376_v59 }
 0xe9e   :  { %v3046_v47 = vmul.f32 1.442695, %v3037_v62 }
 0xea0   :  { %4830 = vmatpush3.bf16.msra.mxu1 %v6748_v24 }
 0xea1   :  { %4831 = vmatprep.subr.bf16.mxu1 %v5376_v59  ;;  %v7036_v16 = vpop.eup %5273 }
 0xea3   :  { %4802 = vmatmul.mubr.msk.bf16.gmra.mxu1 %vm654_vm5, %v2803_v4  ;;  %v3242_v46 = vpop.xlane.xlu1 %3241 }
 0xea4   :  { %v3255_v37 = vsub.f32 %v6929_v52, %v3242_v46  ;;  %4832 = vmatpush3.bf16.msra.mxu1 %v2922_v63  ;;  %4805 = vmatprep.mubr.msk.bf16.mxu1 %vm5380_vm1, %v5376_v59  ;;  %v7038_v63 = vpop.eup %5275 }
 0xea5   :  { %4863 = vmatprep.subr.bf16.mxu1 %v5376_v59  ;;  %v3063_v9 = vpack.c.bf16 %v7036_v16, %v7038_v63 }
 0xea6   :  { %v3260_v18 = vmul.f32 1.442695, %v3255_v37  ;;  %v2565_v37 = vsel %vm654_vm5, %v6966_v58, 0.0  ;;  %v3051_v58 = vsel %vm654_vm5, %v7036_v16, 0.0  ;;  %v2574_v16 = vsel %vm654_vm5, %v6984_v41, 0.0 }
 0xea8   :  { %5277 = vpow2.f32 %v3260_v18 }
 0xeab   :  { %4806 = vmatmul.mubr.msk.bf16.gmra.mxu1 %vm654_vm5, %v2804_v30  ;;  %v3248_v24 = vpop.xlane.xlu1 %3247 }
 0xeac   :  { %v3257_v23 = vsub.f32 %v6937_v25, %v3248_v24  ;;  %4833 = vmatprep.mubr.msk.bf16.mxu1 %vm5380_vm1, %v5376_v59  ;;  %v2571_v24 = vsel %vm654_vm5, %v6977_v38, 0.0 }
 0xeae   :  { %v3264_v52 = vmul.f32 1.442695, %v3257_v23 }
 0xeaf   :  { %v3294_v3 = vpop.permute.xlu1 %3293 }
 0xeb0   :  { %5279 = vpow2.f32 %v3264_v52 }
 0xeb1   :  { %5281 = vpow2.f32 %v3042_v61 }
 0xeb3   :  { %4834 = vmatmul.mubr.msk.bf16.vlgmr.msra.gmra.mxu1 %vm654_vm5, %v3063_v9  ;;  %v2568_v9 = vsel %vm654_vm5, %v6968_v8, 0.0 }
 0xeb4   :  { %4837 = vmatprep.mubr.msk.bf16.mxu1 %vm5380_vm1, %v5376_v59 }
 0xeb5   :  { %v5278_v45 = vpop.eup %5277 }
 0xeb6   :  { %v3270_v25 = vsel %vm654_vm5, %v5278_v45, 0.0 }
 0xeb7   :  { %3271 = vadd.xlane.f32.xlu0 %v3270_v25 }
 0xebd   :  { %v7046_v15 = vpop.eup %5279 }
 0xebe   :  { %v3276_v50 = vsel %vm654_vm5, %v7046_v15, 0.0  ;;  %v5282_v26 = vpop.eup %5281 }
 0xebf   :  { %3277 = vadd.xlane.f32.xlu0 %v3276_v50  ;;  %v3054_v25 = vsel %vm654_vm5, %v5282_v26, 0.0 }
 0xec4   :  { %v3029_v28 = vpop.xlane.xlu0 %3028 }
 0xec5   :  { %v3036_v20 = vsub.f32 %v6945_v11, %v3029_v28 }
 0xec7   :  { %v3044_v56 = vmul.f32 1.442695, %v3036_v20 }
 0xec8   :  { %v3245_v22 = vpop.xlane.xlu0 %3244 }
 0xec9   :  { %5283 = vpow2.f32 %v3044_v56  ;;  %v3256_v21 = vsub.f32 %v6952_v7, %v3245_v22 }
 0xecb   :  { %v3262_v43 = vmul.f32 1.442695, %v3256_v21 }
 0xecc   :  { %v3251_v49 = vpop.xlane.xlu0 %3250 }
 0xecd   :  { %5285 = vpow2.f32 %v3262_v43  ;;  %v3258_v35 = vsub.f32 %v6959_v51, %v3251_v49  ;;  %v5077_v43 = vld [vmem:[%s7564_s4 + $0x38] sm:$0xff]   ;;  %v5078_v49 = vld [vmem:[%s7564_s4 + $0x30] sm:$0xff]  }
 0xece   :  { %5287 = vpow2.f32 %v3046_v47  ;;  %4882 = vmatpush3.bf16.msra.mxu0 %v5077_v43 }
 0xecf   :  { %v3266_v32 = vmul.f32 1.442695, %v3258_v35  ;;  %4883 = vmatprep.subr.bf16.mxu0 %v5376_v59  ;;  %v5079_v35 = vld [vmem:[%s7564_s4 + $0x28] sm:$0xff]  }
 0xed0   :  { %v3296_v57 = vpop.permute.xlu0 %3295 }
 0xed1   :  { %5289 = vpow2.f32 %v3266_v32  ;;  %v3309_v11 = vsel %vm712_vm3, %v3296_v57, 0 }
 0xed2   :  { %4864 = vmatpush3.bf16.msra.mxu1 %v3309_v11  ;;  %4884 = vmatpush3.bf16.msra.mxu0 %v5078_v49 }
 0xed3   :  { %4865 = vmatprep.subr.bf16.mxu1 %v5376_v59  ;;  %4885 = vmatprep.subr.bf16.mxu0 %v5376_v59 }
 0xed6   :  { %v5284_v6 = vpop.eup %5283  ;;  %4866 = vmatpush3.bf16.msra.mxu1 %v3294_v3  ;;  %4886 = vmatpush3.bf16.msra.mxu0 %v5079_v35  ;;  %v5080_v3 = vld [vmem:[%s7564_s4 + $0x20] sm:$0xff]  }
 0xed7   :  { %v3064_v7 = vpack.c.bf16 %v5284_v6, %v5282_v26  ;;  %4867 = vmatprep.subr.bf16.mxu1 %v5376_v59  ;;  %v3057_v8 = vsel %vm654_vm5, %v5284_v6, 0.0  ;;  %4887 = vmatprep.subr.bf16.mxu0 %v5376_v59 }
 0xed9   :  { %4838 = vmatmul.mubr.msk.bf16.gmra.mxu1 %vm654_vm5, %v3064_v7 }
 0xeda   :  { %v5286_v0 = vpop.eup %5285  ;;  %4841 = vmatprep.mubr.msk.bf16.mxu1 %vm5380_vm1, %v5376_v59  ;;  %4888 = vmatpush3.bf16.msra.mxu0 %v5080_v3 }
 0xedb   :  { %v3273_v51 = vsel %vm654_vm5, %v5286_v0, 0.0  ;;  %v5288_v31 = vpop.eup %5287  ;;  %v3285_v30 = vpack.c.bf16 %v5286_v0, %v5278_v45  ;;  %v3048_v45 = vsel %vm654_vm5, %v7038_v63, 0.0  ;;  %4937 = vmatprep.subr.bf16.mxu0 %v5376_v59 }
 0xedc   :  { %3274 = vadd.xlane.f32.xlu1 %v3273_v51  ;;  %v3065_v39 = vpack.c.bf16 %v5288_v31, %v5288_v31 }
 0xede   :  { %v5290_v55 = vpop.eup %5289 }
 0xedf   :  { %v3279_v60 = vsel %vm654_vm5, %v5290_v55, 0.0  ;;  %v3286_v23 = vpack.c.bf16 %v5290_v55, %v7046_v15  ;;  %v3060_v15 = vsel %vm654_vm5, %v5288_v31, 0.0 }
 0xee0   :  { %3280 = vadd.xlane.f32.xlu1 %v3279_v60  ;;  %v3254_v40 = vpop.xlane.xlu1 %3253 }
 0xee1   :  { %v3259_v4 = vsub.f32 %v6982_v53, %v3254_v40  ;;  %4842 = vmatmul.mubr.msk.bf16.gmra.mxu1 %vm654_vm5, %v3065_v39  ;;  %v2577_v53 = vsel %vm654_vm5, %v6994_v1, 0.0 }
 0xee2   :  { %4869 = vmatprep.mubr.msk.bf16.mxu1 %vm5380_vm1, %v5376_v59 }
 0xee3   :  { %v3268_v46 = vmul.f32 1.442695, %v3259_v4 }
 0xee4   :  { %2566 = vadd.xlane.f32.xlu1 %v2565_v37  ;;  %v3292_v18 = vpop.permute.xlu1 %3291 }
 0xee5   :  { %5291 = vpow2.f32 %v3268_v46  ;;  %4868 = vmatpush3.bf16.msra.mxu1 %v3292_v18 }
 0xee6   :  { %4909 = vmatprep.subr.bf16.mxu1 %v5376_v59 }
 0xee8   :  { %2572 = vadd.xlane.f32.xlu1 %v2571_v24 }
 0xee9   :  { %4870 = vmatmul.mubr.msk.bf16.vlgmr.msra.gmra.mxu1 %vm654_vm5, %v3285_v30 }
 0xeea   :  { %4873 = vmatprep.mubr.msk.bf16.mxu1 %vm5380_vm1, %v5376_v59 }
 0xeec   :  { %2578 = vadd.xlane.f32.xlu1 %v2577_v53 }
 0xef0   :  { %3052 = vadd.xlane.f32.xlu1 %v3051_v58 }
 0xef1   :  { %4874 = vmatmul.mubr.msk.bf16.gmra.mxu1 %vm654_vm5, %v3286_v23 }
 0xef2   :  { %v5292_v52 = vpop.eup %5291  ;;  %4877 = vmatprep.mubr.msk.bf16.mxu1 %vm5380_vm1, %v5376_v59 }
 0xef3   :  { %v3282_v38 = vsel %vm654_vm5, %v5292_v52, 0.0  ;;  %v3287_v1 = vpack.c.bf16 %v5292_v52, %v5292_v52 }
 0xef4   :  { %3283 = vadd.xlane.f32.xlu0 %v3282_v38 }
 0xef8   :  { %2569 = vadd.xlane.f32.xlu0 %v2568_v9 }
 0xef9   :  { %4878 = vmatmul.mubr.msk.bf16.gmra.mxu1 %vm654_vm5, %v3287_v1 }
 0xefa   :  { %4917 = vmatprep.mubr.msk.bf16.mxu1 %vm5380_vm1, %v5376_v59 }
 0xefc   :  { %2575 = vadd.xlane.f32.xlu0 %v2574_v16 }
 0xf00   :  { %3049 = vadd.xlane.f32.xlu0 %v3048_v45 }
 0xf01   :  { %v2792_v32 = vpop.xlane.xlu0 %2791 }
 0xf02   :  { %5293 = vrcp.f32 %v2792_v32 }
 0xf04   :  { %3055 = vadd.xlane.f32.xlu0 %v3054_v25 }
 0xf05   :  { %v2795_v11 = vpop.xlane.xlu0 %2794 }
 0xf08   :  { %3058 = vadd.xlane.f32.xlu0 %v3057_v8 }
 0xf09   :  { %v2798_v26 = vpop.xlane.xlu0 %2797 }
 0xf0c   :  { %3061 = vadd.xlane.f32.xlu0 %v3060_v15 }
 0xf0f   :  { %v7096_v50 = vpop.f32.mrf.mxu1  ;;  %v5294_v0 = vpop.eup %5293 }
 0xf11   :  { %v4763_v29 = vpop.f32.mrf.mxu1 }
 0xf13   :  { %v7098_v61 = vpop.f32.mrf.mxu1 }
 0xf15   :  { %v4764_v41 = vpop.f32.mrf.mxu1  ;;  %v2789_v57 = vpop.xlane.xlu1 %2788 }
 0xf16   :  { %5295 = vrcp.f32 %v2789_v57 }
 0xf17   :  { %v7100_v28 = vpop.f32.mrf.mxu1  ;;  %5297 = vrcp.f32 %v2795_v11 }
 0xf18   :  { %5299 = vrcp.f32 %v2798_v26 }
 0xf19   :  { %v4767_v20 = vpop.f32.mrf.mxu1  ;;  %v2801_v49 = vpop.xlane.xlu1 %2800 }
 0xf1b   :  { %v7102_v63 = vpop.f32.mrf.mxu1 }
 0xf1d   :  { %v4768_v62 = vpop.f32.mrf.mxu1 }
 0xf1f   :  { %v7104_v56 = vpop.f32.mrf.mxu1 }
 0xf21   :  { %v4771_v22 = vpop.f32.mrf.mxu1 }
 0xf23   :  { %v2648_v21 = vpop.f32.mrf.mxu1  ;;  %v5296_v51 = vpop.eup %5295 }
 0xf24   :  { %v5298_v37 = vpop.eup %5297 }
 0xf25   :  { %v4772_v47 = vpop.f32.mrf.mxu1  ;;  %v5300_v18 = vpop.eup %5299 }
 0xf40   :  { %v3272_v45 = vpop.xlane.xlu0 %3271 }
 0xf48   :  { %v3278_v15 = vpop.xlane.xlu0 %3277 }
 0xf5b   :  { %v2862_v6 = vpop.f32.mrf.mxu1 }
 0xf5c   :  { %v2889_v55 = vmul.f32 %v5296_v51, %v2862_v6 }
 0xf5d   :  { %v4799_v7 = vpop.f32.mrf.mxu1 }
 0xf5f   :  { %v2865_v31 = vpop.f32.mrf.mxu1 }
 0xf60   :  { %v2890_v60 = vmul.f32 %v5294_v0, %v2865_v31 }
 0xf61   :  { %v4800_v39 = vpop.f32.mrf.mxu1 }
 0xf62   :  { %v5012_v40 = vpack.i.bf16 %v2890_v60, %v2889_v55 }
 0xf63   :  { %v2870_v4 = vpop.f32.mrf.mxu1 }
 0xf64   :  { %5013 = vrot.lane.b32.xlu1 %v5012_v40, %s5378_s23  ;;  %v2891_v24 = vmul.f32 %v5298_v37, %v2870_v4 }
 0xf65   :  { %v4803_v46 = vpop.f32.mrf.mxu1  ;;  %v3275_v51 = vpop.xlane.xlu1 %3274 }
 0xf67   :  { %v2873_v30 = vpop.f32.mrf.mxu1 }
 0xf68   :  { %v2892_v53 = vmul.f32 %v5300_v18, %v2873_v30 }
 0xf69   :  { %v4804_v58 = vpop.f32.mrf.mxu1  ;;  %v3281_v4 = vpop.xlane.xlu1 %3280 }
 0xf6a   :  { %v5017_v23 = vpack.i.bf16 %v2892_v53, %v2891_v24 }
 0xf6b   :  { %v2878_v52 = vpop.f32.mrf.mxu1 }
 0xf6c   :  { %5018 = vrot.lane.b32.xlu0 %v5017_v23, %s5378_s23 }
 0xf6d   :  { %v4807_v38 = vpop.f32.mrf.mxu1 }
 0xf6f   :  { %v2881_v9 = vpop.f32.mrf.mxu1 }
 0xf71   :  { %v4808_v1 = vpop.f32.mrf.mxu1 }
 0xf73   :  { %v3112_v16 = vpop.f32.mrf.mxu1 }
 0xf75   :  { %v4835_v25 = vpop.f32.mrf.mxu1 }
 0xf77   :  { %v7124_v8 = vpop.f32.mrf.mxu1 }
 0xf79   :  { %v4836_v29 = vpop.f32.mrf.mxu1 }
 0xf7d   :  { %v3284_v41 = vpop.xlane.xlu0 %3283 }
 0xf81   :  { %v7126_v20 = vpop.xlane.xlu0 %2569 }
 0xf85   :  { %v7128_v62 = vpop.xlane.xlu0 %2575 }
 0xf89   :  { %v3050_v22 = vpop.xlane.xlu0 %3049 }
 0xf8a   :  { %5301 = vrcp.f32 %v3050_v22 }
 0xf8d   :  { %v3056_v21 = vpop.xlane.xlu0 %3055 }
 0xf8e   :  { %5303 = vrcp.f32 %v3056_v21 }
 0xf91   :  { %v3059_v47 = vpop.xlane.xlu0 %3058 }
 0xf92   :  { %5305 = vrcp.f32 %v3059_v47 }
 0xf93   :  { %5307 = vrcp.f32 %v2801_v49 }
 0xf94   :  { %5309 = vrcp.f32 %v3272_v45 }
 0xf95   :  { %5311 = vrcp.f32 %v3278_v15 }
 0xf96   :  { %5313 = vrcp.f32 %v3275_v51 }
 0xf97   :  { %v5302_v43 = vpop.eup %5301  ;;  %5315 = vrcp.f32 %v3281_v4 }
 0xf98   :  { %v7130_v35 = vmul.f32 %v5302_v43, %v3112_v16  ;;  %5317 = vrcp.f32 %v3284_v41 }
 0xf99   :  { %v3120_v32 = vpop.f32.mrf.mxu1 }
 0xf9b   :  { %v5304_v57 = vpop.eup %5303  ;;  %v4839_v11 = vpop.f32.mrf.mxu1 }
 0xf9c   :  { %v7132_v26 = vmul.f32 %v5304_v57, %v3120_v32 }
 0xf9d   :  { %v3123_v3 = vpop.f32.mrf.mxu1 }
 0xf9f   :  { %v5306_v6 = vpop.eup %5305  ;;  %v4840_v7 = vpop.f32.mrf.mxu1 }
 0xfa0   :  { %v7134_v0 = vmul.f32 %v5306_v6, %v3123_v3  ;;  %v5308_v40 = vpop.eup %5307  ;;  %v2567_v3 = vpop.xlane.xlu1 %2566 }
 0xfa1   :  { %v7136_v31 = vpop.f32.mrf.mxu1  ;;  %v5310_v46 = vpop.eup %5309  ;;  %v2893_v18 = vmul.f32 %v5308_v40, %v2878_v52  ;;  %5319 = vrcp.f32 %v2567_v3 }
 0xfa2   :  { %v5312_v38 = vpop.eup %5311  ;;  %5321 = vrcp.f32 %v7126_v20 }
 0xfa3   :  { %v4843_v55 = vpop.f32.mrf.mxu1  ;;  %v5314_v9 = vpop.eup %5313 }
 0xfa4   :  { %v5316_v22 = vpop.eup %5315  ;;  %v2573_v6 = vpop.xlane.xlu1 %2572 }
 0xfa5   :  { %v3131_v60 = vpop.f32.mrf.mxu1  ;;  %v5318_v21 = vpop.eup %5317  ;;  %5323 = vrcp.f32 %v2573_v6 }
 0xfa6   :  { %5325 = vrcp.f32 %v7128_v62 }
 0xfa7   :  { %v4844_v39 = vpop.f32.mrf.mxu1 }
 0xfa8   :  { %v2579_v7 = vpop.xlane.xlu1 %2578 }
 0xfa9   :  { %v3345_v37 = vpop.f32.mrf.mxu1  ;;  %5327 = vrcp.f32 %v2579_v7 }
 0xfaa   :  { %v3372_v30 = vmul.f32 %v5310_v46, %v3345_v37 }
 0xfab   :  { %v4871_v24 = vpop.f32.mrf.mxu1 }
 0xfac   :  { %v5022_v53 = vpack.i.bf16 %v3372_v30, %v2893_v18  ;;  %v3053_v51 = vpop.xlane.xlu1 %3052  ;;  %v3062_v24 = vpop.xlane.xlu0 %3061 }
 0xfad   :  { %v3348_v58 = vpop.f32.mrf.mxu1  ;;  %5329 = vrcp.f32 %v3053_v51 }
 0xfae   :  { %5023 = vrot.lane.b32.xlu1 %v5022_v53, %s5378_s23  ;;  %v3373_v16 = vmul.f32 %v5314_v9, %v3348_v58  ;;  %v5320_v55 = vpop.eup %5319  ;;  %5331 = vrcp.f32 %v3062_v24 }
 0xfaf   :  { %v4872_v23 = vpop.f32.mrf.mxu1  ;;  %v5322_v60 = vpop.eup %5321  ;;  %v2656_v40 = vmul.f32 %v5320_v55, %v7096_v50  ;;  %v7181_v55 = vld [vmem:[%s7563_s7 + $0x10] sm:$0xff] }
 0xfb0   :  { %v2657_v4 = vmul.f32 %v5322_v60, %v7098_v61 }
 0xfb1   :  { %v3353_v1 = vpop.f32.mrf.mxu1 }
 0xfb2   :  { %v3374_v45 = vmul.f32 %v5312_v38, %v3353_v1  ;;  %v5324_v53 = vpop.eup %5323 }
 0xfb3   :  { %v4875_v25 = vpop.f32.mrf.mxu1  ;;  %v5326_v58 = vpop.eup %5325  ;;  %v2658_v38 = vmul.f32 %v5324_v53, %v7100_v28 }
 0xfb4   :  { %v5027_v15 = vpack.i.bf16 %v3374_v45, %v3373_v16  ;;  %v2659_v50 = vmul.f32 %v5326_v58, %v7102_v63 }
 0xfb5   :  { %v3356_v29 = vpop.f32.mrf.mxu1 }
 0xfb6   :  { %5028 = vrot.lane.b32.xlu1 %v5027_v15, %s5378_s23  ;;  %v3375_v41 = vmul.f32 %v5316_v22, %v3356_v29  ;;  %v5328_v45 = vpop.eup %5327 }
 0xfb7   :  { %v4876_v52 = vpop.f32.mrf.mxu1  ;;  %v2660_v63 = vmul.f32 %v5328_v45, %v7104_v56 }
 0xfb9   :  { %v3361_v47 = vpop.f32.mrf.mxu1 }
 0xfba   :  { %v3376_v43 = vmul.f32 %v5318_v21, %v3361_v47  ;;  %v5330_v21 = vpop.eup %5329 }
 0xfbb   :  { %v4879_v49 = vpop.f32.mrf.mxu1 }
 0xfbc   :  { %v5032_v32 = vpack.i.bf16 %v3376_v43, %v3375_v41  ;;  %v3140_v41 = vmul.f32 %v5330_v21, %v7124_v8 }
 0xfbd   :  { %v3364_v57 = vpop.f32.mrf.mxu1 }
 0xfbe   :  { %5033 = vrot.lane.b32.xlu1 %v5032_v32, %s5378_s23  ;;  %v5332_v57 = vpop.eup %5331 }
 0xfbf   :  { %v4880_v11 = vpop.f32.mrf.mxu1  ;;  %v3143_v3 = vmul.f32 %v5332_v57, %v7136_v31  ;;  %v3419_v31 = vrot.slane %v7181_v55, %v1538_v10 }
 0xfd6   :  { %v5014_v39 = vpop.permute.xlu1 %5013 }
 0xfd7   :  { %v5016_v46 = vunpack.i.h.bf16 %v5014_v39  ;;  %v5015_v37 = vunpack.i.l.bf16 %v5014_v39 }
 0xfd9   :  { %v2915_v18 = vsel %vm569_vm2, %v2657_v4, %v5016_v46  ;;  %v2914_v30 = vsel %vm569_vm2, %v2656_v40, %v5015_v37 }
 0xfda   :  { %v3402_v20 = vpack.c.bf16 %v2915_v18, %v2914_v30 }
 0xfdc   :  { %4890 = vmatmul.mubr.msk.bf16.vlgmr.msra.gmra.mxu0 %vm42_vm0, %v3402_v20 }
 0xfdd   :  { %4893 = vmatprep.mubr.msk.bf16.mxu0 %vm5380_vm1, %v5376_v59 }
 0xfde   :  { %v5019_v62 = vpop.permute.xlu0 %5018 }
 0xfdf   :  { %v5021_v23 = vunpack.i.h.bf16 %v5019_v62  ;;  %v5020_v61 = vunpack.i.l.bf16 %v5019_v62 }
 0xfe1   :  { %v2917_v9 = vsel %vm569_vm2, %v2659_v50, %v5021_v23  ;;  %v2916_v1 = vsel %vm569_vm2, %v2658_v38, %v5020_v61 }
 0xfe2   :  { %v3403_v16 = vpack.c.bf16 %v2917_v9, %v2916_v1 }
 0xfe4   :  { %4894 = vmatmul.mubr.msk.bf16.gmra.mxu0 %vm42_vm0, %v3403_v16 }
 0xfe5   :  { %4897 = vmatprep.mubr.msk.bf16.mxu0 %vm5380_vm1, %v5376_v59 }
0x1020   :  { %v5024_v25 = vpop.permute.xlu1 %5023 }
0x1021   :  { %v5026_v15 = vunpack.i.h.bf16 %v5024_v25  ;;  %v5025_v29 = vunpack.i.l.bf16 %v5024_v25 }
0x1023   :  { %v3397_v28 = vsel %vm569_vm2, %v7130_v35, %v5026_v15  ;;  %v2918_v52 = vsel %vm569_vm2, %v2660_v63, %v5025_v29 }
0x1024   :  { %v3404_v22 = vpack.c.bf16 %v3397_v28, %v2918_v52 }
0x1026   :  { %4898 = vmatmul.mubr.msk.bf16.gmra.mxu0 %vm42_vm0, %v3404_v22 }
0x1027   :  { %4901 = vmatprep.mubr.msk.bf16.mxu0 %vm5380_vm1, %v5376_v59 }
0x1028   :  { %v5029_v47 = vpop.permute.xlu1 %5028 }
0x1029   :  { %v5031_v43 = vunpack.i.h.bf16 %v5029_v47  ;;  %v5030_v49 = vunpack.i.l.bf16 %v5029_v47 }
0x102b   :  { %v3399_v56 = vsel %vm569_vm2, %v7132_v26, %v5031_v43  ;;  %v3398_v32 = vsel %vm569_vm2, %v3140_v41, %v5030_v49 }
0x102c   :  { %v3405_v35 = vpack.c.bf16 %v3399_v56, %v3398_v32 }
0x102e   :  { %4902 = vmatmul.mubr.msk.bf16.gmra.mxu0 %vm42_vm0, %v3405_v35 }
0x102f   :  { %4905 = vmatprep.mubr.msk.bf16.mxu0 %vm5380_vm1, %v5376_v59 }
0x1030   :  { %v5034_v11 = vpop.permute.xlu1 %5033 }
0x1031   :  { %v5036_v6 = vunpack.i.h.bf16 %v5034_v11  ;;  %v5035_v7 = vunpack.i.l.bf16 %v5034_v11 }
0x1033   :  { %v3401_v8 = vsel %vm569_vm2, %v3143_v3, %v5036_v6  ;;  %v3400_v51 = vsel %vm569_vm2, %v7134_v0, %v5035_v7 }
0x1034   :  { %v3406_v26 = vpack.c.bf16 %v3401_v8, %v3400_v51 }
0x1036   :  { %4906 = vmatmul.mubr.msk.bf16.gmra.mxu0 %vm42_vm0, %v3406_v26 }
0x1037   :  { %4953 = vmatprep.mubr.msk.bf16.mxu0 %vm5380_vm1, %v5376_v59 }
0x109c   :  { %v3493_v60 = vpop.f32.mrf.mxu0 }
0x109d   :  { %v3494_v39 = vadd.f32 %v3493_v60, %v3419_v31 }
0x109e   :  { %v4891_v40 = vpop.f32.mrf.mxu0 }
0x109f   :  { %v7187_v0 = vadd.f32 %v3494_v39, %v6505_v33 }
0x10a0   :  { %v3496_v4 = vpop.f32.mrf.mxu0 }
0x10a1   :  { %v3497_v46 = vadd.f32 %v3496_v4, %v3419_v31  ;;  %v3542_v37 = vsel %vm42_vm0, %v7187_v0, 0.0 }
0x10a2   :  { %3543 = vadd.xlane.f32.xlu1 %v3542_v37  ;;  %v4892_v18 = vpop.f32.mrf.mxu0 }
0x10a3   :  { %v7192_v30 = vadd.f32 %v3497_v46, %v6510_v34 }
0x10a4   :  { %v3501_v24 = vpop.f32.mrf.mxu0 }
0x10a5   :  { %v3502_v20 = vadd.f32 %v3501_v24, %v3419_v31  ;;  %v3545_v10 = vsel %vm42_vm0, %v7192_v30, 0.0 }
0x10a6   :  { %3546 = vadd.xlane.f32.xlu0 %v3545_v10  ;;  %v4895_v53 = vpop.f32.mrf.mxu0 }
0x10a7   :  { %v7197_v33 = vadd.f32 %v3502_v20, %v6515_v48 }
0x10a8   :  { %v3504_v58 = vpop.f32.mrf.mxu0 }
0x10a9   :  { %v3505_v62 = vadd.f32 %v3504_v58, %v3419_v31  ;;  %v3548_v50 = vsel %vm42_vm0, %v7197_v33, 0.0 }
0x10aa   :  { %3549 = vadd.xlane.f32.xlu0 %v3548_v50  ;;  %v4896_v23 = vpop.f32.mrf.mxu0  ;;  %v5081_v50 = vld [vmem:[%s7565_s5 + $0x38] sm:$0xff]  }
0x10ab   :  { %v7202_v34 = vadd.f32 %v3505_v62, %v6520_v19  ;;  %4910 = vmatpush3.bf16.msra.mxu1 %v5081_v50  ;;  %v5082_v23 = vld [vmem:[%s7565_s5 + $0x30] sm:$0xff]  }
0x10ac   :  { %4911 = vmatprep.subr.bf16.mxu1 %v5376_v59 }
0x10ad   :  { %v3551_v61 = vsel %vm42_vm0, %v7202_v34, 0.0 }
0x10ae   :  { %3552 = vadd.xlane.f32.xlu1 %v3551_v61  ;;  %v5083_v61 = vld [vmem:[%s7565_s5 + $0x28] sm:$0xff]  }
0x10af   :  { %4912 = vmatpush3.bf16.msra.mxu1 %v5082_v23  ;;  %v5089_v23 = vld [vmem:[%s7566_s6 + $0x58] sm:$0xff]  }
0x10b0   :  { %4913 = vmatprep.subr.bf16.mxu1 %v5376_v59 }
0x10b3   :  { %4914 = vmatpush3.bf16.msra.mxu1 %v5083_v61 }
0x10b4   :  { %4915 = vmatprep.subr.bf16.mxu1 %v5376_v59 }
0x10e6   :  { %v3509_v38 = vpop.f32.mrf.mxu0 }
0x10e7   :  { %v3510_v9 = vadd.f32 %v3509_v38, %v3419_v31  ;;  %v5084_v38 = vld [vmem:[%s7565_s5 + $0x20] sm:$0xff]  }
0x10e8   :  { %v4899_v1 = vpop.f32.mrf.mxu0  ;;  %4916 = vmatpush3.bf16.msra.mxu1 %v5084_v38 }
0x10e9   :  { %v7207_v48 = vadd.f32 %v3510_v9, %v6525_v54 }
0x10ea   :  { %v3512_v16 = vpop.f32.mrf.mxu0 }
0x10eb   :  { %v3513_v45 = vadd.f32 %v3512_v16, %v3419_v31  ;;  %v3554_v25 = vsel %vm42_vm0, %v7207_v48, 0.0 }
0x10ec   :  { %3555 = vadd.xlane.f32.xlu0 %v3554_v25  ;;  %v4900_v63 = vpop.f32.mrf.mxu0 }
0x10ed   :  { %v7212_v19 = vadd.f32 %v3513_v45, %v6530_v2 }
0x10ee   :  { %v3517_v15 = vpop.f32.mrf.mxu0 }
0x10ef   :  { %v3518_v29 = vadd.f32 %v3517_v15, %v3419_v31  ;;  %v3557_v28 = vsel %vm42_vm0, %v7212_v19, 0.0 }
0x10f0   :  { %3558 = vadd.xlane.f32.xlu1 %v3557_v28  ;;  %v4903_v52 = vpop.f32.mrf.mxu0 }
0x10f1   :  { %v7217_v54 = vadd.f32 %v3518_v29, %v6535_v5 }
0x10f2   :  { %v3520_v22 = vpop.f32.mrf.mxu0 }
0x10f3   :  { %v3521_v21 = vadd.f32 %v3520_v22, %v3419_v31  ;;  %v3560_v47 = vsel %vm42_vm0, %v7217_v54, 0.0 }
0x10f4   :  { %3561 = vadd.xlane.f32.xlu0 %v3560_v47  ;;  %v4904_v41 = vpop.f32.mrf.mxu0 }
0x10f5   :  { %v7222_v2 = vadd.f32 %v3521_v21, %v6540_v14 }
0x10f6   :  { %v3525_v43 = vpop.f32.mrf.mxu0 }
0x10f7   :  { %v3526_v49 = vadd.f32 %v3525_v43, %v3419_v31  ;;  %v3563_v56 = vsel %vm42_vm0, %v7222_v2, 0.0 }
0x10f8   :  { %3564 = vadd.xlane.f32.xlu1 %v3563_v56  ;;  %v4907_v32 = vpop.f32.mrf.mxu0 }
0x10f9   :  { %v7227_v5 = vadd.f32 %v3526_v49, %v6545_v17 }
0x10fa   :  { %v3528_v35 = vpop.f32.mrf.mxu0 }
0x10fb   :  { %v3529_v57 = vadd.f32 %v3528_v35, %v3419_v31  ;;  %v3566_v11 = vsel %vm42_vm0, %v7227_v5, 0.0 }
0x10fc   :  { %3567 = vadd.xlane.f32.xlu0 %v3566_v11  ;;  %v4908_v3 = vpop.f32.mrf.mxu0 }
0x10fd   :  { %v7232_v14 = vadd.f32 %v3529_v57, %v6550_v27 }
0x10ff   :  { %v3569_v6 = vsel %vm42_vm0, %v7232_v14, 0.0 }
0x1100   :  { %3570 = vadd.xlane.f32.xlu1 %v3569_v6 }
0x112b   :  { %v3544_v7 = vpop.xlane.xlu1 %3543 }
0x112c   :  { %v3572_v8 = vmul.f32 0.015625, %v3544_v7 }
0x112e   :  { %v7237_v51 = vsub.f32 %v7187_v0, %v3572_v8 }
0x112f   :  { %v3547_v17 = vpop.xlane.xlu0 %3546 }
0x1130   :  { %v3573_v26 = vmul.f32 0.015625, %v3547_v17  ;;  %v3592_v31 = vmul.f32 %v7237_v51, %v7237_v51 }
0x1132   :  { %v7242_v60 = vsub.f32 %v7192_v30, %v3573_v26  ;;  %v3602_v27 = vsel %vm42_vm0, %v3592_v31, 0.0 }
0x1133   :  { %v3550_v39 = vpop.xlane.xlu0 %3549  ;;  %3603 = vadd.xlane.f32.xlu0 %v3602_v27 }
0x1134   :  { %v3574_v40 = vmul.f32 0.015625, %v3550_v39  ;;  %v3593_v4 = vmul.f32 %v7242_v60, %v7242_v60 }
0x1136   :  { %v7248_v46 = vsub.f32 %v7197_v33, %v3574_v40  ;;  %v3605_v37 = vsel %vm42_vm0, %v3593_v4, 0.0  ;;  %v5085_v40 = vld [vmem:[%s7566_s6 + $0x78] sm:$0xff]   ;;  %v5086_v4 = vld [vmem:[%s7566_s6 + $0x70] sm:$0xff]  }
0x1137   :  { %v3553_v18 = vpop.xlane.xlu1 %3552  ;;  %3606 = vadd.xlane.f32.xlu1 %v3605_v37  ;;  %4938 = vmatpush3.bf16.msra.mxu0 %v5085_v40  ;;  %v5087_v37 = vld [vmem:[%s7566_s6 + $0x68] sm:$0xff]  }
0x1138   :  { %v3575_v24 = vmul.f32 0.015625, %v3553_v18  ;;  %v3594_v20 = vmul.f32 %v7248_v46, %v7248_v46  ;;  %4939 = vmatprep.subr.bf16.mxu0 %v5376_v59 }
0x113a   :  { %v7254_v10 = vsub.f32 %v7202_v34, %v3575_v24  ;;  %v3608_v53 = vsel %vm42_vm0, %v3594_v20, 0.0 }
0x113b   :  { %3609 = vadd.xlane.f32.xlu0 %v3608_v53  ;;  %4940 = vmatpush3.bf16.msra.mxu0 %v5086_v4  ;;  %v5088_v53 = vld [vmem:[%s7566_s6 + $0x60] sm:$0xff]  }
0x113c   :  { %v3595_v58 = vmul.f32 %v7254_v10, %v7254_v10  ;;  %4941 = vmatprep.subr.bf16.mxu0 %v5376_v59 }
0x113e   :  { %v3611_v62 = vsel %vm42_vm0, %v3595_v58, 0.0 }
0x113f   :  { %3612 = vadd.xlane.f32.xlu1 %v3611_v62  ;;  %4942 = vmatpush3.bf16.msra.mxu0 %v5087_v37 }
0x1140   :  { %4943 = vmatprep.subr.bf16.mxu0 %v5376_v59 }
0x1143   :  { %4944 = vmatpush3.bf16.msra.mxu0 %v5088_v53 }
0x1144   :  { %4945 = vmatprep.subr.bf16.mxu0 %v5376_v59 }
0x1147   :  { %4946 = vmatpush3.bf16.msra.mxu0 %v5089_v23 }
0x1148   :  { %4947 = vmatprep.subr.bf16.mxu0 %v5376_v59 }
0x1175   :  { %v3556_v9 = vpop.xlane.xlu0 %3555 }
0x1176   :  { %v3576_v1 = vmul.f32 0.015625, %v3556_v9 }
0x1178   :  { %v7276_v16 = vsub.f32 %v7207_v48, %v3576_v1 }
0x1179   :  { %v3559_v45 = vpop.xlane.xlu1 %3558 }
0x117a   :  { %v3577_v25 = vmul.f32 0.015625, %v3559_v45  ;;  %v3596_v63 = vmul.f32 %v7276_v16, %v7276_v16 }
0x117c   :  { %v7281_v15 = vsub.f32 %v7212_v19, %v3577_v25  ;;  %v3614_v29 = vsel %vm42_vm0, %v3596_v63, 0.0 }
0x117d   :  { %v3562_v28 = vpop.xlane.xlu0 %3561  ;;  %3615 = vadd.xlane.f32.xlu0 %v3614_v29  ;;  %v7334_v29 = vrot.slane %v7181_v55, %v1794_v36 }
0x117e   :  { %v3578_v52 = vmul.f32 0.015625, %v3562_v28  ;;  %v3597_v22 = vmul.f32 %v7281_v15, %v7281_v15 }
0x1180   :  { %v7287_v21 = vsub.f32 %v7217_v54, %v3578_v52  ;;  %v3617_v47 = vsel %vm42_vm0, %v3597_v22, 0.0  ;;  %v7340_v22 = vrot.slane %v7181_v55, %v1808_v12 }
0x1181   :  { %v3565_v41 = vpop.xlane.xlu1 %3564  ;;  %3618 = vadd.xlane.f32.xlu1 %v3617_v47 }
0x1182   :  { %v3579_v43 = vmul.f32 0.015625, %v3565_v41  ;;  %v3598_v49 = vmul.f32 %v7287_v21, %v7287_v21 }
0x1184   :  { %v7293_v56 = vsub.f32 %v7222_v2, %v3579_v43  ;;  %v3620_v32 = vsel %vm42_vm0, %v3598_v49, 0.0 }
0x1185   :  { %3621 = vadd.xlane.f32.xlu0 %v3620_v32  ;;  %v3568_v35 = vpop.xlane.xlu0 %3567 }
0x1186   :  { %v3580_v57 = vmul.f32 0.015625, %v3568_v35  ;;  %v3599_v11 = vmul.f32 %v7293_v56, %v7293_v56 }
0x1188   :  { %v7299_v3 = vsub.f32 %v7227_v5, %v3580_v57  ;;  %v3623_v6 = vsel %vm42_vm0, %v3599_v11, 0.0 }
0x1189   :  { %3624 = vadd.xlane.f32.xlu1 %v3623_v6  ;;  %v3571_v7 = vpop.xlane.xlu1 %3570 }
0x118a   :  { %v3581_v8 = vmul.f32 0.015625, %v3571_v7  ;;  %v3600_v17 = vmul.f32 %v7299_v3, %v7299_v3 }
0x118c   :  { %v7305_v26 = vsub.f32 %v7232_v14, %v3581_v8  ;;  %v3626_v31 = vsel %vm42_vm0, %v3600_v17, 0.0 }
0x118d   :  { %3627 = vadd.xlane.f32.xlu0 %v3626_v31 }
0x118e   :  { %v3601_v27 = vmul.f32 %v7305_v26, %v7305_v26 }
0x1190   :  { %v3629_v39 = vsel %vm42_vm0, %v3601_v27, 0.0 }
0x1191   :  { %3630 = vadd.xlane.f32.xlu1 %v3629_v39 }
0x11bc   :  { %v3604_v18 = vpop.xlane.xlu0 %3603 }
0x11bd   :  { %v3632_v24 = vmul.f32 0.015625, %v3604_v18 }
0x11bf   :  { %v3642_v20 = vadd.f32 1e-05, %v3632_v24 }
0x11c0   :  { %v3607_v58 = vpop.xlane.xlu1 %3606 }
0x11c1   :  { %5333 = vrsqrt.f32 %v3642_v20  ;;  %v3633_v62 = vmul.f32 0.015625, %v3607_v58 }
0x11c3   :  { %v3643_v50 = vadd.f32 1e-05, %v3633_v62 }
0x11c4   :  { %v3610_v61 = vpop.xlane.xlu0 %3609 }
0x11c5   :  { %5335 = vrsqrt.f32 %v3643_v50  ;;  %v3634_v38 = vmul.f32 0.015625, %v3610_v61 }
0x11c7   :  { %v3644_v9 = vadd.f32 1e-05, %v3634_v38  ;;  %v5090_v38 = vld [vmem:[%s7566_s6 + $0x50] sm:$0xff]  }
0x11c8   :  { %v3613_v1 = vpop.xlane.xlu1 %3612  ;;  %4948 = vmatpush3.bf16.msra.mxu0 %v5090_v38 }
0x11c9   :  { %5337 = vrsqrt.f32 %v3644_v9  ;;  %v3635_v45 = vmul.f32 0.015625, %v3613_v1  ;;  %4949 = vmatprep.subr.bf16.mxu0 %v5376_v59 }
0x11cb   :  { %v3645_v25 = vadd.f32 1e-05, %v3635_v45 }
0x11cd   :  { %5339 = vrsqrt.f32 %v3645_v25 }
0x11ce   :  { %v5334_v63 = vpop.eup %5333 }
0x11cf   :  { %v3662_v28 = vmul.f32 %v5334_v63, %v7237_v51 }
0x11d1   :  { %v3676_v47 = vmul.f32 %v7334_v29, %v3662_v28 }
0x11d2   :  { %v5336_v52 = vpop.eup %5335 }
0x11d3   :  { %v3663_v41 = vmul.f32 %v5336_v52, %v7242_v60  ;;  %v3690_v32 = vadd.f32 %v7340_v22, %v3676_v47 }
0x11d5   :  { %v3677_v43 = vmul.f32 %v7334_v29, %v3663_v41 }
0x11d6   :  { %v5338_v49 = vpop.eup %5337 }
0x11d7   :  { %v3691_v36 = vadd.f32 %v7340_v22, %v3677_v43  ;;  %v3664_v35 = vmul.f32 %v5338_v49, %v7248_v46  ;;  %v5092_v43 = vld [vmem:[%s7566_s6 + $0x40] sm:$0xff]  }
0x11d9   :  { %v3700_v51 = vpack.c.bf16 %v3691_v36, %v3690_v32  ;;  %v3678_v12 = vmul.f32 %v7334_v29, %v3664_v35 }
0x11da   :  { %v5340_v57 = vpop.eup %5339 }
0x11db   :  { %v3665_v11 = vmul.f32 %v5340_v57, %v7254_v10  ;;  %4918 = vmatmul.mubr.msk.bf16.vlgmr.msra.gmra.mxu1 %vm42_vm0, %v3700_v51  ;;  %v3692_v6 = vadd.f32 %v7340_v22, %v3678_v12 }
0x11dc   :  { %4921 = vmatprep.mubr.msk.bf16.mxu1 %vm5380_vm1, %v5376_v59 }
0x11dd   :  { %v3679_v60 = vmul.f32 %v7334_v29, %v3665_v11 }
0x11df   :  { %v3693_v7 = vadd.f32 %v7340_v22, %v3679_v60 }
0x11e1   :  { %v3701_v8 = vpack.c.bf16 %v3693_v7, %v3692_v6 }
0x11e3   :  { %4922 = vmatmul.mubr.msk.bf16.gmra.mxu1 %vm42_vm0, %v3701_v8 }
0x11e4   :  { %4925 = vmatprep.mubr.msk.bf16.mxu1 %vm5380_vm1, %v5376_v59 }
0x1206   :  { %v3616_v46 = vpop.xlane.xlu0 %3615 }
0x1207   :  { %v3636_v10 = vmul.f32 0.015625, %v3616_v46 }
0x1209   :  { %v3646_v17 = vadd.f32 1e-05, %v3636_v10 }
0x120a   :  { %v3619_v31 = vpop.xlane.xlu1 %3618 }
0x120b   :  { %5341 = vrsqrt.f32 %v3646_v17  ;;  %v3637_v27 = vmul.f32 0.015625, %v3619_v31 }
0x120d   :  { %v3647_v39 = vadd.f32 1e-05, %v3637_v27 }
0x120e   :  { %v3622_v40 = vpop.xlane.xlu0 %3621 }
0x120f   :  { %5343 = vrsqrt.f32 %v3647_v39  ;;  %v3638_v4 = vmul.f32 0.015625, %v3622_v40 }
0x1211   :  { %v3648_v37 = vadd.f32 1e-05, %v3638_v4 }
0x1212   :  { %v3625_v18 = vpop.xlane.xlu1 %3624 }
0x1213   :  { %5345 = vrsqrt.f32 %v3648_v37  ;;  %v3639_v24 = vmul.f32 0.015625, %v3625_v18 }
0x1215   :  { %v3649_v20 = vadd.f32 1e-05, %v3639_v24 }
0x1216   :  { %v3628_v53 = vpop.xlane.xlu0 %3627 }
0x1217   :  { %5347 = vrsqrt.f32 %v3649_v20  ;;  %v3640_v58 = vmul.f32 0.015625, %v3628_v53 }
0x1218   :  { %v5342_v62 = vpop.eup %5341 }
0x1219   :  { %v3666_v50 = vmul.f32 %v5342_v62, %v7276_v16  ;;  %v3650_v23 = vadd.f32 1e-05, %v3640_v58  ;;  %v5091_v16 = vld [vmem:[%s7566_s6 + $0x48] sm:$0xff]  }
0x121a   :  { %v3631_v61 = vpop.xlane.xlu1 %3630  ;;  %4950 = vmatpush3.bf16.msra.mxu0 %v5091_v16 }
0x121b   :  { %5349 = vrsqrt.f32 %v3650_v23  ;;  %v3641_v9 = vmul.f32 0.015625, %v3631_v61  ;;  %v3680_v63 = vmul.f32 %v7334_v29, %v3666_v50  ;;  %4951 = vmatprep.subr.bf16.mxu0 %v5376_v59 }
0x121c   :  { %v5344_v1 = vpop.eup %5343 }
0x121d   :  { %v3667_v45 = vmul.f32 %v5344_v1, %v7281_v15  ;;  %v3651_v25 = vadd.f32 1e-05, %v3641_v9  ;;  %v3694_v41 = vadd.f32 %v7340_v22, %v3680_v63 }
0x121e   :  { %4952 = vmatpush3.bf16.msra.mxu0 %v5092_v43 }
0x121f   :  { %5351 = vrsqrt.f32 %v3651_v25  ;;  %v3681_v28 = vmul.f32 %v7334_v29, %v3667_v45 }
0x1220   :  { %v5346_v52 = vpop.eup %5345 }
0x1221   :  { %v3668_v47 = vmul.f32 %v5346_v52, %v7287_v21  ;;  %v3695_v15 = vadd.f32 %v7340_v22, %v3681_v28 }
0x1223   :  { %v3702_v49 = vpack.c.bf16 %v3695_v15, %v3694_v41  ;;  %v3682_v35 = vmul.f32 %v7334_v29, %v3668_v47 }
0x1224   :  { %v5348_v32 = vpop.eup %5347 }
0x1225   :  { %v3669_v36 = vmul.f32 %v5348_v32, %v7293_v56  ;;  %4926 = vmatmul.mubr.msk.bf16.gmra.mxu1 %vm42_vm0, %v3702_v49  ;;  %v3696_v11 = vadd.f32 %v7340_v22, %v3682_v35 }
0x1226   :  { %4929 = vmatprep.mubr.msk.bf16.mxu1 %vm5380_vm1, %v5376_v59 }
0x1227   :  { %v3683_v21 = vmul.f32 %v7334_v29, %v3669_v36 }
0x1228   :  { %v5350_v51 = vpop.eup %5349 }
0x1229   :  { %v3670_v57 = vmul.f32 %v5350_v51, %v7299_v3  ;;  %v3697_v12 = vadd.f32 %v7340_v22, %v3683_v21 }
0x122b   :  { %v3703_v60 = vpack.c.bf16 %v3697_v12, %v3696_v11  ;;  %v3684_v7 = vmul.f32 %v7334_v29, %v3670_v57 }
0x122c   :  { %v5352_v6 = vpop.eup %5351 }
0x122d   :  { %v3671_v56 = vmul.f32 %v5352_v6, %v7305_v26  ;;  %4930 = vmatmul.mubr.msk.bf16.gmra.mxu1 %vm42_vm0, %v3703_v60  ;;  %v3698_v46 = vadd.f32 %v7340_v22, %v3684_v7  ;;  %v3717_v26 = vrot.slane %v7181_v55, %v1835_v42 }
0x122e   :  { %4933 = vmatprep.mubr.msk.bf16.mxu1 %vm5380_vm1, %v5376_v59 }
0x122f   :  { %v3685_v8 = vmul.f32 %v7334_v29, %v3671_v56 }
0x1231   :  { %v3699_v3 = vadd.f32 %v7340_v22, %v3685_v8  ;;  %v3865_v8 = vrot.slane %v7181_v55, %v1982_v44 }
0x1233   :  { %v3704_v10 = vpack.c.bf16 %v3699_v3, %v3698_v46 }
0x1235   :  { %4934 = vmatmul.mubr.msk.bf16.gmra.mxu1 %vm42_vm0, %v3704_v10 }
0x129b   :  { %v3791_v17 = vpop.f32.mrf.mxu1 }
0x129c   :  { %v3792_v27 = vadd.f32 %v3791_v17, %v3717_v26 }
0x129d   :  { %v4919_v31 = vpop.f32.mrf.mxu1 }
0x129e   :  { %v3830_v37 = vmax.f32 %v3792_v27, 0.0 }
0x129f   :  { %v3794_v39 = vpop.f32.mrf.mxu1 }
0x12a0   :  { %v3795_v40 = vadd.f32 %v3794_v39, %v3717_v26 }
0x12a1   :  { %v4920_v4 = vpop.f32.mrf.mxu1 }
0x12a2   :  { %v3831_v18 = vmax.f32 %v3795_v40, 0.0 }
0x12a3   :  { %v3799_v29 = vpop.f32.mrf.mxu1 }
0x12a4   :  { %v3840_v24 = vpack.c.bf16 %v3831_v18, %v3830_v37  ;;  %v3800_v53 = vadd.f32 %v3799_v29, %v3717_v26 }
0x12a5   :  { %v4923_v20 = vpop.f32.mrf.mxu1 }
0x12a6   :  { %4954 = vmatmul.mubr.bf16.vlgmr.msra.gmra.mxu0 %v3840_v24  ;;  %v3832_v42 = vmax.f32 %v3800_v53, 0.0 }
0x12a7   :  { %v3802_v22 = vpop.f32.mrf.mxu1  ;;  %4957 = vmatprep.mubr.msk.bf16.mxu0 %vm5380_vm1, %v5376_v59 }
0x12a8   :  { %v3803_v58 = vadd.f32 %v3802_v22, %v3717_v26 }
0x12a9   :  { %v4924_v62 = vpop.f32.mrf.mxu1 }
0x12aa   :  { %v3833_v50 = vmax.f32 %v3803_v58, 0.0 }
0x12ac   :  { %v3841_v23 = vpack.c.bf16 %v3833_v50, %v3832_v42 }
0x12ae   :  { %4958 = vmatmul.mubr.bf16.gmra.mxu0 %v3841_v23 }
0x12af   :  { %4961 = vmatprep.mubr.msk.bf16.mxu0 %vm5380_vm1, %v5376_v59 }
0x12e5   :  { %v3807_v61 = vpop.f32.mrf.mxu1 }
0x12e6   :  { %v3808_v9 = vadd.f32 %v3807_v61, %v3717_v26 }
0x12e7   :  { %v4927_v38 = vpop.f32.mrf.mxu1 }
0x12e8   :  { %v3834_v63 = vmax.f32 %v3808_v9, 0.0 }
0x12e9   :  { %v3810_v1 = vpop.f32.mrf.mxu1 }
0x12ea   :  { %v3811_v45 = vadd.f32 %v3810_v1, %v3717_v26 }
0x12eb   :  { %v4928_v25 = vpop.f32.mrf.mxu1 }
0x12ec   :  { %v3835_v16 = vmax.f32 %v3811_v45, 0.0 }
0x12ed   :  { %v3815_v28 = vpop.f32.mrf.mxu1 }
0x12ee   :  { %v3842_v52 = vpack.c.bf16 %v3835_v16, %v3834_v63  ;;  %v3816_v41 = vadd.f32 %v3815_v28, %v3717_v26 }
0x12ef   :  { %v4931_v47 = vpop.f32.mrf.mxu1 }
0x12f0   :  { %4962 = vmatmul.mubr.bf16.gmra.mxu0 %v3842_v52  ;;  %v3836_v32 = vmax.f32 %v3816_v41, 0.0 }
0x12f1   :  { %v3818_v15 = vpop.f32.mrf.mxu1  ;;  %4965 = vmatprep.mubr.msk.bf16.mxu0 %vm5380_vm1, %v5376_v59 }
0x12f2   :  { %v3819_v43 = vadd.f32 %v3818_v15, %v3717_v26 }
0x12f3   :  { %v4932_v49 = vpop.f32.mrf.mxu1 }
0x12f4   :  { %v3837_v36 = vmax.f32 %v3819_v43, 0.0 }
0x12f5   :  { %v3823_v35 = vpop.f32.mrf.mxu1 }
0x12f6   :  { %v3843_v21 = vpack.c.bf16 %v3837_v36, %v3836_v32  ;;  %v3824_v57 = vadd.f32 %v3823_v35, %v3717_v26 }
0x12f7   :  { %v4935_v51 = vpop.f32.mrf.mxu1 }
0x12f8   :  { %4966 = vmatmul.mubr.bf16.gmra.mxu0 %v3843_v21  ;;  %v3838_v6 = vmax.f32 %v3824_v57, 0.0 }
0x12f9   :  { %v3826_v11 = vpop.f32.mrf.mxu1  ;;  %4969 = vmatprep.mubr.msk.bf16.mxu0 %vm5380_vm1, %v5376_v59 }
0x12fa   :  { %v3827_v12 = vadd.f32 %v3826_v11, %v3717_v26 }
0x12fb   :  { %v4936_v60 = vpop.f32.mrf.mxu1 }
0x12fc   :  { %v3839_v56 = vmax.f32 %v3827_v12, 0.0 }
0x12fe   :  { %v3844_v7 = vpack.c.bf16 %v3839_v56, %v3838_v6 }
0x1300   :  { %4970 = vmatmul.mubr.bf16.gmra.mxu0 %v3844_v7 }
0x1366   :  { %v3948_v46 = vpop.f32.mrf.mxu0 }
0x1367   :  { %v3949_v3 = vadd.f32 %v3948_v46, %v3865_v8 }
0x1368   :  { %v4955_v10 = vpop.f32.mrf.mxu0 }
0x1369   :  { %v3987_v17 = vadd.f32 %v3949_v3, %v7187_v0 }
0x136a   :  { %v3951_v31 = vpop.f32.mrf.mxu0 }
0x136b   :  { %v3952_v27 = vadd.f32 %v3951_v31, %v3865_v8  ;;  %v3999_v39 = vsel %vm42_vm0, %v3987_v17, 0.0 }
0x136c   :  { %4000 = vadd.xlane.f32.xlu0 %v3999_v39  ;;  %v4956_v59 = vpop.f32.mrf.mxu0 }
0x136d   :  { %v3988_v26 = vadd.f32 %v3952_v27, %v7192_v30 }
0x136e   :  { %v3956_v40 = vpop.f32.mrf.mxu0 }
0x136f   :  { %v3957_v4 = vadd.f32 %v3956_v40, %v3865_v8  ;;  %v4002_v37 = vsel %vm42_vm0, %v3988_v26, 0.0 }
0x1370   :  { %4003 = vadd.xlane.f32.xlu1 %v4002_v37  ;;  %v4959_v13 = vpop.f32.mrf.mxu0 }
0x1371   :  { %v3989_v44 = vadd.f32 %v3957_v4, %v7197_v33 }
0x1372   :  { %v3959_v55 = vpop.f32.mrf.mxu0 }
0x1373   :  { %v3960_v18 = vadd.f32 %v3959_v55, %v3865_v8  ;;  %v4005_v0 = vsel %vm42_vm0, %v3989_v44, 0.0 }
0x1374   :  { %4006 = vadd.xlane.f32.xlu0 %v4005_v0  ;;  %v4960_v29 = vpop.f32.mrf.mxu0 }
0x1375   :  { %v3990_v24 = vadd.f32 %v3960_v18, %v7202_v34 }
0x1377   :  { %v4008_v20 = vsel %vm42_vm0, %v3990_v24, 0.0 }
0x1378   :  { %4009 = vadd.xlane.f32.xlu1 %v4008_v20 }
0x13b0   :  { %v3964_v30 = vpop.f32.mrf.mxu0 }
0x13b1   :  { %v3965_v53 = vadd.f32 %v3964_v30, %v3865_v8 }
0x13b2   :  { %v4963_v22 = vpop.f32.mrf.mxu0 }
0x13b3   :  { %v3991_v58 = vadd.f32 %v3965_v53, %v7207_v48 }
0x13b4   :  { %v3967_v62 = vpop.f32.mrf.mxu0 }
0x13b5   :  { %v3968_v42 = vadd.f32 %v3967_v62, %v3865_v8  ;;  %v4011_v33 = vsel %vm42_vm0, %v3991_v58, 0.0 }
0x13b6   :  { %4012 = vadd.xlane.f32.xlu0 %v4011_v33  ;;  %v4964_v50 = vpop.f32.mrf.mxu0 }
0x13b7   :  { %v3992_v23 = vadd.f32 %v3968_v42, %v7212_v19 }
0x13b8   :  { %v3972_v61 = vpop.f32.mrf.mxu0 }
0x13b9   :  { %v3973_v38 = vadd.f32 %v3972_v61, %v3865_v8  ;;  %v4014_v34 = vsel %vm42_vm0, %v3992_v23, 0.0 }
0x13ba   :  { %4015 = vadd.xlane.f32.xlu1 %v4014_v34  ;;  %v4967_v9 = vpop.f32.mrf.mxu0 }
0x13bb   :  { %v3993_v1 = vadd.f32 %v3973_v38, %v7217_v54 }
0x13bc   :  { %v3975_v45 = vpop.f32.mrf.mxu0 }
0x13bd   :  { %v3976_v25 = vadd.f32 %v3975_v45, %v3865_v8  ;;  %v4017_v48 = vsel %vm42_vm0, %v3993_v1, 0.0 }
0x13be   :  { %4018 = vadd.xlane.f32.xlu0 %v4017_v48  ;;  %v4968_v63 = vpop.f32.mrf.mxu0 }
0x13bf   :  { %v3994_v16 = vadd.f32 %v3976_v25, %v7222_v2 }
0x13c0   :  { %v3980_v28 = vpop.f32.mrf.mxu0 }
0x13c1   :  { %v3981_v52 = vadd.f32 %v3980_v28, %v3865_v8  ;;  %v4020_v19 = vsel %vm42_vm0, %v3994_v16, 0.0 }
0x13c2   :  { %4021 = vadd.xlane.f32.xlu1 %v4020_v19  ;;  %v4971_v47 = vpop.f32.mrf.mxu0 }
0x13c3   :  { %v3995_v41 = vadd.f32 %v3981_v52, %v7227_v5 }
0x13c4   :  { %v3983_v15 = vpop.f32.mrf.mxu0 }
0x13c5   :  { %v3984_v43 = vadd.f32 %v3983_v15, %v3865_v8  ;;  %v4023_v54 = vsel %vm42_vm0, %v3995_v41, 0.0 }
0x13c6   :  { %4024 = vadd.xlane.f32.xlu0 %v4023_v54  ;;  %v4972_v49 = vpop.f32.mrf.mxu0 }
0x13c7   :  { %v3996_v32 = vadd.f32 %v3984_v43, %v7232_v14 }
0x13c9   :  { %v4026_v36 = vsel %vm42_vm0, %v3996_v32, 0.0 }
0x13ca   :  { %4027 = vadd.xlane.f32.xlu1 %v4026_v36  ;;  %v7482_v36 = vld [vmem:[%s7560_s2 + $0x2] ss:$0 sm:$0xff] }
0x13f5   :  { %v4001_v2 = vpop.xlane.xlu0 %4000 }
0x13f6   :  { %v4029_v35 = vmul.f32 0.015625, %v4001_v2 }
0x13f8   :  { %v7429_v21 = vsub.f32 %v3987_v17, %v4029_v35  ;;  %v7488_v35 = vld [vmem:[%s7560_s2 + $0x3] ss:$0 sm:$0xff] }
0x13f9   :  { %v4004_v51 = vpop.xlane.xlu1 %4003 }
0x13fa   :  { %v4030_v57 = vmul.f32 0.015625, %v4004_v51  ;;  %v4049_v5 = vmul.f32 %v7429_v21, %v7429_v21 }
0x13fc   :  { %v7433_v11 = vsub.f32 %v3988_v26, %v4030_v57  ;;  %v4059_v12 = vsel %vm42_vm0, %v4049_v5, 0.0 }
0x13fd   :  { %v4007_v60 = vpop.xlane.xlu0 %4006  ;;  %4060 = vadd.xlane.f32.xlu0 %v4059_v12 }
0x13fe   :  { %v4031_v6 = vmul.f32 0.015625, %v4007_v60  ;;  %v4050_v14 = vmul.f32 %v7433_v11, %v7433_v11 }
0x1400   :  { %v7438_v56 = vsub.f32 %v3989_v44, %v4031_v6  ;;  %v4062_v7 = vsel %vm42_vm0, %v4050_v14, 0.0 }
0x1401   :  { %v4010_v8 = vpop.xlane.xlu1 %4009  ;;  %4063 = vadd.xlane.f32.xlu1 %v4062_v7 }
0x1402   :  { %v4032_v46 = vmul.f32 0.015625, %v4010_v8  ;;  %v4051_v3 = vmul.f32 %v7438_v56, %v7438_v56 }
0x1404   :  { %v7443_v10 = vsub.f32 %v3990_v24, %v4032_v46  ;;  %v4065_v17 = vsel %vm42_vm0, %v4051_v3, 0.0 }
0x1405   :  { %4066 = vadd.xlane.f32.xlu0 %v4065_v17 }
0x1406   :  { %v4052_v31 = vmul.f32 %v7443_v10, %v7443_v10 }
0x1408   :  { %v4068_v27 = vsel %vm42_vm0, %v4052_v31, 0.0 }
0x1409   :  { %4069 = vadd.xlane.f32.xlu1 %v4068_v27 }
0x143f   :  { %v4013_v39 = vpop.xlane.xlu0 %4012 }
0x1440   :  { %v4033_v59 = vmul.f32 0.015625, %v4013_v39 }
0x1442   :  { %v7449_v26 = vsub.f32 %v3991_v58, %v4033_v59 }
0x1443   :  { %v4016_v40 = vpop.xlane.xlu1 %4015 }
0x1444   :  { %v4034_v4 = vmul.f32 0.015625, %v4016_v40  ;;  %v4053_v37 = vmul.f32 %v7449_v26, %v7449_v26 }
0x1446   :  { %v7453_v13 = vsub.f32 %v3992_v23, %v4034_v4  ;;  %v4071_v44 = vsel %vm42_vm0, %v4053_v37, 0.0 }
0x1447   :  { %v4019_v55 = vpop.xlane.xlu0 %4018  ;;  %4072 = vadd.xlane.f32.xlu0 %v4071_v44 }
0x1448   :  { %v4035_v18 = vmul.f32 0.015625, %v4019_v55  ;;  %v4054_v0 = vmul.f32 %v7453_v13, %v7453_v13 }
0x144a   :  { %v7458_v29 = vsub.f32 %v3993_v1, %v4035_v18  ;;  %v4074_v24 = vsel %vm42_vm0, %v4054_v0, 0.0 }
0x144b   :  { %v4022_v20 = vpop.xlane.xlu1 %4021  ;;  %4075 = vadd.xlane.f32.xlu1 %v4074_v24 }
0x144c   :  { %v4036_v30 = vmul.f32 0.015625, %v4022_v20  ;;  %v4055_v53 = vmul.f32 %v7458_v29, %v7458_v29 }
0x144e   :  { %v7463_v22 = vsub.f32 %v3994_v16, %v4036_v30  ;;  %v4077_v58 = vsel %vm42_vm0, %v4055_v53, 0.0 }
0x144f   :  { %4078 = vadd.xlane.f32.xlu0 %v4077_v58  ;;  %v4025_v62 = vpop.xlane.xlu0 %4024 }
0x1450   :  { %v4037_v42 = vmul.f32 0.015625, %v4025_v62  ;;  %v4056_v33 = vmul.f32 %v7463_v22, %v7463_v22 }
0x1452   :  { %v7468_v50 = vsub.f32 %v3995_v41, %v4037_v42  ;;  %v4080_v23 = vsel %vm42_vm0, %v4056_v33, 0.0 }
0x1453   :  { %4081 = vadd.xlane.f32.xlu1 %v4080_v23  ;;  %v4028_v61 = vpop.xlane.xlu1 %4027 }
0x1454   :  { %v4038_v38 = vmul.f32 0.015625, %v4028_v61  ;;  %v4057_v34 = vmul.f32 %v7468_v50, %v7468_v50 }
0x1456   :  { %v7473_v9 = vsub.f32 %v3996_v32, %v4038_v38  ;;  %v4083_v1 = vsel %vm42_vm0, %v4057_v34, 0.0 }
0x1457   :  { %4084 = vadd.xlane.f32.xlu0 %v4083_v1 }
0x1458   :  { %v4058_v45 = vmul.f32 %v7473_v9, %v7473_v9 }
0x145a   :  { %v4086_v25 = vsel %vm42_vm0, %v4058_v45, 0.0 }
0x145b   :  { %4087 = vadd.xlane.f32.xlu1 %v4086_v25 }
0x1486   :  { %v4061_v48 = vpop.xlane.xlu0 %4060 }
0x1487   :  { %v4089_v63 = vmul.f32 0.015625, %v4061_v48 }
0x1489   :  { %v4099_v16 = vadd.f32 1e-05, %v4089_v63 }
0x148a   :  { %v4064_v28 = vpop.xlane.xlu1 %4063 }
0x148b   :  { %5353 = vrsqrt.f32 %v4099_v16  ;;  %v4090_v52 = vmul.f32 0.015625, %v4064_v28 }
0x148d   :  { %v4100_v19 = vadd.f32 1e-05, %v4090_v52 }
0x148e   :  { %v4067_v47 = vpop.xlane.xlu0 %4066 }
0x148f   :  { %5355 = vrsqrt.f32 %v4100_v19  ;;  %v4091_v41 = vmul.f32 0.015625, %v4067_v47 }
0x1491   :  { %v4101_v15 = vadd.f32 1e-05, %v4091_v41 }
0x1492   :  { %v4070_v43 = vpop.xlane.xlu1 %4069 }
0x1493   :  { %5357 = vrsqrt.f32 %v4101_v15  ;;  %v4092_v54 = vmul.f32 0.015625, %v4070_v43 }
0x1495   :  { %v4102_v49 = vadd.f32 1e-05, %v4092_v54 }
0x1497   :  { %5359 = vrsqrt.f32 %v4102_v49 }
0x1498   :  { %v5354_v32 = vpop.eup %5353 }
0x1499   :  { %v4119_v2 = vmul.f32 %v5354_v32, %v7429_v21 }
0x149b   :  { %v4133_v51 = vmul.f32 %v7482_v36, %v4119_v2 }
0x149c   :  { %v5356_v57 = vpop.eup %5355 }
0x149d   :  { %v4147_v5 = vadd.f32 %v7488_v35, %v4133_v51  ;;  %v4120_v12 = vmul.f32 %v5356_v57, %v7433_v11 }
0x149f   :  { %4157 = vst.msk [vmem:[%s7567_s8] sm:$0xff] %vm42_vm0, %v4147_v5  ;;  %v4134_v60 = vmul.f32 %v7482_v36, %v4120_v12 }
0x14a0   :  { %v5358_v21 = vpop.eup %5357 }
0x14a1   :  { %v4148_v6 = vadd.f32 %v7488_v35, %v4134_v60  ;;  %v4121_v14 = vmul.f32 %v5358_v21, %v7438_v56 }
0x14a3   :  { %4158 = vst.msk [vmem:[%s7567_s8 + $0x8] sm:$0xff] %vm42_vm0, %v4148_v6  ;;  %v4135_v7 = vmul.f32 %v7482_v36, %v4121_v14 }
0x14a4   :  { %v5360_v11 = vpop.eup %5359 }
0x14a5   :  { %v4149_v8 = vadd.f32 %v7488_v35, %v4135_v7  ;;  %v4122_v46 = vmul.f32 %v5360_v11, %v7443_v10 }
0x14a7   :  { %4159 = vst.msk [vmem:[%s7567_s8 + $0x10] sm:$0xff] %vm42_vm0, %v4149_v8  ;;  %v4136_v3 = vmul.f32 %v7482_v36, %v4122_v46 }
0x14a9   :  { %v4150_v56 = vadd.f32 %v7488_v35, %v4136_v3 }
0x14ab   :  { %4160 = vst.msk [vmem:[%s7567_s8 + $0x18] sm:$0xff] %vm42_vm0, %v4150_v56 }
0x14d0   :  { %v4073_v17 = vpop.xlane.xlu0 %4072 }
0x14d1   :  { %v4093_v31 = vmul.f32 0.015625, %v4073_v17 }
0x14d3   :  { %v4103_v27 = vadd.f32 1e-05, %v4093_v31 }
0x14d4   :  { %v4076_v39 = vpop.xlane.xlu1 %4075 }
0x14d5   :  { %5361 = vrsqrt.f32 %v4103_v27  ;;  %v4094_v10 = vmul.f32 0.015625, %v4076_v39 }
0x14d7   :  { %v4104_v59 = vadd.f32 1e-05, %v4094_v10 }
0x14d8   :  { %v4079_v40 = vpop.xlane.xlu0 %4078 }
0x14d9   :  { %5363 = vrsqrt.f32 %v4104_v59  ;;  %v4095_v4 = vmul.f32 0.015625, %v4079_v40 }
0x14db   :  { %v4105_v37 = vadd.f32 1e-05, %v4095_v4 }
0x14dc   :  { %v4082_v44 = vpop.xlane.xlu1 %4081 }
0x14dd   :  { %5365 = vrsqrt.f32 %v4105_v37  ;;  %v4096_v55 = vmul.f32 0.015625, %v4082_v44 }
0x14df   :  { %v4106_v18 = vadd.f32 1e-05, %v4096_v55 }
0x14e0   :  { %v4085_v0 = vpop.xlane.xlu0 %4084 }
0x14e1   :  { %5367 = vrsqrt.f32 %v4106_v18  ;;  %v4097_v24 = vmul.f32 0.015625, %v4085_v0 }
0x14e2   :  { %v5362_v20 = vpop.eup %5361 }
0x14e3   :  { %v4123_v30 = vmul.f32 %v5362_v20, %v7449_v26  ;;  %v4107_v53 = vadd.f32 1e-05, %v4097_v24 }
0x14e4   :  { %v4088_v58 = vpop.xlane.xlu1 %4087 }
0x14e5   :  { %v4137_v62 = vmul.f32 %v7482_v36, %v4123_v30  ;;  %5369 = vrsqrt.f32 %v4107_v53  ;;  %v4098_v42 = vmul.f32 0.015625, %v4088_v58 }
0x14e6   :  { %v5364_v33 = vpop.eup %5363 }
0x14e7   :  { %v4151_v23 = vadd.f32 %v7488_v35, %v4137_v62  ;;  %v4124_v61 = vmul.f32 %v5364_v33, %v7453_v13  ;;  %v4108_v38 = vadd.f32 1e-05, %v4098_v42 }
0x14e9   :  { %4161 = vst.msk [vmem:[%s7567_s8 + $0x20] sm:$0xff] %vm42_vm0, %v4151_v23  ;;  %v4138_v34 = vmul.f32 %v7482_v36, %v4124_v61  ;;  %5371 = vrsqrt.f32 %v4108_v38 }
0x14ea   :  { %v5366_v26 = vpop.eup %5365 }
0x14eb   :  { %v4152_v1 = vadd.f32 %v7488_v35, %v4138_v34  ;;  %v4125_v45 = vmul.f32 %v5366_v26, %v7458_v29 }
0x14ed   :  { %4162 = vst.msk [vmem:[%s7567_s8 + $0x28] sm:$0xff] %vm42_vm0, %v4152_v1  ;;  %v4139_v13 = vmul.f32 %v7482_v36, %v4125_v45 }
0x14ee   :  { %v5368_v25 = vpop.eup %5367 }
0x14ef   :  { %v4153_v48 = vadd.f32 %v7488_v35, %v4139_v13  ;;  %v4126_v63 = vmul.f32 %v5368_v25, %v7463_v22 }
0x14f1   :  { %4163 = vst.msk [vmem:[%s7567_s8 + $0x30] sm:$0xff] %vm42_vm0, %v4153_v48  ;;  %v4140_v16 = vmul.f32 %v7482_v36, %v4126_v63 }
0x14f2   :  { %v5370_v29 = vpop.eup %5369 }
0x14f3   :  { %v4154_v28 = vadd.f32 %v7488_v35, %v4140_v16  ;;  %v4127_v52 = vmul.f32 %v5370_v29, %v7468_v50 }
0x14f5   :  { %4164 = vst.msk [vmem:[%s7567_s8 + $0x38] sm:$0xff] %vm42_vm0, %v4154_v28  ;;  %v4141_v19 = vmul.f32 %v7482_v36, %v4127_v52 }
0x14f6   :  { %v5372_v22 = vpop.eup %5371 }
0x14f7   :  { %v4155_v47 = vadd.f32 %v7488_v35, %v4141_v19  ;;  %v4128_v41 = vmul.f32 %v5372_v22, %v7473_v9 }
0x14f9   :  { %4165 = vst.msk [vmem:[%s7567_s8 + $0x40] sm:$0xff] %vm42_vm0, %v4155_v47  ;;  %v4142_v15 = vmul.f32 %v7482_v36, %v4128_v41 }
0x14fb   :  { %v4156_v50 = vadd.f32 %v7488_v35, %v4142_v15 }
0x14fd   :  { %4166 = vst.msk [vmem:[%s7567_s8 + $0x48] sm:$0xff] %vm42_vm0, %v4156_v50 }

// kernel: forward_fn.5
= control target key start
LH: loop header
LB: loop body
LE: loop exit
PB: predicated region body
PF: predicated region fallthrough
CT: control target
= control target key end

     0   :  { %s8496_s0 = inlined_call_operand.vmem [shape: f32[16,64], index: 0, kind: input, shape index: {}]   ;;  %s8497_s1 = inlined_call_operand.vmem [shape: bf16[16,1600], index: 1, kind: input, shape index: {}]   ;;  %s8498_s2 = inlined_call_operand.vmem [shape: f32[16,16], index: 2, kind: input, shape index: {}]   ;;  %s8499_s3 = inlined_call_operand.vmem [shape: f32[64,212], index: 3, kind: input, shape index: {}]   ;;  %s8500_s4 = inlined_call_operand.vmem [shape: f32[1,212], index: 4, kind: input, shape index: {}]   ;;  %s8501_s5 = inlined_call_operand.vmem [shape: f32[64,208], index: 5, kind: input, shape index: {}]   ;;  %s8502_s6 = inlined_call_operand.vmem [shape: f32[1,208], index: 6, kind: input, shape index: {}]   ;;  %s8503_s7 = inlined_call_operand.vmem [shape: f32[64,208], index: 7, kind: input, shape index: {}]   ;;  %s8504_s8 = inlined_call_operand.vmem [shape: f32[1,208], index: 8, kind: input, shape index: {}]   ;;  %s8505_s9 = inlined_call_operand.vmem [shape: f32[20,64], index: 9, kind: input, shape index: {}]   ;;  %s8506_s10 = inlined_call_operand.vmem [shape: bf16[1600,64], index: 10, kind: input, shape index: {}]   ;;  %s8507_s11 = inlined_call_operand.vmem [shape: f32[16,64], index: 11, kind: input, shape index: {}]   ;;  %s8508_s12 = inlined_call_operand.vmem [shape: f32[1,64], index: 12, kind: input, shape index: {}]   ;;  %s8509_s13 = inlined_call_operand.vmem [shape: f32[64,64], index: 13, kind: input, shape index: {}]   ;;  %s8510_s14 = inlined_call_operand.vmem [shape: f32[1,64], index: 14, kind: input, shape index: {}]   ;;  %s8511_s15 = inlined_call_operand.vmem [shape: f32[64,16], index: 15, kind: input, shape index: {}]   ;;  %s8512_s16 = inlined_call_operand.vmem [shape: f32[1,16], index: 16, kind: input, shape index: {}]   ;;  %s8513_s17 = inlined_call_operand.vmem [shape: bf16[64,20992], index: 17, kind: input, shape index: {}]   ;;  %s8514_s18 = inlined_call_operand.vmem [shape: f32[1,20992], index: 18, kind: input, shape index: {}]   ;;  %s8515_s19 = inlined_call_operand.hbm [shape: f32[16,20], index: 19, kind: output, shape index: {0}]   ;;  %s8516_s20 = inlined_call_operand.hbm [shape: f32[16,16], index: 20, kind: output, shape index: {1}]   ;;  %s8517_s21 = inlined_call_operand.hbm [shape: f32[16,208], index: 21, kind: output, shape index: {2}]   ;;  %s8518_s22 = inlined_call_operand.hbm [shape: f32[16,208], index: 22, kind: output, shape index: {3}]   ;;  %s8519_s23 = inlined_call_operand.vmem [shape: f32[16,20992], index: 23, kind: output, shape index: {4}]  }
   0x1   :  { %8531 = sst [smem:[#allocation19_spill]] %s8496_s0 }
   0x2   :  { %8532 = sst [smem:[#allocation20_spill]] %s8497_s1 }
   0x3   :  { %8533 = sst [smem:[#allocation21_spill]] %s8498_s2 }
   0x4   :  { %8534 = sst [smem:[#allocation22_spill]] %s8499_s3 }
   0x5   :  { %8535 = sst [smem:[#allocation23_spill]] %s8500_s4 }
   0x6   :  { %8536 = sst [smem:[#allocation24_spill]] %s8501_s5 }
   0x7   :  { %8537 = sst [smem:[#allocation25_spill]] %s8502_s6 }
   0x8   :  { %8538 = sst [smem:[#allocation26_spill]] %s8503_s7 }
   0x9   :  { %8539 = sst [smem:[#allocation27_spill]] %s8504_s8 }
   0xa   :  { %8540 = sst [smem:[#allocation28_spill]] %s8513_s17 }
   0xb   :  { %8541 = sst [smem:[#allocation29_spill]] %s8514_s18 }
   0xc   :  { %8542 = sst [smem:[#allocation30_spill]] %s8519_s23 }
   0xd   :  { %29 = vsyncpa [#allocation5], 0 }
   0xe   :  { %30 = vsyncpa [#allocation7], 0 }
   0xf   :  { %31 = vsyncpa [#allocation10], 0  ;;  %s6873_s4 = smov 0   ;;  %s6875_s30 = smov 0  }
  0x10   :  { %s6877_s24 = smov 0  }
  0x11 LB: > { %8543 = sst [smem:[#allocation15_spill]] %s6733_s30  ;;  %s6889_s25 = sadd.s32 4294967295, %s6737_s24   ;;  %s6737_s24 = sphi %s6877_s24, %s8564_s24   ;;  %s6733_s30 = sphi %s6875_s30, %s8566_s30   ;;  %s6729_s4 = sphi %s6873_s4, %s8565_s4  }
  0x12   : > { %s6892_s5 = sadd.s32 1, %s6737_s24   ;;  %s401_s26 = sadd.s32 1, %s6733_s30 }
  0x13   : > { %8544 = sst [smem:[#allocation16_spill]] %s6892_s5  ;;  %s398_s1 = ssub.s32 %s6737_s24, %s6892_s5 }
  0x14   : > { %p399_p0 = scmp.eq.s32.totalorder %s398_s1, 0  ;;  %p408_p1 = scmp.ne.s32.totalorder %s6733_s30, %s6729_s4 }
  0x15   : > { %p409_p2 = scmp.eq.s32.totalorder %s6737_s24, 0  ;;  %p548_p3 = scmp.eq.s32.totalorder %s6889_s25, 3 }
  0x16   : > { %s6902_s2 = scalar_select %p399_p0, %s6733_s30, %s401_s26  }
  0x17   : > { %p410_p4 = por %p409_p2, %p408_p1  ;;  %p6906_p5 = por %p548_p3, %p408_p1 }
  0x18   : > { %8545 = sst [smem:[#allocation17_spill]] %s6902_s2  ;;  %p5573_p6 = scmp.ge.s32.totalorder %s6737_s24, 4 }
  0x19   : > { %s8546_s6 = scalar_select %p6906_p5, 1, 0 }
  0x1a   : > { %621 = sbr.rel (%p5573_p6) target bundleno = 125 (0x7d), region = 84 }
  0x1b   : > { %8547 = sst [smem:[#allocation18_spill]] %s8546_s6 }
  0x1f   : > { %624 = sbr.rel (!%p410_p4) target bundleno = 125 (0x7d), region = 88  ;;  %s626_s27 = sand.u32 (%p410_p4), 1, %s6733_s30  }
  0x20   : > { %s5925_s7 = smul.u32 (%p410_p4), 164, %s6737_s24  ;;  %s8548_s17 = sld [smem:[#allocation28_spill]] (%p410_p4) }
  0x21   : > { %s6178_s28 = smul.u32 (%p410_p4), 1312, %s626_s27 }
  0x23   : > { %s6921_s1 = scalar_lea.vmem (%p410_p4), [#allocation3], %s6178_s28 }
  0x26   : > { %s6916_s0 = scalar_lea.vmem %s8548_s17, %s5925_s7 }
  0x27   : > { %v646_v0 = vld [vmem:[%s6916_s0] sm:$0xff]  ;;  %v648_v1 = vld [vmem:[%s6916_s0 + $0x8] sm:$0xff]  ;;  %v650_v2 = vld [vmem:[%s6916_s0 + $0x10] sm:$0xff] }
  0x28   : > { %647 = vst [vmem:[%s6921_s1] sm:$0xff] %v646_v0  ;;  %649 = vst [vmem:[%s6921_s1 + $0x8] sm:$0xff] %v648_v1  ;;  %v652_v3 = vld [vmem:[%s6916_s0 + $0x18] sm:$0xff]  ;;  %v654_v4 = vld [vmem:[%s6916_s0 + $0x20] sm:$0xff] }
  0x29   : > { %651 = vst [vmem:[%s6921_s1 + $0x10] sm:$0xff] %v650_v2  ;;  %v656_v5 = vld [vmem:[%s6916_s0 + $0x28] sm:$0xff]  ;;  %653 = vst [vmem:[%s6921_s1 + $0x18] sm:$0xff] %v652_v3  ;;  %v658_v6 = vld [vmem:[%s6916_s0 + $0x30] sm:$0xff] }
  0x2a   : > { %655 = vst [vmem:[%s6921_s1 + $0x20] sm:$0xff] %v654_v4  ;;  %657 = vst [vmem:[%s6921_s1 + $0x28] sm:$0xff] %v656_v5  ;;  %v660_v7 = vld [vmem:[%s6916_s0 + $0x38] sm:$0xff]  ;;  %v662_v8 = vld [vmem:[%s6916_s0 + $0x40] sm:$0xff] }
  0x2b   : > { %659 = vst [vmem:[%s6921_s1 + $0x30] sm:$0xff] %v658_v6  ;;  %661 = vst [vmem:[%s6921_s1 + $0x38] sm:$0xff] %v660_v7  ;;  %v664_v9 = vld [vmem:[%s6916_s0 + $0x48] sm:$0xff]  ;;  %v666_v10 = vld [vmem:[%s6916_s0 + $0x50] sm:$0xff] }
  0x2c   : > { %663 = vst [vmem:[%s6921_s1 + $0x40] sm:$0xff] %v662_v8  ;;  %v668_v11 = vld [vmem:[%s6916_s0 + $0x58] sm:$0xff]  ;;  %665 = vst [vmem:[%s6921_s1 + $0x48] sm:$0xff] %v664_v9  ;;  %v670_v12 = vld [vmem:[%s6916_s0 + $0x60] sm:$0xff] }
  0x2d   : > { %667 = vst [vmem:[%s6921_s1 + $0x50] sm:$0xff] %v666_v10  ;;  %669 = vst [vmem:[%s6921_s1 + $0x58] sm:$0xff] %v668_v11  ;;  %v672_v13 = vld [vmem:[%s6916_s0 + $0x68] sm:$0xff]  ;;  %v674_v14 = vld [vmem:[%s6916_s0 + $0x70] sm:$0xff] }
  0x2e   : > { %671 = vst [vmem:[%s6921_s1 + $0x60] sm:$0xff] %v670_v12  ;;  %673 = vst [vmem:[%s6921_s1 + $0x68] sm:$0xff] %v672_v13  ;;  %v676_v15 = vld [vmem:[%s6916_s0 + $0x78] sm:$0xff]  ;;  %v678_v16 = vld [vmem:[%s6916_s0 + $0x80] sm:$0xff] }
  0x2f   : > { %675 = vst [vmem:[%s6921_s1 + $0x70] sm:$0xff] %v674_v14  ;;  %v680_v17 = vld [vmem:[%s6916_s0 + $0x88] sm:$0xff]  ;;  %677 = vst [vmem:[%s6921_s1 + $0x78] sm:$0xff] %v676_v15  ;;  %v682_v18 = vld [vmem:[%s6916_s0 + $0x90] sm:$0xff] }
  0x30   : > { %679 = vst [vmem:[%s6921_s1 + $0x80] sm:$0xff] %v678_v16  ;;  %681 = vst [vmem:[%s6921_s1 + $0x88] sm:$0xff] %v680_v17  ;;  %v684_v19 = vld [vmem:[%s6916_s0 + $0x98] sm:$0xff]  ;;  %v686_v20 = vld [vmem:[%s6916_s0 + $0x290] sm:$0xff] }
  0x31   : > { %683 = vst [vmem:[%s6921_s1 + $0x90] sm:$0xff] %v682_v18  ;;  %685 = vst [vmem:[%s6921_s1 + $0x98] sm:$0xff] %v684_v19  ;;  %v688_v21 = vld [vmem:[%s6916_s0 + $0x298] sm:$0xff]  ;;  %v690_v22 = vld [vmem:[%s6916_s0 + $0x2a0] sm:$0xff] }
  0x32   : > { %687 = vst [vmem:[%s6921_s1 + $0xa4] sm:$0xff] %v686_v20  ;;  %v692_v23 = vld [vmem:[%s6916_s0 + $0x2a8] sm:$0xff]  ;;  %689 = vst [vmem:[%s6921_s1 + $0xac] sm:$0xff] %v688_v21  ;;  %v694_v24 = vld [vmem:[%s6916_s0 + $0x2b0] sm:$0xff] }
  0x33   : > { %691 = vst [vmem:[%s6921_s1 + $0xb4] sm:$0xff] %v690_v22  ;;  %693 = vst [vmem:[%s6921_s1 + $0xbc] sm:$0xff] %v692_v23  ;;  %v696_v25 = vld [vmem:[%s6916_s0 + $0x2b8] sm:$0xff]  ;;  %v698_v26 = vld [vmem:[%s6916_s0 + $0x2c0] sm:$0xff] }
  0x34   : > { %695 = vst [vmem:[%s6921_s1 + $0xc4] sm:$0xff] %v694_v24  ;;  %697 = vst [vmem:[%s6921_s1 + $0xcc] sm:$0xff] %v696_v25  ;;  %v700_v27 = vld [vmem:[%s6916_s0 + $0x2c8] sm:$0xff]  ;;  %v702_v28 = vld [vmem:[%s6916_s0 + $0x2d0] sm:$0xff] }
  0x35   : > { %699 = vst [vmem:[%s6921_s1 + $0xd4] sm:$0xff] %v698_v26  ;;  %v704_v29 = vld [vmem:[%s6916_s0 + $0x2d8] sm:$0xff]  ;;  %701 = vst [vmem:[%s6921_s1 + $0xdc] sm:$0xff] %v700_v27  ;;  %v706_v30 = vld [vmem:[%s6916_s0 + $0x2e0] sm:$0xff] }
  0x36   : > { %703 = vst [vmem:[%s6921_s1 + $0xe4] sm:$0xff] %v702_v28  ;;  %705 = vst [vmem:[%s6921_s1 + $0xec] sm:$0xff] %v704_v29  ;;  %v708_v31 = vld [vmem:[%s6916_s0 + $0x2e8] sm:$0xff]  ;;  %v710_v32 = vld [vmem:[%s6916_s0 + $0x2f0] sm:$0xff] }
  0x37   : > { %707 = vst [vmem:[%s6921_s1 + $0xf4] sm:$0xff] %v706_v30  ;;  %709 = vst [vmem:[%s6921_s1 + $0xfc] sm:$0xff] %v708_v31  ;;  %v712_v33 = vld [vmem:[%s6916_s0 + $0x2f8] sm:$0xff]  ;;  %v714_v34 = vld [vmem:[%s6916_s0 + $0x300] sm:$0xff] }
  0x38   : > { %711 = vst [vmem:[%s6921_s1 + $0x104] sm:$0xff] %v710_v32  ;;  %v716_v35 = vld [vmem:[%s6916_s0 + $0x308] sm:$0xff]  ;;  %713 = vst [vmem:[%s6921_s1 + $0x10c] sm:$0xff] %v712_v33  ;;  %v718_v36 = vld [vmem:[%s6916_s0 + $0x310] sm:$0xff] }
  0x39   : > { %715 = vst [vmem:[%s6921_s1 + $0x114] sm:$0xff] %v714_v34  ;;  %717 = vst [vmem:[%s6921_s1 + $0x11c] sm:$0xff] %v716_v35  ;;  %v720_v37 = vld [vmem:[%s6916_s0 + $0x318] sm:$0xff]  ;;  %v722_v38 = vld [vmem:[%s6916_s0 + $0x320] sm:$0xff] }
  0x3a   : > { %719 = vst [vmem:[%s6921_s1 + $0x124] sm:$0xff] %v718_v36  ;;  %721 = vst [vmem:[%s6921_s1 + $0x12c] sm:$0xff] %v720_v37  ;;  %v724_v39 = vld [vmem:[%s6916_s0 + $0x328] sm:$0xff]  ;;  %v726_v40 = vld [vmem:[%s6916_s0 + $0x520] sm:$0xff] }
  0x3b   : > { %723 = vst [vmem:[%s6921_s1 + $0x134] sm:$0xff] %v722_v38  ;;  %v728_v41 = vld [vmem:[%s6916_s0 + $0x528] sm:$0xff]  ;;  %725 = vst [vmem:[%s6921_s1 + $0x13c] sm:$0xff] %v724_v39  ;;  %v730_v42 = vld [vmem:[%s6916_s0 + $0x530] sm:$0xff] }
  0x3c   : > { %727 = vst [vmem:[%s6921_s1 + $0x148] sm:$0xff] %v726_v40  ;;  %729 = vst [vmem:[%s6921_s1 + $0x150] sm:$0xff] %v728_v41  ;;  %v732_v43 = vld [vmem:[%s6916_s0 + $0x538] sm:$0xff]  ;;  %v734_v44 = vld [vmem:[%s6916_s0 + $0x540] sm:$0xff] }
  0x3d   : > { %731 = vst [vmem:[%s6921_s1 + $0x158] sm:$0xff] %v730_v42  ;;  %733 = vst [vmem:[%s6921_s1 + $0x160] sm:$0xff] %v732_v43  ;;  %v736_v45 = vld [vmem:[%s6916_s0 + $0x548] sm:$0xff]  ;;  %v738_v46 = vld [vmem:[%s6916_s0 + $0x550] sm:$0xff] }
  0x3e   : > { %735 = vst [vmem:[%s6921_s1 + $0x168] sm:$0xff] %v734_v44  ;;  %v740_v47 = vld [vmem:[%s6916_s0 + $0x558] sm:$0xff]  ;;  %737 = vst [vmem:[%s6921_s1 + $0x170] sm:$0xff] %v736_v45  ;;  %v742_v48 = vld [vmem:[%s6916_s0 + $0x560] sm:$0xff] }
  0x3f   : > { %739 = vst [vmem:[%s6921_s1 + $0x178] sm:$0xff] %v738_v46  ;;  %741 = vst [vmem:[%s6921_s1 + $0x180] sm:$0xff] %v740_v47  ;;  %v744_v49 = vld [vmem:[%s6916_s0 + $0x568] sm:$0xff]  ;;  %v746_v50 = vld [vmem:[%s6916_s0 + $0x570] sm:$0xff] }
  0x40   : > { %743 = vst [vmem:[%s6921_s1 + $0x188] sm:$0xff] %v742_v48  ;;  %745 = vst [vmem:[%s6921_s1 + $0x190] sm:$0xff] %v744_v49  ;;  %v748_v51 = vld [vmem:[%s6916_s0 + $0x578] sm:$0xff]  ;;  %v750_v52 = vld [vmem:[%s6916_s0 + $0x580] sm:$0xff] }
  0x41   : > { %747 = vst [vmem:[%s6921_s1 + $0x198] sm:$0xff] %v746_v50  ;;  %v752_v53 = vld [vmem:[%s6916_s0 + $0x588] sm:$0xff]  ;;  %749 = vst [vmem:[%s6921_s1 + $0x1a0] sm:$0xff] %v748_v51  ;;  %v754_v54 = vld [vmem:[%s6916_s0 + $0x590] sm:$0xff] }
  0x42   : > { %751 = vst [vmem:[%s6921_s1 + $0x1a8] sm:$0xff] %v750_v52  ;;  %753 = vst [vmem:[%s6921_s1 + $0x1b0] sm:$0xff] %v752_v53  ;;  %v756_v55 = vld [vmem:[%s6916_s0 + $0x598] sm:$0xff]  ;;  %v758_v56 = vld [vmem:[%s6916_s0 + $0x5a0] sm:$0xff] }
  0x43   : > { %755 = vst [vmem:[%s6921_s1 + $0x1b8] sm:$0xff] %v754_v54  ;;  %757 = vst [vmem:[%s6921_s1 + $0x1c0] sm:$0xff] %v756_v55  ;;  %v760_v57 = vld [vmem:[%s6916_s0 + $0x5a8] sm:$0xff]  ;;  %v762_v58 = vld [vmem:[%s6916_s0 + $0x5b0] sm:$0xff] }
  0x44   : > { %759 = vst [vmem:[%s6921_s1 + $0x1c8] sm:$0xff] %v758_v56  ;;  %v764_v59 = vld [vmem:[%s6916_s0 + $0x5b8] sm:$0xff]  ;;  %761 = vst [vmem:[%s6921_s1 + $0x1d0] sm:$0xff] %v760_v57  ;;  %v766_v60 = vld [vmem:[%s6916_s0 + $0x7b0] sm:$0xff] }
  0x45   : > { %763 = vst [vmem:[%s6921_s1 + $0x1d8] sm:$0xff] %v762_v58  ;;  %765 = vst [vmem:[%s6921_s1 + $0x1e0] sm:$0xff] %v764_v59  ;;  %v768_v61 = vld [vmem:[%s6916_s0 + $0x7b8] sm:$0xff]  ;;  %v770_v62 = vld [vmem:[%s6916_s0 + $0x7c0] sm:$0xff] }
  0x46   : > { %767 = vst [vmem:[%s6921_s1 + $0x1ec] sm:$0xff] %v766_v60  ;;  %769 = vst [vmem:[%s6921_s1 + $0x1f4] sm:$0xff] %v768_v61  ;;  %v772_v63 = vld [vmem:[%s6916_s0 + $0x7c8] sm:$0xff]  ;;  %v774_v0 = vld [vmem:[%s6916_s0 + $0x7d0] sm:$0xff] }
  0x47   : > { %771 = vst [vmem:[%s6921_s1 + $0x1fc] sm:$0xff] %v770_v62  ;;  %v776_v1 = vld [vmem:[%s6916_s0 + $0x7d8] sm:$0xff]  ;;  %773 = vst [vmem:[%s6921_s1 + $0x204] sm:$0xff] %v772_v63  ;;  %v778_v2 = vld [vmem:[%s6916_s0 + $0x7e0] sm:$0xff] }
  0x48   : > { %775 = vst [vmem:[%s6921_s1 + $0x20c] sm:$0xff] %v774_v0  ;;  %777 = vst [vmem:[%s6921_s1 + $0x214] sm:$0xff] %v776_v1  ;;  %v780_v3 = vld [vmem:[%s6916_s0 + $0x7e8] sm:$0xff]  ;;  %v782_v4 = vld [vmem:[%s6916_s0 + $0x7f0] sm:$0xff] }
  0x49   : > { %779 = vst [vmem:[%s6921_s1 + $0x21c] sm:$0xff] %v778_v2  ;;  %781 = vst [vmem:[%s6921_s1 + $0x224] sm:$0xff] %v780_v3  ;;  %v784_v5 = vld [vmem:[%s6916_s0 + $0x7f8] sm:$0xff]  ;;  %v786_v6 = vld [vmem:[%s6916_s0 + $0x800] sm:$0xff] }
  0x4a   : > { %783 = vst [vmem:[%s6921_s1 + $0x22c] sm:$0xff] %v782_v4  ;;  %v788_v7 = vld [vmem:[%s6916_s0 + $0x808] sm:$0xff]  ;;  %785 = vst [vmem:[%s6921_s1 + $0x234] sm:$0xff] %v784_v5  ;;  %v790_v8 = vld [vmem:[%s6916_s0 + $0x810] sm:$0xff] }
  0x4b   : > { %787 = vst [vmem:[%s6921_s1 + $0x23c] sm:$0xff] %v786_v6  ;;  %789 = vst [vmem:[%s6921_s1 + $0x244] sm:$0xff] %v788_v7  ;;  %v792_v9 = vld [vmem:[%s6916_s0 + $0x818] sm:$0xff]  ;;  %v794_v10 = vld [vmem:[%s6916_s0 + $0x820] sm:$0xff] }
  0x4c   : > { %791 = vst [vmem:[%s6921_s1 + $0x24c] sm:$0xff] %v790_v8  ;;  %793 = vst [vmem:[%s6921_s1 + $0x254] sm:$0xff] %v792_v9  ;;  %v796_v11 = vld [vmem:[%s6916_s0 + $0x828] sm:$0xff]  ;;  %v798_v12 = vld [vmem:[%s6916_s0 + $0x830] sm:$0xff] }
  0x4d   : > { %795 = vst [vmem:[%s6921_s1 + $0x25c] sm:$0xff] %v794_v10  ;;  %v800_v13 = vld [vmem:[%s6916_s0 + $0x838] sm:$0xff]  ;;  %797 = vst [vmem:[%s6921_s1 + $0x264] sm:$0xff] %v796_v11  ;;  %v802_v14 = vld [vmem:[%s6916_s0 + $0x840] sm:$0xff] }
  0x4e   : > { %799 = vst [vmem:[%s6921_s1 + $0x26c] sm:$0xff] %v798_v12  ;;  %801 = vst [vmem:[%s6921_s1 + $0x274] sm:$0xff] %v800_v13  ;;  %v804_v15 = vld [vmem:[%s6916_s0 + $0x848] sm:$0xff]  ;;  %v806_v16 = vld [vmem:[%s6916_s0 + $0xa40] sm:$0xff] }
  0x4f   : > { %803 = vst [vmem:[%s6921_s1 + $0x27c] sm:$0xff] %v802_v14  ;;  %805 = vst [vmem:[%s6921_s1 + $0x284] sm:$0xff] %v804_v15  ;;  %v808_v17 = vld [vmem:[%s6916_s0 + $0xa48] sm:$0xff]  ;;  %v810_v18 = vld [vmem:[%s6916_s0 + $0xa50] sm:$0xff] }
  0x50   : > { %807 = vst [vmem:[%s6921_s1 + $0x290] sm:$0xff] %v806_v16  ;;  %v812_v19 = vld [vmem:[%s6916_s0 + $0xa58] sm:$0xff]  ;;  %809 = vst [vmem:[%s6921_s1 + $0x298] sm:$0xff] %v808_v17  ;;  %v814_v20 = vld [vmem:[%s6916_s0 + $0xa60] sm:$0xff] }
  0x51   : > { %811 = vst [vmem:[%s6921_s1 + $0x2a0] sm:$0xff] %v810_v18  ;;  %813 = vst [vmem:[%s6921_s1 + $0x2a8] sm:$0xff] %v812_v19  ;;  %v816_v21 = vld [vmem:[%s6916_s0 + $0xa68] sm:$0xff]  ;;  %v818_v22 = vld [vmem:[%s6916_s0 + $0xa70] sm:$0xff] }
  0x52   : > { %815 = vst [vmem:[%s6921_s1 + $0x2b0] sm:$0xff] %v814_v20  ;;  %817 = vst [vmem:[%s6921_s1 + $0x2b8] sm:$0xff] %v816_v21  ;;  %v820_v23 = vld [vmem:[%s6916_s0 + $0xa78] sm:$0xff]  ;;  %v822_v24 = vld [vmem:[%s6916_s0 + $0xa80] sm:$0xff] }
  0x53   : > { %819 = vst [vmem:[%s6921_s1 + $0x2c0] sm:$0xff] %v818_v22  ;;  %v824_v25 = vld [vmem:[%s6916_s0 + $0xa88] sm:$0xff]  ;;  %821 = vst [vmem:[%s6921_s1 + $0x2c8] sm:$0xff] %v820_v23  ;;  %v826_v26 = vld [vmem:[%s6916_s0 + $0xa90] sm:$0xff] }
  0x54   : > { %823 = vst [vmem:[%s6921_s1 + $0x2d0] sm:$0xff] %v822_v24  ;;  %825 = vst [vmem:[%s6921_s1 + $0x2d8] sm:$0xff] %v824_v25  ;;  %v828_v27 = vld [vmem:[%s6916_s0 + $0xa98] sm:$0xff]  ;;  %v830_v28 = vld [vmem:[%s6916_s0 + $0xaa0] sm:$0xff] }
  0x55   : > { %827 = vst [vmem:[%s6921_s1 + $0x2e0] sm:$0xff] %v826_v26  ;;  %829 = vst [vmem:[%s6921_s1 + $0x2e8] sm:$0xff] %v828_v27  ;;  %v832_v29 = vld [vmem:[%s6916_s0 + $0xaa8] sm:$0xff]  ;;  %v834_v30 = vld [vmem:[%s6916_s0 + $0xab0] sm:$0xff] }
  0x56   : > { %831 = vst [vmem:[%s6921_s1 + $0x2f0] sm:$0xff] %v830_v28  ;;  %v836_v31 = vld [vmem:[%s6916_s0 + $0xab8] sm:$0xff]  ;;  %833 = vst [vmem:[%s6921_s1 + $0x2f8] sm:$0xff] %v832_v29  ;;  %v838_v32 = vld [vmem:[%s6916_s0 + $0xac0] sm:$0xff] }
  0x57   : > { %835 = vst [vmem:[%s6921_s1 + $0x300] sm:$0xff] %v834_v30  ;;  %837 = vst [vmem:[%s6921_s1 + $0x308] sm:$0xff] %v836_v31  ;;  %v840_v33 = vld [vmem:[%s6916_s0 + $0xac8] sm:$0xff]  ;;  %v842_v34 = vld [vmem:[%s6916_s0 + $0xad0] sm:$0xff] }
  0x58   : > { %839 = vst [vmem:[%s6921_s1 + $0x310] sm:$0xff] %v838_v32  ;;  %841 = vst [vmem:[%s6921_s1 + $0x318] sm:$0xff] %v840_v33  ;;  %v844_v35 = vld [vmem:[%s6916_s0 + $0xad8] sm:$0xff]  ;;  %v846_v36 = vld [vmem:[%s6916_s0 + $0xcd0] sm:$0xff] }
  0x59   : > { %843 = vst [vmem:[%s6921_s1 + $0x320] sm:$0xff] %v842_v34  ;;  %v848_v37 = vld [vmem:[%s6916_s0 + $0xcd8] sm:$0xff]  ;;  %845 = vst [vmem:[%s6921_s1 + $0x328] sm:$0xff] %v844_v35  ;;  %v850_v38 = vld [vmem:[%s6916_s0 + $0xce0] sm:$0xff] }
  0x5a   : > { %847 = vst [vmem:[%s6921_s1 + $0x334] sm:$0xff] %v846_v36  ;;  %849 = vst [vmem:[%s6921_s1 + $0x33c] sm:$0xff] %v848_v37  ;;  %v852_v39 = vld [vmem:[%s6916_s0 + $0xce8] sm:$0xff]  ;;  %v854_v40 = vld [vmem:[%s6916_s0 + $0xcf0] sm:$0xff] }
  0x5b   : > { %851 = vst [vmem:[%s6921_s1 + $0x344] sm:$0xff] %v850_v38  ;;  %853 = vst [vmem:[%s6921_s1 + $0x34c] sm:$0xff] %v852_v39  ;;  %v856_v41 = vld [vmem:[%s6916_s0 + $0xcf8] sm:$0xff]  ;;  %v858_v42 = vld [vmem:[%s6916_s0 + $0xd00] sm:$0xff] }
  0x5c   : > { %855 = vst [vmem:[%s6921_s1 + $0x354] sm:$0xff] %v854_v40  ;;  %v860_v43 = vld [vmem:[%s6916_s0 + $0xd08] sm:$0xff]  ;;  %857 = vst [vmem:[%s6921_s1 + $0x35c] sm:$0xff] %v856_v41  ;;  %v862_v44 = vld [vmem:[%s6916_s0 + $0xd10] sm:$0xff] }
  0x5d   : > { %859 = vst [vmem:[%s6921_s1 + $0x364] sm:$0xff] %v858_v42  ;;  %861 = vst [vmem:[%s6921_s1 + $0x36c] sm:$0xff] %v860_v43  ;;  %v864_v45 = vld [vmem:[%s6916_s0 + $0xd18] sm:$0xff]  ;;  %v866_v46 = vld [vmem:[%s6916_s0 + $0xd20] sm:$0xff] }
  0x5e   : > { %863 = vst [vmem:[%s6921_s1 + $0x374] sm:$0xff] %v862_v44  ;;  %865 = vst [vmem:[%s6921_s1 + $0x37c] sm:$0xff] %v864_v45  ;;  %v868_v47 = vld [vmem:[%s6916_s0 + $0xd28] sm:$0xff]  ;;  %v870_v48 = vld [vmem:[%s6916_s0 + $0xd30] sm:$0xff] }
  0x5f   : > { %867 = vst [vmem:[%s6921_s1 + $0x384] sm:$0xff] %v866_v46  ;;  %v872_v49 = vld [vmem:[%s6916_s0 + $0xd38] sm:$0xff]  ;;  %869 = vst [vmem:[%s6921_s1 + $0x38c] sm:$0xff] %v868_v47  ;;  %v874_v50 = vld [vmem:[%s6916_s0 + $0xd40] sm:$0xff] }
  0x60   : > { %871 = vst [vmem:[%s6921_s1 + $0x394] sm:$0xff] %v870_v48  ;;  %873 = vst [vmem:[%s6921_s1 + $0x39c] sm:$0xff] %v872_v49  ;;  %v876_v51 = vld [vmem:[%s6916_s0 + $0xd48] sm:$0xff]  ;;  %v878_v52 = vld [vmem:[%s6916_s0 + $0xd50] sm:$0xff] }
  0x61   : > { %875 = vst [vmem:[%s6921_s1 + $0x3a4] sm:$0xff] %v874_v50  ;;  %877 = vst [vmem:[%s6921_s1 + $0x3ac] sm:$0xff] %v876_v51  ;;  %v880_v53 = vld [vmem:[%s6916_s0 + $0xd58] sm:$0xff]  ;;  %v882_v54 = vld [vmem:[%s6916_s0 + $0xd60] sm:$0xff] }
  0x62   : > { %879 = vst [vmem:[%s6921_s1 + $0x3b4] sm:$0xff] %v878_v52  ;;  %v884_v55 = vld [vmem:[%s6916_s0 + $0xd68] sm:$0xff]  ;;  %881 = vst [vmem:[%s6921_s1 + $0x3bc] sm:$0xff] %v880_v53  ;;  %v886_v56 = vld [vmem:[%s6916_s0 + $0xf60] sm:$0xff] }
  0x63   : > { %883 = vst [vmem:[%s6921_s1 + $0x3c4] sm:$0xff] %v882_v54  ;;  %885 = vst [vmem:[%s6921_s1 + $0x3cc] sm:$0xff] %v884_v55  ;;  %v888_v57 = vld [vmem:[%s6916_s0 + $0xf68] sm:$0xff]  ;;  %v890_v58 = vld [vmem:[%s6916_s0 + $0xf70] sm:$0xff] }
  0x64   : > { %887 = vst [vmem:[%s6921_s1 + $0x3d8] sm:$0xff] %v886_v56  ;;  %889 = vst [vmem:[%s6921_s1 + $0x3e0] sm:$0xff] %v888_v57  ;;  %v892_v59 = vld [vmem:[%s6916_s0 + $0xf78] sm:$0xff]  ;;  %v894_v60 = vld [vmem:[%s6916_s0 + $0xf80] sm:$0xff] }
  0x65   : > { %891 = vst [vmem:[%s6921_s1 + $0x3e8] sm:$0xff] %v890_v58  ;;  %v896_v61 = vld [vmem:[%s6916_s0 + $0xf88] sm:$0xff]  ;;  %893 = vst [vmem:[%s6921_s1 + $0x3f0] sm:$0xff] %v892_v59  ;;  %v898_v62 = vld [vmem:[%s6916_s0 + $0xf90] sm:$0xff] }
  0x66   : > { %895 = vst [vmem:[%s6921_s1 + $0x3f8] sm:$0xff] %v894_v60  ;;  %897 = vst [vmem:[%s6921_s1 + $0x400] sm:$0xff] %v896_v61  ;;  %v900_v63 = vld [vmem:[%s6916_s0 + $0xf98] sm:$0xff]  ;;  %v902_v0 = vld [vmem:[%s6916_s0 + $0xfa0] sm:$0xff] }
  0x67   : > { %899 = vst [vmem:[%s6921_s1 + $0x408] sm:$0xff] %v898_v62  ;;  %901 = vst [vmem:[%s6921_s1 + $0x410] sm:$0xff] %v900_v63  ;;  %v904_v1 = vld [vmem:[%s6916_s0 + $0xfa8] sm:$0xff]  ;;  %v906_v2 = vld [vmem:[%s6916_s0 + $0xfb0] sm:$0xff] }
  0x68   : > { %903 = vst [vmem:[%s6921_s1 + $0x418] sm:$0xff] %v902_v0  ;;  %v908_v3 = vld [vmem:[%s6916_s0 + $0xfb8] sm:$0xff]  ;;  %905 = vst [vmem:[%s6921_s1 + $0x420] sm:$0xff] %v904_v1  ;;  %v910_v4 = vld [vmem:[%s6916_s0 + $0xfc0] sm:$0xff] }
  0x69   : > { %907 = vst [vmem:[%s6921_s1 + $0x428] sm:$0xff] %v906_v2  ;;  %909 = vst [vmem:[%s6921_s1 + $0x430] sm:$0xff] %v908_v3  ;;  %v912_v5 = vld [vmem:[%s6916_s0 + $0xfc8] sm:$0xff]  ;;  %v914_v6 = vld [vmem:[%s6916_s0 + $0xfd0] sm:$0xff] }
  0x6a   : > { %911 = vst [vmem:[%s6921_s1 + $0x438] sm:$0xff] %v910_v4  ;;  %913 = vst [vmem:[%s6921_s1 + $0x440] sm:$0xff] %v912_v5  ;;  %v916_v7 = vld [vmem:[%s6916_s0 + $0xfd8] sm:$0xff]  ;;  %v918_v8 = vld [vmem:[%s6916_s0 + $0xfe0] sm:$0xff] }
  0x6b   : > { %915 = vst [vmem:[%s6921_s1 + $0x448] sm:$0xff] %v914_v6  ;;  %v920_v9 = vld [vmem:[%s6916_s0 + $0xfe8] sm:$0xff]  ;;  %917 = vst [vmem:[%s6921_s1 + $0x450] sm:$0xff] %v916_v7  ;;  %v922_v10 = vld [vmem:[%s6916_s0 + $0xff0] sm:$0xff] }
  0x6c   : > { %919 = vst [vmem:[%s6921_s1 + $0x458] sm:$0xff] %v918_v8  ;;  %921 = vst [vmem:[%s6921_s1 + $0x460] sm:$0xff] %v920_v9  ;;  %v924_v11 = vld [vmem:[%s6916_s0 + $0xff8] sm:$0xff]  ;;  %v926_v12 = vld [vmem:[%s6916_s0 + $0x11f0] sm:$0xff] }
  0x6d   : > { %923 = vst [vmem:[%s6921_s1 + $0x468] sm:$0xff] %v922_v10  ;;  %925 = vst [vmem:[%s6921_s1 + $0x470] sm:$0xff] %v924_v11  ;;  %v928_v13 = vld [vmem:[%s6916_s0 + $0x11f8] sm:$0xff]  ;;  %v930_v14 = vld [vmem:[%s6916_s0 + $0x1200] sm:$0xff] }
  0x6e   : > { %927 = vst [vmem:[%s6921_s1 + $0x47c] sm:$0xff] %v926_v12  ;;  %v932_v15 = vld [vmem:[%s6916_s0 + $0x1208] sm:$0xff]  ;;  %929 = vst [vmem:[%s6921_s1 + $0x484] sm:$0xff] %v928_v13  ;;  %v934_v16 = vld [vmem:[%s6916_s0 + $0x1210] sm:$0xff] }
  0x6f   : > { %931 = vst [vmem:[%s6921_s1 + $0x48c] sm:$0xff] %v930_v14  ;;  %933 = vst [vmem:[%s6921_s1 + $0x494] sm:$0xff] %v932_v15  ;;  %v936_v17 = vld [vmem:[%s6916_s0 + $0x1218] sm:$0xff]  ;;  %v938_v18 = vld [vmem:[%s6916_s0 + $0x1220] sm:$0xff] }
  0x70   : > { %935 = vst [vmem:[%s6921_s1 + $0x49c] sm:$0xff] %v934_v16  ;;  %937 = vst [vmem:[%s6921_s1 + $0x4a4] sm:$0xff] %v936_v17  ;;  %v940_v19 = vld [vmem:[%s6916_s0 + $0x1228] sm:$0xff]  ;;  %v942_v20 = vld [vmem:[%s6916_s0 + $0x1230] sm:$0xff] }
  0x71   : > { %939 = vst [vmem:[%s6921_s1 + $0x4ac] sm:$0xff] %v938_v18  ;;  %v944_v21 = vld [vmem:[%s6916_s0 + $0x1238] sm:$0xff]  ;;  %941 = vst [vmem:[%s6921_s1 + $0x4b4] sm:$0xff] %v940_v19  ;;  %v946_v22 = vld [vmem:[%s6916_s0 + $0x1240] sm:$0xff] }
  0x72   : > { %943 = vst [vmem:[%s6921_s1 + $0x4bc] sm:$0xff] %v942_v20  ;;  %945 = vst [vmem:[%s6921_s1 + $0x4c4] sm:$0xff] %v944_v21  ;;  %v948_v23 = vld [vmem:[%s6916_s0 + $0x1248] sm:$0xff]  ;;  %v950_v24 = vld [vmem:[%s6916_s0 + $0x1250] sm:$0xff] }
  0x73   : > { %947 = vst [vmem:[%s6921_s1 + $0x4cc] sm:$0xff] %v946_v22  ;;  %949 = vst [vmem:[%s6921_s1 + $0x4d4] sm:$0xff] %v948_v23  ;;  %v952_v25 = vld [vmem:[%s6916_s0 + $0x1258] sm:$0xff]  ;;  %v954_v26 = vld [vmem:[%s6916_s0 + $0x1260] sm:$0xff] }
  0x74   : > { %951 = vst [vmem:[%s6921_s1 + $0x4dc] sm:$0xff] %v950_v24  ;;  %v956_v27 = vld [vmem:[%s6916_s0 + $0x1268] sm:$0xff]  ;;  %953 = vst [vmem:[%s6921_s1 + $0x4e4] sm:$0xff] %v952_v25  ;;  %v958_v28 = vld [vmem:[%s6916_s0 + $0x1270] sm:$0xff] }
  0x75   : > { %955 = vst [vmem:[%s6921_s1 + $0x4ec] sm:$0xff] %v954_v26  ;;  %957 = vst [vmem:[%s6921_s1 + $0x4f4] sm:$0xff] %v956_v27  ;;  %v960_v29 = vld [vmem:[%s6916_s0 + $0x1278] sm:$0xff]  ;;  %v962_v30 = vld [vmem:[%s6916_s0 + $0x1280] sm:$0xff] }
  0x76   : > { %959 = vst [vmem:[%s6921_s1 + $0x4fc] sm:$0xff] %v958_v28  ;;  %961 = vst [vmem:[%s6921_s1 + $0x504] sm:$0xff] %v960_v29  ;;  %v964_v31 = vld [vmem:[%s6916_s0 + $0x1288] sm:$0xff]  ;;  %v5575_v32 = vld [vmem:[%s6916_s0 + $0xa0] sm:$0xf] }
  0x77   : > { %963 = vst [vmem:[%s6921_s1 + $0x50c] sm:$0xff] %v962_v30  ;;  %v5577_v33 = vld [vmem:[%s6916_s0 + $0x330] sm:$0xf]  ;;  %965 = vst [vmem:[%s6921_s1 + $0x514] sm:$0xff] %v964_v31  ;;  %v5579_v34 = vld [vmem:[%s6916_s0 + $0x5c0] sm:$0xf] }
  0x78   : > { %5576 = vst [vmem:[%s6921_s1 + $0xa0] sm:$0xf] %v5575_v32  ;;  %5578 = vst [vmem:[%s6921_s1 + $0x144] sm:$0xf] %v5577_v33  ;;  %v5581_v35 = vld [vmem:[%s6916_s0 + $0x850] sm:$0xf] }
  0x79   : > { %v5583_v36 = vld [vmem:[%s6916_s0 + $0xae0] sm:$0xf]  ;;  %5580 = vst [vmem:[%s6921_s1 + $0x1e8] sm:$0xf] %v5579_v34  ;;  %5582 = vst [vmem:[%s6921_s1 + $0x28c] sm:$0xf] %v5581_v35 }
  0x7a   : > { %5584 = vst [vmem:[%s6921_s1 + $0x330] sm:$0xf] %v5583_v36  ;;  %v5585_v37 = vld [vmem:[%s6916_s0 + $0xd70] sm:$0xf]  ;;  %v5587_v38 = vld [vmem:[%s6916_s0 + $0x1000] sm:$0xf] }
  0x7b   : > { %v5589_v39 = vld [vmem:[%s6916_s0 + $0x1290] sm:$0xf]  ;;  %5586 = vst [vmem:[%s6921_s1 + $0x3d4] sm:$0xf] %v5585_v37  ;;  %5588 = vst [vmem:[%s6921_s1 + $0x478] sm:$0xf] %v5587_v38 }
  0x7c   : > { %5590 = vst [vmem:[%s6921_s1 + $0x51c] sm:$0xf] %v5589_v39 }
  0x7d PF: > { %p5591_p7 = scmp.ge.s32.totalorder %s6737_s24, 1  ;;  %p1002_p8 = scmp.lt.s32.totalorder %s6737_s24, 5 }
  0x7f   : > { %p1003_p9 = pnand %p5591_p7, %p1002_p8 }
  0x80   : > { %s1009_s26 = sand.u32 (!%p1003_p9), 1, %s6729_s4   ;;  %s1076_s27 = smul.u32 (!%p1003_p9), 41, %s6889_s25 }
  0x81   : > { %1006 = sbr.rel (%p1003_p9) target bundleno = 1580 (0x62c), region = 118  ;;  %s8549_s18 = sld [smem:[#allocation29_spill]] (!%p1003_p9) }
  0x82   : > { %s6179_s7 = smul.u32 (!%p1003_p9), 1312, %s1009_s26  ;;  %p1077_p10 = scmp.lt.s32.totalorder (!%p1003_p9), %s1076_s27, 163 }
  0x83   : > { %s6180_s28 = smul.u32 (!%p1003_p9), 656, %s1009_s26  ;;  %p5592_p11 = scmp.ne.s32.totalorder (!%p1003_p9), %s6889_s25, 0 }
  0x84   : > { %s7265_s1 = scalar_lea.vmem (!%p1003_p9), [#allocation3], %s6179_s7 }
  0x85   : > { %s7267_s17 = scalar_lea.vmem (!%p1003_p9), [#allocation11], %s6180_s28 }
  0x86   : > { %s8568_s27 = smov (!%p1077_p10, %s1076_s27), 163  ;;  %1086 = sbr.rel (%p5592_p11) target bundleno = 1188 (0x4a4), region = 126 }
  0x87   : > { %s7263_s0 = scalar_lea.vmem %s8549_s18, %s8568_s27  ;;  %s8550_s4 = sld [smem:[#allocation22_spill]] (!%p5592_p11) }
  0x88   : > { %s8552_s28 = sld [smem:[#allocation19_spill]] (!%p5592_p11)  ;;  %s6740_s24 = smov (!%p5592_p11), 64  }
  0x89   : > { %s8555_s27 = sld [smem:[#allocation24_spill]] (!%p5592_p11) }
  0x8a   : > { %s8556_s23 = sld [smem:[#allocation23_spill]] (!%p5592_p11) }
  0x8b   : > { %v6739_v44 = vmov 0.0   ;;  %vm1119_vm0 = vcmask 523264   ;;  %v6243_v13 = vld [vmem:[%s8506_s10 + $0xf8] sm:$0xff]   ;;  %v1109_v31 = vlaneseq  ;;  %vm1215_vm1 = vcmask 519168   ;;  %s8558_s8 = sld [smem:[#allocation27_spill]] }
  0x8c   : > { %1190 = vmatprep.mubr.f32.mxu0 %v6739_v44  ;;  %1331 = vmatprep.mubr.f32.mxu1 %v6739_v44  ;;  %v6300_v30 = vld [vmem:[%s8506_s10 + $0x78] sm:$0xff]   ;;  %vm2640_vm2 = vcmask 1043456   ;;  %vm1226_vm3 = vcmask 162816   ;;  %vm1345_vm4 = vcmask 654336   ;;  %vm6741_vm5 = vmmov 0   ;;  %s8559_s30 = sld [smem:[#allocation21_spill]] }
  0x8d   : > { %s8551_s5 = smov %s8550_s4  ;;  %v1106_v40 = vld [vmem:[%s8550_s4 + $0x78] sm:$0xff]  ;;  %s8553_s4 = sld [smem:[#allocation26_spill]]  ;;  %v1110_v32 = vshrl.u32 %v1109_v31, 7  ;;  %v6287_v31 = vld [vmem:[%s8506_s10 + $0x2e0] sm:$0xff]   ;;  %vm2723_vm6 = vcmask 130048  }
  0x8e   : > { %v1105_v41 = vld [vmem:[%s8551_s5 + $0x70] sm:$0xff]  ;;  %v1104_v42 = vld [vmem:[%s8551_s5 + $0x68] sm:$0xff]  ;;  %1142 = vmatprep.subr.mxu0 %v1106_v40  ;;  %v1103_v43 = vld [vmem:[%s8551_s5 + $0x60] sm:$0xff]  ;;  %s8561_s7 = sld [smem:[#allocation25_spill]] }
  0x8f   : > { %1143 = vmatpush1.msra.mxu0 %v1105_v41  ;;  %v1102_v45 = vld [vmem:[%s8551_s5 + $0x58] sm:$0xff]  ;;  %v1101_v46 = vld [vmem:[%s8551_s5 + $0x50] sm:$0xff]  ;;  %v1100_v47 = vld [vmem:[%s8551_s5 + $0x48] sm:$0xff]  ;;  %v7432_v33 = vsub.s32 0, %v1110_v32  ;;  %v7437_v35 = vsub.s32 1, %v1110_v32 }
  0x90   : > { %1144 = vmatprep.subr.mxu0 %v1104_v42  ;;  %v1099_v48 = vld [vmem:[%s8551_s5 + $0x40] sm:$0xff]  ;;  %v1098_v49 = vld [vmem:[%s8551_s5 + $0x38] sm:$0xff]  ;;  %v1088_v51 = vld [vmem:[%s8552_s28 + $0x8] sm:$0xff] }
  0x91   : > { %1145 = vmatpush1.msra.mxu0 %v1103_v43  ;;  %v1087_v50 = vld [vmem:[%s8552_s28] sm:$0xff]  ;;  %v1097_v52 = vld [vmem:[%s8551_s5 + $0x30] sm:$0xff]  ;;  %v1096_v53 = vld [vmem:[%s8551_s5 + $0x28] sm:$0xff]  ;;  %v1090_v58 = vmax.f32 %v1088_v51, 0.0 }
  0x92   : > { %1146 = vmatprep.subr.mxu0 %v1102_v45  ;;  %v1095_v54 = vld [vmem:[%s8551_s5 + $0x20] sm:$0xff]  ;;  %v1094_v55 = vld [vmem:[%s8551_s5 + $0x18] sm:$0xff]  ;;  %v1093_v56 = vld [vmem:[%s8551_s5 + $0x10] sm:$0xff]  ;;  %v1089_v57 = vmax.f32 %v1087_v50, 0.0  ;;  %s8560_s29 = smov %s8559_s30 }
  0x93   : > { %1147 = vmatpush1.msra.mxu0 %v1101_v46  ;;  %v1092_v59 = vld [vmem:[%s8551_s5 + $0x8] sm:$0xff]  ;;  %v1091_v60 = vld [vmem:[%s8551_s5] sm:$0xff]  ;;  %s8554_s26 = smov %s8553_s4  ;;  %v1364_v61 = vld [vmem:[%s8553_s4 + $0x78] sm:$0xff] }
  0x94   : > { %1148 = vmatprep.subr.mxu0 %v1100_v47  ;;  %v1363_v62 = vld [vmem:[%s8554_s26 + $0x70] sm:$0xff]  ;;  %v1362_v63 = vld [vmem:[%s8554_s26 + $0x68] sm:$0xff]  ;;  %v1361_v0 = vld [vmem:[%s8554_s26 + $0x60] sm:$0xff] }
  0x95   : > { %1149 = vmatpush1.msra.mxu0 %v1099_v48  ;;  %v1360_v1 = vld [vmem:[%s8554_s26 + $0x58] sm:$0xff]  ;;  %v1359_v2 = vld [vmem:[%s8554_s26 + $0x50] sm:$0xff]  ;;  %v1358_v3 = vld [vmem:[%s8554_s26 + $0x48] sm:$0xff] }
  0x96   : > { %1150 = vmatprep.subr.mxu0 %v1098_v49  ;;  %v1357_v4 = vld [vmem:[%s8554_s26 + $0x40] sm:$0xff]  ;;  %v1356_v5 = vld [vmem:[%s8554_s26 + $0x38] sm:$0xff]  ;;  %v1355_v6 = vld [vmem:[%s8554_s26 + $0x30] sm:$0xff] }
  0x97   : > { %1151 = vmatpush1.msra.mxu0 %v1097_v52  ;;  %v1354_v7 = vld [vmem:[%s8554_s26 + $0x28] sm:$0xff]  ;;  %v1353_v8 = vld [vmem:[%s8554_s26 + $0x20] sm:$0xff]  ;;  %v1352_v9 = vld [vmem:[%s8554_s26 + $0x18] sm:$0xff] }
  0x98   : > { %1152 = vmatprep.subr.mxu0 %v1096_v53  ;;  %v1351_v10 = vld [vmem:[%s8554_s26 + $0x10] sm:$0xff]  ;;  %v1350_v11 = vld [vmem:[%s8554_s26 + $0x8] sm:$0xff]  ;;  %v1349_v12 = vld [vmem:[%s8554_s26] sm:$0xff] }
  0x99   : > { %1153 = vmatpush1.msra.mxu0 %v1095_v54  ;;  %v1244_v14 = vld [vmem:[%s8555_s27 + $0x78] sm:$0xff]  ;;  %v1243_v15 = vld [vmem:[%s8555_s27 + $0x70] sm:$0xff]  ;;  %v1242_v16 = vld [vmem:[%s8555_s27 + $0x68] sm:$0xff] }
  0x9a   : > { %1154 = vmatprep.subr.mxu0 %v1094_v55  ;;  %1283 = vmatprep.subr.mxu1 %v1244_v14  ;;  %v1241_v17 = vld [vmem:[%s8555_s27 + $0x60] sm:$0xff]  ;;  %v1240_v18 = vld [vmem:[%s8555_s27 + $0x58] sm:$0xff]  ;;  %v1239_v19 = vld [vmem:[%s8555_s27 + $0x50] sm:$0xff] }
  0x9b   : > { %1155 = vmatpush1.msra.mxu0 %v1093_v56  ;;  %1284 = vmatpush1.msra.mxu1 %v1243_v15  ;;  %v1238_v20 = vld [vmem:[%s8555_s27 + $0x48] sm:$0xff]  ;;  %v1237_v21 = vld [vmem:[%s8555_s27 + $0x40] sm:$0xff]  ;;  %v1236_v22 = vld [vmem:[%s8555_s27 + $0x38] sm:$0xff] }
  0x9c   : > { %1156 = vmatprep.subr.mxu0 %v1092_v59  ;;  %1285 = vmatprep.subr.mxu1 %v1242_v16  ;;  %v1235_v23 = vld [vmem:[%s8555_s27 + $0x30] sm:$0xff]  ;;  %v1234_v24 = vld [vmem:[%s8555_s27 + $0x28] sm:$0xff]  ;;  %v1233_v25 = vld [vmem:[%s8555_s27 + $0x20] sm:$0xff] }
  0x9d   : > { %1157 = vmatpush1.msra.mxu0 %v1091_v60  ;;  %1286 = vmatpush1.msra.mxu1 %v1241_v17  ;;  %v1232_v26 = vld [vmem:[%s8555_s27 + $0x18] sm:$0xff]  ;;  %v1231_v27 = vld [vmem:[%s8555_s27 + $0x10] sm:$0xff]  ;;  %v1230_v28 = vld [vmem:[%s8555_s27 + $0x8] sm:$0xff] }
  0x9e   : > { %5593 = vmatmul.mubr.msk.f32.vlgmr.msra.gmra.mxu0 %vm1119_vm0, %v1089_v57  ;;  %1399 = vmatprep.subr.mxu0 %v1364_v61  ;;  %v1229_v29 = vld [vmem:[%s8555_s27] sm:$0xff]  ;;  %v6244_v45 = vld [vmem:[%s8506_s10 + $0xb8] sm:$0xff]   ;;  %v6245_v49 = vld [vmem:[%s8506_s10 + $0xf0] sm:$0xff]  }
  0x9f   : > { %1196 = vmatprep.mubr.f32.mxu0 %v6739_v44  ;;  %1400 = vmatpush1.msra.mxu0 %v1363_v62  ;;  %v1107_v34 = vld [vmem:[%s8556_s23] sm:$0x3]  ;;  %v6246_v53 = vld [vmem:[%s8506_s10 + $0xb0] sm:$0xff]   ;;  %s8557_s23 = sld [smem:[#allocation20_spill]]  ;;  %v6247_v57 = vld [vmem:[%s8506_s10 + $0xe8] sm:$0xff]  }
  0xa0   : > { %1401 = vmatprep.subr.mxu0 %v1362_v63  ;;  %1287 = vmatprep.subr.mxu1 %v1240_v18  ;;  %v1112_v36 = vrot.slane %v1107_v34, %v7432_v33  ;;  %v1116_v37 = vrot.slane %v1107_v34, %v7437_v35  ;;  %v6249_v59 = vld [vmem:[%s8506_s10 + $0xe0] sm:$0xff]   ;;  %v6251_v61 = vld [vmem:[%s8506_s10 + $0xd8] sm:$0xff]   ;;  %v6253_v63 = vld [vmem:[%s8506_s10 + $0xd0] sm:$0xff]  }
  0xa1   : > { %1402 = vmatpush1.msra.mxu0 %v1361_v0  ;;  %1288 = vmatpush1.msra.mxu1 %v1239_v19  ;;  %v6250_v60 = vld [vmem:[%s8506_s10 + $0xa0] sm:$0xff]   ;;  %v6252_v62 = vld [vmem:[%s8506_s10 + $0x98] sm:$0xff]   ;;  %v6254_v0 = vld [vmem:[%s8506_s10 + $0x90] sm:$0xff]  }
  0xa2   : > { %5594 = vmatmul.mubr.msk.f32.gmra.mxu0 %vm1119_vm0, %v1090_v58  ;;  %1403 = vmatprep.subr.mxu0 %v1360_v1  ;;  %v6248_v58 = vld [vmem:[%s8506_s10 + $0xa8] sm:$0xff]   ;;  %v6269_v14 = vld [vmem:[%s8506_s10 + $0x1a0] sm:$0xff]   ;;  %v6270_v15 = vld [vmem:[%s8506_s10 + $0x1d8] sm:$0xff]  }
  0xa3   : > { %1404 = vmatpush1.msra.mxu0 %v1359_v2  ;;  %1447 = vmatprep.mubr.f32.mxu0 %v6739_v44  ;;  %v6255_v1 = vld [vmem:[%s8506_s10 + $0xc8] sm:$0xff]   ;;  %v6271_v16 = vld [vmem:[%s8506_s10 + $0x198] sm:$0xff]   ;;  %v6272_v17 = vld [vmem:[%s8506_s10 + $0x1d0] sm:$0xff]  }
  0xa4   : > { %1405 = vmatprep.subr.mxu0 %v1358_v3  ;;  %1289 = vmatprep.subr.mxu1 %v1238_v20  ;;  %v6256_v2 = vld [vmem:[%s8506_s10 + $0x88] sm:$0xff]   ;;  %v6257_v3 = vld [vmem:[%s8506_s10 + $0xc0] sm:$0xff]   ;;  %v6273_v18 = vld [vmem:[%s8506_s10 + $0x190] sm:$0xff]  }
  0xa5   : > { %1406 = vmatpush1.msra.mxu0 %v1357_v4  ;;  %1290 = vmatpush1.msra.mxu1 %v1237_v21  ;;  %v6261_v54 = vld [vmem:[%s8557_s23 + $0xc] ss:$52 sps:$4 sm:$0xff]   ;;  %v6289_v34 = vld [vmem:[%s8506_s10 + $0x2d8] sm:$0xff]  }
  0xa6   : > { %1407 = vmatprep.subr.mxu0 %v1356_v5  ;;  %1291 = vmatprep.subr.mxu1 %v1236_v22  ;;  %v6258_v4 = vld [vmem:[%s8506_s10 + $0x80] sm:$0xff]   ;;  %v6262_v5 = vld [vmem:[%s8506_s10 + $0x1f8] sm:$0xff]   ;;  %v6274_v19 = vld [vmem:[%s8506_s10 + $0x1c8] sm:$0xff]  }
  0xa7   : > { %1408 = vmatpush1.msra.mxu0 %v1355_v6  ;;  %1292 = vmatpush1.msra.mxu1 %v1235_v23  ;;  %v6259_v6 = vld [vmem:[%s8557_s23 + $0x8] ss:$52 sps:$4 sm:$0xff]   ;;  %v6276_v21 = vld [vmem:[%s8506_s10 + $0x1c0] sm:$0xff]  }
  0xa8   : > { %1409 = vmatprep.subr.mxu0 %v1354_v7  ;;  %1293 = vmatprep.subr.mxu1 %v1234_v24  ;;  %v6263_v7 = vld [vmem:[%s8506_s10 + $0x1b8] sm:$0xff]   ;;  %v6275_v20 = vld [vmem:[%s8506_s10 + $0x188] sm:$0xff]   ;;  %v6277_v22 = vld [vmem:[%s8506_s10 + $0x180] sm:$0xff]  }
  0xa9   : > { %1410 = vmatpush1.msra.mxu0 %v1353_v8  ;;  %1294 = vmatpush1.msra.mxu1 %v1233_v25  ;;  %v6280_v8 = vld [vmem:[%s8557_s23 + $0x1c] ss:$52 sps:$4 sm:$0xff]   ;;  %v6278_v24 = vld [vmem:[%s8557_s23 + $0x18] ss:$52 sps:$4 sm:$0xff]   ;;  %v6288_v32 = vld [vmem:[%s8506_s10 + $0x2a0] sm:$0xff]  }
  0xaa   : > { %1411 = vmatprep.subr.mxu0 %v1352_v9  ;;  %1295 = vmatprep.subr.mxu1 %v1232_v26  ;;  %v6264_v9 = vld [vmem:[%s8506_s10 + $0x1f0] sm:$0xff]   ;;  %v6281_v23 = vld [vmem:[%s8506_s10 + $0x2f8] sm:$0xff]   ;;  %v6299_v26 = vld [vmem:[%s8557_s23 + $0x2c] ss:$52 sps:$4 sm:$0xff]  }
  0xab   : > { %1412 = vmatpush1.msra.mxu0 %v1351_v10  ;;  %1296 = vmatpush1.msra.mxu1 %v1231_v27  ;;  %v6265_v10 = vld [vmem:[%s8506_s10 + $0x1b0] sm:$0xff]   ;;  %v6282_v25 = vld [vmem:[%s8506_s10 + $0x2b8] sm:$0xff]  }
  0xac   : > { %1413 = vmatprep.subr.mxu0 %v1350_v11  ;;  %1297 = vmatprep.subr.mxu1 %v1230_v28  ;;  %v6266_v11 = vld [vmem:[%s8506_s10 + $0x1e8] sm:$0xff]   ;;  %v6283_v27 = vld [vmem:[%s8506_s10 + $0x2f0] sm:$0xff]  }
  0xad   : > { %1414 = vmatpush1.msra.mxu0 %v1349_v12  ;;  %1298 = vmatpush1.msra.mxu1 %v1229_v29  ;;  %v6267_v12 = vld [vmem:[%s8506_s10 + $0x1a8] sm:$0xff]   ;;  %v6284_v28 = vld [vmem:[%s8506_s10 + $0x2b0] sm:$0xff]  }
  0xae   : > { %5951 = vmatprep.subr.bf16.mxu0 %v6243_v13  ;;  %5929 = vmatprep.subr.bf16.mxu1 %v6300_v30  ;;  %v6268_v13 = vld [vmem:[%s8506_s10 + $0x1e0] sm:$0xff]   ;;  %v6285_v29 = vld [vmem:[%s8506_s10 + $0x2e8] sm:$0xff]  }
  0xaf   : > { %v6286_v30 = vld [vmem:[%s8506_s10 + $0x2a8] sm:$0xff]  }
 0x15e   : > { %v1192_v38 = vpop.f32.mrf.mxu0 }
 0x15f   : > { %v1193_v39 = vadd.f32 %v1192_v38, %v1112_v36  ;;  %v6292_v38 = vld [vmem:[%s8506_s10 + $0x290] sm:$0xff]  }
 0x160   : > { %v1194_v40 = vpop.f32.mrf.mxu0 }
 0x161   : > { %v1203_v41 = vmax.f32 %v1193_v39, 0.0  ;;  %v1195_v42 = vadd.f32 %v1194_v40, %v1116_v37  ;;  %v6293_v39 = vld [vmem:[%s8506_s10 + $0x2c8] sm:$0xff]  }
 0x162   : > { %v1198_v43 = vpop.f32.mrf.mxu0  ;;  %v6294_v40 = vld [vmem:[%s8506_s10 + $0x288] sm:$0xff]  }
 0x163   : > { %v5926_v46 = vpack.c.bf16 %v1203_v41, %v1203_v41  ;;  %v1205_v47 = vmax.f32 %v1195_v42, 0.0  ;;  %1220 = vrot.lane.b32.xlu1 %v1195_v42, %s6740_s24  ;;  %1259 = vrot.lane.b32.xlu0 %v1203_v41, %s6740_s24  ;;  %v1199_v48 = vadd.f32 %v1198_v43, %v1112_v36  ;;  %v6290_v36 = vld [vmem:[%s8506_s10 + $0x298] sm:$0xff]   ;;  %v6295_v41 = vld [vmem:[%s8506_s10 + $0x2c0] sm:$0xff]  }
 0x164   : > { %v1200_v50 = vpop.f32.mrf.mxu0  ;;  %v6296_v42 = vld [vmem:[%s8506_s10 + $0x280] sm:$0xff]   ;;  %v1466_v43 = vld [vmem:[%s8505_s9 + $0x10] sm:$0xf] }
 0x165   : > { %1216 = vst.msk [vmem:[#allocation2] sm:$0xf] %vm1215_vm1, %v5926_v46  ;;  %5599 = vmatmul.mubr.msk.f32.vlgmr.msra.gmra.mxu0 %vm1119_vm0, %v1205_v47  ;;  %v1204_v51 = vmax.f32 %v1199_v48, 0.0  ;;  %v1201_v52 = vadd.f32 %v1200_v50, %v1116_v37  ;;  %v6291_v37 = vld [vmem:[%s8506_s10 + $0x2d0] sm:$0xff]   ;;  %v1465_v46 = vld [vmem:[%s8505_s9 + $0x8] sm:$0xff]  ;;  %v1464_v47 = vld [vmem:[%s8505_s9] sm:$0xff] }
 0x166   : > { %5952 = vmatpush3.bf16.msra.mxu0 %v6244_v45  ;;  %1453 = vmatprep.mubr.f32.mxu0 %v6739_v44  ;;  %v6297_v45 = vld [vmem:[%s8557_s23 + $0x28] ss:$52 sps:$4 sm:$0xff]  }
 0x167   : > { %v5927_v55 = vpack.c.bf16 %v1204_v51, %v1204_v51  ;;  %v1206_v56 = vmax.f32 %v1201_v52, 0.0  ;;  %5953 = vmatprep.subr.bf16.mxu0 %v6245_v49  ;;  %1222 = vrot.lane.b32.xlu1 %v1201_v52, %s6740_s24  ;;  %v6301_v48 = vld [vmem:[%s8506_s10 + $0x38] sm:$0xff]   ;;  %v6302_v49 = vld [vmem:[%s8506_s10 + $0x70] sm:$0xff]  }
 0x168   : > { %1261 = vrot.lane.b32.xlu0 %v1204_v51, %s6740_s24  ;;  %v6303_v52 = vld [vmem:[%s8506_s10 + $0x30] sm:$0xff]  }
 0x169   : > { %1217 = vst.msk [vmem:[#allocation2 + $0x4] sm:$0xf] %vm1215_vm1, %v5927_v55  ;;  %5600 = vmatmul.mubr.msk.f32.gmra.mxu0 %vm1119_vm0, %v1206_v56  ;;  %v6318_v55 = vld [vmem:[%s8557_s23 + $0x4] ss:$52 sps:$4 sm:$0xff]  }
 0x16a   : > { %5954 = vmatpush3.bf16.msra.mxu0 %v6246_v53  ;;  %2422 = vmatprep.mubr.bf16.mxu0 %v6261_v54  ;;  %v6304_v53 = vld [vmem:[%s8506_s10 + $0x68] sm:$0xff]  }
 0x16b   : > { %5955 = vmatprep.subr.bf16.mxu0 %v6247_v57  ;;  %v6305_v57 = vld [vmem:[%s8506_s10 + $0x28] sm:$0xff]  }
 0x16e   : > { %5956 = vmatpush3.bf16.msra.mxu0 %v6248_v58  ;;  %v6306_v58 = vld [vmem:[%s8506_s10 + $0x60] sm:$0xff]  }
 0x16f   : > { %5957 = vmatprep.subr.bf16.mxu0 %v6249_v59  ;;  %v6307_v59 = vld [vmem:[%s8506_s10 + $0x20] sm:$0xff]  }
 0x172   : > { %5958 = vmatpush3.bf16.msra.mxu0 %v6250_v60  ;;  %v6308_v60 = vld [vmem:[%s8506_s10 + $0x58] sm:$0xff]  }
 0x173   : > { %5959 = vmatprep.subr.bf16.mxu0 %v6251_v61  ;;  %v6309_v61 = vld [vmem:[%s8506_s10 + $0x18] sm:$0xff]  }
 0x176   : > { %5960 = vmatpush3.bf16.msra.mxu0 %v6252_v62  ;;  %v6310_v62 = vld [vmem:[%s8506_s10 + $0x50] sm:$0xff]  }
 0x177   : > { %5961 = vmatprep.subr.bf16.mxu0 %v6253_v63  ;;  %v6311_v63 = vld [vmem:[%s8506_s10 + $0x10] sm:$0xff]  }
 0x17a   : > { %5962 = vmatpush3.bf16.msra.mxu0 %v6254_v0  ;;  %v6312_v0 = vld [vmem:[%s8506_s10 + $0x48] sm:$0xff]  }
 0x17b   : > { %5963 = vmatprep.subr.bf16.mxu0 %v6255_v1  ;;  %v6313_v1 = vld [vmem:[%s8506_s10 + $0x8] sm:$0xff]  }
 0x17e   : > { %5964 = vmatpush3.bf16.msra.mxu0 %v6256_v2  ;;  %v6314_v2 = vld [vmem:[%s8506_s10 + $0x40] sm:$0xff]  }
 0x17f   : > { %5965 = vmatprep.subr.bf16.mxu0 %v6257_v3  ;;  %v6315_v3 = vld [vmem:[%s8506_s10] sm:$0xff]  }
 0x182   : > { %5966 = vmatpush3.bf16.msra.mxu0 %v6258_v4  ;;  %v6319_v4 = vld [vmem:[%s8506_s10 + $0x178] sm:$0xff]  }
 0x183   : > { %5995 = vmatprep.subr.bf16.mxu0 %v6262_v5  ;;  %v6316_v5 = vld [vmem:[%s8557_s23] ss:$52 sps:$4 sm:$0xff]  }
 0x185   : > { %2423 = vmatmul.mubr.bf16.vlgmr.msra.gmra.mxu0 %v6259_v6  ;;  %v6320_v6 = vld [vmem:[%s8506_s10 + $0x138] sm:$0xff]  }
 0x186   : > { %5996 = vmatpush3.bf16.msra.mxu0 %v6263_v7  ;;  %2504 = vmatprep.mubr.bf16.mxu0 %v6280_v8  ;;  %v6337_v7 = vld [vmem:[%s8557_s23 + $0x14] ss:$52 sps:$4 sm:$0xff]  }
 0x187   : > { %5997 = vmatprep.subr.bf16.mxu0 %v6264_v9  ;;  %v6321_v8 = vld [vmem:[%s8506_s10 + $0x170] sm:$0xff]  }
 0x188   : > { %v6322_v9 = vld [vmem:[%s8506_s10 + $0x130] sm:$0xff]  }
 0x18a   : > { %5998 = vmatpush3.bf16.msra.mxu0 %v6265_v10  ;;  %v6323_v10 = vld [vmem:[%s8506_s10 + $0x168] sm:$0xff]  }
 0x18b   : > { %5999 = vmatprep.subr.bf16.mxu0 %v6266_v11  ;;  %v6324_v11 = vld [vmem:[%s8506_s10 + $0x128] sm:$0xff]  }
 0x18e   : > { %6000 = vmatpush3.bf16.msra.mxu0 %v6267_v12  ;;  %v6325_v12 = vld [vmem:[%s8506_s10 + $0x160] sm:$0xff]  }
 0x18f   : > { %6001 = vmatprep.subr.bf16.mxu0 %v6268_v13  ;;  %v6326_v13 = vld [vmem:[%s8506_s10 + $0x120] sm:$0xff]  }
 0x192   : > { %6002 = vmatpush3.bf16.msra.mxu0 %v6269_v14  ;;  %v6327_v14 = vld [vmem:[%s8506_s10 + $0x158] sm:$0xff]  }
 0x193   : > { %6003 = vmatprep.subr.bf16.mxu0 %v6270_v15  ;;  %v6328_v15 = vld [vmem:[%s8506_s10 + $0x118] sm:$0xff]  }
 0x196   : > { %6004 = vmatpush3.bf16.msra.mxu0 %v6271_v16  ;;  %v6329_v16 = vld [vmem:[%s8506_s10 + $0x150] sm:$0xff]  }
 0x197   : > { %6005 = vmatprep.subr.bf16.mxu0 %v6272_v17  ;;  %v6330_v17 = vld [vmem:[%s8506_s10 + $0x110] sm:$0xff]  }
 0x19a   : > { %6006 = vmatpush3.bf16.msra.mxu0 %v6273_v18  ;;  %v6331_v18 = vld [vmem:[%s8506_s10 + $0x148] sm:$0xff]  }
 0x19b   : > { %6007 = vmatprep.subr.bf16.mxu0 %v6274_v19  ;;  %v6332_v19 = vld [vmem:[%s8506_s10 + $0x108] sm:$0xff]  }
 0x19e   : > { %6008 = vmatpush3.bf16.msra.mxu0 %v6275_v20  ;;  %v6333_v20 = vld [vmem:[%s8506_s10 + $0x140] sm:$0xff]  }
 0x19f   : > { %6009 = vmatprep.subr.bf16.mxu0 %v6276_v21  ;;  %v6334_v21 = vld [vmem:[%s8506_s10 + $0x100] sm:$0xff]  }
 0x1a2   : > { %6010 = vmatpush3.bf16.msra.mxu0 %v6277_v22  ;;  %v6338_v22 = vld [vmem:[%s8506_s10 + $0x278] sm:$0xff]  }
 0x1a3   : > { %6039 = vmatprep.subr.bf16.mxu0 %v6281_v23  ;;  %v6335_v23 = vld [vmem:[%s8557_s23 + $0x10] ss:$52 sps:$4 sm:$0xff]  }
 0x1a5   : > { %2505 = vmatmul.mubr.bf16.vlgmr.msra.gmra.mxu0 %v6278_v24  ;;  %v6339_v24 = vld [vmem:[%s8506_s10 + $0x238] sm:$0xff]  }
 0x1a6   : > { %6040 = vmatpush3.bf16.msra.mxu0 %v6282_v25  ;;  %2586 = vmatprep.mubr.bf16.mxu0 %v6299_v26  ;;  %v6356_v25 = vld [vmem:[%s8557_s23 + $0x24] ss:$52 sps:$4 sm:$0xff]   ;;  %v6340_v26 = vld [vmem:[%s8506_s10 + $0x270] sm:$0xff]  }
 0x1a7   : > { %6041 = vmatprep.subr.bf16.mxu0 %v6283_v27  ;;  %v6341_v27 = vld [vmem:[%s8506_s10 + $0x230] sm:$0xff]  }
 0x1aa   : > { %6042 = vmatpush3.bf16.msra.mxu0 %v6284_v28  ;;  %v6342_v28 = vld [vmem:[%s8506_s10 + $0x268] sm:$0xff]  }
 0x1ab   : > { %6043 = vmatprep.subr.bf16.mxu0 %v6285_v29  ;;  %v6343_v29 = vld [vmem:[%s8506_s10 + $0x228] sm:$0xff]  }
 0x1ae   : > { %6044 = vmatpush3.bf16.msra.mxu0 %v6286_v30  ;;  %v6344_v30 = vld [vmem:[%s8506_s10 + $0x260] sm:$0xff]  }
 0x1af   : > { %6045 = vmatprep.subr.bf16.mxu0 %v6287_v31  ;;  %v6345_v31 = vld [vmem:[%s8506_s10 + $0x220] sm:$0xff]  }
 0x1b2   : > { %6046 = vmatpush3.bf16.msra.mxu0 %v6288_v32  ;;  %v1365_v32 = vld [vmem:[%s8558_s8] sm:$0x3] }
 0x1b3   : > { %6047 = vmatprep.subr.bf16.mxu0 %v6289_v34  ;;  %v6346_v34 = vld [vmem:[%s8506_s10 + $0x258] sm:$0xff]  }
 0x1b6   : > { %6048 = vmatpush3.bf16.msra.mxu0 %v6290_v36  ;;  %v1370_v36 = vrot.slane %v1365_v32, %v7432_v33 }
 0x1b7   : > { %6049 = vmatprep.subr.bf16.mxu0 %v6291_v37  ;;  %v6347_v37 = vld [vmem:[%s8506_s10 + $0x218] sm:$0xff]  }
 0x1ba   : > { %6050 = vmatpush3.bf16.msra.mxu0 %v6292_v38  ;;  %v1374_v38 = vrot.slane %v1365_v32, %v7437_v35 }
 0x1bb   : > { %6051 = vmatprep.subr.bf16.mxu0 %v6293_v39  ;;  %v6348_v39 = vld [vmem:[%s8506_s10 + $0x250] sm:$0xff]  }
 0x1be   : > { %6052 = vmatpush3.bf16.msra.mxu0 %v6294_v40 }
 0x1bf   : > { %6053 = vmatprep.subr.bf16.mxu0 %v6295_v41 }
 0x1c2   : > { %6054 = vmatpush3.bf16.msra.mxu0 %v6296_v42 }
 0x1c3   : > { %6112 = vmatprep.subr.msk.mxu0 %vm2640_vm2, %v1466_v43 }
 0x1c5   : > { %2587 = vmatmul.mubr.bf16.vlgmr.msra.gmra.mxu0 %v6297_v45 }
 0x1c6   : > { %6113 = vmatpush3.msk.msra.mxu0 %vm2640_vm2, %v1466_v43  ;;  %v6349_v43 = vld [vmem:[%s8506_s10 + $0x210] sm:$0xff]  }
 0x1c7   : > { %6114 = vmatprep.subr.mxu0 %v1465_v46 }
 0x1c8   : > { %6115 = vmatpush3.msra.mxu0 %v1465_v46  ;;  %v6350_v46 = vld [vmem:[%s8506_s10 + $0x248] sm:$0xff]  }
 0x1c9   : > { %6116 = vmatprep.subr.mxu0 %v1464_v47 }
 0x1ca   : > { %6117 = vmatpush3.msra.mxu0 %v1464_v47 }
 0x1d5   : > { %v1221_v50 = vpop.permute.xlu1 %1220  ;;  %v1260_v51 = vpop.permute.xlu0 %1259 }
 0x1d6   : > { %1227 = vst.msk [vmem:[#allocation4] sm:$0xff] %vm1226_vm3, %v1221_v50  ;;  %5597 = vmatmul.mubr.msk.f32.vlgmr.msra.gmra.mxu1 %vm1119_vm0, %v1260_v51  ;;  %6118 = vmatprep.mubr.msk.f32.mxu0 %vm1226_vm3, %v1221_v50  ;;  %v6352_v51 = vld [vmem:[%s8506_s10 + $0x240] sm:$0xff]  }
 0x1d7   : > { %5930 = vmatpush3.bf16.msra.mxu1 %v6301_v48  ;;  %1337 = vmatprep.mubr.f32.mxu1 %v6739_v44 }
 0x1d8   : > { %5931 = vmatprep.subr.bf16.mxu1 %v6302_v49  ;;  %v6351_v49 = vld [vmem:[%s8506_s10 + $0x208] sm:$0xff]  }
 0x1d9   : > { %v1223_v54 = vpop.permute.xlu1 %1222 }
 0x1da   : > { %1228 = vst.msk [vmem:[#allocation4 + $0x8] sm:$0xff] %vm1226_vm3, %v1223_v54  ;;  %6119 = vmatmul.mubr.msk.f32.vlgmr.msra.gmra.mxu0 %vm1226_vm3, %v1223_v54  ;;  %v1262_v56 = vpop.permute.xlu0 %1261  ;;  %v6354_v54 = vld [vmem:[%s8557_s23 + $0x20] ss:$52 sps:$4 sm:$0xff]  }
 0x1db   : > { %5932 = vmatpush3.bf16.msra.mxu1 %v6303_v52 }
 0x1dc   : > { %5933 = vmatprep.subr.bf16.mxu1 %v6304_v53  ;;  %5598 = vmatmul.mubr.msk.f32.gmra.mxu1 %vm1119_vm0, %v1262_v56  ;;  %v6353_v53 = vld [vmem:[%s8506_s10 + $0x200] sm:$0xff]   ;;  %v6358_v56 = vld [vmem:[%s8506_s10 + $0x310] sm:$0xff]  }
 0x1dd   : > { %2381 = vmatprep.mubr.bf16.mxu1 %v6318_v55  ;;  %v6357_v55 = vld [vmem:[%s8506_s10 + $0x318] sm:$0xff]  }
 0x1df   : > { %5934 = vmatpush3.bf16.msra.mxu1 %v6305_v57  ;;  %v6359_v57 = vld [vmem:[%s8506_s10 + $0x308] sm:$0xff]  }
 0x1e0   : > { %5935 = vmatprep.subr.bf16.mxu1 %v6306_v58  ;;  %v6360_v58 = vld [vmem:[%s8506_s10 + $0x300] sm:$0xff]  }
 0x1e3   : > { %5936 = vmatpush3.bf16.msra.mxu1 %v6307_v59  ;;  %v2722_v59 = vld [vmem:[%s8507_s11 + $0x8] sm:$0xff] }
 0x1e4   : > { %5937 = vmatprep.subr.bf16.mxu1 %v6308_v60  ;;  %v6361_v60 = vld [vmem:[%s8557_s23 + $0x30] ss:$52 sps:$4 sm:$0xff]  }
 0x1e7   : > { %5938 = vmatpush3.bf16.msra.mxu1 %v6309_v61  ;;  %v2719_v61 = vld [vmem:[%s8559_s30] sm:$0xff] }
 0x1e8   : > { %5939 = vmatprep.subr.bf16.mxu1 %v6310_v62  ;;  %v2721_v62 = vld [vmem:[%s8507_s11] sm:$0xff] }
 0x1eb   : > { %5940 = vmatpush3.bf16.msra.mxu1 %v6311_v63  ;;  %v2823_v63 = vld [vmem:[%s8509_s13 + $0x38] sm:$0xff] }
 0x1ec   : > { %5941 = vmatprep.subr.bf16.mxu1 %v6312_v0  ;;  %6128 = vmatprep.subr.mxu0 %v2823_v63  ;;  %v2822_v0 = vld [vmem:[%s8509_s13 + $0x30] sm:$0xff] }
 0x1ed   : > { %6129 = vmatpush3.msra.mxu0 %v2823_v63 }
 0x1ee   : > { %6130 = vmatprep.subr.mxu0 %v2822_v0 }
 0x1ef   : > { %5942 = vmatpush3.bf16.msra.mxu1 %v6313_v1  ;;  %6131 = vmatpush3.msra.mxu0 %v2822_v0  ;;  %v2821_v1 = vld [vmem:[%s8509_s13 + $0x28] sm:$0xff] }
 0x1f0   : > { %5943 = vmatprep.subr.bf16.mxu1 %v6314_v2  ;;  %6132 = vmatprep.subr.mxu0 %v2821_v1  ;;  %v2820_v2 = vld [vmem:[%s8509_s13 + $0x20] sm:$0xff] }
 0x1f1   : > { %6133 = vmatpush3.msra.mxu0 %v2821_v1 }
 0x1f2   : > { %6134 = vmatprep.subr.mxu0 %v2820_v2 }
 0x1f3   : > { %5944 = vmatpush3.bf16.msra.mxu1 %v6315_v3  ;;  %6135 = vmatpush3.msra.mxu0 %v2820_v2  ;;  %v2819_v3 = vld [vmem:[%s8509_s13 + $0x18] sm:$0xff] }
 0x1f4   : > { %5973 = vmatprep.subr.bf16.mxu1 %v6319_v4  ;;  %6136 = vmatprep.subr.mxu0 %v2819_v3  ;;  %v2818_v4 = vld [vmem:[%s8509_s13 + $0x10] sm:$0xff] }
 0x1f5   : > { %6137 = vmatpush3.msra.mxu0 %v2819_v3 }
 0x1f6   : > { %2382 = vmatmul.mubr.bf16.vlgmr.msra.gmra.mxu1 %v6316_v5  ;;  %v1245_v5 = vld [vmem:[%s8561_s7] sm:$0x3]  ;;  %6138 = vmatprep.subr.mxu0 %v2818_v4 }
 0x1f7   : > { %5974 = vmatpush3.bf16.msra.mxu1 %v6320_v6  ;;  %2463 = vmatprep.mubr.bf16.mxu1 %v6337_v7  ;;  %v2817_v6 = vld [vmem:[%s8509_s13 + $0x8] sm:$0xff]  ;;  %v1250_v7 = vrot.slane %v1245_v5, %v7432_v33 }
 0x1f8   : > { %5975 = vmatprep.subr.bf16.mxu1 %v6321_v8  ;;  %6139 = vmatpush3.msra.mxu0 %v2818_v4  ;;  %v2816_v8 = vld [vmem:[%s8509_s13] sm:$0xff] }
 0x1f9   : > { %6140 = vmatprep.subr.mxu0 %v2817_v6 }
 0x1fa   : > { %6141 = vmatpush3.msra.mxu0 %v2817_v6 }
 0x1fb   : > { %5976 = vmatpush3.bf16.msra.mxu1 %v6322_v9  ;;  %6142 = vmatprep.subr.mxu0 %v2816_v8  ;;  %v1254_v9 = vrot.slane %v1245_v5, %v7437_v35 }
 0x1fc   : > { %5977 = vmatprep.subr.bf16.mxu1 %v6323_v10  ;;  %6143 = vmatpush3.msra.mxu0 %v2816_v8 }
 0x1ff   : > { %5978 = vmatpush3.bf16.msra.mxu1 %v6324_v11  ;;  %v2921_v11 = vld [vmem:[%s8511_s15 + $0x38] sm:$0xff] }
 0x200   : > { %5979 = vmatprep.subr.bf16.mxu1 %v6325_v12  ;;  %v2920_v12 = vld [vmem:[%s8511_s15 + $0x30] sm:$0xff] }
 0x203   : > { %5980 = vmatpush3.bf16.msra.mxu1 %v6326_v13 }
 0x204   : > { %5981 = vmatprep.subr.bf16.mxu1 %v6327_v14  ;;  %v2919_v14 = vld [vmem:[%s8511_s15 + $0x28] sm:$0xff] }
 0x207   : > { %5982 = vmatpush3.bf16.msra.mxu1 %v6328_v15  ;;  %v2918_v15 = vld [vmem:[%s8511_s15 + $0x20] sm:$0xff] }
 0x208   : > { %5983 = vmatprep.subr.bf16.mxu1 %v6329_v16 }
 0x20b   : > { %5984 = vmatpush3.bf16.msra.mxu1 %v6330_v17 }
 0x20c   : > { %5985 = vmatprep.subr.bf16.mxu1 %v6331_v18 }
 0x20f   : > { %5986 = vmatpush3.bf16.msra.mxu1 %v6332_v19 }
 0x210   : > { %5987 = vmatprep.subr.bf16.mxu1 %v6333_v20 }
 0x213   : > { %5988 = vmatpush3.bf16.msra.mxu1 %v6334_v21 }
 0x214   : > { %6017 = vmatprep.subr.bf16.mxu1 %v6338_v22 }
 0x216   : > { %2464 = vmatmul.mubr.bf16.vlgmr.msra.gmra.mxu1 %v6335_v23 }
 0x217   : > { %6018 = vmatpush3.bf16.msra.mxu1 %v6339_v24  ;;  %2545 = vmatprep.mubr.bf16.mxu1 %v6356_v25 }
 0x218   : > { %6019 = vmatprep.subr.bf16.mxu1 %v6340_v26 }
 0x21b   : > { %6020 = vmatpush3.bf16.msra.mxu1 %v6341_v27 }
 0x21c   : > { %6021 = vmatprep.subr.bf16.mxu1 %v6342_v28 }
 0x21f   : > { %6022 = vmatpush3.bf16.msra.mxu1 %v6343_v29 }
 0x220   : > { %6023 = vmatprep.subr.bf16.mxu1 %v6344_v30 }
 0x223   : > { %6024 = vmatpush3.bf16.msra.mxu1 %v6345_v31 }
 0x224   : > { %6025 = vmatprep.subr.bf16.mxu1 %v6346_v34 }
 0x225   : > { %v1449_v40 = vpop.f32.mrf.mxu0 }
 0x226   : > { %v1450_v41 = vadd.f32 %v1449_v40, %v1370_v36 }
 0x227   : > { %6026 = vmatpush3.bf16.msra.mxu1 %v6347_v37  ;;  %v1451_v42 = vpop.f32.mrf.mxu0 }
 0x228   : > { %1460 = vst [vmem:[#allocation9] sm:$0xff] %v1450_v41  ;;  %v1452_v45 = vadd.f32 %v1451_v42, %v1374_v38  ;;  %6027 = vmatprep.subr.bf16.mxu1 %v6348_v39 }
 0x229   : > { %v1455_v47 = vpop.f32.mrf.mxu0 }
 0x22a   : > { %1461 = vst.msk [vmem:[#allocation9 + $0x8] sm:$0xff] %vm1345_vm4, %v1452_v45  ;;  %v1456_v48 = vadd.f32 %v1455_v47, %v1370_v36 }
 0x22b   : > { %6028 = vmatpush3.bf16.msra.mxu1 %v6349_v43  ;;  %v1457_v50 = vpop.f32.mrf.mxu0 }
 0x22c   : > { %6029 = vmatprep.subr.bf16.mxu1 %v6350_v46  ;;  %1462 = vst [vmem:[#allocation9 + $0x10] sm:$0xff] %v1456_v48  ;;  %v1458_v52 = vadd.f32 %v1457_v50, %v1374_v38 }
 0x22e   : > { %1463 = vst.msk [vmem:[#allocation9 + $0x18] sm:$0xff] %vm1345_vm4, %v1458_v52 }
 0x22f   : > { %6030 = vmatpush3.bf16.msra.mxu1 %v6351_v49 }
 0x230   : > { %6031 = vmatprep.subr.bf16.mxu1 %v6352_v51 }
 0x233   : > { %6032 = vmatpush3.bf16.msra.mxu1 %v6353_v53 }
 0x234   : > { %6100 = vmatprep.subr.bf16.mxu1 %v6739_v44 }
 0x236   : > { %2546 = vmatmul.mubr.bf16.vlgmr.msra.gmra.mxu1 %v6354_v54 }
 0x237   : > { %6101 = vmatpush3.bf16.msra.mxu1 %v6357_v55  ;;  %6108 = vmatprep.mubr.msk.bf16.mxu1 %vm6741_vm5, %v6739_v44 }
 0x238   : > { %6102 = vmatprep.subr.bf16.mxu1 %v6739_v44 }
 0x23b   : > { %6103 = vmatpush3.bf16.msra.mxu1 %v6358_v56 }
 0x23c   : > { %6104 = vmatprep.subr.bf16.mxu1 %v6739_v44 }
 0x23f   : > { %6105 = vmatpush3.bf16.msra.mxu1 %v6359_v57 }
 0x240   : > { %6106 = vmatprep.subr.bf16.mxu1 %v6739_v44  ;;  %v2720_v44 = vld [vmem:[%s8560_s29 + $0x8] sm:$0xff] }
 0x243   : > { %6107 = vmatpush3.bf16.msra.mxu1 %v6360_v58 }
 0x244   : > { %6121 = vmatprep.subr.mxu1 %v2722_v59 }
 0x245   : > { %v5967_v20 = vpop.f32.mrf.mxu0 }
 0x246   : > { %6109 = vmatmul.mubr.msk.bf16.vlgmr.msra.gmra.mxu1 %vm1119_vm0, %v6361_v60 }
 0x247   : > { %6122 = vmatpush3.msra.mxu1 %v2722_v59  ;;  %6125 = vmatprep.mubr.msk.f32.mxu1 %vm2723_vm6, %v2719_v61  ;;  %v5968_v22 = vpop.f32.mrf.mxu0 }
 0x248   : > { %6123 = vmatprep.subr.mxu1 %v2721_v62  ;;  %v5969_v41 = vadd.f32 %v5968_v22, %v5967_v20  ;;  %v2916_v20 = vld [vmem:[%s8511_s15 + $0x10] sm:$0xff]  ;;  %v2914_v22 = vld [vmem:[%s8511_s15] sm:$0xff] }
 0x249   : > { %6124 = vmatpush3.msra.mxu1 %v2721_v62  ;;  %v5970_v24 = vpop.f32.mrf.mxu0 }
 0x24a   : > { %6147 = vmatprep.subr.mxu1 %v2921_v11 }
 0x24b   : > { %v5971_v26 = vpop.f32.mrf.mxu0 }
 0x24c   : > { %v5972_v42 = vadd.f32 %v5971_v26, %v5970_v24 }
 0x24e   : > { %6126 = vmatmul.mubr.msk.f32.vlgmr.msra.gmra.mxu1 %vm2723_vm6, %v2720_v44 }
 0x24f   : > { %6148 = vmatpush3.msra.mxu1 %v2921_v11 }
 0x250   : > { %6149 = vmatprep.subr.mxu1 %v2920_v12 }
 0x251   : > { %6150 = vmatpush3.msra.mxu1 %v2920_v12 }
 0x252   : > { %6151 = vmatprep.subr.mxu1 %v2919_v14 }
 0x253   : > { %6152 = vmatpush3.msra.mxu1 %v2919_v14 }
 0x254   : > { %6153 = vmatprep.subr.mxu1 %v2918_v15 }
 0x255   : > { %6154 = vmatpush3.msra.mxu1 %v2918_v15  ;;  %v5720_v15 = vld [vmem:[%s8508_s12] ss:$0 sm:$0xff] }
 0x265   : > { %v6011_v28 = vpop.f32.mrf.mxu0 }
 0x267   : > { %v6012_v30 = vpop.f32.mrf.mxu0 }
 0x268   : > { %v6013_v53 = vadd.f32 %v6012_v30, %v6011_v28  ;;  %v5724_v30 = vld [vmem:[%s8512_s16] ss:$0 sm:$0xff] }
 0x269   : > { %v6014_v32 = vpop.f32.mrf.mxu0 }
 0x26b   : > { %v6015_v36 = vpop.f32.mrf.mxu0 }
 0x26c   : > { %v6016_v54 = vadd.f32 %v6015_v36, %v6014_v32 }
 0x285   : > { %v6055_v39 = vpop.f32.mrf.mxu0 }
 0x287   : > { %v6056_v49 = vpop.f32.mrf.mxu0 }
 0x288   : > { %v6057_v44 = vadd.f32 %v6056_v49, %v6055_v39 }
 0x289   : > { %v6058_v57 = vpop.f32.mrf.mxu0 }
 0x28b   : > { %v6059_v62 = vpop.f32.mrf.mxu0 }
 0x28c   : > { %v6060_v63 = vadd.f32 %v6059_v62, %v6058_v57 }
 0x296   : > { %v1333_v10 = vpop.f32.mrf.mxu1 }
 0x297   : > { %v1334_v13 = vadd.f32 %v1333_v10, %v1250_v7 }
 0x298   : > { %v1335_v33 = vpop.f32.mrf.mxu1 }
 0x299   : > { %1344 = vst [vmem:[#allocation8] sm:$0xff] %v1334_v13  ;;  %v1336_v35 = vadd.f32 %v1335_v33, %v1254_v9 }
 0x29a   : > { %v6120_v6 = vpop.f32.mrf.mxu0 }
 0x29b   : > { %1346 = vst.msk [vmem:[#allocation8 + $0x8] sm:$0xff] %vm1345_vm4, %v1336_v35 }
 0x29c   : > { %v1339_v16 = vpop.f32.mrf.mxu1  ;;  %v2710_v12 = vpop.f32.mrf.mxu0 }
 0x29d   : > { %v1340_v17 = vadd.f32 %v1339_v16, %v1250_v7 }
 0x29e   : > { %v1341_v18 = vpop.f32.mrf.mxu1 }
 0x29f   : > { %1347 = vst [vmem:[#allocation8 + $0x10] sm:$0xff] %v1340_v17  ;;  %v1342_v19 = vadd.f32 %v1341_v18, %v1254_v9 }
 0x2a1   : > { %1348 = vst.msk [vmem:[#allocation8 + $0x18] sm:$0xff] %vm1345_vm4, %v1342_v19  ;;  %v2917_v19 = vld [vmem:[%s8511_s15 + $0x18] sm:$0xff] }
 0x2a2   : > { %6155 = vmatprep.subr.mxu1 %v2917_v19 }
 0x2a3   : > { %6156 = vmatpush3.msra.mxu1 %v2917_v19 }
 0x2a4   : > { %6157 = vmatprep.subr.mxu1 %v2916_v20 }
 0x2a5   : > { %6158 = vmatpush3.msra.mxu1 %v2916_v20 }
 0x2b6   : > { %v5945_v21 = vpop.f32.mrf.mxu1 }
 0x2b8   : > { %v5946_v23 = vpop.f32.mrf.mxu1 }
 0x2b9   : > { %v5947_v43 = vadd.f32 %v5946_v23, %v5945_v21  ;;  %v2915_v21 = vld [vmem:[%s8511_s15 + $0x8] sm:$0xff]  ;;  %v5721_v23 = vld [vmem:[%s8510_s14] ss:$0 sm:$0xff] }
 0x2ba   : > { %v5948_v25 = vpop.f32.mrf.mxu1  ;;  %6159 = vmatprep.subr.mxu1 %v2915_v21 }
 0x2bb   : > { %v2425_v50 = vadd.f32 %v5969_v41, %v5947_v43  ;;  %6160 = vmatpush3.msra.mxu1 %v2915_v21 }
 0x2bc   : > { %v5949_v27 = vpop.f32.mrf.mxu1  ;;  %6161 = vmatprep.subr.mxu1 %v2914_v22 }
 0x2bd   : > { %v5950_v45 = vadd.f32 %v5949_v27, %v5948_v25  ;;  %6162 = vmatpush3.msra.mxu1 %v2914_v22 }
 0x2bf   : > { %v2428_v51 = vadd.f32 %v5972_v42, %v5950_v45 }
 0x2d6   : > { %v5989_v29 = vpop.f32.mrf.mxu1 }
 0x2d8   : > { %v5990_v31 = vpop.f32.mrf.mxu1 }
 0x2d9   : > { %v5991_v47 = vadd.f32 %v5990_v31, %v5989_v29 }
 0x2da   : > { %v5992_v34 = vpop.f32.mrf.mxu1 }
 0x2db   : > { %v2466_v55 = vadd.f32 %v5991_v47, %v2425_v50 }
 0x2dc   : > { %v5993_v37 = vpop.f32.mrf.mxu1 }
 0x2dd   : > { %v5994_v48 = vadd.f32 %v5993_v37, %v5992_v34  ;;  %v2507_v60 = vadd.f32 %v6013_v53, %v2466_v55 }
 0x2df   : > { %v2469_v56 = vadd.f32 %v5994_v48, %v2428_v51 }
 0x2e1   : > { %v2510_v61 = vadd.f32 %v6016_v54, %v2469_v56 }
 0x2f6   : > { %v6033_v38 = vpop.f32.mrf.mxu1 }
 0x2f8   : > { %v6034_v40 = vpop.f32.mrf.mxu1 }
 0x2f9   : > { %v6035_v58 = vadd.f32 %v6034_v40, %v6033_v38 }
 0x2fa   : > { %v6036_v46 = vpop.f32.mrf.mxu1 }
 0x2fb   : > { %v2548_v0 = vadd.f32 %v6035_v58, %v2507_v60 }
 0x2fc   : > { %v6037_v52 = vpop.f32.mrf.mxu1 }
 0x2fd   : > { %v6038_v59 = vadd.f32 %v6037_v52, %v6036_v46  ;;  %v2589_v4 = vadd.f32 %v6057_v44, %v2548_v0 }
 0x2ff   : > { %v2551_v1 = vadd.f32 %v6038_v59, %v2510_v61 }
 0x301   : > { %v2592_v5 = vadd.f32 %v6060_v63, %v2551_v1 }
 0x306   : > { %v2629_v2 = vpop.f32.mrf.mxu1 }
 0x307   : > { %v2630_v8 = vadd.f32 %v2629_v2, %v2589_v4 }
 0x308   : > { %v6110_v3 = vpop.f32.mrf.mxu1 }
 0x309   : > { %v2711_v33 = vadd.f32 %v2710_v12, %v2630_v8 }
 0x30a   : > { %v2632_v7 = vpop.f32.mrf.mxu1 }
 0x30b   : > { %v2633_v9 = vadd.f32 %v2632_v7, %v2592_v5 }
 0x30c   : > { %v6111_v10 = vpop.f32.mrf.mxu1 }
 0x30d   : > { %v2716_v11 = vadd.f32 %v6120_v6, %v2633_v9 }
 0x30e   : > { %v6127_v13 = vpop.f32.mrf.mxu1 }
 0x30f   : > { %v2806_v14 = vadd.f32 %v6127_v13, %v2716_v11 }
 0x310   : > { %v2796_v35 = vpop.f32.mrf.mxu1 }
 0x311   : > { %v2805_v16 = vadd.f32 %v2796_v35, %v2711_v33  ;;  %v2815_v18 = vadd.f32 %v5720_v15, %v2806_v14 }
 0x313   : > { %v2814_v17 = vadd.f32 %v5720_v15, %v2805_v16 }
 0x315   : > { %6144 = vmatprep.mubr.msk.f32.mxu0 %vm1119_vm0, %v2814_v17 }
 0x316   : > { %6145 = vmatmul.mubr.msk.f32.vlgmr.msra.gmra.mxu0 %vm1119_vm0, %v2815_v18 }
 0x3d6   : > { %v6146_v24 = vpop.f32.mrf.mxu0 }
 0x3d7   : > { %v2909_v25 = vadd.f32 %v6146_v24, %v5721_v23 }
 0x3d8   : > { %v2903_v26 = vpop.f32.mrf.mxu0 }
 0x3d9   : > { %v2904_v27 = vadd.f32 %v5721_v23, %v2903_v26  ;;  %v2913_v29 = vmax.f32 %v2909_v25, 0.0 }
 0x3db   : > { %v2912_v28 = vmax.f32 %v2904_v27, 0.0 }
 0x3dd   : > { %6163 = vmatprep.mubr.msk.f32.mxu1 %vm1119_vm0, %v2912_v28 }
 0x3de   : > { %6164 = vmatmul.mubr.msk.f32.vlgmr.msra.gmra.mxu1 %vm1119_vm0, %v2913_v29 }
 0x49e   : > { %v6165_v31 = vpop.f32.mrf.mxu1 }
 0x49f   : > { %v3007_v32 = vadd.f32 %v6165_v31, %v5724_v30 }
 0x4a0   : > { %v3001_v34 = vpop.f32.mrf.mxu1 }
 0x4a1   : > { %3011 = vst.msk [vmem:[#allocation6 + $0x8] sm:$0xff] %vm2723_vm6, %v3007_v32  ;;  %v3002_v36 = vadd.f32 %v5724_v30, %v3001_v34 }
 0x4a3   : > { %3010 = vst.msk [vmem:[#allocation6] sm:$0xff] %vm2723_vm6, %v3002_v36 }
 0x4a4 PF: > { %v6362_v37 = vld [vmem:[%s7265_s1 + $0x3dc] ss:$164 sps:$4 sm:$0xff]   ;;  %v6742_v39 = vmov 0   ;;  %v6365_v40 = vld [vmem:[%s7265_s1 + $0x294] ss:$164 sps:$4 sm:$0xff]   ;;  %vm4228_vm7 = vcmask 523264  }
 0x4a5   : > { %v6364_v38 = vld [vmem:[%s7265_s1 + $0x3d8] ss:$164 sps:$4 sm:$0xff]   ;;  %4264 = vmatprep.mubr.bf16.mxu0 %v6742_v39  ;;  %4307 = vmatprep.mubr.bf16.mxu1 %v6742_v39  ;;  %v6367_v41 = vld [vmem:[%s7265_s1 + $0x290] ss:$164 sps:$4 sm:$0xff]   ;;  %v6370_v43 = vld [vmem:[%s7265_s1 + $0x3e4] ss:$164 sps:$4 sm:$0xff]  }
 0x4a6   : > { %4240 = vmatprep.subr.bf16.mxu0 %v6362_v37  ;;  %v6368_v42 = vld [vmem:[%s7265_s1 + $0x14c] ss:$164 sps:$4 sm:$0xff]   ;;  %v6373_v45 = vld [vmem:[%s7265_s1 + $0x3e0] ss:$164 sps:$4 sm:$0xff]   ;;  %4283 = vmatprep.subr.bf16.mxu1 %v6370_v43  ;;  %v6379_v48 = vld [vmem:[%s7265_s1 + $0x298] ss:$164 sps:$4 sm:$0xff]  }
 0x4a7   : > { %4241 = vmatpush1.bf16.msra.mxu0 %v6364_v38  ;;  %v6372_v46 = vld [vmem:[%s7265_s1 + $0x148] ss:$164 sps:$4 sm:$0xff]   ;;  %4284 = vmatpush1.bf16.msra.mxu1 %v6373_v45  ;;  %v6376_v47 = vld [vmem:[%s7265_s1 + $0x29c] ss:$164 sps:$4 sm:$0xff]   ;;  %v6381_v50 = vld [vmem:[%s7265_s1 + $0x154] ss:$164 sps:$4 sm:$0xff]  }
 0x4a8   : > { %4242 = vmatprep.subr.bf16.mxu0 %v6365_v40  ;;  %v6374_v49 = vld [vmem:[%s7265_s1 + $0x4] ss:$164 sps:$4 sm:$0xff]   ;;  %4285 = vmatprep.subr.bf16.mxu1 %v6376_v47  ;;  %v6385_v52 = vld [vmem:[%s7265_s1 + $0x3ec] ss:$164 sps:$4 sm:$0xff]   ;;  %v7910_v55 = vld [vmem:[#allocation2] sm:$0xff]   ;;  %vm6744_vm8 = vmmov 0  }
 0x4a9   : > { %v6378_v51 = vld [vmem:[%s7265_s1] ss:$164 sps:$4 sm:$0xff]   ;;  %v6386_v53 = vld [vmem:[%s7265_s1 + $0x150] ss:$164 sps:$4 sm:$0xff]   ;;  %v6383_v56 = vld [vmem:[%s7265_s1 + $0x3e8] ss:$164 sps:$4 sm:$0xff]  }
 0x4aa   : > { %v6387_v54 = vld [vmem:[%s7265_s1 + $0xc] ss:$164 sps:$4 sm:$0xff]   ;;  %v6391_v58 = vld [vmem:[%s7265_s1 + $0x2a4] ss:$164 sps:$4 sm:$0xff]   ;;  %v6398_v59 = vld [vmem:[%s7265_s1 + $0x3f4] ss:$164 sps:$4 sm:$0xff]  }
 0x4ab   : > { %4243 = vmatpush1.bf16.msra.mxu0 %v6367_v41  ;;  %4286 = vmatpush1.bf16.msra.mxu1 %v6379_v48  ;;  %v6392_v57 = vld [vmem:[%s7265_s1 + $0x8] ss:$164 sps:$4 sm:$0xff]   ;;  %v6389_v60 = vld [vmem:[%s7265_s1 + $0x2a0] ss:$164 sps:$4 sm:$0xff]   ;;  %v6396_v61 = vld [vmem:[%s7265_s1 + $0x3f0] ss:$164 sps:$4 sm:$0xff]  }
 0x4ac   : > { %4244 = vmatprep.subr.bf16.mxu0 %v6368_v42  ;;  %4287 = vmatprep.subr.bf16.mxu1 %v6381_v50  ;;  %v6395_v62 = vld [vmem:[%s7265_s1 + $0x15c] ss:$164 sps:$4 sm:$0xff]   ;;  %v6404_v44 = vld [vmem:[%s7265_s1 + $0x2ac] ss:$164 sps:$4 sm:$0xff]   ;;  %v6401_v1 = vld [vmem:[%s7265_s1 + $0x14] ss:$164 sps:$4 sm:$0xff]  }
 0x4ad   : > { %v6393_v63 = vld [vmem:[%s7265_s1 + $0x158] ss:$164 sps:$4 sm:$0xff]   ;;  %v6402_v0 = vld [vmem:[%s7265_s1 + $0x2a8] ss:$164 sps:$4 sm:$0xff]   ;;  %v6399_v3 = vld [vmem:[%s7265_s1 + $0x10] ss:$164 sps:$4 sm:$0xff]  }
 0x4ae   : > { %v6407_v2 = vld [vmem:[%s7265_s1 + $0x164] ss:$164 sps:$4 sm:$0xff]   ;;  %v6410_v5 = vld [vmem:[%s7265_s1 + $0x3fc] ss:$164 sps:$4 sm:$0xff]   ;;  %v6416_v9 = vld [vmem:[%s7265_s1 + $0x2b4] ss:$164 sps:$4 sm:$0xff]  }
 0x4af   : > { %4245 = vmatpush1.bf16.msra.mxu0 %v6372_v46  ;;  %4288 = vmatpush1.bf16.msra.mxu1 %v6386_v53  ;;  %v6405_v4 = vld [vmem:[%s7265_s1 + $0x160] ss:$164 sps:$4 sm:$0xff]   ;;  %v6408_v7 = vld [vmem:[%s7265_s1 + $0x3f8] ss:$164 sps:$4 sm:$0xff]   ;;  %v6414_v11 = vld [vmem:[%s7265_s1 + $0x2b0] ss:$164 sps:$4 sm:$0xff]  }
 0x4b0   : > { %4246 = vmatprep.subr.bf16.mxu0 %v6374_v49  ;;  %4289 = vmatprep.subr.bf16.mxu1 %v6387_v54  ;;  %v6413_v6 = vld [vmem:[%s7265_s1 + $0x1c] ss:$164 sps:$4 sm:$0xff]   ;;  %v6422_v10 = vld [vmem:[%s7265_s1 + $0x404] ss:$164 sps:$4 sm:$0xff]   ;;  %v6419_v13 = vld [vmem:[%s7265_s1 + $0x16c] ss:$164 sps:$4 sm:$0xff]  }
 0x4b1   : > { %v6411_v8 = vld [vmem:[%s7265_s1 + $0x18] ss:$164 sps:$4 sm:$0xff]   ;;  %v6420_v12 = vld [vmem:[%s7265_s1 + $0x400] ss:$164 sps:$4 sm:$0xff]   ;;  %v6417_v14 = vld [vmem:[%s7265_s1 + $0x168] ss:$164 sps:$4 sm:$0xff]  }
 0x4b2   : > { %v6428_v33 = vld [vmem:[%s7265_s1 + $0x2bc] ss:$164 sps:$4 sm:$0xff]   ;;  %v6425_v15 = vld [vmem:[%s7265_s1 + $0x24] ss:$164 sps:$4 sm:$0xff]   ;;  %v6431_v16 = vld [vmem:[%s7265_s1 + $0x174] ss:$164 sps:$4 sm:$0xff]  }
 0x4b3   : > { %4247 = vmatpush1.bf16.msra.mxu0 %v6378_v51  ;;  %4290 = vmatpush1.bf16.msra.mxu1 %v6392_v57  ;;  %v6426_v35 = vld [vmem:[%s7265_s1 + $0x2b8] ss:$164 sps:$4 sm:$0xff]   ;;  %v6423_v17 = vld [vmem:[%s7265_s1 + $0x20] ss:$164 sps:$4 sm:$0xff]   ;;  %v6429_v18 = vld [vmem:[%s7265_s1 + $0x170] ss:$164 sps:$4 sm:$0xff]  }
 0x4b4   : > { %4326 = vmatprep.subr.bf16.mxu0 %v6385_v52  ;;  %4369 = vmatprep.subr.bf16.mxu1 %v6398_v59  ;;  %v6434_v19 = vld [vmem:[%s7265_s1 + $0x40c] ss:$164 sps:$4 sm:$0xff]   ;;  %v6440_v23 = vld [vmem:[%s7265_s1 + $0x2c4] ss:$164 sps:$4 sm:$0xff]   ;;  %v6446_v24 = vld [vmem:[%s7265_s1 + $0x414] ss:$164 sps:$4 sm:$0xff]  }
 0x4b5   : > { %v6437_v20 = vld [vmem:[%s7265_s1 + $0x2c] ss:$164 sps:$4 sm:$0xff]   ;;  %v6438_v25 = vld [vmem:[%s7265_s1 + $0x2c0] ss:$164 sps:$4 sm:$0xff]   ;;  %v6441_v29 = vld [vmem:[%s7265_s1 + $0x178] ss:$164 sps:$4 sm:$0xff]  }
 0x4b6   : > { %5893 = vmatmul.mubr.msk.bf16.vlgmr.msra.gmra.mxu0 %vm4228_vm7, %v7910_v55  ;;  %5894 = vmatmul.mubr.msk.bf16.vlgmr.msra.gmra.mxu1 %vm4228_vm7, %v7910_v55  ;;  %v6432_v21 = vld [vmem:[%s7265_s1 + $0x408] ss:$164 sps:$4 sm:$0xff]   ;;  %v6444_v26 = vld [vmem:[%s7265_s1 + $0x410] ss:$164 sps:$4 sm:$0xff]   ;;  %v6443_v27 = vld [vmem:[%s7265_s1 + $0x17c] ss:$164 sps:$4 sm:$0xff]  }
 0x4b7   : > { %4327 = vmatpush1.bf16.msra.mxu0 %v6383_v56  ;;  %4350 = vmatprep.mubr.bf16.mxu0 %v6742_v39  ;;  %v6435_v22 = vld [vmem:[%s7265_s1 + $0x28] ss:$164 sps:$4 sm:$0xff]   ;;  %v6449_v31 = vld [vmem:[%s7265_s1 + $0x34] ss:$164 sps:$4 sm:$0xff]   ;;  %v6453_v36 = vld [vmem:[%s7265_s1 + $0x180] ss:$164 sps:$4 sm:$0xff]  }
 0x4b8   : > { %4328 = vmatprep.subr.bf16.mxu0 %v6391_v58  ;;  %4370 = vmatpush1.bf16.msra.mxu1 %v6396_v61  ;;  %v6452_v28 = vld [vmem:[%s7265_s1 + $0x2cc] ss:$164 sps:$4 sm:$0xff]   ;;  %v6455_v32 = vld [vmem:[%s7265_s1 + $0x184] ss:$164 sps:$4 sm:$0xff]   ;;  %v6458_v37 = vld [vmem:[%s7265_s1 + $0x41c] ss:$164 sps:$4 sm:$0xff]  }
 0x4b9   : > { %4371 = vmatprep.subr.bf16.mxu1 %v6404_v44  ;;  %4393 = vmatprep.mubr.bf16.mxu1 %v6742_v39  ;;  %v6450_v30 = vld [vmem:[%s7265_s1 + $0x2c8] ss:$164 sps:$4 sm:$0xff]   ;;  %v6447_v34 = vld [vmem:[%s7265_s1 + $0x30] ss:$164 sps:$4 sm:$0xff]   ;;  %v6461_v38 = vld [vmem:[%s7265_s1 + $0x3c] ss:$164 sps:$4 sm:$0xff]  }
 0x4ba   : > { %v6456_v40 = vld [vmem:[%s7265_s1 + $0x418] ss:$164 sps:$4 sm:$0xff]   ;;  %v6470_v43 = vld [vmem:[%s7265_s1 + $0x424] ss:$164 sps:$4 sm:$0xff]   ;;  %v6462_v45 = vld [vmem:[%s7265_s1 + $0x2d0] ss:$164 sps:$4 sm:$0xff]  }
 0x4bb   : > { %4329 = vmatpush1.bf16.msra.mxu0 %v6389_v60  ;;  %v6459_v41 = vld [vmem:[%s7265_s1 + $0x38] ss:$164 sps:$4 sm:$0xff]   ;;  %v6468_v46 = vld [vmem:[%s7265_s1 + $0x420] ss:$164 sps:$4 sm:$0xff]   ;;  %v6467_v47 = vld [vmem:[%s7265_s1 + $0x18c] ss:$164 sps:$4 sm:$0xff]  }
 0x4bc   : > { %4330 = vmatprep.subr.bf16.mxu0 %v6395_v62  ;;  %4372 = vmatpush1.bf16.msra.mxu1 %v6402_v0  ;;  %v6464_v42 = vld [vmem:[%s7265_s1 + $0x2d4] ss:$164 sps:$4 sm:$0xff]   ;;  %v6476_v48 = vld [vmem:[%s7265_s1 + $0x2dc] ss:$164 sps:$4 sm:$0xff]   ;;  %v6465_v49 = vld [vmem:[%s7265_s1 + $0x188] ss:$164 sps:$4 sm:$0xff]  }
 0x4bd   : > { %4373 = vmatprep.subr.bf16.mxu1 %v6407_v2  ;;  %v6474_v50 = vld [vmem:[%s7265_s1 + $0x2d8] ss:$164 sps:$4 sm:$0xff]   ;;  %v6473_v51 = vld [vmem:[%s7265_s1 + $0x44] ss:$164 sps:$4 sm:$0xff]   ;;  %v6477_v54 = vld [vmem:[%s7265_s1 + $0x190] ss:$164 sps:$4 sm:$0xff]  }
 0x4be   : > { %v6479_v52 = vld [vmem:[%s7265_s1 + $0x194] ss:$164 sps:$4 sm:$0xff]   ;;  %v6471_v53 = vld [vmem:[%s7265_s1 + $0x40] ss:$164 sps:$4 sm:$0xff]   ;;  %v6482_v56 = vld [vmem:[%s7265_s1 + $0x42c] ss:$164 sps:$4 sm:$0xff]  }
 0x4bf   : > { %4331 = vmatpush1.bf16.msra.mxu0 %v6393_v63  ;;  %v6485_v57 = vld [vmem:[%s7265_s1 + $0x4c] ss:$164 sps:$4 sm:$0xff]   ;;  %v6488_v60 = vld [vmem:[%s7265_s1 + $0x2e4] ss:$164 sps:$4 sm:$0xff]   ;;  %v6494_v61 = vld [vmem:[%s7265_s1 + $0x434] ss:$164 sps:$4 sm:$0xff]  }
 0x4c0   : > { %4332 = vmatprep.subr.bf16.mxu0 %v6401_v1  ;;  %4374 = vmatpush1.bf16.msra.mxu1 %v6405_v4  ;;  %v6480_v58 = vld [vmem:[%s7265_s1 + $0x428] ss:$164 sps:$4 sm:$0xff]   ;;  %v6486_v62 = vld [vmem:[%s7265_s1 + $0x2e0] ss:$164 sps:$4 sm:$0xff]   ;;  %v6492_v44 = vld [vmem:[%s7265_s1 + $0x430] ss:$164 sps:$4 sm:$0xff]  }
 0x4c1   : > { %4375 = vmatprep.subr.bf16.mxu1 %v6413_v6  ;;  %v6483_v59 = vld [vmem:[%s7265_s1 + $0x48] ss:$164 sps:$4 sm:$0xff]   ;;  %v6491_v63 = vld [vmem:[%s7265_s1 + $0x19c] ss:$164 sps:$4 sm:$0xff]   ;;  %s6746_s8 = smov [#allocation4]  }
 0x4c2   : > { %v6500_v0 = vld [vmem:[%s7265_s1 + $0x2ec] ss:$164 sps:$4 sm:$0xff]   ;;  %v6489_v1 = vld [vmem:[%s7265_s1 + $0x198] ss:$164 sps:$4 sm:$0xff]   ;;  %v6503_v4 = vld [vmem:[%s7265_s1 + $0x1a4] ss:$164 sps:$4 sm:$0xff]  }
 0x4c3   : > { %4333 = vmatpush1.bf16.msra.mxu0 %v6399_v3  ;;  %v6498_v2 = vld [vmem:[%s7265_s1 + $0x2e8] ss:$164 sps:$4 sm:$0xff]   ;;  %v6497_v3 = vld [vmem:[%s7265_s1 + $0x54] ss:$164 sps:$4 sm:$0xff]   ;;  %v6501_v6 = vld [vmem:[%s7265_s1 + $0x1a0] ss:$164 sps:$4 sm:$0xff]  }
 0x4c4   : > { %4412 = vmatprep.subr.bf16.mxu0 %v6410_v5  ;;  %4376 = vmatpush1.bf16.msra.mxu1 %v6411_v8  ;;  %v6495_v5 = vld [vmem:[%s7265_s1 + $0x50] ss:$164 sps:$4 sm:$0xff]   ;;  %v6509_v8 = vld [vmem:[%s7265_s1 + $0x5c] ss:$164 sps:$4 sm:$0xff]   ;;  %s5225_s4 = sshll.u32 %s6746_s8, 4  ;;  %s5226_s4 = int_to_ptr.vmem [resolvable:$true] %s5225_s4 }
 0x4c5   : > { %4455 = vmatprep.subr.bf16.mxu1 %v6422_v10  ;;  %v6507_v10 = vld [vmem:[%s7265_s1 + $0x58] ss:$164 sps:$4 sm:$0xff]  }
 0x4c6   : > { %5895 = vmatmul.mubr.msk.bf16.vlgmr.msra.gmra.mxu0 %vm4228_vm7, %v7910_v55 }
 0x4c7   : > { %4413 = vmatpush1.bf16.msra.mxu0 %v6408_v7  ;;  %4436 = vmatprep.mubr.bf16.mxu0 %v6742_v39  ;;  %v6506_v7 = vld [vmem:[%s7265_s1 + $0x43c] ss:$164 sps:$4 sm:$0xff]  }
 0x4c8   : > { %4414 = vmatprep.subr.bf16.mxu0 %v6416_v9  ;;  %5896 = vmatmul.mubr.msk.bf16.vlgmr.msra.gmra.mxu1 %vm4228_vm7, %v7910_v55  ;;  %v6504_v9 = vld [vmem:[%s7265_s1 + $0x438] ss:$164 sps:$4 sm:$0xff]  }
 0x4c9   : > { %4456 = vmatpush1.bf16.msra.mxu1 %v6420_v12  ;;  %4479 = vmatprep.mubr.bf16.mxu1 %v6742_v39  ;;  %v6518_v12 = vld [vmem:[%s7265_s1 + $0x444] ss:$164 sps:$4 sm:$0xff]  }
 0x4ca   : > { %4457 = vmatprep.subr.bf16.mxu1 %v6428_v33  ;;  %v6516_v33 = vld [vmem:[%s7265_s1 + $0x440] ss:$164 sps:$4 sm:$0xff]  }
 0x4cb   : > { %4415 = vmatpush1.bf16.msra.mxu0 %v6414_v11  ;;  %v6512_v11 = vld [vmem:[%s7265_s1 + $0x2f4] ss:$164 sps:$4 sm:$0xff]  }
 0x4cc   : > { %4416 = vmatprep.subr.bf16.mxu0 %v6419_v13  ;;  %v6510_v13 = vld [vmem:[%s7265_s1 + $0x2f0] ss:$164 sps:$4 sm:$0xff]  }
 0x4cd   : > { %4458 = vmatpush1.bf16.msra.mxu1 %v6426_v35  ;;  %v6524_v35 = vld [vmem:[%s7265_s1 + $0x2fc] ss:$164 sps:$4 sm:$0xff]  }
 0x4ce   : > { %4459 = vmatprep.subr.bf16.mxu1 %v6431_v16  ;;  %v6522_v16 = vld [vmem:[%s7265_s1 + $0x2f8] ss:$164 sps:$4 sm:$0xff]  }
 0x4cf   : > { %4417 = vmatpush1.bf16.msra.mxu0 %v6417_v14  ;;  %v6515_v14 = vld [vmem:[%s7265_s1 + $0x1ac] ss:$164 sps:$4 sm:$0xff]  }
 0x4d0   : > { %4418 = vmatprep.subr.bf16.mxu0 %v6425_v15  ;;  %v6513_v15 = vld [vmem:[%s7265_s1 + $0x1a8] ss:$164 sps:$4 sm:$0xff]  }
 0x4d1   : > { %4460 = vmatpush1.bf16.msra.mxu1 %v6429_v18  ;;  %v6527_v18 = vld [vmem:[%s7265_s1 + $0x1b4] ss:$164 sps:$4 sm:$0xff]  }
 0x4d2   : > { %4461 = vmatprep.subr.bf16.mxu1 %v6437_v20  ;;  %v6525_v20 = vld [vmem:[%s7265_s1 + $0x1b0] ss:$164 sps:$4 sm:$0xff]  }
 0x4d3   : > { %4419 = vmatpush1.bf16.msra.mxu0 %v6423_v17  ;;  %v6521_v17 = vld [vmem:[%s7265_s1 + $0x64] ss:$164 sps:$4 sm:$0xff]  }
 0x4d4   : > { %4498 = vmatprep.subr.bf16.mxu0 %v6434_v19  ;;  %v6519_v19 = vld [vmem:[%s7265_s1 + $0x60] ss:$164 sps:$4 sm:$0xff]  }
 0x4d5   : > { %4462 = vmatpush1.bf16.msra.mxu1 %v6435_v22  ;;  %v6533_v22 = vld [vmem:[%s7265_s1 + $0x6c] ss:$164 sps:$4 sm:$0xff]  }
 0x4d6   : > { %5897 = vmatmul.mubr.msk.bf16.vlgmr.msra.gmra.mxu0 %vm4228_vm7, %v7910_v55  ;;  %4541 = vmatprep.subr.bf16.mxu1 %v6446_v24  ;;  %v6531_v24 = vld [vmem:[%s7265_s1 + $0x68] ss:$164 sps:$4 sm:$0xff]  }
 0x4d7   : > { %4499 = vmatpush1.bf16.msra.mxu0 %v6432_v21  ;;  %4522 = vmatprep.mubr.bf16.mxu0 %v6742_v39  ;;  %v6530_v21 = vld [vmem:[%s7265_s1 + $0x44c] ss:$164 sps:$4 sm:$0xff]  }
 0x4d8   : > { %4500 = vmatprep.subr.bf16.mxu0 %v6440_v23  ;;  %5898 = vmatmul.mubr.msk.bf16.vlgmr.msra.gmra.mxu1 %vm4228_vm7, %v7910_v55  ;;  %v6528_v23 = vld [vmem:[%s7265_s1 + $0x448] ss:$164 sps:$4 sm:$0xff]  }
 0x4d9   : > { %4542 = vmatpush1.bf16.msra.mxu1 %v6444_v26  ;;  %4565 = vmatprep.mubr.bf16.mxu1 %v6742_v39  ;;  %v6542_v26 = vld [vmem:[%s7265_s1 + $0x454] ss:$164 sps:$4 sm:$0xff]  }
 0x4da   : > { %4543 = vmatprep.subr.bf16.mxu1 %v6452_v28  ;;  %v6540_v28 = vld [vmem:[%s7265_s1 + $0x450] ss:$164 sps:$4 sm:$0xff]  }
 0x4db   : > { %4501 = vmatpush1.bf16.msra.mxu0 %v6438_v25  ;;  %v6536_v25 = vld [vmem:[%s7265_s1 + $0x304] ss:$164 sps:$4 sm:$0xff]  }
 0x4dc   : > { %4502 = vmatprep.subr.bf16.mxu0 %v6443_v27  ;;  %v6534_v27 = vld [vmem:[%s7265_s1 + $0x300] ss:$164 sps:$4 sm:$0xff]  }
 0x4dd   : > { %4544 = vmatpush1.bf16.msra.mxu1 %v6450_v30  ;;  %v6548_v30 = vld [vmem:[%s7265_s1 + $0x30c] ss:$164 sps:$4 sm:$0xff]  }
 0x4de   : > { %4545 = vmatprep.subr.bf16.mxu1 %v6455_v32  ;;  %v6546_v32 = vld [vmem:[%s7265_s1 + $0x308] ss:$164 sps:$4 sm:$0xff]  }
 0x4df   : > { %4503 = vmatpush1.bf16.msra.mxu0 %v6441_v29  ;;  %v6539_v29 = vld [vmem:[%s7265_s1 + $0x1bc] ss:$164 sps:$4 sm:$0xff]  }
 0x4e0   : > { %4504 = vmatprep.subr.bf16.mxu0 %v6449_v31  ;;  %v6537_v31 = vld [vmem:[%s7265_s1 + $0x1b8] ss:$164 sps:$4 sm:$0xff]  }
 0x4e1   : > { %4546 = vmatpush1.bf16.msra.mxu1 %v6453_v36  ;;  %v6551_v36 = vld [vmem:[%s7265_s1 + $0x1c4] ss:$164 sps:$4 sm:$0xff]  }
 0x4e2   : > { %4547 = vmatprep.subr.bf16.mxu1 %v6461_v38  ;;  %v6549_v38 = vld [vmem:[%s7265_s1 + $0x1c0] ss:$164 sps:$4 sm:$0xff]  }
 0x4e3   : > { %4505 = vmatpush1.bf16.msra.mxu0 %v6447_v34  ;;  %v6545_v34 = vld [vmem:[%s7265_s1 + $0x74] ss:$164 sps:$4 sm:$0xff]  }
 0x4e4   : > { %4584 = vmatprep.subr.bf16.mxu0 %v6458_v37  ;;  %v6543_v37 = vld [vmem:[%s7265_s1 + $0x70] ss:$164 sps:$4 sm:$0xff]  }
 0x4e5   : > { %4548 = vmatpush1.bf16.msra.mxu1 %v6459_v41  ;;  %v6557_v41 = vld [vmem:[%s7265_s1 + $0x7c] ss:$164 sps:$4 sm:$0xff]  }
 0x4e6   : > { %5899 = vmatmul.mubr.msk.bf16.vlgmr.msra.gmra.mxu0 %vm4228_vm7, %v7910_v55  ;;  %4627 = vmatprep.subr.bf16.mxu1 %v6470_v43  ;;  %v6555_v43 = vld [vmem:[%s7265_s1 + $0x78] ss:$164 sps:$4 sm:$0xff]  }
 0x4e7   : > { %4585 = vmatpush1.bf16.msra.mxu0 %v6456_v40  ;;  %4608 = vmatprep.mubr.bf16.mxu0 %v6742_v39  ;;  %v6554_v40 = vld [vmem:[%s7265_s1 + $0x45c] ss:$164 sps:$4 sm:$0xff]  }
 0x4e8   : > { %4586 = vmatprep.subr.bf16.mxu0 %v6464_v42  ;;  %5900 = vmatmul.mubr.msk.bf16.vlgmr.msra.gmra.mxu1 %vm4228_vm7, %v7910_v55  ;;  %v6552_v42 = vld [vmem:[%s7265_s1 + $0x458] ss:$164 sps:$4 sm:$0xff]  }
 0x4e9   : > { %4628 = vmatpush1.bf16.msra.mxu1 %v6468_v46  ;;  %4651 = vmatprep.mubr.bf16.mxu1 %v6742_v39  ;;  %v6566_v46 = vld [vmem:[%s7265_s1 + $0x464] ss:$164 sps:$4 sm:$0xff]  }
 0x4ea   : > { %4629 = vmatprep.subr.bf16.mxu1 %v6476_v48  ;;  %v6564_v48 = vld [vmem:[%s7265_s1 + $0x460] ss:$164 sps:$4 sm:$0xff]  }
 0x4eb   : > { %4587 = vmatpush1.bf16.msra.mxu0 %v6462_v45  ;;  %v6560_v45 = vld [vmem:[%s7265_s1 + $0x314] ss:$164 sps:$4 sm:$0xff]  }
 0x4ec   : > { %4588 = vmatprep.subr.bf16.mxu0 %v6467_v47  ;;  %v6558_v47 = vld [vmem:[%s7265_s1 + $0x310] ss:$164 sps:$4 sm:$0xff]  }
 0x4ed   : > { %4630 = vmatpush1.bf16.msra.mxu1 %v6474_v50  ;;  %v6572_v50 = vld [vmem:[%s7265_s1 + $0x31c] ss:$164 sps:$4 sm:$0xff]  }
 0x4ee   : > { %4631 = vmatprep.subr.bf16.mxu1 %v6479_v52  ;;  %v6570_v52 = vld [vmem:[%s7265_s1 + $0x318] ss:$164 sps:$4 sm:$0xff]  }
 0x4ef   : > { %4589 = vmatpush1.bf16.msra.mxu0 %v6465_v49  ;;  %v6563_v49 = vld [vmem:[%s7265_s1 + $0x1cc] ss:$164 sps:$4 sm:$0xff]  }
 0x4f0   : > { %4590 = vmatprep.subr.bf16.mxu0 %v6473_v51  ;;  %v6561_v51 = vld [vmem:[%s7265_s1 + $0x1c8] ss:$164 sps:$4 sm:$0xff]  }
 0x4f1   : > { %4632 = vmatpush1.bf16.msra.mxu1 %v6477_v54  ;;  %v6575_v54 = vld [vmem:[%s7265_s1 + $0x1d4] ss:$164 sps:$4 sm:$0xff]  }
 0x4f2   : > { %4633 = vmatprep.subr.bf16.mxu1 %v6485_v57  ;;  %v6573_v57 = vld [vmem:[%s7265_s1 + $0x1d0] ss:$164 sps:$4 sm:$0xff]  }
 0x4f3   : > { %4591 = vmatpush1.bf16.msra.mxu0 %v6471_v53  ;;  %v6569_v53 = vld [vmem:[%s7265_s1 + $0x84] ss:$164 sps:$4 sm:$0xff]  }
 0x4f4   : > { %4670 = vmatprep.subr.bf16.mxu0 %v6482_v56  ;;  %v6567_v56 = vld [vmem:[%s7265_s1 + $0x80] ss:$164 sps:$4 sm:$0xff]  }
 0x4f5   : > { %4634 = vmatpush1.bf16.msra.mxu1 %v6483_v59  ;;  %v6581_v59 = vld [vmem:[%s7265_s1 + $0x8c] ss:$164 sps:$4 sm:$0xff]  }
 0x4f6   : > { %5901 = vmatmul.mubr.msk.bf16.vlgmr.msra.gmra.mxu0 %vm4228_vm7, %v7910_v55  ;;  %4713 = vmatprep.subr.bf16.mxu1 %v6494_v61  ;;  %v6579_v61 = vld [vmem:[%s7265_s1 + $0x88] ss:$164 sps:$4 sm:$0xff]  }
 0x4f7   : > { %4671 = vmatpush1.bf16.msra.mxu0 %v6480_v58  ;;  %4694 = vmatprep.mubr.bf16.mxu0 %v6742_v39  ;;  %v6578_v58 = vld [vmem:[%s7265_s1 + $0x46c] ss:$164 sps:$4 sm:$0xff]  }
 0x4f8   : > { %4672 = vmatprep.subr.bf16.mxu0 %v6488_v60  ;;  %5902 = vmatmul.mubr.msk.bf16.vlgmr.msra.gmra.mxu1 %vm4228_vm7, %v7910_v55  ;;  %v6576_v60 = vld [vmem:[%s7265_s1 + $0x468] ss:$164 sps:$4 sm:$0xff]  }
 0x4f9   : > { %4714 = vmatpush1.bf16.msra.mxu1 %v6492_v44  ;;  %4737 = vmatprep.mubr.bf16.mxu1 %v6742_v39  ;;  %v6590_v44 = vld [vmem:[%s7265_s1 + $0x474] ss:$164 sps:$4 sm:$0xff]  }
 0x4fa   : > { %4715 = vmatprep.subr.bf16.mxu1 %v6500_v0  ;;  %v6588_v0 = vld [vmem:[%s7265_s1 + $0x470] ss:$164 sps:$4 sm:$0xff]  }
 0x4fb   : > { %4673 = vmatpush1.bf16.msra.mxu0 %v6486_v62  ;;  %v6584_v62 = vld [vmem:[%s7265_s1 + $0x324] ss:$164 sps:$4 sm:$0xff]  }
 0x4fc   : > { %4674 = vmatprep.subr.bf16.mxu0 %v6491_v63  ;;  %v6582_v63 = vld [vmem:[%s7265_s1 + $0x320] ss:$164 sps:$4 sm:$0xff]  }
 0x4fd   : > { %4716 = vmatpush1.bf16.msra.mxu1 %v6498_v2  ;;  %v6596_v2 = vld [vmem:[%s7265_s1 + $0x32c] ss:$164 sps:$4 sm:$0xff]  }
 0x4fe   : > { %4717 = vmatprep.subr.bf16.mxu1 %v6503_v4  ;;  %v6594_v4 = vld [vmem:[%s7265_s1 + $0x328] ss:$164 sps:$4 sm:$0xff]  }
 0x4ff   : > { %4675 = vmatpush1.bf16.msra.mxu0 %v6489_v1  ;;  %v6587_v1 = vld [vmem:[%s7265_s1 + $0x1dc] ss:$164 sps:$4 sm:$0xff]  }
 0x500   : > { %4676 = vmatprep.subr.bf16.mxu0 %v6497_v3  ;;  %v6585_v3 = vld [vmem:[%s7265_s1 + $0x1d8] ss:$164 sps:$4 sm:$0xff]  }
 0x501   : > { %4718 = vmatpush1.bf16.msra.mxu1 %v6501_v6  ;;  %v6599_v6 = vld [vmem:[%s7265_s1 + $0x1e4] ss:$164 sps:$4 sm:$0xff]  }
 0x502   : > { %4719 = vmatprep.subr.bf16.mxu1 %v6509_v8  ;;  %v6597_v8 = vld [vmem:[%s7265_s1 + $0x1e0] ss:$164 sps:$4 sm:$0xff]  }
 0x503   : > { %4677 = vmatpush1.bf16.msra.mxu0 %v6495_v5  ;;  %v6593_v5 = vld [vmem:[%s7265_s1 + $0x94] ss:$164 sps:$4 sm:$0xff]  }
 0x504   : > { %4756 = vmatprep.subr.bf16.mxu0 %v6506_v7  ;;  %v6591_v7 = vld [vmem:[%s7265_s1 + $0x90] ss:$164 sps:$4 sm:$0xff]  }
 0x505   : > { %4720 = vmatpush1.bf16.msra.mxu1 %v6507_v10  ;;  %v6600_v10 = vld [vmem:[%s7265_s1 + $0x478] ss:$164 sps:$4 sm:$0xff]  }
 0x506   : > { %5903 = vmatmul.mubr.msk.bf16.vlgmr.msra.gmra.mxu0 %vm4228_vm7, %v7910_v55  ;;  %4799 = vmatprep.subr.bf16.mxu1 %v6518_v12  ;;  %v6743_v12 = vmov 0.0  }
 0x507   : > { %4757 = vmatpush1.bf16.msra.mxu0 %v6504_v9  ;;  %4780 = vmatprep.mubr.bf16.mxu0 %v6742_v39  ;;  %v6603_v9 = vld [vmem:[%s7265_s1 + $0x9c] ss:$164 sps:$4 sm:$0xff]  }
 0x508   : > { %4758 = vmatprep.subr.bf16.mxu0 %v6512_v11  ;;  %5904 = vmatmul.mubr.msk.bf16.vlgmr.msra.gmra.mxu1 %vm4228_vm7, %v7910_v55  ;;  %v6601_v11 = vld [vmem:[%s7265_s1 + $0x98] ss:$164 sps:$4 sm:$0xff]  }
 0x509   : > { %4800 = vmatpush1.bf16.msra.mxu1 %v6516_v33  ;;  %4823 = vmatprep.mubr.bf16.mxu1 %v6742_v39  ;;  %v6606_v33 = vld [vmem:[%s7265_s1 + $0xa0] ss:$164 sps:$4 sm:$0xff]  }
 0x50a   : > { %4801 = vmatprep.subr.bf16.mxu1 %v6524_v35 }
 0x50b   : > { %4759 = vmatpush1.bf16.msra.mxu0 %v6510_v13  ;;  %v6605_v13 = vld [vmem:[%s7265_s1 + $0x1e8] ss:$164 sps:$4 sm:$0xff]  }
 0x50c   : > { %4760 = vmatprep.subr.bf16.mxu0 %v6515_v14  ;;  %v3194_v14 = vlaneseq }
 0x50d   : > { %4802 = vmatpush1.bf16.msra.mxu1 %v6522_v16  ;;  %v3182_v16 = vld [vmem:[%s7263_s0] sm:$0xff] }
 0x50e   : > { %4803 = vmatprep.subr.bf16.mxu1 %v6527_v18  ;;  %v3195_v35 = vshrl.u32 %v3194_v14, 7 }
 0x50f   : > { %4761 = vmatpush1.bf16.msra.mxu0 %v6513_v15 }
 0x510   : > { %4762 = vmatprep.subr.bf16.mxu0 %v6521_v17  ;;  %v8120_v15 = vsub.s32 0, %v3195_v35  ;;  %v8123_v17 = vsub.s32 1, %v3195_v35 }
 0x511   : > { %4804 = vmatpush1.bf16.msra.mxu1 %v6525_v20 }
 0x512   : > { %4805 = vmatprep.subr.bf16.mxu1 %v6533_v22  ;;  %v3197_v18 = vrot.slane %v3182_v16, %v8120_v15  ;;  %v3201_v20 = vrot.slane %v3182_v16, %v8123_v17 }
 0x513   : > { %4763 = vmatpush1.bf16.msra.mxu0 %v6519_v19  ;;  %v8126_v19 = vsub.s32 2, %v3195_v35 }
 0x514   : > { %4842 = vmatprep.subr.bf16.mxu0 %v6530_v21  ;;  %v8129_v21 = vsub.s32 3, %v3195_v35 }
 0x515   : > { %4806 = vmatpush1.bf16.msra.mxu1 %v6531_v24 }
 0x516   : > { %5905 = vmatmul.mubr.msk.bf16.vlgmr.msra.gmra.mxu0 %vm4228_vm7, %v7910_v55  ;;  %4885 = vmatprep.subr.bf16.mxu1 %v6542_v26  ;;  %v3209_v26 = vrot.slane %v3182_v16, %v8129_v21 }
 0x517   : > { %4843 = vmatpush1.bf16.msra.mxu0 %v6528_v23  ;;  %4866 = vmatprep.mubr.bf16.mxu0 %v6742_v39  ;;  %v3205_v23 = vrot.slane %v3182_v16, %v8126_v19 }
 0x518   : > { %4844 = vmatprep.subr.bf16.mxu0 %v6536_v25  ;;  %5906 = vmatmul.mubr.msk.bf16.vlgmr.msra.gmra.mxu1 %vm4228_vm7, %v7910_v55 }
 0x519   : > { %4886 = vmatpush1.bf16.msra.mxu1 %v6540_v28  ;;  %4909 = vmatprep.mubr.bf16.mxu1 %v6742_v39 }
 0x51a   : > { %4887 = vmatprep.subr.bf16.mxu1 %v6548_v30 }
 0x51b   : > { %4845 = vmatpush1.bf16.msra.mxu0 %v6534_v27 }
 0x51c   : > { %4846 = vmatprep.subr.bf16.mxu0 %v6539_v29 }
 0x51d   : > { %4888 = vmatpush1.bf16.msra.mxu1 %v6546_v32 }
 0x51e   : > { %4889 = vmatprep.subr.bf16.mxu1 %v6551_v36 }
 0x51f   : > { %4847 = vmatpush1.bf16.msra.mxu0 %v6537_v31 }
 0x520   : > { %4848 = vmatprep.subr.bf16.mxu0 %v6545_v34 }
 0x521   : > { %4890 = vmatpush1.bf16.msra.mxu1 %v6549_v38 }
 0x522   : > { %4891 = vmatprep.subr.bf16.mxu1 %v6557_v41 }
 0x523   : > { %4849 = vmatpush1.bf16.msra.mxu0 %v6543_v37 }
 0x524   : > { %4928 = vmatprep.subr.bf16.mxu0 %v6554_v40  ;;  %v8139_v40 = vsub.s32 4, %v3195_v35 }
 0x525   : > { %4892 = vmatpush1.bf16.msra.mxu1 %v6555_v43  ;;  %v8142_v43 = vsub.s32 5, %v3195_v35 }
 0x526   : > { %5907 = vmatmul.mubr.msk.bf16.vlgmr.msra.gmra.mxu0 %vm4228_vm7, %v7910_v55  ;;  %4971 = vmatprep.subr.bf16.mxu1 %v6566_v46  ;;  %v8146_v46 = vsub.s32 6, %v3195_v35 }
 0x527   : > { %4929 = vmatpush1.bf16.msra.mxu0 %v6552_v42  ;;  %4952 = vmatprep.mubr.bf16.mxu0 %v6742_v39 }
 0x528   : > { %4930 = vmatprep.subr.bf16.mxu0 %v6560_v45  ;;  %5908 = vmatmul.mubr.msk.bf16.vlgmr.msra.gmra.mxu1 %vm4228_vm7, %v7910_v55  ;;  %v3213_v45 = vrot.slane %v3182_v16, %v8139_v40 }
 0x529   : > { %4972 = vmatpush1.bf16.msra.mxu1 %v6564_v48  ;;  %4995 = vmatprep.mubr.bf16.mxu1 %v6742_v39  ;;  %v8149_v48 = vsub.s32 7, %v3195_v35 }
 0x52a   : > { %4973 = vmatprep.subr.bf16.mxu1 %v6572_v50 }
 0x52b   : > { %4931 = vmatpush1.bf16.msra.mxu0 %v6558_v47  ;;  %v3217_v47 = vrot.slane %v3182_v16, %v8142_v43 }
 0x52c   : > { %4932 = vmatprep.subr.bf16.mxu0 %v6563_v49 }
 0x52d   : > { %4974 = vmatpush1.bf16.msra.mxu1 %v6570_v52 }
 0x52e   : > { %4975 = vmatprep.subr.bf16.mxu1 %v6575_v54  ;;  %v3225_v54 = vrot.slane %v3182_v16, %v8149_v48 }
 0x52f   : > { %4933 = vmatpush1.bf16.msra.mxu0 %v6561_v51  ;;  %v3221_v51 = vrot.slane %v3182_v16, %v8146_v46 }
 0x530   : > { %4934 = vmatprep.subr.bf16.mxu0 %v6569_v53 }
 0x531   : > { %4976 = vmatpush1.bf16.msra.mxu1 %v6573_v57 }
 0x532   : > { %4977 = vmatprep.subr.bf16.mxu1 %v6581_v59 }
 0x533   : > { %4935 = vmatpush1.bf16.msra.mxu0 %v6567_v56 }
 0x534   : > { %5014 = vmatprep.subr.bf16.mxu0 %v6578_v58 }
 0x535   : > { %4978 = vmatpush1.bf16.msra.mxu1 %v6579_v61 }
 0x536   : > { %5909 = vmatmul.mubr.msk.bf16.vlgmr.msra.gmra.mxu0 %vm4228_vm7, %v7910_v55  ;;  %5057 = vmatprep.subr.bf16.mxu1 %v6590_v44 }
 0x537   : > { %5015 = vmatpush1.bf16.msra.mxu0 %v6576_v60  ;;  %5038 = vmatprep.mubr.bf16.mxu0 %v6742_v39 }
 0x538   : > { %5016 = vmatprep.subr.bf16.mxu0 %v6584_v62  ;;  %5910 = vmatmul.mubr.msk.bf16.vlgmr.msra.gmra.mxu1 %vm4228_vm7, %v7910_v55 }
 0x539   : > { %5058 = vmatpush1.bf16.msra.mxu1 %v6588_v0  ;;  %5081 = vmatprep.mubr.bf16.mxu1 %v6742_v39  ;;  %v6604_v39 = vld [vmem:[%s7265_s1 + $0x330] ss:$164 sps:$4 sm:$0xff]   ;;  %s6745_s1 = smov [#allocation6]  }
 0x53a   : > { %5059 = vmatprep.subr.bf16.mxu1 %v6596_v2  ;;  %v8160_v2 = vld [vmem:[%s7263_s0 + $0x8] sm:$0xff]  ;;  %s5238_s5 = sshll.u32 %s6745_s1, 4  ;;  %s5239_s5 = int_to_ptr.vmem [resolvable:$true] %s5238_s5 }
 0x53b   : > { %5017 = vmatpush1.bf16.msra.mxu0 %v6582_v63  ;;  %s6607_s7 = scalar_lea.vmem %s5239_s5, 256  ;;  %p6614_p1 = scmp.lt.s32.totalorder %s5239_s5, %s5239_s5 }
 0x53c   : > { %5018 = vmatprep.subr.bf16.mxu0 %v6587_v1  ;;  %p6608_p12 = scmp.ne.s32.totalorder %s5239_s5, %s6607_s7  ;;  %p6615_p2 = scmp.lt.s32.totalorder %s6607_s7, %s6607_s7 }
 0x53d   : > { %5060 = vmatpush1.bf16.msra.mxu1 %v6594_v4  ;;  %v3229_v4 = vrot.slane %v8160_v2, %v8120_v15 }
 0x53e   : > { %5061 = vmatprep.subr.bf16.mxu1 %v6599_v6  ;;  %p6609_p13 = pnand %p6608_p12, %p548_p3  ;;  %p6616_p4 = por %p6615_p2, %p6614_p1 }
 0x53f   : > { %5019 = vmatpush1.bf16.msra.mxu0 %v6585_v3 }
 0x540   : > { %5020 = vmatprep.subr.bf16.mxu0 %v6593_v5  ;;  %v3233_v5 = vrot.slane %v8160_v2, %v8123_v17  ;;  %p6610_p0 = pneg %p6609_p13 }
 0x541   : > { %5062 = vmatpush1.bf16.msra.mxu1 %v6597_v8  ;;  %v3237_v8 = vrot.slane %v8160_v2, %v8126_v19 }
 0x542   : > { %5063 = vmatprep.subr.bf16.mxu1 %v6603_v9  ;;  %p6617_p6 = pnand %p6616_p4, %p6610_p0 }
 0x543   : > { %5021 = vmatpush1.bf16.msra.mxu0 %v6591_v7 }
 0x544   : > { %6166 = vmatprep.subr.bf16.mxu0 %v6743_v12 }
 0x545   : > { %5064 = vmatpush1.bf16.msra.mxu1 %v6601_v11  ;;  %v3241_v11 = vrot.slane %v8160_v2, %v8129_v21 }
 0x546   : > { %5911 = vmatmul.mubr.msk.bf16.vlgmr.msra.gmra.mxu0 %vm4228_vm7, %v7910_v55 }
 0x547   : > { %6167 = vmatpush3.bf16.msra.mxu0 %v6600_v10  ;;  %6174 = vmatprep.mubr.msk.bf16.mxu0 %vm6744_vm8, %v6743_v12 }
 0x548   : > { %6168 = vmatprep.subr.bf16.mxu0 %v6743_v12  ;;  %5912 = vmatmul.mubr.msk.bf16.vlgmr.msra.gmra.mxu1 %vm4228_vm7, %v7910_v55 }
 0x54b   : > { %6169 = vmatpush3.bf16.msra.mxu0 %v6604_v39 }
 0x54c   : > { %6170 = vmatprep.subr.bf16.mxu0 %v6743_v12 }
 0x54f   : > { %6171 = vmatpush3.bf16.msra.mxu0 %v6605_v13 }
 0x550   : > { %6172 = vmatprep.subr.bf16.mxu0 %v6743_v12 }
 0x553   : > { %6173 = vmatpush3.bf16.msra.mxu0 %v6606_v33 }
 0x556   : > { %6175 = vmatmul.mubr.msk.bf16.vlgmr.msra.gmra.mxu0 %vm4228_vm7, %v7910_v55 }
 0x576   : > { %v4266_v22 = vpop.f32.mrf.mxu0  ;;  %v4309_v28 = vpop.f32.mrf.mxu1 }
 0x577   : > { %v4267_v55 = vadd.f32 %v4266_v22, %v3197_v18  ;;  %v4310_v30 = vadd.f32 %v4309_v28, %v3205_v23 }
 0x578   : > { %v4268_v24 = vpop.f32.mrf.mxu0  ;;  %v4311_v32 = vpop.f32.mrf.mxu1 }
 0x579   : > { %5133 = vst [vmem:[%s7267_s17] sm:$0xff] %v4267_v55  ;;  %v4269_v25 = vadd.f32 %v4268_v24, %v3201_v20  ;;  %5135 = vst [vmem:[%s7267_s17 + $0x10] sm:$0xff] %v4310_v30  ;;  %v4312_v36 = vadd.f32 %v4311_v32, %v3209_v26 }
 0x57a   : > { %v4270_v27 = vpop.f32.mrf.mxu0  ;;  %v4313_v37 = vpop.f32.mrf.mxu1 }
 0x57b   : > { %5134 = vst [vmem:[%s7267_s17 + $0x8] sm:$0xff] %v4269_v25  ;;  %v4271_v29 = vadd.f32 %v4270_v27, %v3197_v18  ;;  %5136 = vst [vmem:[%s7267_s17 + $0x18] sm:$0xff] %v4312_v36  ;;  %v4314_v38 = vadd.f32 %v4313_v37, %v3205_v23 }
 0x57c   : > { %v4272_v31 = vpop.f32.mrf.mxu0  ;;  %v4315_v41 = vpop.f32.mrf.mxu1 }
 0x57d   : > { %5174 = vst [vmem:[%s7267_s17 + $0x148] sm:$0xff] %v4271_v29  ;;  %v4273_v34 = vadd.f32 %v4272_v31, %v3201_v20  ;;  %5176 = vst [vmem:[%s7267_s17 + $0x158] sm:$0xff] %v4314_v38  ;;  %v4316_v42 = vadd.f32 %v4315_v41, %v3209_v26 }
 0x57f   : > { %5175 = vst [vmem:[%s7267_s17 + $0x150] sm:$0xff] %v4273_v34  ;;  %5177 = vst [vmem:[%s7267_s17 + $0x160] sm:$0xff] %v4316_v42 }
 0x586   : > { %v4352_v49 = vpop.f32.mrf.mxu0 }
 0x587   : > { %v4353_v50 = vadd.f32 %v4352_v49, %v3213_v45 }
 0x588   : > { %v4354_v52 = vpop.f32.mrf.mxu0  ;;  %v4395_v57 = vpop.f32.mrf.mxu1 }
 0x589   : > { %5137 = vst [vmem:[%s7267_s17 + $0x20] sm:$0xff] %v4353_v50  ;;  %v4355_v53 = vadd.f32 %v4354_v52, %v3217_v47  ;;  %v4396_v59 = vadd.f32 %v4395_v57, %v3221_v51 }
 0x58a   : > { %v4356_v56 = vpop.f32.mrf.mxu0  ;;  %v4397_v61 = vpop.f32.mrf.mxu1 }
 0x58b   : > { %5138 = vst [vmem:[%s7267_s17 + $0x28] sm:$0xff] %v4355_v53  ;;  %v4357_v58 = vadd.f32 %v4356_v56, %v3213_v45  ;;  %5139 = vst [vmem:[%s7267_s17 + $0x30] sm:$0xff] %v4396_v59  ;;  %v4398_v44 = vadd.f32 %v4397_v61, %v3225_v54 }
 0x58c   : > { %v4358_v60 = vpop.f32.mrf.mxu0  ;;  %v4399_v63 = vpop.f32.mrf.mxu1 }
 0x58d   : > { %5178 = vst [vmem:[%s7267_s17 + $0x168] sm:$0xff] %v4357_v58  ;;  %v4359_v62 = vadd.f32 %v4358_v60, %v3217_v47  ;;  %5140 = vst [vmem:[%s7267_s17 + $0x38] sm:$0xff] %v4398_v44  ;;  %v4400_v0 = vadd.f32 %v4399_v63, %v3221_v51 }
 0x58e   : > { %v4401_v1 = vpop.f32.mrf.mxu1 }
 0x58f   : > { %5179 = vst [vmem:[%s7267_s17 + $0x170] sm:$0xff] %v4359_v62  ;;  %5180 = vst [vmem:[%s7267_s17 + $0x178] sm:$0xff] %v4400_v0  ;;  %v4402_v3 = vadd.f32 %v4401_v1, %v3225_v54 }
 0x591   : > { %5181 = vst [vmem:[%s7267_s17 + $0x180] sm:$0xff] %v4402_v3 }
 0x596   : > { %v4438_v6 = vpop.f32.mrf.mxu0 }
 0x597   : > { %v4439_v7 = vadd.f32 %v4438_v6, %v3229_v4 }
 0x598   : > { %v4440_v9 = vpop.f32.mrf.mxu0  ;;  %v4481_v39 = vpop.f32.mrf.mxu1 }
 0x599   : > { %5141 = vst [vmem:[%s7267_s17 + $0x40] sm:$0xff] %v4439_v7  ;;  %v4441_v10 = vadd.f32 %v4440_v9, %v3233_v5  ;;  %v4482_v33 = vadd.f32 %v4481_v39, %v3237_v8 }
 0x59a   : > { %v4442_v12 = vpop.f32.mrf.mxu0  ;;  %v4483_v35 = vpop.f32.mrf.mxu1 }
 0x59b   : > { %5142 = vst [vmem:[%s7267_s17 + $0x48] sm:$0xff] %v4441_v10  ;;  %v4443_v13 = vadd.f32 %v4442_v12, %v3229_v4  ;;  %5143 = vst [vmem:[%s7267_s17 + $0x50] sm:$0xff] %v4482_v33  ;;  %v4484_v18 = vadd.f32 %v4483_v35, %v3241_v11 }
 0x59c   : > { %v4444_v14 = vpop.f32.mrf.mxu0 }
 0x59d   : > { %5182 = vst [vmem:[%s7267_s17 + $0x188] sm:$0xff] %v4443_v13  ;;  %v4445_v16 = vadd.f32 %v4444_v14, %v3233_v5 }
 0x59e   : > { %6620 = shalt.err (!%p6617_p6)
}
 0x59f   : > { %s6747_s2 = smov 128   ;;  %s6748_s30 = smov 8   ;;  %v4485_v20 = vpop.f32.mrf.mxu1  ;;  %5183 = vst [vmem:[%s7267_s17 + $0x190] sm:$0xff] %v4445_v16  ;;  %5144 = vst [vmem:[%s7267_s17 + $0x58] sm:$0xff] %v4484_v18 }
 0x5a0   : > { %6184 = dma.vmem_to_hbm [thread:$0]  (%p548_p3), %s5239_s5, 256, %s8516_s20, [#allocation7], %s6747_s2, %s6747_s2, %s6748_s30   ;;  %v4486_v22 = vadd.f32 %v4485_v20, %v3237_v8 }
 0x5a1   : > { %s6631_s3 = scalar_lea.vmem %s5226_s4, 256  ;;  %p6638_p10 = scmp.lt.s32.totalorder %s5226_s4, %s5226_s4 }
 0x5a2   : > { %p6632_p7 = scmp.ne.s32.totalorder %s5226_s4, %s6631_s3  ;;  %p6639_p11 = scmp.lt.s32.totalorder %s6631_s3, %s6631_s3 }
 0x5a4   : > { %p6633_p8 = pnand %p6632_p7, %p548_p3  ;;  %p6640_p12 = por %p6639_p11, %p6638_p10 }
 0x5a6   : > { %p6634_p9 = pneg %p6633_p8 }
 0x5a8   : > { %p6641_p13 = pnand %p6640_p12, %p6634_p9 }
 0x5aa   : > { %6644 = shalt.err (!%p6641_p13)
}
 0x5ab   : > { %6182 = dma.vmem_to_hbm [thread:$0]  (%p548_p3), %s5226_s4, 256, %s8515_s19, [#allocation5], %s6747_s2, %s6747_s2, %s6748_s30   ;;  %v4487_v55 = vpop.f32.mrf.mxu1 }
 0x5ac   : > { %s6749_s5 = smov [#allocation8]   ;;  %5184 = vst [vmem:[%s7267_s17 + $0x198] sm:$0xff] %v4486_v22  ;;  %v4488_v23 = vadd.f32 %v4487_v55, %v3241_v11 }
 0x5ad   : > { %s5251_s8 = sshll.u32 %s6749_s5, 4  ;;  %s5252_s8 = int_to_ptr.vmem [resolvable:$true] %s5251_s8 }
 0x5ae   : > { %s6655_s7 = scalar_lea.vmem %s5252_s8, 512  ;;  %p6662_p4 = scmp.lt.s32.totalorder %s5252_s8, %s5252_s8 }
 0x5af   : > { %p6656_p0 = scmp.ne.s32.totalorder %s5252_s8, %s6655_s7  ;;  %p6663_p6 = scmp.lt.s32.totalorder %s6655_s7, %s6655_s7 }
 0x5b1   : > { %p6657_p1 = pnand %p6656_p0, %p548_p3  ;;  %p6664_p7 = por %p6663_p6, %p6662_p4 }
 0x5b3   : > { %p6658_p2 = pneg %p6657_p1 }
 0x5b5   : > { %p6665_p8 = pnand %p6664_p7, %p6658_p2 }
 0x5b7   : > { %6668 = shalt.err (!%p6665_p8)
}
 0x5b8   : > { %s6750_s24 = smov 256   ;;  %s6751_s4 = smov 16   ;;  %5185 = vst [vmem:[%s7267_s17 + $0x1a0] sm:$0xff] %v4488_v23  ;;  %v3245_v24 = vrot.slane %v8160_v2, %v8139_v40  ;;  %v3249_v25 = vrot.slane %v8160_v2, %v8142_v43  ;;  %v4524_v26 = vpop.f32.mrf.mxu0 }
 0x5b9   : > { %6186 = dma.vmem_to_hbm [thread:$0]  (%p548_p3), %s5252_s8, 512, %s8517_s21, [#allocation7], %s6750_s24, %s6750_s24, %s6751_s4  }
 0x5ba   : > { %s6752_s6 = smov [#allocation9]  }
 0x5bb   : > { %s5264_s3 = sshll.u32 %s6752_s6, 4  ;;  %s5265_s3 = int_to_ptr.vmem [resolvable:$true] %s5264_s3 }
 0x5bc   : > { %s6679_s18 = scalar_lea.vmem %s5265_s3, 512  ;;  %p6686_p12 = scmp.lt.s32.totalorder %s5265_s3, %s5265_s3 }
 0x5bd   : > { %p6680_p9 = scmp.ne.s32.totalorder %s5265_s3, %s6679_s18  ;;  %p6687_p13 = scmp.lt.s32.totalorder %s6679_s18, %s6679_s18 }
 0x5bf   : > { %p6681_p10 = pnand %p6680_p9, %p548_p3  ;;  %p6688_p0 = por %p6687_p13, %p6686_p12 }
 0x5c1   : > { %p6682_p11 = pneg %p6681_p10 }
 0x5c3   : > { %p6689_p1 = pnand %p6688_p0, %p6682_p11 }
 0x5c5   : > { %6692 = shalt.err (!%p6689_p1)
}
 0x5c6   : > { %6188 = dma.vmem_to_hbm [thread:$0]  (%p548_p3), %s5265_s3, 512, %s8518_s22, [#allocation10], %s6750_s24, %s6750_s24, %s6751_s4   ;;  %v4525_v27 = vadd.f32 %v4524_v26, %v3245_v24  ;;  %v3253_v28 = vrot.slane %v8160_v2, %v8146_v46  ;;  %v4526_v29 = vpop.f32.mrf.mxu0  ;;  %v3257_v31 = vrot.slane %v8160_v2, %v8149_v48  ;;  %v4567_v34 = vpop.f32.mrf.mxu1 }
 0x5c7   : > { %v4527_v30 = vadd.f32 %v4526_v29, %v3249_v25  ;;  %v3184_v51 = vld [vmem:[%s7263_s0 + $0x10] sm:$0xff]  ;;  %s8563_s4 = sld [smem:[#allocation30_spill]] (%p6906_p5) }
 0x5c8   : > { %5145 = vst [vmem:[%s7267_s17 + $0x60] sm:$0xff] %v4525_v27  ;;  %v4528_v32 = vpop.f32.mrf.mxu0  ;;  %v4568_v37 = vadd.f32 %v4567_v34, %v3253_v28  ;;  %v4569_v41 = vpop.f32.mrf.mxu1  ;;  %v3261_v53 = vrot.slane %v3184_v51, %v8120_v15  ;;  %v3265_v54 = vrot.slane %v3184_v51, %v8123_v17  ;;  %v3269_v58 = vrot.slane %v3184_v51, %v8126_v19 }
 0x5c9   : > { %5146 = vst [vmem:[%s7267_s17 + $0x68] sm:$0xff] %v4527_v30  ;;  %v4529_v36 = vadd.f32 %v4528_v32, %v3245_v24  ;;  %v4570_v45 = vadd.f32 %v4569_v41, %v3257_v31  ;;  %v3273_v61 = vrot.slane %v3184_v51, %v8129_v21  ;;  %v3277_v9 = vrot.slane %v3184_v51, %v8139_v40 }
 0x5ca   : > { %v4530_v38 = vpop.f32.mrf.mxu0  ;;  %5147 = vst [vmem:[%s7267_s17 + $0x70] sm:$0xff] %v4568_v37  ;;  %v4571_v47 = vpop.f32.mrf.mxu1  ;;  %v3281_v10 = vrot.slane %v3184_v51, %v8142_v43  ;;  %v3285_v39 = vrot.slane %v3184_v51, %v8146_v46  ;;  %v3289_v14 = vrot.slane %v3184_v51, %v8149_v48 }
 0x5cb   : > { %5186 = vst [vmem:[%s7267_s17 + $0x1a8] sm:$0xff] %v4529_v36  ;;  %v4531_v42 = vadd.f32 %v4530_v38, %v3249_v25  ;;  %5148 = vst [vmem:[%s7267_s17 + $0x78] sm:$0xff] %v4570_v45  ;;  %v4572_v49 = vadd.f32 %v4571_v47, %v3253_v28  ;;  %v3185_v28 = vld [vmem:[%s7263_s0 + $0x18] sm:$0xff] }
 0x5cc   : > { %v4573_v50 = vpop.f32.mrf.mxu1  ;;  %v4610_v56 = vpop.f32.mrf.mxu0  ;;  %v3293_v30 = vrot.slane %v3185_v28, %v8120_v15  ;;  %v3301_v36 = vrot.slane %v3185_v28, %v8126_v19  ;;  %v3305_v41 = vrot.slane %v3185_v28, %v8129_v21 }
 0x5cd   : > { %5187 = vst [vmem:[%s7267_s17 + $0x1b0] sm:$0xff] %v4531_v42  ;;  %5188 = vst [vmem:[%s7267_s17 + $0x1b8] sm:$0xff] %v4572_v49  ;;  %v4574_v52 = vadd.f32 %v4573_v50, %v3257_v31  ;;  %v4611_v57 = vadd.f32 %v4610_v56, %v3261_v53  ;;  %v3297_v31 = vrot.slane %v3185_v28, %v8123_v17 }
 0x5ce   : > { %v4612_v59 = vpop.f32.mrf.mxu0  ;;  %v4653_v44 = vpop.f32.mrf.mxu1 }
 0x5cf   : > { %5189 = vst [vmem:[%s7267_s17 + $0x1c0] sm:$0xff] %v4574_v52  ;;  %5149 = vst [vmem:[%s7267_s17 + $0x80] sm:$0xff] %v4611_v57  ;;  %v4613_v60 = vadd.f32 %v4612_v59, %v3265_v54  ;;  %v4654_v0 = vadd.f32 %v4653_v44, %v3269_v58  ;;  %v3309_v59 = vrot.slane %v3185_v28, %v8139_v40 }
 0x5d0   : > { %v4614_v62 = vpop.f32.mrf.mxu0  ;;  %v4655_v2 = vpop.f32.mrf.mxu1  ;;  %v3317_v44 = vrot.slane %v3185_v28, %v8146_v46 }
 0x5d1   : > { %5150 = vst [vmem:[%s7267_s17 + $0x88] sm:$0xff] %v4613_v60  ;;  %v4615_v63 = vadd.f32 %v4614_v62, %v3261_v53  ;;  %5151 = vst [vmem:[%s7267_s17 + $0x90] sm:$0xff] %v4654_v0  ;;  %v4656_v4 = vadd.f32 %v4655_v2, %v3273_v61  ;;  %v3313_v60 = vrot.slane %v3185_v28, %v8142_v43 }
 0x5d2   : > { %v4616_v1 = vpop.f32.mrf.mxu0  ;;  %v4657_v5 = vpop.f32.mrf.mxu1 }
 0x5d3   : > { %5190 = vst [vmem:[%s7267_s17 + $0x1c8] sm:$0xff] %v4615_v63  ;;  %v4617_v3 = vadd.f32 %v4616_v1, %v3265_v54  ;;  %5152 = vst [vmem:[%s7267_s17 + $0x98] sm:$0xff] %v4656_v4  ;;  %v4658_v6 = vadd.f32 %v4657_v5, %v3269_v58  ;;  %v3321_v1 = vrot.slane %v3185_v28, %v8149_v48 }
 0x5d4   : > { %v4659_v7 = vpop.f32.mrf.mxu1  ;;  %v4696_v11 = vpop.f32.mrf.mxu0 }
 0x5d5   : > { %5191 = vst [vmem:[%s7267_s17 + $0x1d0] sm:$0xff] %v4617_v3  ;;  %5192 = vst [vmem:[%s7267_s17 + $0x1d8] sm:$0xff] %v4658_v6  ;;  %v4660_v8 = vadd.f32 %v4659_v7, %v3273_v61  ;;  %v4697_v12 = vadd.f32 %v4696_v11, %v3277_v9 }
 0x5d6   : > { %v4698_v13 = vpop.f32.mrf.mxu0  ;;  %v4739_v16 = vpop.f32.mrf.mxu1 }
 0x5d7   : > { %5193 = vst [vmem:[%s7267_s17 + $0x1e0] sm:$0xff] %v4660_v8  ;;  %5153 = vst [vmem:[%s7267_s17 + $0xa0] sm:$0xff] %v4697_v12  ;;  %v4699_v33 = vadd.f32 %v4698_v13, %v3281_v10  ;;  %v4740_v20 = vadd.f32 %v4739_v16, %v3285_v39 }
 0x5d8   : > { %v4700_v35 = vpop.f32.mrf.mxu0  ;;  %v4741_v55 = vpop.f32.mrf.mxu1 }
 0x5d9   : > { %5154 = vst [vmem:[%s7267_s17 + $0xa8] sm:$0xff] %v4699_v33  ;;  %v4701_v18 = vadd.f32 %v4700_v35, %v3277_v9  ;;  %5155 = vst [vmem:[%s7267_s17 + $0xb0] sm:$0xff] %v4740_v20  ;;  %v4742_v24 = vadd.f32 %v4741_v55, %v3289_v14 }
 0x5da   : > { %v4702_v22 = vpop.f32.mrf.mxu0  ;;  %v4743_v25 = vpop.f32.mrf.mxu1 }
 0x5db   : > { %5194 = vst [vmem:[%s7267_s17 + $0x1e8] sm:$0xff] %v4701_v18  ;;  %v4703_v23 = vadd.f32 %v4702_v22, %v3281_v10  ;;  %5156 = vst [vmem:[%s7267_s17 + $0xb8] sm:$0xff] %v4742_v24  ;;  %v4744_v26 = vadd.f32 %v4743_v25, %v3285_v39  ;;  %v3186_v39 = vld [vmem:[%s7263_s0 + $0x20] sm:$0xff] }
 0x5dc   : > { %v4745_v27 = vpop.f32.mrf.mxu1  ;;  %v4782_v32 = vpop.f32.mrf.mxu0  ;;  %v3325_v33 = vrot.slane %v3186_v39, %v8120_v15  ;;  %v3333_v18 = vrot.slane %v3186_v39, %v8126_v19  ;;  %v3337_v55 = vrot.slane %v3186_v39, %v8129_v21 }
 0x5dd   : > { %5195 = vst [vmem:[%s7267_s17 + $0x1f0] sm:$0xff] %v4703_v23  ;;  %5196 = vst [vmem:[%s7267_s17 + $0x1f8] sm:$0xff] %v4744_v26  ;;  %v4746_v29 = vadd.f32 %v4745_v27, %v3289_v14  ;;  %v4783_v34 = vadd.f32 %v4782_v32, %v3293_v30  ;;  %v3329_v14 = vrot.slane %v3186_v39, %v8123_v17 }
 0x5de   : > { %v4784_v37 = vpop.f32.mrf.mxu0  ;;  %v4825_v45 = vpop.f32.mrf.mxu1  ;;  %v3345_v32 = vrot.slane %v3186_v39, %v8142_v43 }
 0x5df   : > { %5197 = vst [vmem:[%s7267_s17 + $0x200] sm:$0xff] %v4746_v29  ;;  %5157 = vst [vmem:[%s7267_s17 + $0xc0] sm:$0xff] %v4783_v34  ;;  %v4785_v38 = vadd.f32 %v4784_v37, %v3297_v31  ;;  %v4826_v49 = vadd.f32 %v4825_v45, %v3301_v36  ;;  %v3349_v37 = vrot.slane %v3186_v39, %v8146_v46 }
 0x5e0   : > { %v4786_v42 = vpop.f32.mrf.mxu0  ;;  %v4827_v51 = vpop.f32.mrf.mxu1 }
 0x5e1   : > { %5158 = vst [vmem:[%s7267_s17 + $0xc8] sm:$0xff] %v4785_v38  ;;  %v4787_v47 = vadd.f32 %v4786_v42, %v3293_v30  ;;  %5159 = vst [vmem:[%s7267_s17 + $0xd0] sm:$0xff] %v4826_v49  ;;  %v4828_v53 = vadd.f32 %v4827_v51, %v3305_v41  ;;  %v3353_v42 = vrot.slane %v3186_v39, %v8149_v48 }
 0x5e2   : > { %v4788_v50 = vpop.f32.mrf.mxu0  ;;  %v4829_v54 = vpop.f32.mrf.mxu1 }
 0x5e3   : > { %5198 = vst [vmem:[%s7267_s17 + $0x208] sm:$0xff] %v4787_v47  ;;  %v4789_v52 = vadd.f32 %v4788_v50, %v3297_v31  ;;  %5160 = vst [vmem:[%s7267_s17 + $0xd8] sm:$0xff] %v4828_v53  ;;  %v4830_v56 = vadd.f32 %v4829_v54, %v3301_v36  ;;  %v3341_v31 = vrot.slane %v3186_v39, %v8139_v40  ;;  %v5319_v39 = vld [vmem:[%s7267_s17 + $0x78] sm:$0xff] (%p6906_p5) }
 0x5e4   : > { %v4831_v57 = vpop.f32.mrf.mxu1 }
 0x5e5   : > { %5199 = vst [vmem:[%s7267_s17 + $0x210] sm:$0xff] %v4789_v52  ;;  %5200 = vst [vmem:[%s7267_s17 + $0x218] sm:$0xff] %v4830_v56  ;;  %v4832_v58 = vadd.f32 %v4831_v57, %v3305_v41  ;;  %v5727_v56 = vld [vmem:[%s7263_s0 + $0x28] ss:$0 sm:$0xff]  ;;  %s5928_s0 = smul.u32 (%p6906_p5), 328, %s6889_s25 }
 0x5e6   : > { %v4868_v61 = vpop.f32.mrf.mxu0 }
 0x5e7   : > { %5201 = vst [vmem:[%s7267_s17 + $0x220] sm:$0xff] %v4832_v58  ;;  %v4869_v62 = vadd.f32 %v4868_v61, %v3309_v59  ;;  %s8314_s2 = scalar_lea.vmem (%p6906_p5), %s8563_s4, %s5928_s0 }
 0x5e8   : > { %v4870_v63 = vpop.f32.mrf.mxu0  ;;  %v4911_v3 = vpop.f32.mrf.mxu1  ;;  %5320 = vst [vmem:[%s8314_s2 + $0x78] sm:$0xff] (%p6906_p5), %v5319_v39 }
 0x5e9   : > { %5161 = vst [vmem:[%s7267_s17 + $0xe0] sm:$0xff] %v4869_v62  ;;  %v4871_v0 = vadd.f32 %v4870_v63, %v3313_v60  ;;  %v4912_v5 = vadd.f32 %v4911_v3, %v3317_v44  ;;  %v5291_v63 = vld [vmem:[%s7267_s17 + $0x8] sm:$0xff] (%p6906_p5) }
 0x5ea   : > { %v4872_v2 = vpop.f32.mrf.mxu0  ;;  %v4913_v7 = vpop.f32.mrf.mxu1  ;;  %v5299_v3 = vld [vmem:[%s7267_s17 + $0x28] sm:$0xff] (%p6906_p5)  ;;  %5292 = vst [vmem:[%s8314_s2 + $0x8] sm:$0xff] (%p6906_p5), %v5291_v63 }
 0x5eb   : > { %5162 = vst [vmem:[%s7267_s17 + $0xe8] sm:$0xff] %v4871_v0  ;;  %v4873_v4 = vadd.f32 %v4872_v2, %v3309_v59  ;;  %5163 = vst [vmem:[%s7267_s17 + $0xf0] sm:$0xff] %v4912_v5  ;;  %v4914_v9 = vadd.f32 %v4913_v7, %v3321_v1  ;;  %v5293_v0 = vld [vmem:[%s7267_s17 + $0x10] sm:$0xff] (%p6906_p5)  ;;  %v5297_v2 = vld [vmem:[%s7267_s17 + $0x20] sm:$0xff] (%p6906_p5) }
 0x5ec   : > { %v4874_v6 = vpop.f32.mrf.mxu0  ;;  %v4915_v10 = vpop.f32.mrf.mxu1  ;;  %v5303_v5 = vld [vmem:[%s7267_s17 + $0x38] sm:$0xff] (%p6906_p5)  ;;  %5294 = vst [vmem:[%s8314_s2 + $0x10] sm:$0xff] (%p6906_p5), %v5293_v0  ;;  %5298 = vst [vmem:[%s8314_s2 + $0x20] sm:$0xff] (%p6906_p5), %v5297_v2  ;;  %v5307_v7 = vld [vmem:[%s7267_s17 + $0x48] sm:$0xff] (%p6906_p5) }
 0x5ed   : > { %5202 = vst [vmem:[%s7267_s17 + $0x228] sm:$0xff] %v4873_v4  ;;  %v4875_v8 = vadd.f32 %v4874_v6, %v3313_v60  ;;  %5164 = vst [vmem:[%s7267_s17 + $0xf8] sm:$0xff] %v4914_v9  ;;  %v4916_v11 = vadd.f32 %v4915_v10, %v3317_v44  ;;  %v5289_v44 = vld [vmem:[%s7267_s17] sm:$0xff] (%p6906_p5)  ;;  %v5301_v4 = vld [vmem:[%s7267_s17 + $0x30] sm:$0xff] (%p6906_p5) }
 0x5ee   : > { %v4917_v12 = vpop.f32.mrf.mxu1  ;;  %v5305_v6 = vld [vmem:[%s7267_s17 + $0x40] sm:$0xff] (%p6906_p5)  ;;  %5290 = vst [vmem:[%s8314_s2] sm:$0xff] (%p6906_p5), %v5289_v44  ;;  %5300 = vst [vmem:[%s8314_s2 + $0x28] sm:$0xff] (%p6906_p5), %v5299_v3  ;;  %v5311_v9 = vld [vmem:[%s7267_s17 + $0x58] sm:$0xff] (%p6906_p5) }
 0x5ef   : > { %5203 = vst [vmem:[%s7267_s17 + $0x230] sm:$0xff] %v4875_v8  ;;  %5204 = vst [vmem:[%s7267_s17 + $0x238] sm:$0xff] %v4916_v11  ;;  %v4918_v13 = vadd.f32 %v4917_v12, %v3321_v1  ;;  %v5295_v1 = vld [vmem:[%s7267_s17 + $0x18] sm:$0xff] (%p6906_p5)  ;;  %v5309_v8 = vld [vmem:[%s7267_s17 + $0x50] sm:$0xff] (%p6906_p5) }
 0x5f0   : > { %5296 = vst [vmem:[%s8314_s2 + $0x18] sm:$0xff] (%p6906_p5), %v5295_v1  ;;  %5302 = vst [vmem:[%s8314_s2 + $0x30] sm:$0xff] (%p6906_p5), %v5301_v4  ;;  %v5313_v10 = vld [vmem:[%s7267_s17 + $0x60] sm:$0xff] (%p6906_p5)  ;;  %v5315_v11 = vld [vmem:[%s7267_s17 + $0x68] sm:$0xff] (%p6906_p5) }
 0x5f1   : > { %5205 = vst [vmem:[%s7267_s17 + $0x240] sm:$0xff] %v4918_v13  ;;  %5304 = vst [vmem:[%s8314_s2 + $0x38] sm:$0xff] (%p6906_p5), %v5303_v5  ;;  %v5317_v12 = vld [vmem:[%s7267_s17 + $0x70] sm:$0xff] (%p6906_p5)  ;;  %v5321_v13 = vld [vmem:[%s7267_s17 + $0x80] sm:$0xff] (%p6906_p5) }
 0x5f2   : > { %5306 = vst [vmem:[%s8314_s2 + $0x40] sm:$0xff] (%p6906_p5), %v5305_v6  ;;  %5308 = vst [vmem:[%s8314_s2 + $0x48] sm:$0xff] (%p6906_p5), %v5307_v7  ;;  %v5417_v44 = vld [vmem:[%s7267_s17 + $0x200] sm:$0xff] (%p6906_p5)  ;;  %v5419_v63 = vld [vmem:[%s7267_s17 + $0x208] sm:$0xff] (%p6906_p5) }
 0x5f3   : > { %5310 = vst [vmem:[%s8314_s2 + $0x50] sm:$0xff] (%p6906_p5), %v5309_v8  ;;  %5312 = vst [vmem:[%s8314_s2 + $0x58] sm:$0xff] (%p6906_p5), %v5311_v9  ;;  %v5421_v0 = vld [vmem:[%s7267_s17 + $0x210] sm:$0xff] (%p6906_p5)  ;;  %v5423_v1 = vld [vmem:[%s7267_s17 + $0x218] sm:$0xff] (%p6906_p5) }
 0x5f4   : > { %5314 = vst [vmem:[%s8314_s2 + $0x60] sm:$0xff] (%p6906_p5), %v5313_v10  ;;  %5316 = vst [vmem:[%s8314_s2 + $0x68] sm:$0xff] (%p6906_p5), %v5315_v11  ;;  %v5425_v2 = vld [vmem:[%s7267_s17 + $0x220] sm:$0xff] (%p6906_p5)  ;;  %v5427_v3 = vld [vmem:[%s7267_s17 + $0x228] sm:$0xff] (%p6906_p5) }
 0x5f5   : > { %5318 = vst [vmem:[%s8314_s2 + $0x70] sm:$0xff] (%p6906_p5), %v5317_v12  ;;  %5322 = vst [vmem:[%s8314_s2 + $0x80] sm:$0xff] (%p6906_p5), %v5321_v13 }
 0x5f6   : > { %v4954_v35 = vpop.f32.mrf.mxu0  ;;  %5418 = vst [vmem:[%s8314_s2 + $0x5d8] sm:$0xff] (%p6906_p5), %v5417_v44  ;;  %5420 = vst [vmem:[%s8314_s2 + $0x5e0] sm:$0xff] (%p6906_p5), %v5419_v63  ;;  %v5429_v4 = vld [vmem:[%s7267_s17 + $0x230] sm:$0xff] (%p6906_p5)  ;;  %v5431_v5 = vld [vmem:[%s7267_s17 + $0x238] sm:$0xff] (%p6906_p5) }
 0x5f7   : > { %v4955_v16 = vadd.f32 %v4954_v35, %v3325_v33  ;;  %v5327_v35 = vld [vmem:[%s7267_s17 + $0x98] sm:$0xff] (%p6906_p5)  ;;  %5422 = vst [vmem:[%s8314_s2 + $0x5e8] sm:$0xff] (%p6906_p5), %v5421_v0  ;;  %5424 = vst [vmem:[%s8314_s2 + $0x5f0] sm:$0xff] (%p6906_p5), %v5423_v1 }
 0x5f8   : > { %v4956_v20 = vpop.f32.mrf.mxu0  ;;  %v4997_v24 = vpop.f32.mrf.mxu1  ;;  %5328 = vst [vmem:[%s8314_s2 + $0x98] sm:$0xff] (%p6906_p5), %v5327_v35  ;;  %5426 = vst [vmem:[%s8314_s2 + $0x5f8] sm:$0xff] (%p6906_p5), %v5425_v2  ;;  %v5433_v6 = vld [vmem:[%s7267_s17 + $0x240] sm:$0xff] (%p6906_p5) }
 0x5f9   : > { %5165 = vst [vmem:[%s7267_s17 + $0x100] sm:$0xff] %v4955_v16  ;;  %v4957_v22 = vadd.f32 %v4956_v20, %v3329_v14  ;;  %v4998_v25 = vadd.f32 %v4997_v24, %v3333_v18  ;;  %v5329_v16 = vld [vmem:[%s7267_s17 + $0xa0] sm:$0xff] (%p6906_p5)  ;;  %v5333_v20 = vld [vmem:[%s7267_s17 + $0xb0] sm:$0xff] (%p6906_p5)  ;;  %5428 = vst [vmem:[%s8314_s2 + $0x600] sm:$0xff] (%p6906_p5), %v5427_v3 }
 0x5fa   : > { %v4958_v23 = vpop.f32.mrf.mxu0  ;;  %v4999_v26 = vpop.f32.mrf.mxu1  ;;  %5330 = vst [vmem:[%s8314_s2 + $0xa0] sm:$0xff] (%p6906_p5), %v5329_v16  ;;  %5334 = vst [vmem:[%s8314_s2 + $0xb0] sm:$0xff] (%p6906_p5), %v5333_v20  ;;  %v5341_v24 = vld [vmem:[%s7267_s17 + $0xd0] sm:$0xff] (%p6906_p5) }
 0x5fb   : > { %5166 = vst [vmem:[%s7267_s17 + $0x108] sm:$0xff] %v4957_v22  ;;  %v4959_v15 = vadd.f32 %v4958_v23, %v3325_v33  ;;  %5167 = vst [vmem:[%s7267_s17 + $0x110] sm:$0xff] %v4998_v25  ;;  %v5000_v19 = vadd.f32 %v4999_v26, %v3337_v55  ;;  %v5323_v33 = vld [vmem:[%s7267_s17 + $0x88] sm:$0xff] (%p6906_p5)  ;;  %v5335_v22 = vld [vmem:[%s7267_s17 + $0xb8] sm:$0xff] (%p6906_p5) }
 0x5fc   : > { %v4960_v17 = vpop.f32.mrf.mxu0  ;;  %v5001_v28 = vpop.f32.mrf.mxu1  ;;  %5324 = vst [vmem:[%s8314_s2 + $0x88] sm:$0xff] (%p6906_p5), %v5323_v33  ;;  %5336 = vst [vmem:[%s8314_s2 + $0xb8] sm:$0xff] (%p6906_p5), %v5335_v22  ;;  %v5339_v23 = vld [vmem:[%s7267_s17 + $0xc8] sm:$0xff] (%p6906_p5)  ;;  %v5345_v25 = vld [vmem:[%s7267_s17 + $0xe0] sm:$0xff] (%p6906_p5) }
 0x5fd   : > { %5206 = vst [vmem:[%s7267_s17 + $0x248] sm:$0xff] %v4959_v15  ;;  %v4961_v27 = vadd.f32 %v4960_v17, %v3329_v14  ;;  %5168 = vst [vmem:[%s7267_s17 + $0x118] sm:$0xff] %v5000_v19  ;;  %v5002_v29 = vadd.f32 %v5001_v28, %v3333_v18  ;;  %v5325_v14 = vld [vmem:[%s7267_s17 + $0x90] sm:$0xff] (%p6906_p5)  ;;  %v5331_v18 = vld [vmem:[%s7267_s17 + $0xa8] sm:$0xff] (%p6906_p5) }
 0x5fe   : > { %v5003_v21 = vpop.f32.mrf.mxu1  ;;  %5326 = vst [vmem:[%s8314_s2 + $0x90] sm:$0xff] (%p6906_p5), %v5325_v14  ;;  %5332 = vst [vmem:[%s8314_s2 + $0xa8] sm:$0xff] (%p6906_p5), %v5331_v18  ;;  %v5343_v15 = vld [vmem:[%s7267_s17 + $0xd8] sm:$0xff] (%p6906_p5)  ;;  %v5347_v17 = vld [vmem:[%s7267_s17 + $0xe8] sm:$0xff] (%p6906_p5) }
 0x5ff   : > { %5207 = vst [vmem:[%s7267_s17 + $0x250] sm:$0xff] %v4961_v27  ;;  %5208 = vst [vmem:[%s7267_s17 + $0x258] sm:$0xff] %v5002_v29  ;;  %v5004_v30 = vadd.f32 %v5003_v21, %v3337_v55  ;;  %v5337_v55 = vld [vmem:[%s7267_s17 + $0xc0] sm:$0xff] (%p6906_p5)  ;;  %v5349_v26 = vld [vmem:[%s7267_s17 + $0xf0] sm:$0xff] (%p6906_p5) }
 0x600   : > { %5338 = vst [vmem:[%s8314_s2 + $0xc0] sm:$0xff] (%p6906_p5), %v5337_v55  ;;  %5340 = vst [vmem:[%s8314_s2 + $0xc8] sm:$0xff] (%p6906_p5), %v5339_v23  ;;  %v5351_v27 = vld [vmem:[%s7267_s17 + $0xf8] sm:$0xff] (%p6906_p5)  ;;  %v5353_v19 = vld [vmem:[%s7267_s17 + $0x100] sm:$0xff] (%p6906_p5) }
 0x601   : > { %5209 = vst [vmem:[%s7267_s17 + $0x260] sm:$0xff] %v5004_v30  ;;  %5342 = vst [vmem:[%s8314_s2 + $0xd0] sm:$0xff] (%p6906_p5), %v5341_v24 }
 0x602   : > { %5344 = vst [vmem:[%s8314_s2 + $0xd8] sm:$0xff] (%p6906_p5), %v5343_v15  ;;  %5346 = vst [vmem:[%s8314_s2 + $0xe0] sm:$0xff] (%p6906_p5), %v5345_v25  ;;  %v5355_v28 = vld [vmem:[%s7267_s17 + $0x108] sm:$0xff] (%p6906_p5)  ;;  %v5357_v29 = vld [vmem:[%s7267_s17 + $0x110] sm:$0xff] (%p6906_p5) }
 0x603   : > { %5348 = vst [vmem:[%s8314_s2 + $0xe8] sm:$0xff] (%p6906_p5), %v5347_v17  ;;  %5350 = vst [vmem:[%s8314_s2 + $0xf0] sm:$0xff] (%p6906_p5), %v5349_v26 }
 0x604   : > { %5352 = vst [vmem:[%s8314_s2 + $0xf8] sm:$0xff] (%p6906_p5), %v5351_v27  ;;  %5354 = vst [vmem:[%s8314_s2 + $0x100] sm:$0xff] (%p6906_p5), %v5353_v19  ;;  %v5359_v21 = vld [vmem:[%s7267_s17 + $0x118] sm:$0xff] (%p6906_p5)  ;;  %v5435_v7 = vld [vmem:[%s7267_s17 + $0x248] sm:$0xff] (%p6906_p5) }
 0x605   : > { %5356 = vst [vmem:[%s8314_s2 + $0x108] sm:$0xff] (%p6906_p5), %v5355_v28  ;;  %5358 = vst [vmem:[%s8314_s2 + $0x110] sm:$0xff] (%p6906_p5), %v5357_v29 }
 0x606   : > { %v5040_v34 = vpop.f32.mrf.mxu0  ;;  %5360 = vst [vmem:[%s8314_s2 + $0x118] sm:$0xff] (%p6906_p5), %v5359_v21  ;;  %5430 = vst [vmem:[%s8314_s2 + $0x608] sm:$0xff] (%p6906_p5), %v5429_v4  ;;  %v5437_v8 = vld [vmem:[%s7267_s17 + $0x250] sm:$0xff] (%p6906_p5)  ;;  %v5439_v9 = vld [vmem:[%s7267_s17 + $0x258] sm:$0xff] (%p6906_p5) }
 0x607   : > { %v5041_v36 = vadd.f32 %v5040_v34, %v3341_v31  ;;  %5432 = vst [vmem:[%s8314_s2 + $0x610] sm:$0xff] (%p6906_p5), %v5431_v5  ;;  %5434 = vst [vmem:[%s8314_s2 + $0x618] sm:$0xff] (%p6906_p5), %v5433_v6 }
 0x608   : > { %v5042_v38 = vpop.f32.mrf.mxu0  ;;  %v5083_v47 = vpop.f32.mrf.mxu1  ;;  %5436 = vst [vmem:[%s8314_s2 + $0x620] sm:$0xff] (%p6906_p5), %v5435_v7  ;;  %5438 = vst [vmem:[%s8314_s2 + $0x628] sm:$0xff] (%p6906_p5), %v5437_v8  ;;  %v5441_v10 = vld [vmem:[%s7267_s17 + $0x260] sm:$0xff] (%p6906_p5) }
 0x609   : > { %5169 = vst [vmem:[%s7267_s17 + $0x120] sm:$0xff] %v5041_v36  ;;  %v5043_v41 = vadd.f32 %v5042_v38, %v3345_v32  ;;  %v5084_v43 = vadd.f32 %v5083_v47, %v3349_v37  ;;  %v5373_v38 = vld [vmem:[%s7267_s17 + $0x150] sm:$0xff] (%p6906_p5)  ;;  %5440 = vst [vmem:[%s8314_s2 + $0x630] sm:$0xff] (%p6906_p5), %v5439_v9 }
 0x60a   : > { %v5044_v45 = vpop.f32.mrf.mxu0  ;;  %v5085_v50 = vpop.f32.mrf.mxu1  ;;  %5374 = vst [vmem:[%s8314_s2 + $0x528] sm:$0xff] (%p6906_p5), %v5373_v38  ;;  %v5381_v47 = vld [vmem:[%s7267_s17 + $0x170] sm:$0xff] (%p6906_p5)  ;;  %5442 = vst [vmem:[%s8314_s2 + $0x638] sm:$0xff] (%p6906_p5), %v5441_v10 }
 0x60b   : > { %5170 = vst [vmem:[%s7267_s17 + $0x128] sm:$0xff] %v5043_v41  ;;  %v5045_v40 = vadd.f32 %v5044_v45, %v3341_v31  ;;  %5171 = vst [vmem:[%s7267_s17 + $0x130] sm:$0xff] %v5084_v43  ;;  %v5086_v51 = vadd.f32 %v5085_v50, %v3353_v42  ;;  %v5375_v41 = vld [vmem:[%s7267_s17 + $0x158] sm:$0xff] (%p6906_p5)  ;;  %v5379_v45 = vld [vmem:[%s7267_s17 + $0x168] sm:$0xff] (%p6906_p5) }
 0x60c   : > { %v5046_v49 = vpop.f32.mrf.mxu0  ;;  %v5087_v52 = vpop.f32.mrf.mxu1  ;;  %5376 = vst [vmem:[%s8314_s2 + $0x530] sm:$0xff] (%p6906_p5), %v5375_v41  ;;  %5380 = vst [vmem:[%s8314_s2 + $0x540] sm:$0xff] (%p6906_p5), %v5379_v45  ;;  %v5385_v43 = vld [vmem:[%s7267_s17 + $0x180] sm:$0xff] (%p6906_p5)  ;;  %v5389_v50 = vld [vmem:[%s7267_s17 + $0x190] sm:$0xff] (%p6906_p5) }
 0x60d   : > { %5210 = vst [vmem:[%s7267_s17 + $0x268] sm:$0xff] %v5045_v40  ;;  %v5047_v46 = vadd.f32 %v5046_v49, %v3345_v32  ;;  %5172 = vst [vmem:[%s7267_s17 + $0x138] sm:$0xff] %v5086_v51  ;;  %v5088_v48 = vadd.f32 %v5087_v52, %v3349_v37  ;;  %v5371_v37 = vld [vmem:[%s7267_s17 + $0x148] sm:$0xff] (%p6906_p5)  ;;  %v5383_v40 = vld [vmem:[%s7267_s17 + $0x178] sm:$0xff] (%p6906_p5) }
 0x60e   : > { %v5089_v53 = vpop.f32.mrf.mxu1  ;;  %5372 = vst [vmem:[%s8314_s2 + $0x520] sm:$0xff] (%p6906_p5), %v5371_v37  ;;  %5382 = vst [vmem:[%s8314_s2 + $0x548] sm:$0xff] (%p6906_p5), %v5381_v47  ;;  %v5387_v49 = vld [vmem:[%s7267_s17 + $0x188] sm:$0xff] (%p6906_p5)  ;;  %v5393_v51 = vld [vmem:[%s7267_s17 + $0x1a0] sm:$0xff] (%p6906_p5) }
 0x60f   : > { %5211 = vst [vmem:[%s7267_s17 + $0x270] sm:$0xff] %v5047_v46  ;;  %5212 = vst [vmem:[%s7267_s17 + $0x278] sm:$0xff] %v5088_v48  ;;  %v5090_v54 = vadd.f32 %v5089_v53, %v3353_v42  ;;  %v5377_v42 = vld [vmem:[%s7267_s17 + $0x160] sm:$0xff] (%p6906_p5)  ;;  %v5391_v46 = vld [vmem:[%s7267_s17 + $0x198] sm:$0xff] (%p6906_p5) }
 0x610   : > { %v5361_v30 = vld [vmem:[%s7267_s17 + $0x120] sm:$0xff] (%p6906_p5)  ;;  %5378 = vst [vmem:[%s8314_s2 + $0x538] sm:$0xff] (%p6906_p5), %v5377_v42  ;;  %5384 = vst [vmem:[%s8314_s2 + $0x550] sm:$0xff] (%p6906_p5), %v5383_v40  ;;  %v5395_v52 = vld [vmem:[%s7267_s17 + $0x1a8] sm:$0xff] (%p6906_p5) }
 0x611   : > { %5213 = vst [vmem:[%s7267_s17 + $0x280] sm:$0xff] %v5090_v54  ;;  %5362 = vst [vmem:[%s8314_s2 + $0x120] sm:$0xff] (%p6906_p5), %v5361_v30  ;;  %v5397_v48 = vld [vmem:[%s7267_s17 + $0x1b0] sm:$0xff] (%p6906_p5)  ;;  %v5399_v53 = vld [vmem:[%s7267_s17 + $0x1b8] sm:$0xff] (%p6906_p5) }
 0x612   : > { %v5363_v31 = vld [vmem:[%s7267_s17 + $0x128] sm:$0xff] (%p6906_p5)  ;;  %v5365_v32 = vld [vmem:[%s7267_s17 + $0x130] sm:$0xff] (%p6906_p5)  ;;  %5386 = vst [vmem:[%s8314_s2 + $0x558] sm:$0xff] (%p6906_p5), %v5385_v43  ;;  %5388 = vst [vmem:[%s8314_s2 + $0x560] sm:$0xff] (%p6906_p5), %v5387_v49 }
 0x613   : > { %5364 = vst [vmem:[%s8314_s2 + $0x128] sm:$0xff] (%p6906_p5), %v5363_v31  ;;  %5366 = vst [vmem:[%s8314_s2 + $0x130] sm:$0xff] (%p6906_p5), %v5365_v32  ;;  %v5401_v54 = vld [vmem:[%s7267_s17 + $0x1c0] sm:$0xff] (%p6906_p5) }
 0x614   : > { %v5367_v34 = vld [vmem:[%s7267_s17 + $0x138] sm:$0xff] (%p6906_p5)  ;;  %5390 = vst [vmem:[%s8314_s2 + $0x568] sm:$0xff] (%p6906_p5), %v5389_v50  ;;  %5392 = vst [vmem:[%s8314_s2 + $0x570] sm:$0xff] (%p6906_p5), %v5391_v46  ;;  %v5443_v11 = vld [vmem:[%s7267_s17 + $0x268] sm:$0xff] (%p6906_p5) }
 0x615   : > { %5368 = vst [vmem:[%s8314_s2 + $0x138] sm:$0xff] (%p6906_p5), %v5367_v34  ;;  %5394 = vst [vmem:[%s8314_s2 + $0x578] sm:$0xff] (%p6906_p5), %v5393_v51 }
 0x616   : > { %v5126_v57 = vpop.f32.mrf.mxu0  ;;  %5396 = vst [vmem:[%s8314_s2 + $0x580] sm:$0xff] (%p6906_p5), %v5395_v52  ;;  %5398 = vst [vmem:[%s8314_s2 + $0x588] sm:$0xff] (%p6906_p5), %v5397_v48  ;;  %v5445_v12 = vld [vmem:[%s7267_s17 + $0x270] sm:$0xff] (%p6906_p5)  ;;  %v5447_v39 = vld [vmem:[%s7267_s17 + $0x278] sm:$0xff] (%p6906_p5) }
 0x617   : > { %v5127_v58 = vadd.f32 %v5727_v56, %v5126_v57  ;;  %5400 = vst [vmem:[%s8314_s2 + $0x590] sm:$0xff] (%p6906_p5), %v5399_v53  ;;  %5402 = vst [vmem:[%s8314_s2 + $0x598] sm:$0xff] (%p6906_p5), %v5401_v54  ;;  %v5405_v57 = vld [vmem:[%s7267_s17 + $0x1d0] sm:$0xff] (%p6906_p5) }
 0x618   : > { %v6176_v59 = vpop.f32.mrf.mxu0  ;;  %5406 = vst [vmem:[%s8314_s2 + $0x5a8] sm:$0xff] (%p6906_p5), %v5405_v57  ;;  %5444 = vst [vmem:[%s8314_s2 + $0x640] sm:$0xff] (%p6906_p5), %v5443_v11  ;;  %v5449_v13 = vld [vmem:[%s7267_s17 + $0x280] sm:$0xff] (%p6906_p5) }
 0x619   : > { %5173 = vst [vmem:[%s7267_s17 + $0x140] sm:$0xff] %v5127_v58  ;;  %5273 = sbr.rel (!%p6906_p5) target bundleno = 1574 (0x626), region = 146  ;;  %v5407_v58 = vld [vmem:[%s7267_s17 + $0x1d8] sm:$0xff] (%p6906_p5)  ;;  %v5409_v59 = vld [vmem:[%s7267_s17 + $0x1e0] sm:$0xff] (%p6906_p5)  ;;  %5446 = vst [vmem:[%s8314_s2 + $0x648] sm:$0xff] (%p6906_p5), %v5445_v12 }
 0x61a   : > { %v5129_v60 = vpop.f32.mrf.mxu0  ;;  %5408 = vst [vmem:[%s8314_s2 + $0x5b0] sm:$0xff] (%p6906_p5), %v5407_v58  ;;  %5410 = vst [vmem:[%s8314_s2 + $0x5b8] sm:$0xff] (%p6906_p5), %v5409_v59 }
 0x61b   : > { %v5130_v61 = vadd.f32 %v5727_v56, %v5129_v60  ;;  %v5403_v56 = vld [vmem:[%s7267_s17 + $0x1c8] sm:$0xff] (%p6906_p5)  ;;  %5448 = vst [vmem:[%s8314_s2 + $0x650] sm:$0xff] (%p6906_p5), %v5447_v39  ;;  %5450 = vst [vmem:[%s8314_s2 + $0x658] sm:$0xff] (%p6906_p5), %v5449_v13 }
 0x61c   : > { %v6177_v62 = vpop.f32.mrf.mxu0  ;;  %5404 = vst [vmem:[%s8314_s2 + $0x5a0] sm:$0xff] (%p6906_p5), %v5403_v56  ;;  %v5411_v60 = vld [vmem:[%s7267_s17 + $0x1e8] sm:$0xff] (%p6906_p5) }
 0x61d   : > { %5214 = vst [vmem:[%s7267_s17 + $0x288] sm:$0xff] %v5130_v61  ;;  %v5413_v61 = vld [vmem:[%s7267_s17 + $0x1f0] sm:$0xff] (%p6906_p5)  ;;  %5412 = vst [vmem:[%s8314_s2 + $0x5c0] sm:$0xff] (%p6906_p5), %v5411_v60  ;;  %v5415_v62 = vld [vmem:[%s7267_s17 + $0x1f8] sm:$0xff] (%p6906_p5) }
 0x61e   : > { %5414 = vst [vmem:[%s8314_s2 + $0x5c8] sm:$0xff] %v5413_v61  ;;  %5416 = vst [vmem:[%s8314_s2 + $0x5d0] sm:$0xff] %v5415_v62 }
 0x620   : > { %v5369_v36 = vld [vmem:[%s7267_s17 + $0x140] sm:$0xff] }
 0x621   : > { %5370 = vst [vmem:[%s8314_s2 + $0x140] sm:$0xff] %v5369_v36 }
 0x624   : > { %v5451_v33 = vld [vmem:[%s7267_s17 + $0x288] sm:$0xff] }
 0x625   : > { %5452 = vst [vmem:[%s8314_s2 + $0x660] sm:$0xff] %v5451_v33 }
 0x626 PF: > { %6716 = dma.done.wait (%p548_p3), [#allocation5], 256  }
 0x627   : > { %6718 = vsyncadd (%p548_p3), [#allocation5], 4294967040 }
 0x628   : > { %6720 = dma.done.wait (%p548_p3), [#allocation7], 768  }
 0x629   : > { %6722 = vsyncadd (%p548_p3), [#allocation7], 4294966528 }
 0x62a   : > { %6724 = dma.done.wait (%p548_p3), [#allocation10], 512  }
 0x62b   : > { %6726 = vsyncadd (%p548_p3), [#allocation10], 4294966784 }
 0x62c PF: > { %s8564_s24 = sld [smem:[#allocation16_spill]] }
 0x62d   : > { %s8565_s4 = sld [smem:[#allocation15_spill]] }
 0x62e   : > { %s8566_s30 = sld [smem:[#allocation17_spill]] }
 0x632   : > { %p34_p5 = scmp.ge.s32.totalorder %s8564_s24, 6  }
 0x634   :  { %36 = sbr.rel (!%p34_p5) target bundleno = 17 (0x11), region = 226 }
 0x639   :  { %5484 = vsyncpa [#allocation5], 1 }
 0x63a   :  { %5486 = vsyncpa [#allocation5 + $0x1], 1 }
 0x63b   :  { %5487 = vsyncpa [#allocation7], 1 }
 0x63c   :  { %5488 = vsyncpa [#allocation10], 1 }

</bundles_post_ra>
